<compile_context>
chip_gen: v7x
topology: tpu7x:2x2x1
jax: 0.10.0
libtpu: 0.0.40
codegen_flags: <defaults>
</compile_context>

<pallas_src>
import math
from functools import partial

import numpy as np
import jax
import jax.numpy as jnp
from jax.experimental import pallas as pl
from jax.experimental.pallas import tpu as pltpu


# -----------------------------------------------------------------------------
# Small helpers
# -----------------------------------------------------------------------------
def _round_up(x, m):
    return ((x + m - 1) // m) * m


def _pick_tile(p):
    """p is a multiple of 128. Prefer 256/512 tiles (wide MXU), keep >=2 blocks."""
    for c in (512, 256):
        if p % c == 0 and p // c >= 2:
            return c
    for c in (512, 256):
        if p % c == 0:
            return c
    return 128


def _pick_tm(m):
    if m >= 1024:
        return 512
    if m > 512:
        return 256
    return _round_up(max(m, 1), 16)      # 16: bf16 sublane packing granularity


# -----------------------------------------------------------------------------
# Pre-padded weight containers.  Static metadata lives in the pytree aux_data so
# it stays a Python int under jit (needed for slicing / loop bounds).
# -----------------------------------------------------------------------------
@jax.tree_util.register_pytree_node_class
class MM:
    """(Kp, Np) bf16 weight + (1, Np) f32 bias, padded to 128-multiples at init."""

    def __init__(self, w, b, n_out):
        self.w, self.b, self.n_out = w, b, n_out

    def tree_flatten(self):
        return (self.w, self.b), (self.n_out,)

    @classmethod
    def tree_unflatten(cls, aux, children):
        return cls(children[0], children[1], aux[0])


@jax.tree_util.register_pytree_node_class
class ConvK:
    """(K, Cin_p, Cout_p) bf16 weight + (1, Cout_p) f32 bias for k>1 'same' conv."""

    def __init__(self, w, b, cin, cout, k, dil):
        self.w, self.b = w, b
        self.cin, self.cout, self.k, self.dil = cin, cout, k, dil

    def tree_flatten(self):
        return (self.w, self.b), (self.cin, self.cout, self.k, self.dil)

    @classmethod
    def tree_unflatten(cls, aux, children):
        return cls(children[0], children[1], *aux)


def prep_linear(w_kn, b_n=None):
    K, N = w_kn.shape
    Kp, Np = _round_up(K, 128), _round_up(N, 128)
    wp = jnp.zeros((Kp, Np), jnp.bfloat16).at[:K, :N].set(
        jnp.asarray(w_kn, jnp.float32).astype(jnp.bfloat16))
    b = jnp.zeros((N,), jnp.float32) if b_n is None else jnp.asarray(b_n, jnp.float32)
    bp = jnp.zeros((1, Np), jnp.float32).at[0, :N].set(b)
    return MM(wp, bp, N)


def prep_conv1x1(w_torch, b):
    return prep_linear(w_torch[:, :, 0].T, b)


def prep_convk(w_torch, b, dilation):
    cout, cin, k = w_torch.shape
    cinp, coutp = _round_up(cin, 128), _round_up(cout, 128)
    wt = jnp.transpose(w_torch, (2, 1, 0)).astype(jnp.float32)      # (K, Cin, Cout)
    wp = jnp.zeros((k, cinp, coutp), jnp.bfloat16).at[:, :cin, :cout].set(
        wt.astype(jnp.bfloat16))
    bp = jnp.zeros((1, coutp), jnp.float32).at[0, :cout].set(
        jnp.asarray(b, jnp.float32))
    return ConvK(wp, bp, cin, cout, k, dilation)


# -----------------------------------------------------------------------------
# Pallas kernel 1: tiled bf16 matmul with f32 accumulation + fused bias/ReLU
# -----------------------------------------------------------------------------
def _mm_kernel(x_ref, w_ref, b_ref, o_ref, acc_ref, *, act):
    @pl.when(pl.program_id(2) == 0)
    def _():
        acc_ref[...] = jnp.zeros_like(acc_ref)

    acc_ref[...] += jnp.dot(x_ref[...], w_ref[...],
                            preferred_element_type=jnp.float32)

    @pl.when(pl.program_id(2) == pl.num_programs(2) - 1)
    def _():
        y = acc_ref[...] + b_ref[...]
        if act == "relu":
            y = jnp.maximum(y, 0.0)
        o_ref[...] = y.astype(o_ref.dtype)


def pallas_matmul(x, mm, act="none"):
    """act(x @ W + b) with pre-padded bf16 weights. Returns (M, n_out) f32."""
    M, K = x.shape
    Kp, Np = mm.w.shape
    tm, tk, tn = _pick_tm(M), _pick_tile(Kp), _pick_tile(Np)
    Mp = _round_up(M, tm)
    if M == Mp and K == Kp:
        xp = x.astype(jnp.bfloat16)
    else:
        xp = jnp.zeros((Mp, Kp), jnp.bfloat16).at[:M, :K].set(
            x.astype(jnp.bfloat16))
    grid = (Mp // tm, Np // tn, Kp // tk)
    out = pl.pallas_call(
        partial(_mm_kernel, act=act),
        out_shape=jax.ShapeDtypeStruct((Mp, Np), jnp.float32),
        grid_spec=pltpu.PrefetchScalarGridSpec(
            num_scalar_prefetch=0,
            grid=grid,
            in_specs=[
                pl.BlockSpec((tm, tk), lambda i, j, k: (i, k)),
                pl.BlockSpec((tk, tn), lambda i, j, k: (k, j)),
                pl.BlockSpec((1, tn), lambda i, j, k: (0, j)),
            ],
            out_specs=pl.BlockSpec((tm, tn), lambda i, j, k: (i, j)),
            scratch_shapes=[pltpu.VMEM((tm, tn), jnp.float32)],
        ),
        compiler_params=pltpu.CompilerParams(
            dimension_semantics=("parallel", "parallel", "arbitrary")),
    )(xp, mm.w, mm.b)
    return out[:M, :mm.n_out]


def conv1x1(x, mm, act="none"):
    B, T, _ = x.shape
    y = pallas_matmul(x.reshape(B * T, -1), mm, act=act)
    return y.reshape(B, T, mm.n_out)


# -----------------------------------------------------------------------------
# Pallas kernel 2: k>1 dilated 'same' conv via in-kernel tap accumulation
#                  (no im2col copy in HBM; x is read once per batch element)
# -----------------------------------------------------------------------------
def _convk_kernel(x_ref, w_ref, b_ref, o_ref, *, ktaps, dilation, act):
    tout = o_ref.shape[1]
    acc = jnp.zeros((tout, o_ref.shape[2]), jnp.float32)
    for k in range(ktaps):                           # static unroll over taps
        xs = x_ref[0, pl.ds(k * dilation, tout), :]
        acc = acc + jnp.dot(xs, w_ref[k], preferred_element_type=jnp.float32)
    y = acc + b_ref[...]
    if act == "relu":
        y = jnp.maximum(y, 0.0)
    o_ref[0] = y


def conv_k(x, ck, act="none"):
    B, T, cin = x.shape
    pad = (ck.k // 2) * ck.dil
    T8 = _round_up(T, 8)
    cinp, coutp = ck.w.shape[1], ck.w.shape[2]
    tbuf = T8 + 2 * pad
    xp = jnp.zeros((B, tbuf, cinp), jnp.bfloat16)
    xp = xp.at[:, pad:pad + T, :cin].set(x.astype(jnp.bfloat16))
    out = pl.pallas_call(
        partial(_convk_kernel, ktaps=ck.k, dilation=ck.dil, act=act),
        out_shape=jax.ShapeDtypeStruct((B, T8, coutp), jnp.float32),
        grid_spec=pltpu.PrefetchScalarGridSpec(
            num_scalar_prefetch=0,
            grid=(B,),
            in_specs=[
                pl.BlockSpec((1, tbuf, cinp), lambda b: (b, 0, 0)),
                pl.BlockSpec((ck.k, cinp, coutp), lambda b: (0, 0, 0)),
                pl.BlockSpec((1, coutp), lambda b: (0, 0)),
            ],
            out_specs=pl.BlockSpec((1, T8, coutp), lambda b: (b, 0, 0)),
        ),
        compiler_params=pltpu.CompilerParams(dimension_semantics=("parallel",)),
    )(xp, ck.w, ck.b)
    return out[:, :T, :ck.cout]


# -----------------------------------------------------------------------------
# Pallas kernel 3: fused STFT (DFT matmuls) + power spectrum + mel projection
# -----------------------------------------------------------------------------
def _melspec_kernel(f_ref, cos_ref, sin_ref, mel_ref, o_ref):
    fr = f_ref[...]
    re = jnp.dot(fr, cos_ref[...], preferred_element_type=jnp.float32)
    im = jnp.dot(fr, sin_ref[...], preferred_element_type=jnp.float32)
    power = re * re + im * im
    o_ref[...] = jnp.dot(power, mel_ref[...], preferred_element_type=jnp.float32)


def mel_spectrogram(wav, params, *, n_fft=512, hop=160, n_mels=80):
    B, L = wav.shape
    pad = n_fft // 2
    xw = jnp.pad(wav, ((0, 0), (pad, pad)), mode="reflect")   # torch.stft center
    n_frames = 1 + (xw.shape[1] - n_fft) // hop
    idx = jnp.arange(n_frames)[:, None] * hop + jnp.arange(n_fft)[None, :]
    frames = xw[:, idx] * params["stft_window"]               # (B, F, n_fft)
    M = B * n_frames
    tm = _pick_tm(M)
    Mp = _round_up(M, tm)
    nbp = params["dft_cos"].shape[1]                          # padded #bins (384)
    nmp = params["mel_w"].shape[1]                            # padded #mels (128)
    fm = jnp.zeros((Mp, n_fft), jnp.bfloat16).at[:M].set(
        frames.reshape(M, n_fft).astype(jnp.bfloat16))
    out = pl.pallas_call(
        _melspec_kernel,
        out_shape=jax.ShapeDtypeStruct((Mp, nmp), jnp.float32),
        grid_spec=pltpu.PrefetchScalarGridSpec(
            num_scalar_prefetch=0,
            grid=(Mp // tm,),
            in_specs=[
                pl.BlockSpec((tm, n_fft), lambda i: (i, 0)),
                pl.BlockSpec((n_fft, nbp), lambda i: (0, 0)),
                pl.BlockSpec((n_fft, nbp), lambda i: (0, 0)),
                pl.BlockSpec((nbp, nmp), lambda i: (0, 0)),
            ],
            out_specs=pl.BlockSpec((tm, nmp), lambda i: (i, 0)),
        ),
        compiler_params=pltpu.CompilerParams(dimension_semantics=("parallel",)),
    )(fm, params["dft_cos"], params["dft_sin"], params["mel_w"])
    return out[:M, :n_mels].reshape(B, n_frames, n_mels)


# -----------------------------------------------------------------------------
# Pallas kernel 4: fused att2 matmul + time-softmax + attentive statistics pool
#   (online softmax over T chunks; attention logits/weights never hit HBM)
# -----------------------------------------------------------------------------
def _attn_pool_kernel(h_ref, x_ref, w_ref, b_ref, mask_ref,
                      mu_ref, sg_ref, m_sc, s_sc, ws_sc, wq_sc):
    ti = pl.program_id(1)

    @pl.when(ti == 0)
    def _():
        m_sc[...] = jnp.full_like(m_sc, -1e30)
        s_sc[...] = jnp.zeros_like(s_sc)
        ws_sc[...] = jnp.zeros_like(ws_sc)
        wq_sc[...] = jnp.zeros_like(wq_sc)

    h = h_ref[0]                                             # (tt, 256) bf16
    x = x_ref[0]                                             # (tt, C)   f32
    # attention logits for this time chunk, computed on the fly (MXU)
    z = jnp.dot(h, w_ref[...], preferred_element_type=jnp.float32) + b_ref[...]
    z = z + mask_ref[0]                                      # -1e30 on padded rows

    m_prev = m_sc[...]
    m_new = jnp.maximum(m_prev, jnp.max(z, axis=0, keepdims=True))
    alpha = jnp.exp(m_prev - m_new)
    p = jnp.exp(z - m_new)                                   # padded rows -> 0
    px = p * x
    s_sc[...] = alpha * s_sc[...] + jnp.sum(p, axis=0, keepdims=True)
    ws_sc[...] = alpha * ws_sc[...] + jnp.sum(px, axis=0, keepdims=True)
    wq_sc[...] = alpha * wq_sc[...] + jnp.sum(px * x, axis=0, keepdims=True)
    m_sc[...] = m_new

    @pl.when(ti == pl.num_programs(1) - 1)
    def _():
        inv = 1.0 / s_sc[...]
        mu = ws_sc[...] * inv
        ex2 = wq_sc[...] * inv
        mu_ref[0] = mu
        sg_ref[0] = jnp.sqrt(jnp.maximum(ex2 - mu * mu, 1e-4))


def attn_softmax_pool(x, h, att2, *, tt_max=128):
    """x: (B,T,1536) features, h: (B,T,256) pre-att2 activations."""
    B, T, C = x.shape
    Hk = h.shape[-1]
    Kp, Np = att2.w.shape
    assert C % 128 == 0 and att2.n_out == C and Np == C and Kp == _round_up(Hk, 128)
    tt = tt_max if T >= tt_max else _round_up(T, 8)
    Tp = _round_up(T, tt)
    if Tp == T:
        xp = x
        hp = h.astype(jnp.bfloat16)
    else:
        xp = jnp.zeros((B, Tp, C), jnp.float32).at[:, :T].set(x)
        hp = jnp.zeros((B, Tp, Kp), jnp.bfloat16).at[:, :T, :Hk].set(
            h.astype(jnp.bfloat16))
    # additive time mask: 0 on valid frames, -1e30 on padding
    mask = jnp.full((1, Tp, 1), -1e30, jnp.float32).at[:, :T, :].set(0.0)
    mu, sg = pl.pallas_call(
        _attn_pool_kernel,
        out_shape=(jax.ShapeDtypeStruct((B, 1, C), jnp.float32),
                   jax.ShapeDtypeStruct((B, 1, C), jnp.float32)),
        grid_spec=pltpu.PrefetchScalarGridSpec(
            num_scalar_prefetch=0,
            grid=(B, Tp // tt),
            in_specs=[
                pl.BlockSpec((1, tt, Kp), lambda b, t: (b, t, 0)),
                pl.BlockSpec((1, tt, C), lambda b, t: (b, t, 0)),
                pl.BlockSpec((Kp, Np), lambda b, t: (0, 0)),
                pl.BlockSpec((1, Np), lambda b, t: (0, 0)),
                pl.BlockSpec((1, tt, 1), lambda b, t: (0, t, 0)),
            ],
            out_specs=(pl.BlockSpec((1, 1, C), lambda b, t: (b, 0, 0)),
                       pl.BlockSpec((1, 1, C), lambda b, t: (b, 0, 0))),
            scratch_shapes=[pltpu.VMEM((1, C), jnp.float32)] * 4,
        ),
        compiler_params=pltpu.CompilerParams(
            dimension_semantics=("parallel", "arbitrary")),
    )(hp, xp, att2.w, att2.b, mask)
    return mu[:, 0, :], sg[:, 0, :]


# -----------------------------------------------------------------------------
# Network glue (plain JAX): BN statistics, SE module, Bottle2neck wiring
# -----------------------------------------------------------------------------
def batchnorm(x, gamma, beta, *, axes, eps=1e-5):
    mean = jnp.mean(x, axis=axes, keepdims=True)
    var = jnp.mean(jnp.square(x - mean), axis=axes, keepdims=True)
    return (x - mean) * jax.lax.rsqrt(var + eps) * gamma + beta


def se_module(x, p):
    # Tiny GEMMs (M == batch): plain XLA, Pallas launch/pad overhead dominates.
    s = jnp.mean(x, axis=1)                                  # AdaptiveAvgPool1d(1)
    s = jax.nn.relu(s @ p["se_w1"] + p["se_b1"])
    s = jax.nn.sigmoid(s @ p["se_w2"] + p["se_b2"])
    return x * s[:, None, :]


def bottle2neck(x, p):
    # TODO(synk): the 7 Res2Net branch convs stay as separate kernels because
    #             training-mode BN needs global (B,T) statistics between
    #             branches; a fully VMEM-resident fused loop would need a
    #             two-pass grid.
    residual = x
    width = p["convs"][0].cout
    scale = len(p["convs"]) + 1
    out = conv1x1(x, p["conv1"])
    out = jnp.maximum(batchnorm(out, p["bn1_g"], p["bn1_b"], axes=(0, 1)), 0.0)
    spx = [out[:, :, i * width:(i + 1) * width] for i in range(scale)]
    outs = []
    sp = None
    for i in range(scale - 1):
        sp = spx[i] if i == 0 else sp + spx[i]
        sp = conv_k(sp, p["convs"][i], act="relu")
        sp = batchnorm(sp, p["bns_g"][i], p["bns_b"][i], axes=(0, 1))
        outs.append(sp)
    outs.append(spx[scale - 1])
    out = jnp.concatenate(outs, axis=-1)
    out = conv1x1(out, p["conv3"], act="relu")
    out = batchnorm(out, p["bn3_g"], p["bn3_b"], axes=(0, 1))
    out = se_module(out, p)
    return out + residual


# -----------------------------------------------------------------------------
# Full ECAPA-TDNN forward
# -----------------------------------------------------------------------------
def ecapa_forward(params, wav):
    x = mel_spectrogram(wav, params)                         # (B, T, 80)
    x = jnp.log(x + 1e-6)
    x = x - jnp.mean(x, axis=1, keepdims=True)               # cepstral mean norm

    x = conv_k(x, params["conv1"], act="relu")
    x = batchnorm(x, params["bn1_g"], params["bn1_b"], axes=(0, 1))

    x1 = bottle2neck(x, params["layer1"])
    x2 = bottle2neck(x + x1, params["layer2"])
    x3 = bottle2neck(x + x1 + x2, params["layer3"])

    x = conv1x1(jnp.concatenate([x1, x2, x3], axis=-1),
                params["layer4"], act="relu")                # (B, T, 1536)

    # Attention: never materialize global_x (B,T,4608).  The broadcast mean/std
    # branches of att1 reduce to a per-batch bias.
    mean_t = jnp.mean(x, axis=1)                             # (B, 1536)
    std_t = jnp.sqrt(jnp.clip(jnp.var(x, axis=1, ddof=1), 1e-4, None))
    bias_b = (mean_t @ params["att1_wmu"] + std_t @ params["att1_wsd"]
              + params["att1_b"])                            # (B, 256) tiny GEMM
    h = conv1x1(x, params["att1_x"])                         # x @ W_x (Pallas)
    h = jnp.maximum(h + bias_b[:, None, :], 0.0)             # ReLU after full bias
    h = batchnorm(h, params["att_bn_g"], params["att_bn_b"], axes=(0, 1))
    h = jnp.tanh(h)                                          # (B, T, 256)

    # fused: att2 matmul + softmax(T) + attentive statistics pooling
    mu, sg = attn_softmax_pool(x, h, params["att2"])
    e = jnp.concatenate([mu, sg], axis=-1)                   # (B, 3072)
    e = batchnorm(e, params["bn5_g"], params["bn5_b"], axes=(0,))
    e = e @ params["fc6_w"] + params["fc6_b"]                # Linear(3072, 256)
    e = batchnorm(e, params["bn6_g"], params["bn6_b"], axes=(0,))
    return e


# -----------------------------------------------------------------------------
# Deterministic parameter init (shapes from the module __init__) + prep
# -----------------------------------------------------------------------------
def mel_filter_bank_np(n_mels=80, n_fft=512, sample_rate=16000, f_min=20, f_max=7600):
    mel = np.linspace(1125 * math.log(1 + f_min / 700.0),
                      1125 * math.log(1 + f_max / 700.0), n_mels + 2)
    hz = 700 * (np.exp(mel / 1125) - 1)
    bins = np.floor((n_fft + 1) * hz / sample_rate).astype(np.int64)
    fb = np.zeros((n_mels, n_fft // 2 + 1), np.float32)
    for i in range(1, n_mels + 1):
        left, center, right = int(bins[i - 1]), int(bins[i]), int(bins[i + 1])
        for j in range(left, center):
            fb[i - 1, j] = (j - left) / (center - left)
        for j in range(center, right):
            fb[i - 1, j] = (right - j) / (right - center)
    return fb


def _init_conv(key, cout, cin, k):
    k1, k2 = jax.random.split(key)
    bound = 1.0 / math.sqrt(cin * k)
    w = jax.random.uniform(k1, (cout, cin, k), jnp.float32, -bound, bound)
    b = jax.random.uniform(k2, (cout,), jnp.float32, -bound, bound)
    return w, b


def _init_bottle2neck(key, C, dilation, scale=8):
    width = C // scale
    keys = jax.random.split(key, 5)
    p = {}
    w, b = _init_conv(keys[0], width * scale, C, 1)
    p["conv1"] = prep_conv1x1(w, b)
    p["bn1_g"], p["bn1_b"] = jnp.ones(width * scale), jnp.zeros(width * scale)
    sub = jax.random.split(keys[1], scale - 1)
    p["convs"], p["bns_g"], p["bns_b"] = [], [], []
    for i in range(scale - 1):
        cw, cb = _init_conv(sub[i], width, width, 3)
        p["convs"].append(prep_convk(cw, cb, dilation))
        p["bns_g"].append(jnp.ones(width))
        p["bns_b"].append(jnp.zeros(width))
    w, b = _init_conv(keys[2], C, width * scale, 1)
    p["conv3"] = prep_conv1x1(w, b)
    p["bn3_g"], p["bn3_b"] = jnp.ones(C), jnp.zeros(C)
    w1, b1 = _init_conv(keys[3], 128, C, 1)
    w2, b2 = _init_conv(keys[4], C, 128, 1)
    p["se_w1"], p["se_b1"] = w1[:, :, 0].T, b1
    p["se_w2"], p["se_b2"] = w2[:, :, 0].T, b2
    return p


def init_params(key, C, *, n_fft=512, win_length=400, n_mels=80):
    keys = jax.random.split(key, 8)
    p = {}
    # ---- DSP constants, pre-padded bf16/f32 once outside jit ----
    n_bins = n_fft // 2 + 1
    nbp, nmp = _round_up(n_bins, 128), _round_up(n_mels, 128)
    kk = np.arange(n_fft, dtype=np.float64)[:, None]
    ff = np.arange(n_bins, dtype=np.float64)[None, :]
    ang = 2.0 * np.pi * kk * ff / n_fft
    p["dft_cos"] = jnp.zeros((n_fft, nbp), jnp.bfloat16).at[:, :n_bins].set(
        jnp.asarray(np.cos(ang), jnp.float32).astype(jnp.bfloat16))
    p["dft_sin"] = jnp.zeros((n_fft, nbp), jnp.bfloat16).at[:, :n_bins].set(
        jnp.asarray(np.sin(ang), jnp.float32).astype(jnp.bfloat16))
    p["mel_w"] = jnp.zeros((nbp, nmp), jnp.float32).at[:n_bins, :n_mels].set(
        jnp.asarray(mel_filter_bank_np(n_mels, n_fft).T))
    win = 0.54 - 0.46 * np.cos(2.0 * np.pi * np.arange(win_length) / win_length)
    wpad = (n_fft - win_length) // 2
    p["stft_window"] = jnp.asarray(
        np.pad(win, (wpad, n_fft - win_length - wpad)), jnp.float32)
    # ---- network weights (torch-layout init, then pre-pad/transposed) ----
    w, b = _init_conv(keys[0], C, 80, 5)
    p["conv1"] = prep_convk(w, b, 1)
    p["bn1_g"], p["bn1_b"] = jnp.ones(C), jnp.zeros(C)
    p["layer1"] = _init_bottle2neck(keys[1], C, 2)
    p["layer2"] = _init_bottle2neck(keys[2], C, 3)
    p["layer3"] = _init_bottle2neck(keys[3], C, 4)
    w, b = _init_conv(keys[4], 1536, 3 * C, 1)
    p["layer4"] = prep_conv1x1(w, b)
    w, b = _init_conv(keys[5], 256, 4608, 1)
    wm = w[:, :, 0]                                          # (256, 4608)
    p["att1_x"] = prep_linear(wm[:, :1536].T)                # bias folded per batch
    p["att1_wmu"] = wm[:, 1536:3072].T                       # (1536, 256) f32
    p["att1_wsd"] = wm[:, 3072:].T
    p["att1_b"] = b
    p["att_bn_g"], p["att_bn_b"] = jnp.ones(256), jnp.zeros(256)
    w, b = _init_conv(keys[6], 1536, 256, 1)
    p["att2"] = prep_conv1x1(w, b)
    p["bn5_g"], p["bn5_b"] = jnp.ones(3072), jnp.zeros(3072)
    wfc, bfc = _init_conv(keys[7], 256, 3072, 1)             # nn.Linear(3072, 256)
    p["fc6_w"], p["fc6_b"] = wfc[:, :, 0].T, bfc             # y = x @ W.T + b
    p["bn6_g"], p["bn6_b"] = jnp.ones(256), jnp.zeros(256)
    return p


if __name__ == "__main__":
    key = jax.random.PRNGKey(0)
    C = 64                                    # small intermediate channel count
    params = init_params(key, C)
    # waveform (batch=2, samples=3200) -> 21 STFT frames
    wav = 0.1 * jax.random.normal(jax.random.PRNGKey(0), (2, 3200), jnp.float32)
    fwd = jax.jit(ecapa_forward)
    out = jax.block_until_ready(fwd(params, wav))
    assert out.shape == (2, 256) and bool(jnp.all(jnp.isfinite(out)))
    print("KERNEL_OK")
</pallas_src>

<mosaic_0001>
module attributes {stable_mosaic.version = 11 : i64} {
  func.func @_melspec_kernel(%arg0: i32, %arg1: memref<48x512xbf16, #tpu.memory_space<vmem>>, %arg2: memref<512x384xbf16, #tpu.memory_space<vmem>>, %arg3: memref<512x384xbf16, #tpu.memory_space<vmem>>, %arg4: memref<384x128xf32, #tpu.memory_space<vmem>>, %arg5: memref<48x128xf32, #tpu.memory_space<vmem>>) attributes {dimension_semantics = [#tpu.dimension_semantics<parallel>], iteration_bounds = array<i64: 1>, scalar_prefetch = 0 : i64, scratch_operands = 0 : i64, tpu.core_type = #tpu.core_type<tc>, window_params = [{transform_indices = @transform_0, window_bounds = array<i64: 48, 512>}, {pipeline_mode = #tpu.pipeline_mode<synchronous>, transform_indices = @transform_1, window_bounds = array<i64: 512, 384>}, {pipeline_mode = #tpu.pipeline_mode<synchronous>, transform_indices = @transform_2, window_bounds = array<i64: 512, 384>}, {pipeline_mode = #tpu.pipeline_mode<synchronous>, transform_indices = @transform_3, window_bounds = array<i64: 384, 128>}, {transform_indices = @transform_4, window_bounds = array<i64: 48, 128>}]} {
    %c0 = arith.constant 0 : index
    %c0_0 = arith.constant 0 : index
    %0 = vector.load %arg1[%c0, %c0_0] : memref<48x512xbf16, #tpu.memory_space<vmem>>, vector<48x512xbf16>
    %c0_1 = arith.constant 0 : index
    %c0_2 = arith.constant 0 : index
    %1 = vector.load %arg2[%c0_1, %c0_2] : memref<512x384xbf16, #tpu.memory_space<vmem>>, vector<512x384xbf16>
    %cst = arith.constant dense<0.000000e+00> : vector<48x384xf32>
    %2 = tpu.matmul %0, %1, %cst {dimension_numbers = #tpu.dot_dimension_numbers<[1], [0], [0], [1], [0, 0, 1, 1], [], []>} : vector<48x512xbf16>, vector<512x384xbf16>, vector<48x384xf32> -> vector<48x384xf32>
    %c0_3 = arith.constant 0 : index
    %c0_4 = arith.constant 0 : index
    %3 = vector.load %arg3[%c0_3, %c0_4] : memref<512x384xbf16, #tpu.memory_space<vmem>>, vector<512x384xbf16>
    %cst_5 = arith.constant dense<0.000000e+00> : vector<48x384xf32>
    %4 = tpu.matmul %0, %3, %cst_5 {dimension_numbers = #tpu.dot_dimension_numbers<[1], [0], [0], [1], [0, 0, 1, 1], [], []>} : vector<48x512xbf16>, vector<512x384xbf16>, vector<48x384xf32> -> vector<48x384xf32>
    %5 = arith.mulf %2, %2 : vector<48x384xf32>
    %6 = arith.mulf %4, %4 : vector<48x384xf32>
    %7 = arith.addf %5, %6 : vector<48x384xf32>
    %c0_6 = arith.constant 0 : index
    %c0_7 = arith.constant 0 : index
    %8 = vector.load %arg4[%c0_6, %c0_7] : memref<384x128xf32, #tpu.memory_space<vmem>>, vector<384x128xf32>
    %cst_8 = arith.constant dense<0.000000e+00> : vector<48x128xf32>
    %9 = tpu.matmul %7, %8, %cst_8 {dimension_numbers = #tpu.dot_dimension_numbers<[1], [0], [0], [1], [0, 0, 1, 1], [], []>} : vector<48x384xf32>, vector<384x128xf32>, vector<48x128xf32> -> vector<48x128xf32>
    %c0_9 = arith.constant 0 : index
    %c0_10 = arith.constant 0 : index
    %10 = vector.load %arg5[%c0_9, %c0_10] : memref<48x128xf32, #tpu.memory_space<vmem>>, vector<48x128xf32>
    tpu.vector_store %arg5[%c0_9, %c0_10], %9 {strides = array<i32>} : memref<48x128xf32, #tpu.memory_space<vmem>>, vector<48x128xf32>,
    return
  }
  func.func @transform_0(%arg0: i32) -> (i32, i32) {
    %c0_i32 = arith.constant 0 : i32
    %c0_i32_0 = arith.constant 0 : i32
    return %arg0, %c0_i32 : i32, i32
  }
  func.func @transform_1(%arg0: i32) -> (i32, i32) {
    %c0_i32 = arith.constant 0 : i32
    %c0_i32_0 = arith.constant 0 : i32
    %c0_i32_1 = arith.constant 0 : i32
    return %c0_i32, %c0_i32_0 : i32, i32
  }
  func.func @transform_2(%arg0: i32) -> (i32, i32) {
    %c0_i32 = arith.constant 0 : i32
    %c0_i32_0 = arith.constant 0 : i32
    %c0_i32_1 = arith.constant 0 : i32
    return %c0_i32, %c0_i32_0 : i32, i32
  }
  func.func @transform_3(%arg0: i32) -> (i32, i32) {
    %c0_i32 = arith.constant 0 : i32
    %c0_i32_0 = arith.constant 0 : i32
    %c0_i32_1 = arith.constant 0 : i32
    return %c0_i32, %c0_i32_0 : i32, i32
  }
  func.func @transform_4(%arg0: i32) -> (i32, i32) {
    %c0_i32 = arith.constant 0 : i32
    %c0_i32_0 = arith.constant 0 : i32
    return %arg0, %c0_i32 : i32, i32
  }
}

module attributes {stable_mosaic.version = 11 : i64} {
  func.func @_convk_kernel(%arg0: i32, %arg1: memref<1x28x128xbf16, #tpu.memory_space<vmem>>, %arg2: memref<5x128x128xbf16, #tpu.memory_space<vmem>>, %arg3: memref<1x128xf32, #tpu.memory_space<vmem>>, %arg4: memref<1x24x128xf32, #tpu.memory_space<vmem>>) attributes {dimension_semantics = [#tpu.dimension_semantics<parallel>], iteration_bounds = array<i64: 2>, scalar_prefetch = 0 : i64, scratch_operands = 0 : i64, tpu.core_type = #tpu.core_type<tc>, window_params = [{transform_indices = @transform_0, window_bounds = array<i64: 1, 28, 128>}, {pipeline_mode = #tpu.pipeline_mode<synchronous>, transform_indices = @transform_1, window_bounds = array<i64: 5, 128, 128>}, {pipeline_mode = #tpu.pipeline_mode<synchronous>, transform_indices = @transform_2, window_bounds = array<i64: 1, 128>}, {transform_indices = @transform_3, window_bounds = array<i64: 1, 24, 128>}]} {
    %cst = arith.constant 0.000000e+00 : f32
    %0 = vector.broadcast %cst : f32 to vector<24x128xf32>
    %c0 = arith.constant 0 : index
    %c0_0 = arith.constant 0 : index
    %c0_1 = arith.constant 0 : index
    %1 = vector.load %arg1[%c0, %c0_0, %c0_1] : memref<1x28x128xbf16, #tpu.memory_space<vmem>>, vector<1x24x128xbf16>
    %2 = vector.shape_cast %1 : vector<1x24x128xbf16> to vector<24x128xbf16>
    %c0_2 = arith.constant 0 : index
    %c0_3 = arith.constant 0 : index
    %c0_4 = arith.constant 0 : index
    %3 = vector.load %arg2[%c0_2, %c0_3, %c0_4] : memref<5x128x128xbf16, #tpu.memory_space<vmem>>, vector<1x128x128xbf16>
    %4 = vector.shape_cast %3 : vector<1x128x128xbf16> to vector<128x128xbf16>
    %cst_5 = arith.constant dense<0.000000e+00> : vector<24x128xf32>
    %5 = tpu.matmul %2, %4, %cst_5 {dimension_numbers = #tpu.dot_dimension_numbers<[1], [0], [0], [1], [0, 0, 1, 1], [], []>} : vector<24x128xbf16>, vector<128x128xbf16>, vector<24x128xf32> -> vector<24x128xf32>
    %6 = arith.addf %0, %5 : vector<24x128xf32>
    %c0_6 = arith.constant 0 : index
    %c1 = arith.constant 1 : index
    %c0_7 = arith.constant 0 : index
    %7 = vector.load %arg1[%c0_6, %c1, %c0_7] : memref<1x28x128xbf16, #tpu.memory_space<vmem>>, vector<1x24x128xbf16>
    %8 = vector.shape_cast %7 : vector<1x24x128xbf16> to vector<24x128xbf16>
    %c1_8 = arith.constant 1 : index
    %c0_9 = arith.constant 0 : index
    %c0_10 = arith.constant 0 : index
    %9 = vector.load %arg2[%c1_8, %c0_9, %c0_10] : memref<5x128x128xbf16, #tpu.memory_space<vmem>>, vector<1x128x128xbf16>
    %10 = vector.shape_cast %9 : vector<1x128x128xbf16> to vector<128x128xbf16>
    %cst_11 = arith.constant dense<0.000000e+00> : vector<24x128xf32>
    %11 = tpu.matmul %8, %10, %cst_11 {dimension_numbers = #tpu.dot_dimension_numbers<[1], [0], [0], [1], [0, 0, 1, 1], [], []>} : vector<24x128xbf16>, vector<128x128xbf16>, vector<24x128xf32> -> vector<24x128xf32>
    %12 = arith.addf %6, %11 : vector<24x128xf32>
    %c0_12 = arith.constant 0 : index
    %c2 = arith.constant 2 : index
    %c0_13 = arith.constant 0 : index
    %13 = vector.load %arg1[%c0_12, %c2, %c0_13] : memref<1x28x128xbf16, #tpu.memory_space<vmem>>, vector<1x24x128xbf16>
    %14 = vector.shape_cast %13 : vector<1x24x128xbf16> to vector<24x128xbf16>
    %c2_14 = arith.constant 2 : index
    %c0_15 = arith.constant 0 : index
    %c0_16 = arith.constant 0 : index
    %15 = vector.load %arg2[%c2_14, %c0_15, %c0_16] : memref<5x128x128xbf16, #tpu.memory_space<vmem>>, vector<1x128x128xbf16>
    %16 = vector.shape_cast %15 : vector<1x128x128xbf16> to vector<128x128xbf16>
    %cst_17 = arith.constant dense<0.000000e+00> : vector<24x128xf32>
    %17 = tpu.matmul %14, %16, %cst_17 {dimension_numbers = #tpu.dot_dimension_numbers<[1], [0], [0], [1], [0, 0, 1, 1], [], []>} : vector<24x128xbf16>, vector<128x128xbf16>, vector<24x128xf32> -> vector<24x128xf32>
    %18 = arith.addf %12, %17 : vector<24x128xf32>
    %c0_18 = arith.constant 0 : index
    %c3 = arith.constant 3 : index
    %c0_19 = arith.constant 0 : index
    %19 = vector.load %arg1[%c0_18, %c3, %c0_19] : memref<1x28x128xbf16, #tpu.memory_space<vmem>>, vector<1x24x128xbf16>
    %20 = vector.shape_cast %19 : vector<1x24x128xbf16> to vector<24x128xbf16>
    %c3_20 = arith.constant 3 : index
    %c0_21 = arith.constant 0 : index
    %c0_22 = arith.constant 0 : index
    %21 = vector.load %arg2[%c3_20, %c0_21, %c0_22] : memref<5x128x128xbf16, #tpu.memory_space<vmem>>, vector<1x128x128xbf16>
    %22 = vector.shape_cast %21 : vector<1x128x128xbf16> to vector<128x128xbf16>
    %cst_23 = arith.constant dense<0.000000e+00> : vector<24x128xf32>
    %23 = tpu.matmul %20, %22, %cst_23 {dimension_numbers = #tpu.dot_dimension_numbers<[1], [0], [0], [1], [0, 0, 1, 1], [], []>} : vector<24x128xbf16>, vector<128x128xbf16>, vector<24x128xf32> -> vector<24x128xf32>
    %24 = arith.addf %18, %23 : vector<24x128xf32>
    %c0_24 = arith.constant 0 : index
    %c4 = arith.constant 4 : index
    %c0_25 = arith.constant 0 : index
    %25 = vector.load %arg1[%c0_24, %c4, %c0_25] : memref<1x28x128xbf16, #tpu.memory_space<vmem>>, vector<1x24x128xbf16>
    %26 = vector.shape_cast %25 : vector<1x24x128xbf16> to vector<24x128xbf16>
    %c4_26 = arith.constant 4 : index
    %c0_27 = arith.constant 0 : index
    %c0_28 = arith.constant 0 : index
    %27 = vector.load %arg2[%c4_26, %c0_27, %c0_28] : memref<5x128x128xbf16, #tpu.memory_space<vmem>>, vector<1x128x128xbf16>
    %28 = vector.shape_cast %27 : vector<1x128x128xbf16> to vector<128x128xbf16>
    %cst_29 = arith.constant dense<0.000000e+00> : vector<24x128xf32>
    %29 = tpu.matmul %26, %28, %cst_29 {dimension_numbers = #tpu.dot_dimension_numbers<[1], [0], [0], [1], [0, 0, 1, 1], [], []>} : vector<24x128xbf16>, vector<128x128xbf16>, vector<24x128xf32> -> vector<24x128xf32>
    %30 = arith.addf %24, %29 : vector<24x128xf32>
    %c0_30 = arith.constant 0 : index
    %c0_31 = arith.constant 0 : index
    %31 = vector.load %arg3[%c0_30, %c0_31] : memref<1x128xf32, #tpu.memory_space<vmem>>, vector<1x128xf32>
    %32 = vector.broadcast %31 : vector<1x128xf32> to vector<24x128xf32>
    %33 = arith.addf %30, %32 : vector<24x128xf32>
    %cst_32 = arith.constant 0.000000e+00 : f32
    %34 = vector.broadcast %cst_32 : f32 to vector<24x128xf32>
    %35 = arith.maximumf %33, %34 : vector<24x128xf32>
    %c0_33 = arith.constant 0 : index
    %c0_34 = arith.constant 0 : index
    %c0_35 = arith.constant 0 : index
    %36 = vector.load %arg4[%c0_33, %c0_34, %c0_35] : memref<1x24x128xf32, #tpu.memory_space<vmem>>, vector<1x24x128xf32>
    %37 = vector.shape_cast %36 : vector<1x24x128xf32> to vector<24x128xf32>
    %38 = vector.shape_cast %35 : vector<24x128xf32> to vector<1x24x128xf32>
    tpu.vector_store %arg4[%c0_33, %c0_34, %c0_35], %38 {strides = array<i32>} : memref<1x24x128xf32, #tpu.memory_space<vmem>>, vector<1x24x128xf32>,
    return
  }
  func.func @transform_0(%arg0: i32) -> (i32, i32, i32) {
    %c0_i32 = arith.constant 0 : i32
    %c0_i32_0 = arith.constant 0 : i32
    %c0_i32_1 = arith.constant 0 : i32
    return %arg0, %c0_i32, %c0_i32_0 : i32, i32, i32
  }
  func.func @transform_1(%arg0: i32) -> (i32, i32, i32) {
    %c0_i32 = arith.constant 0 : i32
    %c0_i32_0 = arith.constant 0 : i32
    %c0_i32_1 = arith.constant 0 : i32
    %c0_i32_2 = arith.constant 0 : i32
    return %c0_i32, %c0_i32_0, %c0_i32_1 : i32, i32, i32
  }
  func.func @transform_2(%arg0: i32) -> (i32, i32) {
    %c0_i32 = arith.constant 0 : i32
    %c0_i32_0 = arith.constant 0 : i32
    %c0_i32_1 = arith.constant 0 : i32
    return %c0_i32, %c0_i32_0 : i32, i32
  }
  func.func @transform_3(%arg0: i32) -> (i32, i32, i32) {
    %c0_i32 = arith.constant 0 : i32
    %c0_i32_0 = arith.constant 0 : i32
    %c0_i32_1 = arith.constant 0 : i32
    return %arg0, %c0_i32, %c0_i32_0 : i32, i32, i32
  }
}

module attributes {stable_mosaic.version = 11 : i64} {
  func.func @_mm_kernel(%arg0: i32, %arg1: i32, %arg2: i32, %arg3: memref<48x128xbf16, #tpu.memory_space<vmem>>, %arg4: memref<128x128xbf16, #tpu.memory_space<vmem>>, %arg5: memref<1x128xf32, #tpu.memory_space<vmem>>, %arg6: memref<48x128xf32, #tpu.memory_space<vmem>>, %arg7: memref<48x128xf32, #tpu.memory_space<vmem>>) attributes {dimension_semantics = [#tpu.dimension_semantics<parallel>, #tpu.dimension_semantics<parallel>, #tpu.dimension_semantics<arbitrary>], iteration_bounds = array<i64: 1, 1, 1>, scalar_prefetch = 0 : i64, scratch_operands = 1 : i64, tpu.core_type = #tpu.core_type<tc>, window_params = [{transform_indices = @transform_0, window_bounds = array<i64: 48, 128>}, {transform_indices = @transform_1, window_bounds = array<i64: 128, 128>}, {transform_indices = @transform_2, window_bounds = array<i64: 1, 128>}, {transform_indices = @transform_3, window_bounds = array<i64: 48, 128>}]} {
    %c0_i32 = arith.constant 0 : i32
    %0 = arith.cmpi eq, %arg2, %c0_i32 : i32
    %1 = arith.extui %0 : i1 to i32
    %c0_i32_0 = arith.constant 0 : i32
    %2 = arith.cmpi ne, %1, %c0_i32_0 : i32
    scf.if %2 {
      %cst_10 = arith.constant 0.000000e+00 : f32
      %12 = vector.broadcast %cst_10 : f32 to vector<48x128xf32>
      %c0_11 = arith.constant 0 : index
      %c0_12 = arith.constant 0 : index
      %13 = vector.load %arg7[%c0_11, %c0_12] : memref<48x128xf32, #tpu.memory_space<vmem>>, vector<48x128xf32>
      tpu.vector_store %arg7[%c0_11, %c0_12], %12 {strides = array<i32>} : memref<48x128xf32, #tpu.memory_space<vmem>>, vector<48x128xf32>,
    } else {
    }
    %c0 = arith.constant 0 : index
    %c0_1 = arith.constant 0 : index
    %3 = vector.load %arg7[%c0, %c0_1] : memref<48x128xf32, #tpu.memory_space<vmem>>, vector<48x128xf32>
    %c0_2 = arith.constant 0 : index
    %c0_3 = arith.constant 0 : index
    %4 = vector.load %arg3[%c0_2, %c0_3] : memref<48x128xbf16, #tpu.memory_space<vmem>>, vector<48x128xbf16>
    %c0_4 = arith.constant 0 : index
    %c0_5 = arith.constant 0 : index
    %5 = vector.load %arg4[%c0_4, %c0_5] : memref<128x128xbf16, #tpu.memory_space<vmem>>, vector<128x128xbf16>
    %cst = arith.constant dense<0.000000e+00> : vector<48x128xf32>
    %6 = tpu.matmul %4, %5, %cst {dimension_numbers = #tpu.dot_dimension_numbers<[1], [0], [0], [1], [0, 0, 1, 1], [], []>} : vector<48x128xbf16>, vector<128x128xbf16>, vector<48x128xf32> -> vector<48x128xf32>
    %7 = arith.addf %3, %6 : vector<48x128xf32>
    %c0_6 = arith.constant 0 : index
    %c0_7 = arith.constant 0 : index
    %8 = vector.load %arg7[%c0_6, %c0_7] : memref<48x128xf32, #tpu.memory_space<vmem>>, vector<48x128xf32>
    tpu.vector_store %arg7[%c0_6, %c0_7], %7 {strides = array<i32>} : memref<48x128xf32, #tpu.memory_space<vmem>>, vector<48x128xf32>,
    %c0_i32_8 = arith.constant 0 : i32
    %9 = arith.cmpi eq, %arg2, %c0_i32_8 : i32
    %10 = arith.extui %9 : i1 to i32
    %c0_i32_9 = arith.constant 0 : i32
    %11 = arith.cmpi ne, %10, %c0_i32_9 : i32
    scf.if %11 {
      %c0_10 = arith.constant 0 : index
      %c0_11 = arith.constant 0 : index
      %12 = vector.load %arg7[%c0_10, %c0_11] : memref<48x128xf32, #tpu.memory_space<vmem>>, vector<48x128xf32>
      %c0_12 = arith.constant 0 : index
      %c0_13 = arith.constant 0 : index
      %13 = vector.load %arg5[%c0_12, %c0_13] : memref<1x128xf32, #tpu.memory_space<vmem>>, vector<1x128xf32>
      %14 = vector.broadcast %13 : vector<1x128xf32> to vector<48x128xf32>
      %15 = arith.addf %12, %14 : vector<48x128xf32>
      %c0_14 = arith.constant 0 : index
      %c0_15 = arith.constant 0 : index
      %16 = vector.load %arg6[%c0_14, %c0_15] : memref<48x128xf32, #tpu.memory_space<vmem>>, vector<48x128xf32>
      tpu.vector_store %arg6[%c0_14, %c0_15], %15 {strides = array<i32>} : memref<48x128xf32, #tpu.memory_space<vmem>>, vector<48x128xf32>,
    } else {
    }
    return
  }
  func.func @transform_0(%arg0: i32, %arg1: i32, %arg2: i32) -> (i32, i32) {
    %c0_i32 = arith.constant 0 : i32
    return %arg0, %arg2 : i32, i32
  }
  func.func @transform_1(%arg0: i32, %arg1: i32, %arg2: i32) -> (i32, i32) {
    %c0_i32 = arith.constant 0 : i32
    return %arg2, %arg1 : i32, i32
  }
  func.func @transform_2(%arg0: i32, %arg1: i32, %arg2: i32) -> (i32, i32) {
    %c0_i32 = arith.constant 0 : i32
    %c0_i32_0 = arith.constant 0 : i32
    return %c0_i32, %arg1 : i32, i32
  }
  func.func @transform_3(%arg0: i32, %arg1: i32, %arg2: i32) -> (i32, i32) {
    %c0_i32 = arith.constant 0 : i32
    return %arg0, %arg1 : i32, i32
  }
}

module attributes {stable_mosaic.version = 11 : i64} {
  func.func @_convk_kernel(%arg0: i32, %arg1: memref<1x28x128xbf16, #tpu.memory_space<vmem>>, %arg2: memref<3x128x128xbf16, #tpu.memory_space<vmem>>, %arg3: memref<1x128xf32, #tpu.memory_space<vmem>>, %arg4: memref<1x24x128xf32, #tpu.memory_space<vmem>>) attributes {dimension_semantics = [#tpu.dimension_semantics<parallel>], iteration_bounds = array<i64: 2>, scalar_prefetch = 0 : i64, scratch_operands = 0 : i64, tpu.core_type = #tpu.core_type<tc>, window_params = [{transform_indices = @transform_0, window_bounds = array<i64: 1, 28, 128>}, {pipeline_mode = #tpu.pipeline_mode<synchronous>, transform_indices = @transform_1, window_bounds = array<i64: 3, 128, 128>}, {pipeline_mode = #tpu.pipeline_mode<synchronous>, transform_indices = @transform_2, window_bounds = array<i64: 1, 128>}, {transform_indices = @transform_3, window_bounds = array<i64: 1, 24, 128>}]} {
    %cst = arith.constant 0.000000e+00 : f32
    %0 = vector.broadcast %cst : f32 to vector<24x128xf32>
    %c0 = arith.constant 0 : index
    %c0_0 = arith.constant 0 : index
    %c0_1 = arith.constant 0 : index
    %1 = vector.load %arg1[%c0, %c0_0, %c0_1] : memref<1x28x128xbf16, #tpu.memory_space<vmem>>, vector<1x24x128xbf16>
    %2 = vector.shape_cast %1 : vector<1x24x128xbf16> to vector<24x128xbf16>
    %c0_2 = arith.constant 0 : index
    %c0_3 = arith.constant 0 : index
    %c0_4 = arith.constant 0 : index
    %3 = vector.load %arg2[%c0_2, %c0_3, %c0_4] : memref<3x128x128xbf16, #tpu.memory_space<vmem>>, vector<1x128x128xbf16>
    %4 = vector.shape_cast %3 : vector<1x128x128xbf16> to vector<128x128xbf16>
    %cst_5 = arith.constant dense<0.000000e+00> : vector<24x128xf32>
    %5 = tpu.matmul %2, %4, %cst_5 {dimension_numbers = #tpu.dot_dimension_numbers<[1], [0], [0], [1], [0, 0, 1, 1], [], []>} : vector<24x128xbf16>, vector<128x128xbf16>, vector<24x128xf32> -> vector<24x128xf32>
    %6 = arith.addf %0, %5 : vector<24x128xf32>
    %c0_6 = arith.constant 0 : index
    %c2 = arith.constant 2 : index
    %c0_7 = arith.constant 0 : index
    %7 = vector.load %arg1[%c0_6, %c2, %c0_7] : memref<1x28x128xbf16, #tpu.memory_space<vmem>>, vector<1x24x128xbf16>
    %8 = vector.shape_cast %7 : vector<1x24x128xbf16> to vector<24x128xbf16>
    %c1 = arith.constant 1 : index
    %c0_8 = arith.constant 0 : index
    %c0_9 = arith.constant 0 : index
    %9 = vector.load %arg2[%c1, %c0_8, %c0_9] : memref<3x128x128xbf16, #tpu.memory_space<vmem>>, vector<1x128x128xbf16>
    %10 = vector.shape_cast %9 : vector<1x128x128xbf16> to vector<128x128xbf16>
    %cst_10 = arith.constant dense<0.000000e+00> : vector<24x128xf32>
    %11 = tpu.matmul %8, %10, %cst_10 {dimension_numbers = #tpu.dot_dimension_numbers<[1], [0], [0], [1], [0, 0, 1, 1], [], []>} : vector<24x128xbf16>, vector<128x128xbf16>, vector<24x128xf32> -> vector<24x128xf32>
    %12 = arith.addf %6, %11 : vector<24x128xf32>
    %c0_11 = arith.constant 0 : index
    %c4 = arith.constant 4 : index
    %c0_12 = arith.constant 0 : index
    %13 = vector.load %arg1[%c0_11, %c4, %c0_12] : memref<1x28x128xbf16, #tpu.memory_space<vmem>>, vector<1x24x128xbf16>
    %14 = vector.shape_cast %13 : vector<1x24x128xbf16> to vector<24x128xbf16>
    %c2_13 = arith.constant 2 : index
    %c0_14 = arith.constant 0 : index
    %c0_15 = arith.constant 0 : index
    %15 = vector.load %arg2[%c2_13, %c0_14, %c0_15] : memref<3x128x128xbf16, #tpu.memory_space<vmem>>, vector<1x128x128xbf16>
    %16 = vector.shape_cast %15 : vector<1x128x128xbf16> to vector<128x128xbf16>
    %cst_16 = arith.constant dense<0.000000e+00> : vector<24x128xf32>
    %17 = tpu.matmul %14, %16, %cst_16 {dimension_numbers = #tpu.dot_dimension_numbers<[1], [0], [0], [1], [0, 0, 1, 1], [], []>} : vector<24x128xbf16>, vector<128x128xbf16>, vector<24x128xf32> -> vector<24x128xf32>
    %18 = arith.addf %12, %17 : vector<24x128xf32>
    %c0_17 = arith.constant 0 : index
    %c0_18 = arith.constant 0 : index
    %19 = vector.load %arg3[%c0_17, %c0_18] : memref<1x128xf32, #tpu.memory_space<vmem>>, vector<1x128xf32>
    %20 = vector.broadcast %19 : vector<1x128xf32> to vector<24x128xf32>
    %21 = arith.addf %18, %20 : vector<24x128xf32>
    %cst_19 = arith.constant 0.000000e+00 : f32
    %22 = vector.broadcast %cst_19 : f32 to vector<24x128xf32>
    %23 = arith.maximumf %21, %22 : vector<24x128xf32>
    %c0_20 = arith.constant 0 : index
    %c0_21 = arith.constant 0 : index
    %c0_22 = arith.constant 0 : index
    %24 = vector.load %arg4[%c0_20, %c0_21, %c0_22] : memref<1x24x128xf32, #tpu.memory_space<vmem>>, vector<1x24x128xf32>
    %25 = vector.shape_cast %24 : vector<1x24x128xf32> to vector<24x128xf32>
    %26 = vector.shape_cast %23 : vector<24x128xf32> to vector<1x24x128xf32>
    tpu.vector_store %arg4[%c0_20, %c0_21, %c0_22], %26 {strides = array<i32>} : memref<1x24x128xf32, #tpu.memory_space<vmem>>, vector<1x24x128xf32>,
    return
  }
  func.func @transform_0(%arg0: i32) -> (i32, i32, i32) {
    %c0_i32 = arith.constant 0 : i32
    %c0_i32_0 = arith.constant 0 : i32
    %c0_i32_1 = arith.constant 0 : i32
    return %arg0, %c0_i32, %c0_i32_0 : i32, i32, i32
  }
  func.func @transform_1(%arg0: i32) -> (i32, i32, i32) {
    %c0_i32 = arith.constant 0 : i32
    %c0_i32_0 = arith.constant 0 : i32
    %c0_i32_1 = arith.constant 0 : i32
    %c0_i32_2 = arith.constant 0 : i32
    return %c0_i32, %c0_i32_0, %c0_i32_1 : i32, i32, i32
  }
  func.func @transform_2(%arg0: i32) -> (i32, i32) {
    %c0_i32 = arith.constant 0 : i32
    %c0_i32_0 = arith.constant 0 : i32
    %c0_i32_1 = arith.constant 0 : i32
    return %c0_i32, %c0_i32_0 : i32, i32
  }
  func.func @transform_3(%arg0: i32) -> (i32, i32, i32) {
    %c0_i32 = arith.constant 0 : i32
    %c0_i32_0 = arith.constant 0 : i32
    %c0_i32_1 = arith.constant 0 : i32
    return %arg0, %c0_i32, %c0_i32_0 : i32, i32, i32
  }
}

module attributes {stable_mosaic.version = 11 : i64} {
  func.func @_convk_kernel(%arg0: i32, %arg1: memref<1x28x128xbf16, #tpu.memory_space<vmem>>, %arg2: memref<3x128x128xbf16, #tpu.memory_space<vmem>>, %arg3: memref<1x128xf32, #tpu.memory_space<vmem>>, %arg4: memref<1x24x128xf32, #tpu.memory_space<vmem>>) attributes {dimension_semantics = [#tpu.dimension_semantics<parallel>], iteration_bounds = array<i64: 2>, scalar_prefetch = 0 : i64, scratch_operands = 0 : i64, tpu.core_type = #tpu.core_type<tc>, window_params = [{transform_indices = @transform_0, window_bounds = array<i64: 1, 28, 128>}, {pipeline_mode = #tpu.pipeline_mode<synchronous>, transform_indices = @transform_1, window_bounds = array<i64: 3, 128, 128>}, {pipeline_mode = #tpu.pipeline_mode<synchronous>, transform_indices = @transform_2, window_bounds = array<i64: 1, 128>}, {transform_indices = @transform_3, window_bounds = array<i64: 1, 24, 128>}]} {
    %cst = arith.constant 0.000000e+00 : f32
    %0 = vector.broadcast %cst : f32 to vector<24x128xf32>
    %c0 = arith.constant 0 : index
    %c0_0 = arith.constant 0 : index
    %c0_1 = arith.constant 0 : index
    %1 = vector.load %arg1[%c0, %c0_0, %c0_1] : memref<1x28x128xbf16, #tpu.memory_space<vmem>>, vector<1x24x128xbf16>
    %2 = vector.shape_cast %1 : vector<1x24x128xbf16> to vector<24x128xbf16>
    %c0_2 = arith.constant 0 : index
    %c0_3 = arith.constant 0 : index
    %c0_4 = arith.constant 0 : index
    %3 = vector.load %arg2[%c0_2, %c0_3, %c0_4] : memref<3x128x128xbf16, #tpu.memory_space<vmem>>, vector<1x128x128xbf16>
    %4 = vector.shape_cast %3 : vector<1x128x128xbf16> to vector<128x128xbf16>
    %cst_5 = arith.constant dense<0.000000e+00> : vector<24x128xf32>
    %5 = tpu.matmul %2, %4, %cst_5 {dimension_numbers = #tpu.dot_dimension_numbers<[1], [0], [0], [1], [0, 0, 1, 1], [], []>} : vector<24x128xbf16>, vector<128x128xbf16>, vector<24x128xf32> -> vector<24x128xf32>
    %6 = arith.addf %0, %5 : vector<24x128xf32>
    %c0_6 = arith.constant 0 : index
    %c2 = arith.constant 2 : index
    %c0_7 = arith.constant 0 : index
    %7 = vector.load %arg1[%c0_6, %c2, %c0_7] : memref<1x28x128xbf16, #tpu.memory_space<vmem>>, vector<1x24x128xbf16>
    %8 = vector.shape_cast %7 : vector<1x24x128xbf16> to vector<24x128xbf16>
    %c1 = arith.constant 1 : index
    %c0_8 = arith.constant 0 : index
    %c0_9 = arith.constant 0 : index
    %9 = vector.load %arg2[%c1, %c0_8, %c0_9] : memref<3x128x128xbf16, #tpu.memory_space<vmem>>, vector<1x128x128xbf16>
    %10 = vector.shape_cast %9 : vector<1x128x128xbf16> to vector<128x128xbf16>
    %cst_10 = arith.constant dense<0.000000e+00> : vector<24x128xf32>
    %11 = tpu.matmul %8, %10, %cst_10 {dimension_numbers = #tpu.dot_dimension_numbers<[1], [0], [0], [1], [0, 0, 1, 1], [], []>} : vector<24x128xbf16>, vector<128x128xbf16>, vector<24x128xf32> -> vector<24x128xf32>
    %12 = arith.addf %6, %11 : vector<24x128xf32>
    %c0_11 = arith.constant 0 : index
    %c4 = arith.constant 4 : index
    %c0_12 = arith.constant 0 : index
    %13 = vector.load %arg1[%c0_11, %c4, %c0_12] : memref<1x28x128xbf16, #tpu.memory_space<vmem>>, vector<1x24x128xbf16>
    %14 = vector.shape_cast %13 : vector<1x24x128xbf16> to vector<24x128xbf16>
    %c2_13 = arith.constant 2 : index
    %c0_14 = arith.constant 0 : index
    %c0_15 = arith.constant 0 : index
    %15 = vector.load %arg2[%c2_13, %c0_14, %c0_15] : memref<3x128x128xbf16, #tpu.memory_space<vmem>>, vector<1x128x128xbf16>
    %16 = vector.shape_cast %15 : vector<1x128x128xbf16> to vector<128x128xbf16>
    %cst_16 = arith.constant dense<0.000000e+00> : vector<24x128xf32>
    %17 = tpu.matmul %14, %16, %cst_16 {dimension_numbers = #tpu.dot_dimension_numbers<[1], [0], [0], [1], [0, 0, 1, 1], [], []>} : vector<24x128xbf16>, vector<128x128xbf16>, vector<24x128xf32> -> vector<24x128xf32>
    %18 = arith.addf %12, %17 : vector<24x128xf32>
    %c0_17 = arith.constant 0 : index
    %c0_18 = arith.constant 0 : index
    %19 = vector.load %arg3[%c0_17, %c0_18] : memref<1x128xf32, #tpu.memory_space<vmem>>, vector<1x128xf32>
    %20 = vector.broadcast %19 : vector<1x128xf32> to vector<24x128xf32>
    %21 = arith.addf %18, %20 : vector<24x128xf32>
    %cst_19 = arith.constant 0.000000e+00 : f32
    %22 = vector.broadcast %cst_19 : f32 to vector<24x128xf32>
    %23 = arith.maximumf %21, %22 : vector<24x128xf32>
    %c0_20 = arith.constant 0 : index
    %c0_21 = arith.constant 0 : index
    %c0_22 = arith.constant 0 : index
    %24 = vector.load %arg4[%c0_20, %c0_21, %c0_22] : memref<1x24x128xf32, #tpu.memory_space<vmem>>, vector<1x24x128xf32>
    %25 = vector.shape_cast %24 : vector<1x24x128xf32> to vector<24x128xf32>
    %26 = vector.shape_cast %23 : vector<24x128xf32> to vector<1x24x128xf32>
    tpu.vector_store %arg4[%c0_20, %c0_21, %c0_22], %26 {strides = array<i32>} : memref<1x24x128xf32, #tpu.memory_space<vmem>>, vector<1x24x128xf32>,
    return
  }
  func.func @transform_0(%arg0: i32) -> (i32, i32, i32) {
    %c0_i32 = arith.constant 0 : i32
    %c0_i32_0 = arith.constant 0 : i32
    %c0_i32_1 = arith.constant 0 : i32
    return %arg0, %c0_i32, %c0_i32_0 : i32, i32, i32
  }
  func.func @transform_1(%arg0: i32) -> (i32, i32, i32) {
    %c0_i32 = arith.constant 0 : i32
    %c0_i32_0 = arith.constant 0 : i32
    %c0_i32_1 = arith.constant 0 : i32
    %c0_i32_2 = arith.constant 0 : i32
    return %c0_i32, %c0_i32_0, %c0_i32_1 : i32, i32, i32
  }
  func.func @transform_2(%arg0: i32) -> (i32, i32) {
    %c0_i32 = arith.constant 0 : i32
    %c0_i32_0 = arith.constant 0 : i32
    %c0_i32_1 = arith.constant 0 : i32
    return %c0_i32, %c0_i32_0 : i32, i32
  }
  func.func @transform_3(%arg0: i32) -> (i32, i32, i32) {
    %c0_i32 = arith.constant 0 : i32
    %c0_i32_0 = arith.constant 0 : i32
    %c0_i32_1 = arith.constant 0 : i32
    return %arg0, %c0_i32, %c0_i32_0 : i32, i32, i32
  }
}

module attributes {stable_mosaic.version = 11 : i64} {
  func.func @_mm_kernel(%arg0: i32, %arg1: i32, %arg2: i32, %arg3: memref<48x128xbf16, #tpu.memory_space<vmem>>, %arg4: memref<128x128xbf16, #tpu.memory_space<vmem>>, %arg5: memref<1x128xf32, #tpu.memory_space<vmem>>, %arg6: memref<48x128xf32, #tpu.memory_space<vmem>>, %arg7: memref<48x128xf32, #tpu.memory_space<vmem>>) attributes {dimension_semantics = [#tpu.dimension_semantics<parallel>, #tpu.dimension_semantics<parallel>, #tpu.dimension_semantics<arbitrary>], iteration_bounds = array<i64: 1, 1, 1>, scalar_prefetch = 0 : i64, scratch_operands = 1 : i64, tpu.core_type = #tpu.core_type<tc>, window_params = [{transform_indices = @transform_0, window_bounds = array<i64: 48, 128>}, {transform_indices = @transform_1, window_bounds = array<i64: 128, 128>}, {transform_indices = @transform_2, window_bounds = array<i64: 1, 128>}, {transform_indices = @transform_3, window_bounds = array<i64: 48, 128>}]} {
    %c0_i32 = arith.constant 0 : i32
    %0 = arith.cmpi eq, %arg2, %c0_i32 : i32
    %1 = arith.extui %0 : i1 to i32
    %c0_i32_0 = arith.constant 0 : i32
    %2 = arith.cmpi ne, %1, %c0_i32_0 : i32
    scf.if %2 {
      %cst_10 = arith.constant 0.000000e+00 : f32
      %12 = vector.broadcast %cst_10 : f32 to vector<48x128xf32>
      %c0_11 = arith.constant 0 : index
      %c0_12 = arith.constant 0 : index
      %13 = vector.load %arg7[%c0_11, %c0_12] : memref<48x128xf32, #tpu.memory_space<vmem>>, vector<48x128xf32>
      tpu.vector_store %arg7[%c0_11, %c0_12], %12 {strides = array<i32>} : memref<48x128xf32, #tpu.memory_space<vmem>>, vector<48x128xf32>,
    } else {
    }
    %c0 = arith.constant 0 : index
    %c0_1 = arith.constant 0 : index
    %3 = vector.load %arg7[%c0, %c0_1] : memref<48x128xf32, #tpu.memory_space<vmem>>, vector<48x128xf32>
    %c0_2 = arith.constant 0 : index
    %c0_3 = arith.constant 0 : index
    %4 = vector.load %arg3[%c0_2, %c0_3] : memref<48x128xbf16, #tpu.memory_space<vmem>>, vector<48x128xbf16>
    %c0_4 = arith.constant 0 : index
    %c0_5 = arith.constant 0 : index
    %5 = vector.load %arg4[%c0_4, %c0_5] : memref<128x128xbf16, #tpu.memory_space<vmem>>, vector<128x128xbf16>
    %cst = arith.constant dense<0.000000e+00> : vector<48x128xf32>
    %6 = tpu.matmul %4, %5, %cst {dimension_numbers = #tpu.dot_dimension_numbers<[1], [0], [0], [1], [0, 0, 1, 1], [], []>} : vector<48x128xbf16>, vector<128x128xbf16>, vector<48x128xf32> -> vector<48x128xf32>
    %7 = arith.addf %3, %6 : vector<48x128xf32>
    %c0_6 = arith.constant 0 : index
    %c0_7 = arith.constant 0 : index
    %8 = vector.load %arg7[%c0_6, %c0_7] : memref<48x128xf32, #tpu.memory_space<vmem>>, vector<48x128xf32>
    tpu.vector_store %arg7[%c0_6, %c0_7], %7 {strides = array<i32>} : memref<48x128xf32, #tpu.memory_space<vmem>>, vector<48x128xf32>,
    %c0_i32_8 = arith.constant 0 : i32
    %9 = arith.cmpi eq, %arg2, %c0_i32_8 : i32
    %10 = arith.extui %9 : i1 to i32
    %c0_i32_9 = arith.constant 0 : i32
    %11 = arith.cmpi ne, %10, %c0_i32_9 : i32
    scf.if %11 {
      %c0_10 = arith.constant 0 : index
      %c0_11 = arith.constant 0 : index
      %12 = vector.load %arg7[%c0_10, %c0_11] : memref<48x128xf32, #tpu.memory_space<vmem>>, vector<48x128xf32>
      %c0_12 = arith.constant 0 : index
      %c0_13 = arith.constant 0 : index
      %13 = vector.load %arg5[%c0_12, %c0_13] : memref<1x128xf32, #tpu.memory_space<vmem>>, vector<1x128xf32>
      %14 = vector.broadcast %13 : vector<1x128xf32> to vector<48x128xf32>
      %15 = arith.addf %12, %14 : vector<48x128xf32>
      %cst_14 = arith.constant 0.000000e+00 : f32
      %16 = vector.broadcast %cst_14 : f32 to vector<48x128xf32>
      %17 = arith.maximumf %15, %16 : vector<48x128xf32>
      %c0_15 = arith.constant 0 : index
      %c0_16 = arith.constant 0 : index
      %18 = vector.load %arg6[%c0_15, %c0_16] : memref<48x128xf32, #tpu.memory_space<vmem>>, vector<48x128xf32>
      tpu.vector_store %arg6[%c0_15, %c0_16], %17 {strides = array<i32>} : memref<48x128xf32, #tpu.memory_space<vmem>>, vector<48x128xf32>,
    } else {
    }
    return
  }
  func.func @transform_0(%arg0: i32, %arg1: i32, %arg2: i32) -> (i32, i32) {
    %c0_i32 = arith.constant 0 : i32
    return %arg0, %arg2 : i32, i32
  }
  func.func @transform_1(%arg0: i32, %arg1: i32, %arg2: i32) -> (i32, i32) {
    %c0_i32 = arith.constant 0 : i32
    return %arg2, %arg1 : i32, i32
  }
  func.func @transform_2(%arg0: i32, %arg1: i32, %arg2: i32) -> (i32, i32) {
    %c0_i32 = arith.constant 0 : i32
    %c0_i32_0 = arith.constant 0 : i32
    return %c0_i32, %arg1 : i32, i32
  }
  func.func @transform_3(%arg0: i32, %arg1: i32, %arg2: i32) -> (i32, i32) {
    %c0_i32 = arith.constant 0 : i32
    return %arg0, %arg1 : i32, i32
  }
}

module attributes {stable_mosaic.version = 11 : i64} {
  func.func @_convk_kernel(%arg0: i32, %arg1: memref<1x30x128xbf16, #tpu.memory_space<vmem>>, %arg2: memref<3x128x128xbf16, #tpu.memory_space<vmem>>, %arg3: memref<1x128xf32, #tpu.memory_space<vmem>>, %arg4: memref<1x24x128xf32, #tpu.memory_space<vmem>>) attributes {dimension_semantics = [#tpu.dimension_semantics<parallel>], iteration_bounds = array<i64: 2>, scalar_prefetch = 0 : i64, scratch_operands = 0 : i64, tpu.core_type = #tpu.core_type<tc>, window_params = [{transform_indices = @transform_0, window_bounds = array<i64: 1, 30, 128>}, {pipeline_mode = #tpu.pipeline_mode<synchronous>, transform_indices = @transform_1, window_bounds = array<i64: 3, 128, 128>}, {pipeline_mode = #tpu.pipeline_mode<synchronous>, transform_indices = @transform_2, window_bounds = array<i64: 1, 128>}, {transform_indices = @transform_3, window_bounds = array<i64: 1, 24, 128>}]} {
    %cst = arith.constant 0.000000e+00 : f32
    %0 = vector.broadcast %cst : f32 to vector<24x128xf32>
    %c0 = arith.constant 0 : index
    %c0_0 = arith.constant 0 : index
    %c0_1 = arith.constant 0 : index
    %1 = vector.load %arg1[%c0, %c0_0, %c0_1] : memref<1x30x128xbf16, #tpu.memory_space<vmem>>, vector<1x24x128xbf16>
    %2 = vector.shape_cast %1 : vector<1x24x128xbf16> to vector<24x128xbf16>
    %c0_2 = arith.constant 0 : index
    %c0_3 = arith.constant 0 : index
    %c0_4 = arith.constant 0 : index
    %3 = vector.load %arg2[%c0_2, %c0_3, %c0_4] : memref<3x128x128xbf16, #tpu.memory_space<vmem>>, vector<1x128x128xbf16>
    %4 = vector.shape_cast %3 : vector<1x128x128xbf16> to vector<128x128xbf16>
    %cst_5 = arith.constant dense<0.000000e+00> : vector<24x128xf32>
    %5 = tpu.matmul %2, %4, %cst_5 {dimension_numbers = #tpu.dot_dimension_numbers<[1], [0], [0], [1], [0, 0, 1, 1], [], []>} : vector<24x128xbf16>, vector<128x128xbf16>, vector<24x128xf32> -> vector<24x128xf32>
    %6 = arith.addf %0, %5 : vector<24x128xf32>
    %c0_6 = arith.constant 0 : index
    %c3 = arith.constant 3 : index
    %c0_7 = arith.constant 0 : index
    %7 = vector.load %arg1[%c0_6, %c3, %c0_7] : memref<1x30x128xbf16, #tpu.memory_space<vmem>>, vector<1x24x128xbf16>
    %8 = vector.shape_cast %7 : vector<1x24x128xbf16> to vector<24x128xbf16>
    %c1 = arith.constant 1 : index
    %c0_8 = arith.constant 0 : index
    %c0_9 = arith.constant 0 : index
    %9 = vector.load %arg2[%c1, %c0_8, %c0_9] : memref<3x128x128xbf16, #tpu.memory_space<vmem>>, vector<1x128x128xbf16>
    %10 = vector.shape_cast %9 : vector<1x128x128xbf16> to vector<128x128xbf16>
    %cst_10 = arith.constant dense<0.000000e+00> : vector<24x128xf32>
    %11 = tpu.matmul %8, %10, %cst_10 {dimension_numbers = #tpu.dot_dimension_numbers<[1], [0], [0], [1], [0, 0, 1, 1], [], []>} : vector<24x128xbf16>, vector<128x128xbf16>, vector<24x128xf32> -> vector<24x128xf32>
    %12 = arith.addf %6, %11 : vector<24x128xf32>
    %c0_11 = arith.constant 0 : index
    %c6 = arith.constant 6 : index
    %c0_12 = arith.constant 0 : index
    %13 = vector.load %arg1[%c0_11, %c6, %c0_12] : memref<1x30x128xbf16, #tpu.memory_space<vmem>>, vector<1x24x128xbf16>
    %14 = vector.shape_cast %13 : vector<1x24x128xbf16> to vector<24x128xbf16>
    %c2 = arith.constant 2 : index
    %c0_13 = arith.constant 0 : index
    %c0_14 = arith.constant 0 : index
    %15 = vector.load %arg2[%c2, %c0_13, %c0_14] : memref<3x128x128xbf16, #tpu.memory_space<vmem>>, vector<1x128x128xbf16>
    %16 = vector.shape_cast %15 : vector<1x128x128xbf16> to vector<128x128xbf16>
    %cst_15 = arith.constant dense<0.000000e+00> : vector<24x128xf32>
    %17 = tpu.matmul %14, %16, %cst_15 {dimension_numbers = #tpu.dot_dimension_numbers<[1], [0], [0], [1], [0, 0, 1, 1], [], []>} : vector<24x128xbf16>, vector<128x128xbf16>, vector<24x128xf32> -> vector<24x128xf32>
    %18 = arith.addf %12, %17 : vector<24x128xf32>
    %c0_16 = arith.constant 0 : index
    %c0_17 = arith.constant 0 : index
    %19 = vector.load %arg3[%c0_16, %c0_17] : memref<1x128xf32, #tpu.memory_space<vmem>>, vector<1x128xf32>
    %20 = vector.broadcast %19 : vector<1x128xf32> to vector<24x128xf32>
    %21 = arith.addf %18, %20 : vector<24x128xf32>
    %cst_18 = arith.constant 0.000000e+00 : f32
    %22 = vector.broadcast %cst_18 : f32 to vector<24x128xf32>
    %23 = arith.maximumf %21, %22 : vector<24x128xf32>
    %c0_19 = arith.constant 0 : index
    %c0_20 = arith.constant 0 : index
    %c0_21 = arith.constant 0 : index
    %24 = vector.load %arg4[%c0_19, %c0_20, %c0_21] : memref<1x24x128xf32, #tpu.memory_space<vmem>>, vector<1x24x128xf32>
    %25 = vector.shape_cast %24 : vector<1x24x128xf32> to vector<24x128xf32>
    %26 = vector.shape_cast %23 : vector<24x128xf32> to vector<1x24x128xf32>
    tpu.vector_store %arg4[%c0_19, %c0_20, %c0_21], %26 {strides = array<i32>} : memref<1x24x128xf32, #tpu.memory_space<vmem>>, vector<1x24x128xf32>,
    return
  }
  func.func @transform_0(%arg0: i32) -> (i32, i32, i32) {
    %c0_i32 = arith.constant 0 : i32
    %c0_i32_0 = arith.constant 0 : i32
    %c0_i32_1 = arith.constant 0 : i32
    return %arg0, %c0_i32, %c0_i32_0 : i32, i32, i32
  }
  func.func @transform_1(%arg0: i32) -> (i32, i32, i32) {
    %c0_i32 = arith.constant 0 : i32
    %c0_i32_0 = arith.constant 0 : i32
    %c0_i32_1 = arith.constant 0 : i32
    %c0_i32_2 = arith.constant 0 : i32
    return %c0_i32, %c0_i32_0, %c0_i32_1 : i32, i32, i32
  }
  func.func @transform_2(%arg0: i32) -> (i32, i32) {
    %c0_i32 = arith.constant 0 : i32
    %c0_i32_0 = arith.constant 0 : i32
    %c0_i32_1 = arith.constant 0 : i32
    return %c0_i32, %c0_i32_0 : i32, i32
  }
  func.func @transform_3(%arg0: i32) -> (i32, i32, i32) {
    %c0_i32 = arith.constant 0 : i32
    %c0_i32_0 = arith.constant 0 : i32
    %c0_i32_1 = arith.constant 0 : i32
    return %arg0, %c0_i32, %c0_i32_0 : i32, i32, i32
  }
}

module attributes {stable_mosaic.version = 11 : i64} {
  func.func @_convk_kernel(%arg0: i32, %arg1: memref<1x32x128xbf16, #tpu.memory_space<vmem>>, %arg2: memref<3x128x128xbf16, #tpu.memory_space<vmem>>, %arg3: memref<1x128xf32, #tpu.memory_space<vmem>>, %arg4: memref<1x24x128xf32, #tpu.memory_space<vmem>>) attributes {dimension_semantics = [#tpu.dimension_semantics<parallel>], iteration_bounds = array<i64: 2>, scalar_prefetch = 0 : i64, scratch_operands = 0 : i64, tpu.core_type = #tpu.core_type<tc>, window_params = [{transform_indices = @transform_0, window_bounds = array<i64: 1, 32, 128>}, {pipeline_mode = #tpu.pipeline_mode<synchronous>, transform_indices = @transform_1, window_bounds = array<i64: 3, 128, 128>}, {pipeline_mode = #tpu.pipeline_mode<synchronous>, transform_indices = @transform_2, window_bounds = array<i64: 1, 128>}, {transform_indices = @transform_3, window_bounds = array<i64: 1, 24, 128>}]} {
    %cst = arith.constant 0.000000e+00 : f32
    %0 = vector.broadcast %cst : f32 to vector<24x128xf32>
    %c0 = arith.constant 0 : index
    %c0_0 = arith.constant 0 : index
    %c0_1 = arith.constant 0 : index
    %1 = vector.load %arg1[%c0, %c0_0, %c0_1] : memref<1x32x128xbf16, #tpu.memory_space<vmem>>, vector<1x24x128xbf16>
    %2 = vector.shape_cast %1 : vector<1x24x128xbf16> to vector<24x128xbf16>
    %c0_2 = arith.constant 0 : index
    %c0_3 = arith.constant 0 : index
    %c0_4 = arith.constant 0 : index
    %3 = vector.load %arg2[%c0_2, %c0_3, %c0_4] : memref<3x128x128xbf16, #tpu.memory_space<vmem>>, vector<1x128x128xbf16>
    %4 = vector.shape_cast %3 : vector<1x128x128xbf16> to vector<128x128xbf16>
    %cst_5 = arith.constant dense<0.000000e+00> : vector<24x128xf32>
    %5 = tpu.matmul %2, %4, %cst_5 {dimension_numbers = #tpu.dot_dimension_numbers<[1], [0], [0], [1], [0, 0, 1, 1], [], []>} : vector<24x128xbf16>, vector<128x128xbf16>, vector<24x128xf32> -> vector<24x128xf32>
    %6 = arith.addf %0, %5 : vector<24x128xf32>
    %c0_6 = arith.constant 0 : index
    %c4 = arith.constant 4 : index
    %c0_7 = arith.constant 0 : index
    %7 = vector.load %arg1[%c0_6, %c4, %c0_7] : memref<1x32x128xbf16, #tpu.memory_space<vmem>>, vector<1x24x128xbf16>
    %8 = vector.shape_cast %7 : vector<1x24x128xbf16> to vector<24x128xbf16>
    %c1 = arith.constant 1 : index
    %c0_8 = arith.constant 0 : index
    %c0_9 = arith.constant 0 : index
    %9 = vector.load %arg2[%c1, %c0_8, %c0_9] : memref<3x128x128xbf16, #tpu.memory_space<vmem>>, vector<1x128x128xbf16>
    %10 = vector.shape_cast %9 : vector<1x128x128xbf16> to vector<128x128xbf16>
    %cst_10 = arith.constant dense<0.000000e+00> : vector<24x128xf32>
    %11 = tpu.matmul %8, %10, %cst_10 {dimension_numbers = #tpu.dot_dimension_numbers<[1], [0], [0], [1], [0, 0, 1, 1], [], []>} : vector<24x128xbf16>, vector<128x128xbf16>, vector<24x128xf32> -> vector<24x128xf32>
    %12 = arith.addf %6, %11 : vector<24x128xf32>
    %c0_11 = arith.constant 0 : index
    %c8 = arith.constant 8 : index
    %c0_12 = arith.constant 0 : index
    %13 = vector.load %arg1[%c0_11, %c8, %c0_12] : memref<1x32x128xbf16, #tpu.memory_space<vmem>>, vector<1x24x128xbf16>
    %14 = vector.shape_cast %13 : vector<1x24x128xbf16> to vector<24x128xbf16>
    %c2 = arith.constant 2 : index
    %c0_13 = arith.constant 0 : index
    %c0_14 = arith.constant 0 : index
    %15 = vector.load %arg2[%c2, %c0_13, %c0_14] : memref<3x128x128xbf16, #tpu.memory_space<vmem>>, vector<1x128x128xbf16>
    %16 = vector.shape_cast %15 : vector<1x128x128xbf16> to vector<128x128xbf16>
    %cst_15 = arith.constant dense<0.000000e+00> : vector<24x128xf32>
    %17 = tpu.matmul %14, %16, %cst_15 {dimension_numbers = #tpu.dot_dimension_numbers<[1], [0], [0], [1], [0, 0, 1, 1], [], []>} : vector<24x128xbf16>, vector<128x128xbf16>, vector<24x128xf32> -> vector<24x128xf32>
    %18 = arith.addf %12, %17 : vector<24x128xf32>
    %c0_16 = arith.constant 0 : index
    %c0_17 = arith.constant 0 : index
    %19 = vector.load %arg3[%c0_16, %c0_17] : memref<1x128xf32, #tpu.memory_space<vmem>>, vector<1x128xf32>
    %20 = vector.broadcast %19 : vector<1x128xf32> to vector<24x128xf32>
    %21 = arith.addf %18, %20 : vector<24x128xf32>
    %cst_18 = arith.constant 0.000000e+00 : f32
    %22 = vector.broadcast %cst_18 : f32 to vector<24x128xf32>
    %23 = arith.maximumf %21, %22 : vector<24x128xf32>
    %c0_19 = arith.constant 0 : index
    %c0_20 = arith.constant 0 : index
    %c0_21 = arith.constant 0 : index
    %24 = vector.load %arg4[%c0_19, %c0_20, %c0_21] : memref<1x24x128xf32, #tpu.memory_space<vmem>>, vector<1x24x128xf32>
    %25 = vector.shape_cast %24 : vector<1x24x128xf32> to vector<24x128xf32>
    %26 = vector.shape_cast %23 : vector<24x128xf32> to vector<1x24x128xf32>
    tpu.vector_store %arg4[%c0_19, %c0_20, %c0_21], %26 {strides = array<i32>} : memref<1x24x128xf32, #tpu.memory_space<vmem>>, vector<1x24x128xf32>,
    return
  }
  func.func @transform_0(%arg0: i32) -> (i32, i32, i32) {
    %c0_i32 = arith.constant 0 : i32
    %c0_i32_0 = arith.constant 0 : i32
    %c0_i32_1 = arith.constant 0 : i32
    return %arg0, %c0_i32, %c0_i32_0 : i32, i32, i32
  }
  func.func @transform_1(%arg0: i32) -> (i32, i32, i32) {
    %c0_i32 = arith.constant 0 : i32
    %c0_i32_0 = arith.constant 0 : i32
    %c0_i32_1 = arith.constant 0 : i32
    %c0_i32_2 = arith.constant 0 : i32
    return %c0_i32, %c0_i32_0, %c0_i32_1 : i32, i32, i32
  }
  func.func @transform_2(%arg0: i32) -> (i32, i32) {
    %c0_i32 = arith.constant 0 : i32
    %c0_i32_0 = arith.constant 0 : i32
    %c0_i32_1 = arith.constant 0 : i32
    return %c0_i32, %c0_i32_0 : i32, i32
  }
  func.func @transform_3(%arg0: i32) -> (i32, i32, i32) {
    %c0_i32 = arith.constant 0 : i32
    %c0_i32_0 = arith.constant 0 : i32
    %c0_i32_1 = arith.constant 0 : i32
    return %arg0, %c0_i32, %c0_i32_0 : i32, i32, i32
  }
}

module attributes {stable_mosaic.version = 11 : i64} {
  func.func @_convk_kernel(%arg0: i32, %arg1: memref<1x32x128xbf16, #tpu.memory_space<vmem>>, %arg2: memref<3x128x128xbf16, #tpu.memory_space<vmem>>, %arg3: memref<1x128xf32, #tpu.memory_space<vmem>>, %arg4: memref<1x24x128xf32, #tpu.memory_space<vmem>>) attributes {dimension_semantics = [#tpu.dimension_semantics<parallel>], iteration_bounds = array<i64: 2>, scalar_prefetch = 0 : i64, scratch_operands = 0 : i64, tpu.core_type = #tpu.core_type<tc>, window_params = [{transform_indices = @transform_0, window_bounds = array<i64: 1, 32, 128>}, {pipeline_mode = #tpu.pipeline_mode<synchronous>, transform_indices = @transform_1, window_bounds = array<i64: 3, 128, 128>}, {pipeline_mode = #tpu.pipeline_mode<synchronous>, transform_indices = @transform_2, window_bounds = array<i64: 1, 128>}, {transform_indices = @transform_3, window_bounds = array<i64: 1, 24, 128>}]} {
    %cst = arith.constant 0.000000e+00 : f32
    %0 = vector.broadcast %cst : f32 to vector<24x128xf32>
    %c0 = arith.constant 0 : index
    %c0_0 = arith.constant 0 : index
    %c0_1 = arith.constant 0 : index
    %1 = vector.load %arg1[%c0, %c0_0, %c0_1] : memref<1x32x128xbf16, #tpu.memory_space<vmem>>, vector<1x24x128xbf16>
    %2 = vector.shape_cast %1 : vector<1x24x128xbf16> to vector<24x128xbf16>
    %c0_2 = arith.constant 0 : index
    %c0_3 = arith.constant 0 : index
    %c0_4 = arith.constant 0 : index
    %3 = vector.load %arg2[%c0_2, %c0_3, %c0_4] : memref<3x128x128xbf16, #tpu.memory_space<vmem>>, vector<1x128x128xbf16>
    %4 = vector.shape_cast %3 : vector<1x128x128xbf16> to vector<128x128xbf16>
    %cst_5 = arith.constant dense<0.000000e+00> : vector<24x128xf32>
    %5 = tpu.matmul %2, %4, %cst_5 {dimension_numbers = #tpu.dot_dimension_numbers<[1], [0], [0], [1], [0, 0, 1, 1], [], []>} : vector<24x128xbf16>, vector<128x128xbf16>, vector<24x128xf32> -> vector<24x128xf32>
    %6 = arith.addf %0, %5 : vector<24x128xf32>
    %c0_6 = arith.constant 0 : index
    %c4 = arith.constant 4 : index
    %c0_7 = arith.constant 0 : index
    %7 = vector.load %arg1[%c0_6, %c4, %c0_7] : memref<1x32x128xbf16, #tpu.memory_space<vmem>>, vector<1x24x128xbf16>
    %8 = vector.shape_cast %7 : vector<1x24x128xbf16> to vector<24x128xbf16>
    %c1 = arith.constant 1 : index
    %c0_8 = arith.constant 0 : index
    %c0_9 = arith.constant 0 : index
    %9 = vector.load %arg2[%c1, %c0_8, %c0_9] : memref<3x128x128xbf16, #tpu.memory_space<vmem>>, vector<1x128x128xbf16>
    %10 = vector.shape_cast %9 : vector<1x128x128xbf16> to vector<128x128xbf16>
    %cst_10 = arith.constant dense<0.000000e+00> : vector<24x128xf32>
    %11 = tpu.matmul %8, %10, %cst_10 {dimension_numbers = #tpu.dot_dimension_numbers<[1], [0], [0], [1], [0, 0, 1, 1], [], []>} : vector<24x128xbf16>, vector<128x128xbf16>, vector<24x128xf32> -> vector<24x128xf32>
    %12 = arith.addf %6, %11 : vector<24x128xf32>
    %c0_11 = arith.constant 0 : index
    %c8 = arith.constant 8 : index
    %c0_12 = arith.constant 0 : index
    %13 = vector.load %arg1[%c0_11, %c8, %c0_12] : memref<1x32x128xbf16, #tpu.memory_space<vmem>>, vector<1x24x128xbf16>
    %14 = vector.shape_cast %13 : vector<1x24x128xbf16> to vector<24x128xbf16>
    %c2 = arith.constant 2 : index
    %c0_13 = arith.constant 0 : index
    %c0_14 = arith.constant 0 : index
    %15 = vector.load %arg2[%c2, %c0_13, %c0_14] : memref<3x128x128xbf16, #tpu.memory_space<vmem>>, vector<1x128x128xbf16>
    %16 = vector.shape_cast %15 : vector<1x128x128xbf16> to vector<128x128xbf16>
    %cst_15 = arith.constant dense<0.000000e+00> : vector<24x128xf32>
    %17 = tpu.matmul %14, %16, %cst_15 {dimension_numbers = #tpu.dot_dimension_numbers<[1], [0], [0], [1], [0, 0, 1, 1], [], []>} : vector<24x128xbf16>, vector<128x128xbf16>, vector<24x128xf32> -> vector<24x128xf32>
    %18 = arith.addf %12, %17 : vector<24x128xf32>
    %c0_16 = arith.constant 0 : index
    %c0_17 = arith.constant 0 : index
    %19 = vector.load %arg3[%c0_16, %c0_17] : memref<1x128xf32, #tpu.memory_space<vmem>>, vector<1x128xf32>
    %20 = vector.broadcast %19 : vector<1x128xf32> to vector<24x128xf32>
    %21 = arith.addf %18, %20 : vector<24x128xf32>
    %cst_18 = arith.constant 0.000000e+00 : f32
    %22 = vector.broadcast %cst_18 : f32 to vector<24x128xf32>
    %23 = arith.maximumf %21, %22 : vector<24x128xf32>
    %c0_19 = arith.constant 0 : index
    %c0_20 = arith.constant 0 : index
    %c0_21 = arith.constant 0 : index
    %24 = vector.load %arg4[%c0_19, %c0_20, %c0_21] : memref<1x24x128xf32, #tpu.memory_space<vmem>>, vector<1x24x128xf32>
    %25 = vector.shape_cast %24 : vector<1x24x128xf32> to vector<24x128xf32>
    %26 = vector.shape_cast %23 : vector<24x128xf32> to vector<1x24x128xf32>
    tpu.vector_store %arg4[%c0_19, %c0_20, %c0_21], %26 {strides = array<i32>} : memref<1x24x128xf32, #tpu.memory_space<vmem>>, vector<1x24x128xf32>,
    return
  }
  func.func @transform_0(%arg0: i32) -> (i32, i32, i32) {
    %c0_i32 = arith.constant 0 : i32
    %c0_i32_0 = arith.constant 0 : i32
    %c0_i32_1 = arith.constant 0 : i32
    return %arg0, %c0_i32, %c0_i32_0 : i32, i32, i32
  }
  func.func @transform_1(%arg0: i32) -> (i32, i32, i32) {
    %c0_i32 = arith.constant 0 : i32
    %c0_i32_0 = arith.constant 0 : i32
    %c0_i32_1 = arith.constant 0 : i32
    %c0_i32_2 = arith.constant 0 : i32
    return %c0_i32, %c0_i32_0, %c0_i32_1 : i32, i32, i32
  }
  func.func @transform_2(%arg0: i32) -> (i32, i32) {
    %c0_i32 = arith.constant 0 : i32
    %c0_i32_0 = arith.constant 0 : i32
    %c0_i32_1 = arith.constant 0 : i32
    return %c0_i32, %c0_i32_0 : i32, i32
  }
  func.func @transform_3(%arg0: i32) -> (i32, i32, i32) {
    %c0_i32 = arith.constant 0 : i32
    %c0_i32_0 = arith.constant 0 : i32
    %c0_i32_1 = arith.constant 0 : i32
    return %arg0, %c0_i32, %c0_i32_0 : i32, i32, i32
  }
}

module attributes {stable_mosaic.version = 11 : i64} {
  func.func @_mm_kernel(%arg0: i32, %arg1: i32, %arg2: i32, %arg3: memref<48x256xbf16, #tpu.memory_space<vmem>>, %arg4: memref<256x512xbf16, #tpu.memory_space<vmem>>, %arg5: memref<1x512xf32, #tpu.memory_space<vmem>>, %arg6: memref<48x512xf32, #tpu.memory_space<vmem>>, %arg7: memref<48x512xf32, #tpu.memory_space<vmem>>) attributes {dimension_semantics = [#tpu.dimension_semantics<parallel>, #tpu.dimension_semantics<parallel>, #tpu.dimension_semantics<arbitrary>], iteration_bounds = array<i64: 1, 3, 1>, scalar_prefetch = 0 : i64, scratch_operands = 1 : i64, tpu.core_type = #tpu.core_type<tc>, window_params = [{transform_indices = @transform_0, window_bounds = array<i64: 48, 256>}, {transform_indices = @transform_1, window_bounds = array<i64: 256, 512>}, {transform_indices = @transform_2, window_bounds = array<i64: 1, 512>}, {transform_indices = @transform_3, window_bounds = array<i64: 48, 512>}]} {
    %c0_i32 = arith.constant 0 : i32
    %0 = arith.cmpi eq, %arg2, %c0_i32 : i32
    %1 = arith.extui %0 : i1 to i32
    %c0_i32_0 = arith.constant 0 : i32
    %2 = arith.cmpi ne, %1, %c0_i32_0 : i32
    scf.if %2 {
      %cst_10 = arith.constant 0.000000e+00 : f32
      %12 = vector.broadcast %cst_10 : f32 to vector<48x512xf32>
      %c0_11 = arith.constant 0 : index
      %c0_12 = arith.constant 0 : index
      %13 = vector.load %arg7[%c0_11, %c0_12] : memref<48x512xf32, #tpu.memory_space<vmem>>, vector<48x512xf32>
      tpu.vector_store %arg7[%c0_11, %c0_12], %12 {strides = array<i32>} : memref<48x512xf32, #tpu.memory_space<vmem>>, vector<48x512xf32>,
    } else {
    }
    %c0 = arith.constant 0 : index
    %c0_1 = arith.constant 0 : index
    %3 = vector.load %arg7[%c0, %c0_1] : memref<48x512xf32, #tpu.memory_space<vmem>>, vector<48x512xf32>
    %c0_2 = arith.constant 0 : index
    %c0_3 = arith.constant 0 : index
    %4 = vector.load %arg3[%c0_2, %c0_3] : memref<48x256xbf16, #tpu.memory_space<vmem>>, vector<48x256xbf16>
    %c0_4 = arith.constant 0 : index
    %c0_5 = arith.constant 0 : index
    %5 = vector.load %arg4[%c0_4, %c0_5] : memref<256x512xbf16, #tpu.memory_space<vmem>>, vector<256x512xbf16>
    %cst = arith.constant dense<0.000000e+00> : vector<48x512xf32>
    %6 = tpu.matmul %4, %5, %cst {dimension_numbers = #tpu.dot_dimension_numbers<[1], [0], [0], [1], [0, 0, 1, 1], [], []>} : vector<48x256xbf16>, vector<256x512xbf16>, vector<48x512xf32> -> vector<48x512xf32>
    %7 = arith.addf %3, %6 : vector<48x512xf32>
    %c0_6 = arith.constant 0 : index
    %c0_7 = arith.constant 0 : index
    %8 = vector.load %arg7[%c0_6, %c0_7] : memref<48x512xf32, #tpu.memory_space<vmem>>, vector<48x512xf32>
    tpu.vector_store %arg7[%c0_6, %c0_7], %7 {strides = array<i32>} : memref<48x512xf32, #tpu.memory_space<vmem>>, vector<48x512xf32>,
    %c0_i32_8 = arith.constant 0 : i32
    %9 = arith.cmpi eq, %arg2, %c0_i32_8 : i32
    %10 = arith.extui %9 : i1 to i32
    %c0_i32_9 = arith.constant 0 : i32
    %11 = arith.cmpi ne, %10, %c0_i32_9 : i32
    scf.if %11 {
      %c0_10 = arith.constant 0 : index
      %c0_11 = arith.constant 0 : index
      %12 = vector.load %arg7[%c0_10, %c0_11] : memref<48x512xf32, #tpu.memory_space<vmem>>, vector<48x512xf32>
      %c0_12 = arith.constant 0 : index
      %c0_13 = arith.constant 0 : index
      %13 = vector.load %arg5[%c0_12, %c0_13] : memref<1x512xf32, #tpu.memory_space<vmem>>, vector<1x512xf32>
      %14 = vector.broadcast %13 : vector<1x512xf32> to vector<48x512xf32>
      %15 = arith.addf %12, %14 : vector<48x512xf32>
      %cst_14 = arith.constant 0.000000e+00 : f32
      %16 = vector.broadcast %cst_14 : f32 to vector<48x512xf32>
      %17 = arith.maximumf %15, %16 : vector<48x512xf32>
      %c0_15 = arith.constant 0 : index
      %c0_16 = arith.constant 0 : index
      %18 = vector.load %arg6[%c0_15, %c0_16] : memref<48x512xf32, #tpu.memory_space<vmem>>, vector<48x512xf32>
      tpu.vector_store %arg6[%c0_15, %c0_16], %17 {strides = array<i32>} : memref<48x512xf32, #tpu.memory_space<vmem>>, vector<48x512xf32>,
    } else {
    }
    return
  }
  func.func @transform_0(%arg0: i32, %arg1: i32, %arg2: i32) -> (i32, i32) {
    %c0_i32 = arith.constant 0 : i32
    return %arg0, %arg2 : i32, i32
  }
  func.func @transform_1(%arg0: i32, %arg1: i32, %arg2: i32) -> (i32, i32) {
    %c0_i32 = arith.constant 0 : i32
    return %arg2, %arg1 : i32, i32
  }
  func.func @transform_2(%arg0: i32, %arg1: i32, %arg2: i32) -> (i32, i32) {
    %c0_i32 = arith.constant 0 : i32
    %c0_i32_0 = arith.constant 0 : i32
    return %c0_i32, %arg1 : i32, i32
  }
  func.func @transform_3(%arg0: i32, %arg1: i32, %arg2: i32) -> (i32, i32) {
    %c0_i32 = arith.constant 0 : i32
    return %arg0, %arg1 : i32, i32
  }
}

module attributes {stable_mosaic.version = 11 : i64} {
  func.func @_mm_kernel(%arg0: i32, %arg1: i32, %arg2: i32, %arg3: memref<48x512xbf16, #tpu.memory_space<vmem>>, %arg4: memref<512x256xbf16, #tpu.memory_space<vmem>>, %arg5: memref<1x256xf32, #tpu.memory_space<vmem>>, %arg6: memref<48x256xf32, #tpu.memory_space<vmem>>, %arg7: memref<48x256xf32, #tpu.memory_space<vmem>>) attributes {dimension_semantics = [#tpu.dimension_semantics<parallel>, #tpu.dimension_semantics<parallel>, #tpu.dimension_semantics<arbitrary>], iteration_bounds = array<i64: 1, 1, 3>, scalar_prefetch = 0 : i64, scratch_operands = 1 : i64, tpu.core_type = #tpu.core_type<tc>, window_params = [{transform_indices = @transform_0, window_bounds = array<i64: 48, 512>}, {transform_indices = @transform_1, window_bounds = array<i64: 512, 256>}, {transform_indices = @transform_2, window_bounds = array<i64: 1, 256>}, {transform_indices = @transform_3, window_bounds = array<i64: 48, 256>}]} {
    %c0_i32 = arith.constant 0 : i32
    %0 = arith.cmpi eq, %arg2, %c0_i32 : i32
    %1 = arith.extui %0 : i1 to i32
    %c0_i32_0 = arith.constant 0 : i32
    %2 = arith.cmpi ne, %1, %c0_i32_0 : i32
    scf.if %2 {
      %cst_9 = arith.constant 0.000000e+00 : f32
      %12 = vector.broadcast %cst_9 : f32 to vector<48x256xf32>
      %c0_10 = arith.constant 0 : index
      %c0_11 = arith.constant 0 : index
      %13 = vector.load %arg7[%c0_10, %c0_11] : memref<48x256xf32, #tpu.memory_space<vmem>>, vector<48x256xf32>
      tpu.vector_store %arg7[%c0_10, %c0_11], %12 {strides = array<i32>} : memref<48x256xf32, #tpu.memory_space<vmem>>, vector<48x256xf32>,
    } else {
    }
    %c0 = arith.constant 0 : index
    %c0_1 = arith.constant 0 : index
    %3 = vector.load %arg7[%c0, %c0_1] : memref<48x256xf32, #tpu.memory_space<vmem>>, vector<48x256xf32>
    %c0_2 = arith.constant 0 : index
    %c0_3 = arith.constant 0 : index
    %4 = vector.load %arg3[%c0_2, %c0_3] : memref<48x512xbf16, #tpu.memory_space<vmem>>, vector<48x512xbf16>
    %c0_4 = arith.constant 0 : index
    %c0_5 = arith.constant 0 : index
    %5 = vector.load %arg4[%c0_4, %c0_5] : memref<512x256xbf16, #tpu.memory_space<vmem>>, vector<512x256xbf16>
    %cst = arith.constant dense<0.000000e+00> : vector<48x256xf32>
    %6 = tpu.matmul %4, %5, %cst {dimension_numbers = #tpu.dot_dimension_numbers<[1], [0], [0], [1], [0, 0, 1, 1], [], []>} : vector<48x512xbf16>, vector<512x256xbf16>, vector<48x256xf32> -> vector<48x256xf32>
    %7 = arith.addf %3, %6 : vector<48x256xf32>
    %c0_6 = arith.constant 0 : index
    %c0_7 = arith.constant 0 : index
    %8 = vector.load %arg7[%c0_6, %c0_7] : memref<48x256xf32, #tpu.memory_space<vmem>>, vector<48x256xf32>
    tpu.vector_store %arg7[%c0_6, %c0_7], %7 {strides = array<i32>} : memref<48x256xf32, #tpu.memory_space<vmem>>, vector<48x256xf32>,
    %c2_i32 = arith.constant 2 : i32
    %9 = arith.cmpi eq, %arg2, %c2_i32 : i32
    %10 = arith.extui %9 : i1 to i32
    %c0_i32_8 = arith.constant 0 : i32
    %11 = arith.cmpi ne, %10, %c0_i32_8 : i32
    scf.if %11 {
      %c0_9 = arith.constant 0 : index
      %c0_10 = arith.constant 0 : index
      %12 = vector.load %arg7[%c0_9, %c0_10] : memref<48x256xf32, #tpu.memory_space<vmem>>, vector<48x256xf32>
      %c0_11 = arith.constant 0 : index
      %c0_12 = arith.constant 0 : index
      %13 = vector.load %arg5[%c0_11, %c0_12] : memref<1x256xf32, #tpu.memory_space<vmem>>, vector<1x256xf32>
      %14 = vector.broadcast %13 : vector<1x256xf32> to vector<48x256xf32>
      %15 = arith.addf %12, %14 : vector<48x256xf32>
      %c0_13 = arith.constant 0 : index
      %c0_14 = arith.constant 0 : index
      %16 = vector.load %arg6[%c0_13, %c0_14] : memref<48x256xf32, #tpu.memory_space<vmem>>, vector<48x256xf32>
      tpu.vector_store %arg6[%c0_13, %c0_14], %15 {strides = array<i32>} : memref<48x256xf32, #tpu.memory_space<vmem>>, vector<48x256xf32>,
    } else {
    }
    return
  }
  func.func @transform_0(%arg0: i32, %arg1: i32, %arg2: i32) -> (i32, i32) {
    %c0_i32 = arith.constant 0 : i32
    return %arg0, %arg2 : i32, i32
  }
  func.func @transform_1(%arg0: i32, %arg1: i32, %arg2: i32) -> (i32, i32) {
    %c0_i32 = arith.constant 0 : i32
    return %arg2, %arg1 : i32, i32
  }
  func.func @transform_2(%arg0: i32, %arg1: i32, %arg2: i32) -> (i32, i32) {
    %c0_i32 = arith.constant 0 : i32
    %c0_i32_0 = arith.constant 0 : i32
    return %c0_i32, %arg1 : i32, i32
  }
  func.func @transform_3(%arg0: i32, %arg1: i32, %arg2: i32) -> (i32, i32) {
    %c0_i32 = arith.constant 0 : i32
    return %arg0, %arg1 : i32, i32
  }
}

module attributes {stable_mosaic.version = 11 : i64} {
  func.func @_attn_pool_kernel(%arg0: i32, %arg1: i32, %arg2: memref<1x24x256xbf16, #tpu.memory_space<vmem>>, %arg3: memref<1x24x1536xf32, #tpu.memory_space<vmem>>, %arg4: memref<256x1536xbf16, #tpu.memory_space<vmem>>, %arg5: memref<1x1536xf32, #tpu.memory_space<vmem>>, %arg6: memref<1x24x1xf32, #tpu.memory_space<vmem>>, %arg7: memref<1x1x1536xf32, #tpu.memory_space<vmem>>, %arg8: memref<1x1x1536xf32, #tpu.memory_space<vmem>>, %arg9: memref<1x1536xf32, #tpu.memory_space<vmem>>, %arg10: memref<1x1536xf32, #tpu.memory_space<vmem>>, %arg11: memref<1x1536xf32, #tpu.memory_space<vmem>>, %arg12: memref<1x1536xf32, #tpu.memory_space<vmem>>) attributes {dimension_semantics = [#tpu.dimension_semantics<parallel>, #tpu.dimension_semantics<arbitrary>], iteration_bounds = array<i64: 2, 1>, scalar_prefetch = 0 : i64, scratch_operands = 4 : i64, tpu.core_type = #tpu.core_type<tc>, window_params = [{transform_indices = @transform_0, window_bounds = array<i64: 1, 24, 256>}, {transform_indices = @transform_1, window_bounds = array<i64: 1, 24, 1536>}, {pipeline_mode = #tpu.pipeline_mode<synchronous>, transform_indices = @transform_2, window_bounds = array<i64: 256, 1536>}, {pipeline_mode = #tpu.pipeline_mode<synchronous>, transform_indices = @transform_3, window_bounds = array<i64: 1, 1536>}, {transform_indices = @transform_4, window_bounds = array<i64: 1, 24, 1>}, {transform_indices = @transform_5, window_bounds = array<i64: 1, 1, 1536>}, {transform_indices = @transform_6, window_bounds = array<i64: 1, 1, 1536>}]} {
    %c0_i32 = arith.constant 0 : i32
    %0 = arith.cmpi eq, %arg1, %c0_i32 : i32
    %1 = arith.extui %0 : i1 to i32
    %c0_i32_0 = arith.constant 0 : i32
    %2 = arith.cmpi ne, %1, %c0_i32_0 : i32
    scf.if %2 {
      %cst_35 = arith.constant -1.000000e+30 : f32
      %49 = vector.broadcast %cst_35 : f32 to vector<1x1536xf32>
      %c0_36 = arith.constant 0 : index
      %c0_37 = arith.constant 0 : index
      %50 = vector.load %arg9[%c0_36, %c0_37] : memref<1x1536xf32, #tpu.memory_space<vmem>>, vector<1x1536xf32>
      tpu.vector_store %arg9[%c0_36, %c0_37], %49 {strides = array<i32>} : memref<1x1536xf32, #tpu.memory_space<vmem>>, vector<1x1536xf32>,
      %cst_38 = arith.constant 0.000000e+00 : f32
      %51 = vector.broadcast %cst_38 : f32 to vector<1x1536xf32>
      %c0_39 = arith.constant 0 : index
      %c0_40 = arith.constant 0 : index
      %52 = vector.load %arg10[%c0_39, %c0_40] : memref<1x1536xf32, #tpu.memory_space<vmem>>, vector<1x1536xf32>
      tpu.vector_store %arg10[%c0_39, %c0_40], %51 {strides = array<i32>} : memref<1x1536xf32, #tpu.memory_space<vmem>>, vector<1x1536xf32>,
      %cst_41 = arith.constant 0.000000e+00 : f32
      %53 = vector.broadcast %cst_41 : f32 to vector<1x1536xf32>
      %c0_42 = arith.constant 0 : index
      %c0_43 = arith.constant 0 : index
      %54 = vector.load %arg11[%c0_42, %c0_43] : memref<1x1536xf32, #tpu.memory_space<vmem>>, vector<1x1536xf32>
      tpu.vector_store %arg11[%c0_42, %c0_43], %53 {strides = array<i32>} : memref<1x1536xf32, #tpu.memory_space<vmem>>, vector<1x1536xf32>,
      %cst_44 = arith.constant 0.000000e+00 : f32
      %55 = vector.broadcast %cst_44 : f32 to vector<1x1536xf32>
      %c0_45 = arith.constant 0 : index
      %c0_46 = arith.constant 0 : index
      %56 = vector.load %arg12[%c0_45, %c0_46] : memref<1x1536xf32, #tpu.memory_space<vmem>>, vector<1x1536xf32>
      tpu.vector_store %arg12[%c0_45, %c0_46], %55 {strides = array<i32>} : memref<1x1536xf32, #tpu.memory_space<vmem>>, vector<1x1536xf32>,
    } else {
    }
    %c0 = arith.constant 0 : index
    %c0_1 = arith.constant 0 : index
    %c0_2 = arith.constant 0 : index
    %3 = vector.load %arg2[%c0, %c0_1, %c0_2] : memref<1x24x256xbf16, #tpu.memory_space<vmem>>, vector<1x24x256xbf16>
    %4 = vector.shape_cast %3 : vector<1x24x256xbf16> to vector<24x256xbf16>
    %c0_3 = arith.constant 0 : index
    %c0_4 = arith.constant 0 : index
    %c0_5 = arith.constant 0 : index
    %5 = vector.load %arg3[%c0_3, %c0_4, %c0_5] : memref<1x24x1536xf32, #tpu.memory_space<vmem>>, vector<1x24x1536xf32>
    %6 = vector.shape_cast %5 : vector<1x24x1536xf32> to vector<24x1536xf32>
    %c0_6 = arith.constant 0 : index
    %c0_7 = arith.constant 0 : index
    %7 = vector.load %arg4[%c0_6, %c0_7] : memref<256x1536xbf16, #tpu.memory_space<vmem>>, vector<256x1536xbf16>
    %cst = arith.constant dense<0.000000e+00> : vector<24x1536xf32>
    %8 = tpu.matmul %4, %7, %cst {dimension_numbers = #tpu.dot_dimension_numbers<[1], [0], [0], [1], [0, 0, 1, 1], [], []>} : vector<24x256xbf16>, vector<256x1536xbf16>, vector<24x1536xf32> -> vector<24x1536xf32>
    %c0_8 = arith.constant 0 : index
    %c0_9 = arith.constant 0 : index
    %9 = vector.load %arg5[%c0_8, %c0_9] : memref<1x1536xf32, #tpu.memory_space<vmem>>, vector<1x1536xf32>
    %10 = vector.broadcast %9 : vector<1x1536xf32> to vector<24x1536xf32>
    %11 = arith.addf %8, %10 : vector<24x1536xf32>
    %c0_10 = arith.constant 0 : index
    %c0_11 = arith.constant 0 : index
    %c0_12 = arith.constant 0 : index
    %12 = vector.load %arg6[%c0_10, %c0_11, %c0_12] : memref<1x24x1xf32, #tpu.memory_space<vmem>>, vector<1x24x1xf32>
    %13 = vector.shape_cast %12 : vector<1x24x1xf32> to vector<24x1xf32>
    %14 = vector.broadcast %13 : vector<24x1xf32> to vector<24x1536xf32>
    %15 = arith.addf %11, %14 : vector<24x1536xf32>
    %c0_13 = arith.constant 0 : index
    %c0_14 = arith.constant 0 : index
    %16 = vector.load %arg9[%c0_13, %c0_14] : memref<1x1536xf32, #tpu.memory_space<vmem>>, vector<1x1536xf32>
    %cst_15 = arith.constant dense<0xFF800000> : vector<1536xf32>
    %17 = vector.multi_reduction <maximumf>, %15, %cst_15 [0] : vector<24x1536xf32> to vector<1536xf32>
    %18 = vector.shape_cast %17 : vector<1536xf32> to vector<1x1536xf32>
    %19 = arith.maximumf %16, %18 : vector<1x1536xf32>
    %20 = arith.subf %16, %19 : vector<1x1536xf32>
    %21 = math.exp %20 : vector<1x1536xf32>
    %22 = vector.broadcast %19 : vector<1x1536xf32> to vector<24x1536xf32>
    %23 = arith.subf %15, %22 : vector<24x1536xf32>
    %24 = math.exp %23 : vector<24x1536xf32>
    %25 = arith.mulf %24, %6 : vector<24x1536xf32>
    %c0_16 = arith.constant 0 : index
    %c0_17 = arith.constant 0 : index
    %26 = vector.load %arg10[%c0_16, %c0_17] : memref<1x1536xf32, #tpu.memory_space<vmem>>, vector<1x1536xf32>
    %27 = arith.mulf %21, %26 : vector<1x1536xf32>
    %cst_18 = arith.constant dense<0.000000e+00> : vector<1536xf32>
    %28 = vector.multi_reduction <add>, %24, %cst_18 [0] : vector<24x1536xf32> to vector<1536xf32>
    %29 = vector.shape_cast %28 : vector<1536xf32> to vector<1x1536xf32>
    %30 = arith.addf %27, %29 : vector<1x1536xf32>
    %c0_19 = arith.constant 0 : index
    %c0_20 = arith.constant 0 : index
    %31 = vector.load %arg10[%c0_19, %c0_20] : memref<1x1536xf32, #tpu.memory_space<vmem>>, vector<1x1536xf32>
    tpu.vector_store %arg10[%c0_19, %c0_20], %30 {strides = array<i32>} : memref<1x1536xf32, #tpu.memory_space<vmem>>, vector<1x1536xf32>,
    %c0_21 = arith.constant 0 : index
    %c0_22 = arith.constant 0 : index
    %32 = vector.load %arg11[%c0_21, %c0_22] : memref<1x1536xf32, #tpu.memory_space<vmem>>, vector<1x1536xf32>
    %33 = arith.mulf %21, %32 : vector<1x1536xf32>
    %cst_23 = arith.constant dense<0.000000e+00> : vector<1536xf32>
    %34 = vector.multi_reduction <add>, %25, %cst_23 [0] : vector<24x1536xf32> to vector<1536xf32>
    %35 = vector.shape_cast %34 : vector<1536xf32> to vector<1x1536xf32>
    %36 = arith.addf %33, %35 : vector<1x1536xf32>
    %c0_24 = arith.constant 0 : index
    %c0_25 = arith.constant 0 : index
    %37 = vector.load %arg11[%c0_24, %c0_25] : memref<1x1536xf32, #tpu.memory_space<vmem>>, vector<1x1536xf32>
    tpu.vector_store %arg11[%c0_24, %c0_25], %36 {strides = array<i32>} : memref<1x1536xf32, #tpu.memory_space<vmem>>, vector<1x1536xf32>,
    %c0_26 = arith.constant 0 : index
    %c0_27 = arith.constant 0 : index
    %38 = vector.load %arg12[%c0_26, %c0_27] : memref<1x1536xf32, #tpu.memory_space<vmem>>, vector<1x1536xf32>
    %39 = arith.mulf %21, %38 : vector<1x1536xf32>
    %40 = arith.mulf %25, %6 : vector<24x1536xf32>
    %cst_28 = arith.constant dense<0.000000e+00> : vector<1536xf32>
    %41 = vector.multi_reduction <add>, %40, %cst_28 [0] : vector<24x1536xf32> to vector<1536xf32>
    %42 = vector.shape_cast %41 : vector<1536xf32> to vector<1x1536xf32>
    %43 = arith.addf %39, %42 : vector<1x1536xf32>
    %c0_29 = arith.constant 0 : index
    %c0_30 = arith.constant 0 : index
    %44 = vector.load %arg12[%c0_29, %c0_30] : memref<1x1536xf32, #tpu.memory_space<vmem>>, vector<1x1536xf32>
    tpu.vector_store %arg12[%c0_29, %c0_30], %43 {strides = array<i32>} : memref<1x1536xf32, #tpu.memory_space<vmem>>, vector<1x1536xf32>,
    %c0_31 = arith.constant 0 : index
    %c0_32 = arith.constant 0 : index
    %45 = vector.load %arg9[%c0_31, %c0_32] : memref<1x1536xf32, #tpu.memory_space<vmem>>, vector<1x1536xf32>
    tpu.vector_store %arg9[%c0_31, %c0_32], %19 {strides = array<i32>} : memref<1x1536xf32, #tpu.memory_space<vmem>>, vector<1x1536xf32>,
    %c0_i32_33 = arith.constant 0 : i32
    %46 = arith.cmpi eq, %arg1, %c0_i32_33 : i32
    %47 = arith.extui %46 : i1 to i32
    %c0_i32_34 = arith.constant 0 : i32
    %48 = arith.cmpi ne, %47, %c0_i32_34 : i32
    scf.if %48 {
      %c0_35 = arith.constant 0 : index
      %c0_36 = arith.constant 0 : index
      %49 = vector.load %arg10[%c0_35, %c0_36] : memref<1x1536xf32, #tpu.memory_space<vmem>>, vector<1x1536xf32>
      %cst_37 = arith.constant 1.000000e+00 : f32
      %50 = vector.broadcast %cst_37 : f32 to vector<1x1536xf32>
      %51 = arith.divf %50, %49 : vector<1x1536xf32>
      %c0_38 = arith.constant 0 : index
      %c0_39 = arith.constant 0 : index
      %52 = vector.load %arg11[%c0_38, %c0_39] : memref<1x1536xf32, #tpu.memory_space<vmem>>, vector<1x1536xf32>
      %53 = arith.mulf %52, %51 : vector<1x1536xf32>
      %c0_40 = arith.constant 0 : index
      %c0_41 = arith.constant 0 : index
      %54 = vector.load %arg12[%c0_40, %c0_41] : memref<1x1536xf32, #tpu.memory_space<vmem>>, vector<1x1536xf32>
      %55 = arith.mulf %54, %51 : vector<1x1536xf32>
      %c0_42 = arith.constant 0 : index
      %c0_43 = arith.constant 0 : index
      %c0_44 = arith.constant 0 : index
      %56 = vector.load %arg7[%c0_42, %c0_43, %c0_44] : memref<1x1x1536xf32, #tpu.memory_space<vmem>>, vector<1x1x1536xf32>
      %57 = vector.shape_cast %56 : vector<1x1x1536xf32> to vector<1x1536xf32>
      %58 = vector.shape_cast %53 : vector<1x1536xf32> to vector<1x1x1536xf32>
      tpu.vector_store %arg7[%c0_42, %c0_43, %c0_44], %58 {strides = array<i32>} : memref<1x1x1536xf32, #tpu.memory_space<vmem>>, vector<1x1x1536xf32>,
      %59 = arith.mulf %53, %53 : vector<1x1536xf32>
      %60 = arith.subf %55, %59 : vector<1x1536xf32>
      %cst_45 = arith.constant 9.99999974E-5 : f32
      %61 = vector.broadcast %cst_45 : f32 to vector<1x1536xf32>
      %62 = arith.maximumf %60, %61 : vector<1x1536xf32>
      %63 = math.sqrt %62 : vector<1x1536xf32>
      %c0_46 = arith.constant 0 : index
      %c0_47 = arith.constant 0 : index
      %c0_48 = arith.constant 0 : index
      %64 = vector.load %arg8[%c0_46, %c0_47, %c0_48] : memref<1x1x1536xf32, #tpu.memory_space<vmem>>, vector<1x1x1536xf32>
      %65 = vector.shape_cast %64 : vector<1x1x1536xf32> to vector<1x1536xf32>
      %66 = vector.shape_cast %63 : vector<1x1536xf32> to vector<1x1x1536xf32>
      tpu.vector_store %arg8[%c0_46, %c0_47, %c0_48], %66 {strides = array<i32>} : memref<1x1x1536xf32, #tpu.memory_space<vmem>>, vector<1x1x1536xf32>,
    } else {
    }
    return
  }
  func.func @transform_0(%arg0: i32, %arg1: i32) -> (i32, i32, i32) {
    %c0_i32 = arith.constant 0 : i32
    %c0_i32_0 = arith.constant 0 : i32
    return %arg0, %arg1, %c0_i32 : i32, i32, i32
  }
  func.func @transform_1(%arg0: i32, %arg1: i32) -> (i32, i32, i32) {
    %c0_i32 = arith.constant 0 : i32
    %c0_i32_0 = arith.constant 0 : i32
    return %arg0, %arg1, %c0_i32 : i32, i32, i32
  }
  func.func @transform_2(%arg0: i32, %arg1: i32) -> (i32, i32) {
    %c0_i32 = arith.constant 0 : i32
    %c0_i32_0 = arith.constant 0 : i32
    %c0_i32_1 = arith.constant 0 : i32
    return %c0_i32, %c0_i32_0 : i32, i32
  }
  func.func @transform_3(%arg0: i32, %arg1: i32) -> (i32, i32) {
    %c0_i32 = arith.constant 0 : i32
    %c0_i32_0 = arith.constant 0 : i32
    %c0_i32_1 = arith.constant 0 : i32
    return %c0_i32, %c0_i32_0 : i32, i32
  }
  func.func @transform_4(%arg0: i32, %arg1: i32) -> (i32, i32, i32) {
    %c0_i32 = arith.constant 0 : i32
    %c0_i32_0 = arith.constant 0 : i32
    %c0_i32_1 = arith.constant 0 : i32
    return %c0_i32, %arg1, %c0_i32_0 : i32, i32, i32
  }
  func.func @transform_5(%arg0: i32, %arg1: i32) -> (i32, i32, i32) {
    %c0_i32 = arith.constant 0 : i32
    %c0_i32_0 = arith.constant 0 : i32
    %c0_i32_1 = arith.constant 0 : i32
    return %arg0, %c0_i32, %c0_i32_0 : i32, i32, i32
  }
  func.func @transform_6(%arg0: i32, %arg1: i32) -> (i32, i32, i32) {
    %c0_i32 = arith.constant 0 : i32
    %c0_i32_0 = arith.constant 0 : i32
    %c0_i32_1 = arith.constant 0 : i32
    return %arg0, %c0_i32, %c0_i32_0 : i32, i32, i32
  }
}

</mosaic_0001>

<bundles_post_ra>
// kernel: ecapa_forward.33
= control target key start
LH: loop header
LB: loop body
LE: loop exit
PB: predicated region body
PF: predicated region fallthrough
CT: control target
= control target key end

     0   :  { %s1250_s12 = smov 0   ;;  %s1424_s0 = inlined_call_operand.vmem [shape: bf16[2,28,128], index: 0, kind: input, shape index: {}]   ;;  %s1425_s1 = inlined_call_operand.vmem [shape: bf16[5,128,128], index: 1, kind: input, shape index: {}]   ;;  %s1426_s2 = inlined_call_operand.vmem [shape: f32[1,128], index: 2, kind: input, shape index: {}]   ;;  %s1427_s3 = inlined_call_operand.vmem [shape: f32[2,24,128], index: 3, kind: output, shape index: {}]  }
   0x1 LB: > { %s895_s13 = sadd.s32 4294967295, %s1228_s12   ;;  %p899_p0 = scmp.ge.s32.totalorder %s1228_s12, 1  ;;  %s1228_s12 = sphi %s1250_s12, %s13_s12  }
   0x2   : > { %p137_p1 = scmp.lt.s32.totalorder %s1228_s12, 3 }
   0x4   : > { %p138_p2 = pnand %p899_p0, %p137_p1 }
   0x5   : > { %v1176_v0 = vld [vmem:[%s1425_s1 + $0x40] sm:$0xff] (!%p138_p2)   ;;  %v1178_v2 = vld [vmem:[%s1425_s1 + $0x48] sm:$0xff] (!%p138_p2)   ;;  %p161_p3 = scmp.lt.s32.totalorder (!%p138_p2), %s895_s13, 1  ;;  %v1180_v4 = vld [vmem:[%s1425_s1 + $0x50] sm:$0xff] (!%p138_p2)   ;;  %vm219_vm0 = vsmask.f32 (!%p138_p2), 7424 }
   0x6   : > { %141 = sbr.rel (%p138_p2) target bundleno = 324 (0x144), region = 32  ;;  %v1177_v1 = vld [vmem:[%s1425_s1] sm:$0xff] (!%p138_p2)   ;;  %1067 = vmatprep.subr.bf16.mxu0 (!%p138_p2), %v1176_v0  ;;  %v1179_v3 = vld [vmem:[%s1425_s1 + $0x8] sm:$0xff] (!%p138_p2)   ;;  %v1181_v5 = vld [vmem:[%s1425_s1 + $0x10] sm:$0xff] (!%p138_p2)   ;;  %vm453_vm1 = vcmask (!%p138_p2), 1046528   ;;  %vm719_vm3 = vcmask (!%p138_p2), 1045504  }
   0x7   : > { %1087 = vmatprep.subr.bf16.mxu1 (!%p138_p2), %v1177_v1  ;;  %1068 = vmatpush3.bf16.msra.mxu0 (!%p138_p2), %v1176_v0  ;;  %v1182_v6 = vld [vmem:[%s1425_s1 + $0x58] sm:$0xff] (!%p138_p2)   ;;  %v1184_v8 = vld [vmem:[%s1425_s1 + $0x60] sm:$0xff] (!%p138_p2)   ;;  %v1186_v10 = vld [vmem:[%s1425_s1 + $0x68] sm:$0xff] (!%p138_p2)   ;;  %vm579_vm2 = vsmask.f32 (!%p138_p2), 6400 }
   0x8   : > { %1088 = vmatpush3.bf16.msra.mxu1 (!%p138_p2), %v1177_v1  ;;  %1069 = vmatprep.subr.bf16.mxu0 (!%p138_p2), %v1178_v2  ;;  %v1183_v7 = vld [vmem:[%s1425_s1 + $0x18] sm:$0xff] (!%p138_p2)   ;;  %v1185_v9 = vld [vmem:[%s1425_s1 + $0x20] sm:$0xff] (!%p138_p2)   ;;  %v1187_v14 = vld [vmem:[%s1425_s1 + $0x28] sm:$0xff] (!%p138_p2)  }
   0x9   : > { %1089 = vmatprep.subr.bf16.mxu1 (!%p138_p2), %v1179_v3  ;;  %v1188_v20 = vld [vmem:[%s1425_s1 + $0x70] sm:$0xff] (!%p138_p2)   ;;  %v1190_v26 = vld [vmem:[%s1425_s1 + $0x78] sm:$0xff] (!%p138_p2)   ;;  %v1195_v30 = vld [vmem:[%s1425_s1 + $0x80] sm:$0xff] (!%p138_p2)  }
   0xa   : > { %v1189_v22 = vld [vmem:[%s1425_s1 + $0x30] sm:$0xff] (!%p138_p2)   ;;  %v1191_v27 = vld [vmem:[%s1425_s1 + $0x38] sm:$0xff] (!%p138_p2)   ;;  %v1196_v31 = vld [vmem:[%s1425_s1 + $0xc0] sm:$0xff] (!%p138_p2)  }
   0xb   : > { %1070 = vmatpush3.bf16.msra.mxu0 (!%p138_p2), %v1178_v2  ;;  %v1197_v34 = vld [vmem:[%s1425_s1 + $0x88] sm:$0xff] (!%p138_p2)   ;;  %v1199_v37 = vld [vmem:[%s1425_s1 + $0x90] sm:$0xff] (!%p138_p2)   ;;  %v1201_v48 = vld [vmem:[%s1425_s1 + $0x98] sm:$0xff] (!%p138_p2)  }
   0xc   : > { %1090 = vmatpush3.bf16.msra.mxu1 (!%p138_p2), %v1179_v3  ;;  %1071 = vmatprep.subr.bf16.mxu0 (!%p138_p2), %v1180_v4  ;;  %v1198_v35 = vld [vmem:[%s1425_s1 + $0xc8] sm:$0xff] (!%p138_p2)   ;;  %v1200_v42 = vld [vmem:[%s1425_s1 + $0xd0] sm:$0xff] (!%p138_p2)   ;;  %v1202_v49 = vld [vmem:[%s1425_s1 + $0xd8] sm:$0xff] (!%p138_p2)  }
   0xd   : > { %s1429_s13 = smov (!%p161_p3, %s895_s13), 1  ;;  %1091 = vmatprep.subr.bf16.mxu1 %v1181_v5  ;;  %v1203_v57 = vld [vmem:[%s1425_s1 + $0xa0] sm:$0xff]   ;;  %v1205_v60 = vld [vmem:[%s1425_s1 + $0xa8] sm:$0xff]   ;;  %v1207_v62 = vld [vmem:[%s1425_s1 + $0xb0] sm:$0xff]  }
   0xe   : > { %s1016_s30 = sshll.u32 %s1429_s13, 4  ;;  %v1204_v59 = vld [vmem:[%s1425_s1 + $0xe0] sm:$0xff]   ;;  %v1206_v61 = vld [vmem:[%s1425_s1 + $0xe8] sm:$0xff]   ;;  %v1208_v63 = vld [vmem:[%s1425_s1 + $0xf0] sm:$0xff]   ;;  %s1167_s24 = smul.u32 24, %s1429_s13 }
   0xf   : > { %1072 = vmatpush3.bf16.msra.mxu0 %v1180_v4  ;;  %s1294_s10 = scalar_lea.vmem %s1424_s0, %s1016_s30  ;;  %v1209_v1 = vld [vmem:[%s1425_s1 + $0xb8] sm:$0xff]   ;;  %v1212_v4 = vld [vmem:[%s1425_s1 + $0x100] sm:$0xff]  }
  0x10   : > { %1092 = vmatpush3.bf16.msra.mxu1 %v1181_v5  ;;  %1073 = vmatprep.subr.bf16.mxu0 %v1182_v6  ;;  %v172_v11 = vld [vmem:[%s1294_s10] sm:$0xf]  ;;  %v1301_v12 = vld [vmem:[%s1294_s10 + $0x4] sm:$0xf]  ;;  %v174_v13 = vld [vmem:[%s1294_s10 + $0x8] sm:$0xf]  ;;  %s170_s29 = scalar_lea.vmem %s1427_s3, %s1167_s24 }
  0x11   : > { %1093 = vmatprep.subr.bf16.mxu1 %v1183_v7  ;;  %v191_v15 = vld [vmem:[%s1294_s10 + $0xc] sm:$0x1]  ;;  %v919_v16 = vcombine.low %v172_v11, %v1301_v12  ;;  %v929_v33 = vcombine.low %v174_v13, %v174_v13  ;;  %v432_v36 = vld [vmem:[%s1294_s10] sm:$0xe]  ;;  %v1210_v2 = vld [vmem:[%s1425_s1 + $0xf8] sm:$0xff]  }
  0x12   : > { %v1309_v17 = vcombine.low %v174_v13, %v191_v15  ;;  %v954_v38 = vcombine.low %v432_v36, %v1301_v12  ;;  %v558_v40 = vld [vmem:[%s1294_s10 + $0xc] sm:$0x3]  ;;  %v698_v0 = vld [vmem:[%s1294_s10] sm:$0xc] }
  0x13   : > { %1074 = vmatpush3.bf16.msra.mxu0 %v1182_v6  ;;  %v221_v18 = vshrl.u32 %v919_v16, 16  ;;  %v223_v19 = vshll.u32 %v919_v16, 16  ;;  %1103 = vmatprep.mubr.bf16.mxu1 %v919_v16  ;;  %v1345_v41 = vcombine.low %v174_v13, %v558_v40  ;;  %v1004_v3 = vcombine.low %v698_v0, %v1301_v12  ;;  %v1217_v11 = vld [vmem:[%s1425_s1 + $0x120] sm:$0xff]   ;;  %v1218_v12 = vld [vmem:[%s1425_s1 + $0x128] sm:$0xff]   ;;  %v1219_v13 = vld [vmem:[%s1425_s1 + $0x130] sm:$0xff]  }
  0x14   : > { %1094 = vmatpush3.bf16.msra.mxu1 %v1183_v7  ;;  %1075 = vmatprep.subr.bf16.mxu0 %v1184_v8  ;;  %v228_v21 = vshll.u32 %v1309_v17, 16  ;;  %v232_v29 = vshrl.u32 %v1309_v17, 16  ;;  %v455_v39 = vrot.slane %v1309_v17, 1  ;;  %v454_v43 = vrot.slane %v954_v38, 1  ;;  %v1214_v7 = vld [vmem:[%s1425_s1 + $0x108] sm:$0xff]  }
  0x15   : > { %1095 = vmatprep.subr.bf16.mxu1 %v1185_v9  ;;  %v225_v23 = vrot.slane %v223_v19, 1  ;;  %v581_v44 = vshrl.u32 %v954_v38, 16  ;;  %v584_v45 = vshll.u32 %v954_v38, 16  ;;  %v589_v46 = vshrl.u32 %v1345_v41, 16 }
  0x16   : > { %v230_v24 = vrot.slane %v228_v21, 1  ;;  %v592_v47 = vshll.u32 %v1345_v41, 16  ;;  %v456_v50 = vsel %vm453_vm1, %v454_v43, %v455_v39  ;;  %v720_v5 = vrot.slane %v1004_v3, 2 }
  0x17   : > { %1076 = vmatpush3.bf16.msra.mxu0 %v1184_v8  ;;  %v226_v25 = vor.u32 %v225_v23, %v221_v18  ;;  %v583_v51 = vrot.slane %v581_v44, 1  ;;  %v586_v52 = vrot.slane %v584_v45, 2  ;;  %v591_v53 = vrot.slane %v589_v46, 1 }
  0x18   : > { %1096 = vmatpush3.bf16.msra.mxu1 %v1185_v9  ;;  %1077 = vmatprep.subr.bf16.mxu0 %v1186_v10  ;;  %v234_v32 = vor.u32 %v232_v29, %v230_v24  ;;  %v594_v54 = vrot.slane %v592_v47, 2  ;;  %v721_v6 = vrot.slane %v1345_v41, 2  ;;  %v1215_v9 = vld [vmem:[%s1425_s1 + $0x110] sm:$0xff]   ;;  %v1013_v41 = vld [vmem:[%s1426_s2] ss:$0 sm:$0xff] }
  0x19   : > { %1097 = vmatprep.subr.bf16.mxu1 %v1187_v14  ;;  %v231_v28 = vsel %vm219_vm0, %v226_v25, %v230_v24  ;;  %v587_v55 = vor.u32 %v586_v52, %v583_v51 }
  0x1a   : > { %1083 = vmatprep.mubr.bf16.mxu0 %v231_v28  ;;  %v595_v56 = vor.u32 %v594_v54, %v591_v53  ;;  %v722_v8 = vsel %vm719_vm3, %v720_v5, %v721_v6 }
  0x1b   : > { %1078 = vmatpush3.bf16.msra.mxu0 %v1186_v10  ;;  %v1216_v10 = vld [vmem:[%s1425_s1 + $0x118] sm:$0xff]  }
  0x1c   : > { %1098 = vmatpush3.bf16.msra.mxu1 %v1187_v14  ;;  %1079 = vmatprep.subr.bf16.mxu0 %v1188_v20  ;;  %v596_v58 = vsel %vm579_vm2, %v587_v55, %v595_v56  ;;  %v1220_v14 = vld [vmem:[%s1425_s1 + $0x138] sm:$0xff]  }
  0x1d   : > { %1099 = vmatprep.subr.bf16.mxu1 %v1189_v22 }
  0x1f   : > { %1080 = vmatpush3.bf16.msra.mxu0 %v1188_v20 }
  0x20   : > { %1100 = vmatpush3.bf16.msra.mxu1 %v1189_v22  ;;  %1081 = vmatprep.subr.bf16.mxu0 %v1190_v26 }
  0x21   : > { %1101 = vmatprep.subr.bf16.mxu1 %v1191_v27 }
  0x23   : > { %1082 = vmatpush3.bf16.msra.mxu0 %v1190_v26 }
  0x24   : > { %1102 = vmatpush3.bf16.msra.mxu1 %v1191_v27  ;;  %1107 = vmatprep.subr.bf16.mxu0 %v1195_v30 }
  0x25   : > { %1127 = vmatprep.subr.bf16.mxu1 %v1196_v31 }
  0x26   : > { %1084 = vmatmul.mubr.bf16.vlgmr.msra.gmra.mrb[0].mxu0 %v234_v32 }
  0x27   : > { %1104 = vmatmul.mubr.bf16.vlgmr.msra.gmra.mrb[0].mxu1 %v929_v33  ;;  %1108 = vmatpush3.bf16.msra.mxu0 %v1195_v30 }
  0x28   : > { %1128 = vmatpush3.bf16.msra.mxu1 %v1196_v31  ;;  %1109 = vmatprep.subr.bf16.mxu0 %v1197_v34 }
  0x29   : > { %1129 = vmatprep.subr.bf16.mxu1 %v1198_v35  ;;  %1123 = vmatprep.mubr.bf16.mxu0 %v456_v50 }
  0x2a   : > { %1143 = vmatprep.mubr.bf16.mxu1 %v596_v58 }
  0x2b   : > { %1110 = vmatpush3.bf16.msra.mxu0 %v1197_v34 }
  0x2c   : > { %1130 = vmatpush3.bf16.msra.mxu1 %v1198_v35  ;;  %1111 = vmatprep.subr.bf16.mxu0 %v1199_v37 }
  0x2d   : > { %1131 = vmatprep.subr.bf16.mxu1 %v1200_v42 }
  0x2f   : > { %1112 = vmatpush3.bf16.msra.mxu0 %v1199_v37 }
  0x30   : > { %1132 = vmatpush3.bf16.msra.mxu1 %v1200_v42  ;;  %1113 = vmatprep.subr.bf16.mxu0 %v1201_v48 }
  0x31   : > { %1133 = vmatprep.subr.bf16.mxu1 %v1202_v49 }
  0x33   : > { %1114 = vmatpush3.bf16.msra.mxu0 %v1201_v48 }
  0x34   : > { %1134 = vmatpush3.bf16.msra.mxu1 %v1202_v49  ;;  %1115 = vmatprep.subr.bf16.mxu0 %v1203_v57 }
  0x35   : > { %1135 = vmatprep.subr.bf16.mxu1 %v1204_v59 }
  0x37   : > { %1116 = vmatpush3.bf16.msra.mxu0 %v1203_v57 }
  0x38   : > { %1136 = vmatpush3.bf16.msra.mxu1 %v1204_v59  ;;  %1117 = vmatprep.subr.bf16.mxu0 %v1205_v60 }
  0x39   : > { %1137 = vmatprep.subr.bf16.mxu1 %v1206_v61 }
  0x3b   : > { %1118 = vmatpush3.bf16.msra.mxu0 %v1205_v60 }
  0x3c   : > { %1138 = vmatpush3.bf16.msra.mxu1 %v1206_v61  ;;  %1119 = vmatprep.subr.bf16.mxu0 %v1207_v62 }
  0x3d   : > { %1139 = vmatprep.subr.bf16.mxu1 %v1208_v63 }
  0x3f   : > { %1120 = vmatpush3.bf16.msra.mxu0 %v1207_v62 }
  0x40   : > { %1140 = vmatpush3.bf16.msra.mxu1 %v1208_v63  ;;  %1121 = vmatprep.subr.bf16.mxu0 %v1209_v1 }
  0x41   : > { %1141 = vmatprep.subr.bf16.mxu1 %v1210_v2 }
  0x43   : > { %1122 = vmatpush3.bf16.msra.mxu0 %v1209_v1 }
  0x44   : > { %1142 = vmatpush3.bf16.msra.mxu1 %v1210_v2  ;;  %1147 = vmatprep.subr.bf16.mxu0 %v1212_v4 }
  0x46   : > { %1124 = vmatmul.mubr.bf16.vlgmr.msra.gmra.mrb[4].mxu0 %v455_v39 }
  0x47   : > { %1148 = vmatpush3.bf16.msra.mxu0 %v1212_v4  ;;  %1144 = vmatmul.mubr.bf16.vlgmr.msra.gmra.mrb[4].mxu1 %v595_v56 }
  0x48   : > { %1149 = vmatprep.subr.bf16.mxu0 %v1214_v7  ;;  %1163 = vmatprep.mubr.bf16.mxu0 %v722_v8 }
  0x4b   : > { %1150 = vmatpush3.bf16.msra.mxu0 %v1214_v7 }
  0x4c   : > { %1151 = vmatprep.subr.bf16.mxu0 %v1215_v9 }
  0x4f   : > { %1152 = vmatpush3.bf16.msra.mxu0 %v1215_v9 }
  0x50   : > { %1153 = vmatprep.subr.bf16.mxu0 %v1216_v10 }
  0x53   : > { %1154 = vmatpush3.bf16.msra.mxu0 %v1216_v10 }
  0x54   : > { %1155 = vmatprep.subr.bf16.mxu0 %v1217_v11 }
  0x57   : > { %1156 = vmatpush3.bf16.msra.mxu0 %v1217_v11 }
  0x58   : > { %1157 = vmatprep.subr.bf16.mxu0 %v1218_v12 }
  0x5b   : > { %1158 = vmatpush3.bf16.msra.mxu0 %v1218_v12 }
  0x5c   : > { %1159 = vmatprep.subr.bf16.mxu0 %v1219_v13 }
  0x5f   : > { %1160 = vmatpush3.bf16.msra.mxu0 %v1219_v13 }
  0x60   : > { %1161 = vmatprep.subr.bf16.mxu0 %v1220_v14 }
  0x63   : > { %1162 = vmatpush3.bf16.msra.mxu0 %v1220_v14 }
  0x66   : > { %1164 = vmatmul.mubr.bf16.vlgmr.msra.gmra.mrb[8].mxu0 %v721_v6 }
  0xf9   : > { %v1085_v15 = vpop.f32.mrb[0].mxu0 }
  0xfa   : > { %v1105_v16 = vpop.f32.mrb[0].mxu1  ;;  %v319_v17 = vpop.f32.mrb[1].mxu0 }
  0xfb   : > { %v427_v18 = vadd.f32 %v1105_v16, %v1085_v15  ;;  %v418_v19 = vpop.f32.mrb[1].mxu1  ;;  %v1086_v20 = vpop.f32.mrb[2].mxu0 }
  0xfc   : > { %v419_v21 = vadd.f32 %v418_v19, %v319_v17  ;;  %v1106_v22 = vpop.f32.mrb[2].mxu1  ;;  %v322_v23 = vpop.f32.mrb[3].mxu0 }
  0xfd   : > { %v421_v24 = vpop.f32.mrb[3].mxu1 }
  0xfe   : > { %v422_v25 = vadd.f32 %v421_v24, %v322_v23 }
 0x119   : > { %v1125_v26 = vpop.f32.mrb[4].mxu0 }
 0x11a   : > { %v557_v27 = vadd.f32 %v1125_v26, %v427_v18  ;;  %v541_v28 = vpop.f32.mrb[5].mxu0  ;;  %v1145_v29 = vpop.f32.mrb[4].mxu1 }
 0x11b   : > { %v555_v30 = vadd.f32 %v541_v28, %v419_v21  ;;  %v1126_v31 = vpop.f32.mrb[6].mxu0  ;;  %v681_v32 = vpop.f32.mrb[5].mxu1 }
 0x11c   : > { %v697_v33 = vadd.f32 %v1145_v29, %v557_v27  ;;  %v544_v34 = vpop.f32.mrb[7].mxu0  ;;  %v1146_v35 = vpop.f32.mrb[6].mxu1 }
 0x11d   : > { %v556_v36 = vadd.f32 %v544_v34, %v422_v25  ;;  %v695_v37 = vadd.f32 %v681_v32, %v555_v30  ;;  %v684_v38 = vpop.f32.mrb[7].mxu1 }
 0x11f   : > { %v696_v39 = vadd.f32 %v684_v38, %v556_v36 }
 0x139   : > { %v1165_v40 = vpop.f32.mrb[8].mxu0 }
 0x13a   : > { %v823_v42 = vadd.f32 %v1165_v40, %v697_v33  ;;  %v807_v43 = vpop.f32.mrb[9].mxu0 }
 0x13b   : > { %v821_v44 = vadd.f32 %v807_v43, %v695_v37  ;;  %v1166_v45 = vpop.f32.mrb[10].mxu0 }
 0x13c   : > { %v833_v46 = vadd.f32 %v1013_v41, %v823_v42  ;;  %v810_v47 = vpop.f32.mrb[11].mxu0 }
 0x13d   : > { %v831_v48 = vadd.f32 %v1013_v41, %v821_v44  ;;  %v822_v49 = vadd.f32 %v810_v47, %v696_v39 }
 0x13e   : > { %v836_v50 = vmax.f32 %v833_v46, 0.0 }
 0x13f   : > { %v834_v51 = vmax.f32 %v831_v48, 0.0  ;;  %v832_v52 = vadd.f32 %v1013_v41, %v822_v49 }
 0x140   : > { %839 = vst [vmem:[%s170_s29 + $0x10] sm:$0xff] %v836_v50 }
 0x141   : > { %837 = vst [vmem:[%s170_s29] sm:$0xff] %v834_v51  ;;  %v835_v53 = vmax.f32 %v832_v52, 0.0 }
 0x143   : > { %838 = vst [vmem:[%s170_s29 + $0x8] sm:$0xff] %v835_v53 }
 0x144 PF: > { %s13_s12 = sadd.s32 1, %s1228_s12  }
 0x145   : > { %p10_p4 = scmp.ge.s32.totalorder %s13_s12, 4  }
 0x147   :  { %12 = sbr.rel (!%p10_p4) target bundleno = 1 (0x1), region = 66 }

// kernel: ecapa_forward.34
= control target key start
LH: loop header
LB: loop body
LE: loop exit
PB: predicated region body
PF: predicated region fallthrough
CT: control target
= control target key end

     0   :  { %v300_v0 = vmov 0.0   ;;  %vm301_vm0 = vmmov 0   ;;  %s379_s1 = inlined_call_operand.vmem [shape: bf16[128,128], index: 1, kind: input, shape index: {}]   ;;  %s380_s0 = inlined_call_operand.vmem [shape: bf16[48,128], index: 0, kind: input, shape index: {}]   ;;  %s381_s2 = inlined_call_operand.vmem [shape: f32[1,128], index: 2, kind: input, shape index: {}]   ;;  %s382_s3 = inlined_call_operand.vmem [shape: f32[48,128], index: 3, kind: output, shape index: {}]  }
   0x1   :  { %271 = vmatprep.subr.bf16.mxu1 %v300_v0  ;;  %v289_v1 = vld [vmem:[%s379_s1] sm:$0xff]   ;;  %243 = vmatprep.subr.bf16.mxu0 %v300_v0  ;;  %v290_v2 = vld [vmem:[%s379_s1 + $0x8] sm:$0xff]   ;;  %v291_v3 = vld [vmem:[%s379_s1 + $0x10] sm:$0xff]  }
   0x2   :  { %263 = vmatprep.mubr.msk.bf16.mxu1 %vm301_vm0, %v300_v0  ;;  %259 = vmatprep.mubr.msk.bf16.mxu0 %vm301_vm0, %v300_v0  ;;  %v292_v4 = vld [vmem:[%s379_s1 + $0x18] sm:$0xff]   ;;  %v293_v5 = vld [vmem:[%s379_s1 + $0x20] sm:$0xff]   ;;  %v294_v6 = vld [vmem:[%s379_s1 + $0x28] sm:$0xff]  }
   0x3   :  { %279 = vmatpush3.bf16.msra.mxu1 %v289_v1  ;;  %244 = vmatpush3.bf16.msra.mxu0 %v289_v1  ;;  %v295_v7 = vld [vmem:[%s379_s1 + $0x30] sm:$0xff]   ;;  %v296_v8 = vld [vmem:[%s379_s1 + $0x38] sm:$0xff]   ;;  %v297_v9 = vld [vmem:[%s380_s0 + $0x8] sm:$0xff]  }
   0x4   :  { %272 = vmatprep.subr.bf16.mxu1 %v300_v0  ;;  %245 = vmatprep.subr.bf16.mxu0 %v300_v0  ;;  %v298_v10 = vld [vmem:[%s380_s0] sm:$0xff]   ;;  %v299_v11 = vld [vmem:[%s380_s0 + $0x10] sm:$0xff]  }
   0x5   :  { %v231_v12 = vld [vmem:[%s381_s2] ss:$0 sm:$0xff] }
   0x7   :  { %280 = vmatpush3.bf16.msra.mxu1 %v290_v2  ;;  %246 = vmatpush3.bf16.msra.mxu0 %v290_v2 }
   0x8   :  { %273 = vmatprep.subr.bf16.mxu1 %v300_v0  ;;  %247 = vmatprep.subr.bf16.mxu0 %v300_v0 }
   0xb   :  { %281 = vmatpush3.bf16.msra.mxu1 %v291_v3  ;;  %248 = vmatpush3.bf16.msra.mxu0 %v291_v3 }
   0xc   :  { %274 = vmatprep.subr.bf16.mxu1 %v300_v0  ;;  %249 = vmatprep.subr.bf16.mxu0 %v300_v0 }
   0xf   :  { %282 = vmatpush3.bf16.msra.mxu1 %v292_v4  ;;  %250 = vmatpush3.bf16.msra.mxu0 %v292_v4 }
  0x10   :  { %275 = vmatprep.subr.bf16.mxu1 %v300_v0  ;;  %251 = vmatprep.subr.bf16.mxu0 %v300_v0 }
  0x13   :  { %283 = vmatpush3.bf16.msra.mxu1 %v293_v5  ;;  %252 = vmatpush3.bf16.msra.mxu0 %v293_v5 }
  0x14   :  { %276 = vmatprep.subr.bf16.mxu1 %v300_v0  ;;  %253 = vmatprep.subr.bf16.mxu0 %v300_v0 }
  0x17   :  { %284 = vmatpush3.bf16.msra.mxu1 %v294_v6  ;;  %254 = vmatpush3.bf16.msra.mxu0 %v294_v6 }
  0x18   :  { %277 = vmatprep.subr.bf16.mxu1 %v300_v0  ;;  %255 = vmatprep.subr.bf16.mxu0 %v300_v0 }
  0x1b   :  { %285 = vmatpush3.bf16.msra.mxu1 %v295_v7  ;;  %256 = vmatpush3.bf16.msra.mxu0 %v295_v7 }
  0x1c   :  { %278 = vmatprep.subr.bf16.mxu1 %v300_v0  ;;  %257 = vmatprep.subr.bf16.mxu0 %v300_v0 }
  0x1f   :  { %286 = vmatpush3.bf16.msra.mxu1 %v296_v8  ;;  %258 = vmatpush3.bf16.msra.mxu0 %v296_v8 }
  0x22   :  { %264 = vmatmul.mubr.bf16.vlgmr.msra.gmra.mrb[0].mxu1 %v297_v9  ;;  %260 = vmatmul.mubr.bf16.vlgmr.msra.gmra.mrb[0].mxu0 %v298_v10 }
  0x23   :  { %267 = vmatprep.mubr.msk.bf16.mxu1 %vm301_vm0, %v300_v0 }
  0x2a   :  { %268 = vmatmul.mubr.bf16.gmra.mrb[4].mxu1 %v299_v11 }
  0xf5   :  { %v161_v13 = vpop.f32.mrb[0].mxu1  ;;  %v153_v14 = vpop.f32.mrb[0].mxu0 }
  0xf6   :  { %v206_v15 = vadd.f32 %v231_v12, %v161_v13  ;;  %v265_v16 = vpop.f32.mrb[1].mxu1  ;;  %v204_v17 = vadd.f32 %v231_v12, %v153_v14  ;;  %v261_v18 = vpop.f32.mrb[1].mxu0 }
  0xf7   :  { %v164_v19 = vpop.f32.mrb[2].mxu1  ;;  %v156_v20 = vpop.f32.mrb[2].mxu0 }
  0xf8   :  { %212 = vst [vmem:[%s382_s3 + $0x10] sm:$0xff] %v206_v15  ;;  %v207_v21 = vadd.f32 %v231_v12, %v164_v19  ;;  %v266_v22 = vpop.f32.mrb[3].mxu1  ;;  %210 = vst [vmem:[%s382_s3] sm:$0xff] %v204_v17  ;;  %v205_v23 = vadd.f32 %v231_v12, %v156_v20  ;;  %v262_v24 = vpop.f32.mrb[3].mxu0 }
  0xfa   :  { %213 = vst [vmem:[%s382_s3 + $0x18] sm:$0xff] %v207_v21  ;;  %211 = vst [vmem:[%s382_s3 + $0x8] sm:$0xff] %v205_v23 }
  0xfd   :  { %v169_v25 = vpop.f32.mrb[4].mxu1 }
  0xfe   :  { %v208_v26 = vadd.f32 %v231_v12, %v169_v25  ;;  %v269_v27 = vpop.f32.mrb[5].mxu1 }
  0xff   :  { %v172_v28 = vpop.f32.mrb[6].mxu1 }
 0x100   :  { %214 = vst [vmem:[%s382_s3 + $0x20] sm:$0xff] %v208_v26  ;;  %v209_v29 = vadd.f32 %v231_v12, %v172_v28  ;;  %v270_v30 = vpop.f32.mrb[7].mxu1 }
 0x102   :  { %215 = vst [vmem:[%s382_s3 + $0x28] sm:$0xff] %v209_v29 }

// kernel: ecapa_forward.32
= control target key start
LH: loop header
LB: loop body
LE: loop exit
PB: predicated region body
PF: predicated region fallthrough
CT: control target
= control target key end

     0   :  { %s3920_s1 = inlined_call_operand.vmem [shape: bf16[512,384], index: 1, kind: input, shape index: {}]   ;;  %s3921_s0 = inlined_call_operand.vmem [shape: bf16[48,512], index: 0, kind: input, shape index: {}]   ;;  %s3922_s2 = inlined_call_operand.vmem [shape: bf16[512,384], index: 2, kind: input, shape index: {}]   ;;  %s3923_s3 = inlined_call_operand.vmem [shape: f32[384,128], index: 3, kind: input, shape index: {}]   ;;  %s3924_s4 = inlined_call_operand.vmem [shape: f32[48,128], index: 4, kind: output, shape index: {}]  }
   0x1   :  { %v2693_v0 = vld [vmem:[%s3920_s1 + $0x4] ss:$12 sps:$4 sm:$0xff]   ;;  %v2695_v1 = vld [vmem:[%s3920_s1 + $0xc8] ss:$12 sps:$4 sm:$0xff]   ;;  %v2696_v2 = vld [vmem:[%s3920_s1] ss:$12 sps:$4 sm:$0xff]  }
   0x2   :  { %730 = vmatprep.subr.bf16.mxu0 %v2693_v0  ;;  %2356 = vmatprep.subr.bf16.mxu1 %v2695_v1  ;;  %v2697_v3 = vld [vmem:[%s3920_s1 + $0x8] ss:$12 sps:$4 sm:$0xff]   ;;  %v2700_v5 = vld [vmem:[%s3920_s1 + $0xe0] ss:$12 sps:$4 sm:$0xff]   ;;  %v2701_v6 = vld [vmem:[%s3920_s1 + $0x18] ss:$12 sps:$4 sm:$0xff]  }
   0x3   :  { %731 = vmatpush1.bf16.msra.mxu0 %v2696_v2  ;;  %v2698_v4 = vld [vmem:[%s3920_s1 + $0x1c] ss:$12 sps:$4 sm:$0xff]   ;;  %2357 = vmatpush3.bf16.msra.mxu1 %v2697_v3  ;;  %v2702_v7 = vld [vmem:[%s3920_s1 + $0x20] ss:$12 sps:$4 sm:$0xff]   ;;  %v2705_v9 = vld [vmem:[%s3920_s1 + $0xf8] ss:$12 sps:$4 sm:$0xff]  }
   0x4   :  { %732 = vmatprep.subr.bf16.mxu0 %v2698_v4  ;;  %2358 = vmatprep.subr.bf16.mxu1 %v2700_v5  ;;  %v2703_v8 = vld [vmem:[%s3920_s1 + $0x34] ss:$12 sps:$4 sm:$0xff]   ;;  %v2706_v10 = vld [vmem:[%s3920_s1 + $0x30] ss:$12 sps:$4 sm:$0xff]   ;;  %v2707_v11 = vld [vmem:[%s3920_s1 + $0x38] ss:$12 sps:$4 sm:$0xff]  }
   0x5   :  { %v2708_v12 = vld [vmem:[%s3920_s1 + $0x4c] ss:$12 sps:$4 sm:$0xff]   ;;  %v2710_v13 = vld [vmem:[%s3920_s1 + $0x110] ss:$12 sps:$4 sm:$0xff]   ;;  %v2711_v14 = vld [vmem:[%s3920_s1 + $0x48] ss:$12 sps:$4 sm:$0xff]  }
   0x6   :  { %v2712_v15 = vld [vmem:[%s3920_s1 + $0x50] ss:$12 sps:$4 sm:$0xff]   ;;  %v2715_v17 = vld [vmem:[%s3920_s1 + $0x128] ss:$12 sps:$4 sm:$0xff]   ;;  %v2716_v18 = vld [vmem:[%s3920_s1 + $0x60] ss:$12 sps:$4 sm:$0xff]  }
   0x7   :  { %733 = vmatpush1.bf16.msra.mxu0 %v2701_v6  ;;  %2359 = vmatpush3.bf16.msra.mxu1 %v2702_v7  ;;  %v2713_v16 = vld [vmem:[%s3920_s1 + $0x64] ss:$12 sps:$4 sm:$0xff]   ;;  %v2717_v19 = vld [vmem:[%s3920_s1 + $0x68] ss:$12 sps:$4 sm:$0xff]   ;;  %v2720_v21 = vld [vmem:[%s3920_s1 + $0x140] ss:$12 sps:$4 sm:$0xff]  }
   0x8   :  { %734 = vmatprep.subr.bf16.mxu0 %v2703_v8  ;;  %2360 = vmatprep.subr.bf16.mxu1 %v2705_v9  ;;  %v2718_v20 = vld [vmem:[%s3920_s1 + $0x7c] ss:$12 sps:$4 sm:$0xff]   ;;  %v2721_v22 = vld [vmem:[%s3920_s1 + $0x78] ss:$12 sps:$4 sm:$0xff]   ;;  %v2722_v23 = vld [vmem:[%s3920_s1 + $0x80] ss:$12 sps:$4 sm:$0xff]  }
   0x9   :  { %v2723_v24 = vld [vmem:[%s3920_s1 + $0x94] ss:$12 sps:$4 sm:$0xff]   ;;  %v2725_v25 = vld [vmem:[%s3920_s1 + $0x158] ss:$12 sps:$4 sm:$0xff]   ;;  %v2726_v26 = vld [vmem:[%s3920_s1 + $0x90] ss:$12 sps:$4 sm:$0xff]  }
   0xa   :  { %v2727_v27 = vld [vmem:[%s3920_s1 + $0x98] ss:$12 sps:$4 sm:$0xff]   ;;  %v2730_v29 = vld [vmem:[%s3920_s1 + $0x170] ss:$12 sps:$4 sm:$0xff]   ;;  %v2731_v31 = vld [vmem:[%s3920_s1 + $0xa8] ss:$12 sps:$4 sm:$0xff]  }
   0xb   :  { %735 = vmatpush1.bf16.msra.mxu0 %v2706_v10  ;;  %2361 = vmatpush3.bf16.msra.mxu1 %v2707_v11  ;;  %v2728_v28 = vld [vmem:[%s3920_s1 + $0xac] ss:$12 sps:$4 sm:$0xff]   ;;  %v3086_v30 = vld [vmem:[%s3921_s0 + $0x4] ss:$16 sps:$4 sm:$0xff]   ;;  %v2732_v32 = vld [vmem:[%s3920_s1 + $0xb0] ss:$12 sps:$4 sm:$0xff]  }
   0xc   :  { %736 = vmatprep.subr.bf16.mxu0 %v2708_v12  ;;  %2362 = vmatprep.subr.bf16.mxu1 %v2710_v13  ;;  %v2735_v33 = vld [vmem:[%s3920_s1 + $0xc4] ss:$12 sps:$4 sm:$0xff]   ;;  %v2738_v34 = vld [vmem:[%s3920_s1 + $0x248] ss:$12 sps:$4 sm:$0xff]   ;;  %v2739_v36 = vld [vmem:[%s3920_s1 + $0xc0] ss:$12 sps:$4 sm:$0xff]  }
   0xd   :  { %888 = vmatprep.mubr.bf16.mxu1 %v3086_v30  ;;  %v3104_v35 = vld [vmem:[%s3921_s0] ss:$16 sps:$4 sm:$0xff]   ;;  %762 = vmatprep.mubr.bf16.mxu0 %v3086_v30  ;;  %v2740_v37 = vld [vmem:[%s3920_s1 + $0x188] ss:$12 sps:$4 sm:$0xff]   ;;  %v2744_v40 = vld [vmem:[%s3920_s1 + $0xd8] ss:$12 sps:$4 sm:$0xff]  }
   0xe   :  { %v2741_v38 = vld [vmem:[%s3920_s1 + $0xdc] ss:$12 sps:$4 sm:$0xff]   ;;  %v2743_v39 = vld [vmem:[%s3920_s1 + $0x260] ss:$12 sps:$4 sm:$0xff]   ;;  %v2748_v43 = vld [vmem:[%s3920_s1 + $0x278] ss:$12 sps:$4 sm:$0xff]  }
   0xf   :  { %737 = vmatpush1.bf16.msra.mxu0 %v2711_v14  ;;  %2363 = vmatpush3.bf16.msra.mxu1 %v2712_v15  ;;  %v2745_v41 = vld [vmem:[%s3920_s1 + $0x1a0] ss:$12 sps:$4 sm:$0xff]   ;;  %v2749_v44 = vld [vmem:[%s3920_s1 + $0xf0] ss:$12 sps:$4 sm:$0xff]   ;;  %v2750_v45 = vld [vmem:[%s3920_s1 + $0x1b8] ss:$12 sps:$4 sm:$0xff]  }
  0x10   :  { %738 = vmatprep.subr.bf16.mxu0 %v2713_v16  ;;  %2364 = vmatprep.subr.bf16.mxu1 %v2715_v17  ;;  %v2746_v42 = vld [vmem:[%s3920_s1 + $0xf4] ss:$12 sps:$4 sm:$0xff]   ;;  %v2751_v46 = vld [vmem:[%s3920_s1 + $0x10c] ss:$12 sps:$4 sm:$0xff]   ;;  %v2753_v48 = vld [vmem:[%s3920_s1 + $0x290] ss:$12 sps:$4 sm:$0xff]  }
  0x11   :  { %v3144_v47 = vld [vmem:[%s3921_s0 + $0x24] ss:$16 sps:$4 sm:$0xff]   ;;  %v3152_v49 = vld [vmem:[%s3921_s0 + $0x20] ss:$16 sps:$4 sm:$0xff]   ;;  %v2764_v56 = vld [vmem:[%s3920_s1 + $0x13c] ss:$12 sps:$4 sm:$0xff]  }
  0x12   :  { %v2754_v50 = vld [vmem:[%s3920_s1 + $0x108] ss:$12 sps:$4 sm:$0xff]   ;;  %v2757_v51 = vld [vmem:[%s3920_s1 + $0x1d0] ss:$12 sps:$4 sm:$0xff]   ;;  %v2762_v54 = vld [vmem:[%s3920_s1 + $0x120] ss:$12 sps:$4 sm:$0xff]  }
  0x13   :  { %739 = vmatpush1.bf16.msra.mxu0 %v2716_v18  ;;  %2365 = vmatpush3.bf16.msra.mxu1 %v2717_v19  ;;  %v2759_v52 = vld [vmem:[%s3920_s1 + $0x124] ss:$12 sps:$4 sm:$0xff]   ;;  %v2761_v53 = vld [vmem:[%s3920_s1 + $0x2a8] ss:$12 sps:$4 sm:$0xff]   ;;  %v2766_v58 = vld [vmem:[%s3920_s1 + $0x2c0] ss:$12 sps:$4 sm:$0xff]  }
  0x14   :  { %740 = vmatprep.subr.bf16.mxu0 %v2718_v20  ;;  %2366 = vmatprep.subr.bf16.mxu1 %v2720_v21  ;;  %v2763_v55 = vld [vmem:[%s3920_s1 + $0x1e8] ss:$12 sps:$4 sm:$0xff]   ;;  %v3188_v59 = vld [vmem:[%s3921_s0 + $0x40] ss:$16 sps:$4 sm:$0xff]   ;;  %v2767_v60 = vld [vmem:[%s3920_s1 + $0x138] ss:$12 sps:$4 sm:$0xff]  }
  0x15   :  { %v3180_v57 = vld [vmem:[%s3921_s0 + $0x44] ss:$16 sps:$4 sm:$0xff]   ;;  %v2770_v61 = vld [vmem:[%s3920_s1 + $0x200] ss:$12 sps:$4 sm:$0xff]   ;;  %v2775_v0 = vld [vmem:[%s3920_s1 + $0x150] ss:$12 sps:$4 sm:$0xff]  }
  0x16   :  { %v2772_v62 = vld [vmem:[%s3920_s1 + $0x154] ss:$12 sps:$4 sm:$0xff]   ;;  %v2774_v63 = vld [vmem:[%s3920_s1 + $0x2d8] ss:$12 sps:$4 sm:$0xff]   ;;  %v2779_v3 = vld [vmem:[%s3920_s1 + $0x2f0] ss:$12 sps:$4 sm:$0xff]  }
  0x17   :  { %741 = vmatpush1.bf16.msra.mxu0 %v2721_v22  ;;  %2367 = vmatpush3.bf16.msra.mxu1 %v2722_v23  ;;  %v2776_v1 = vld [vmem:[%s3920_s1 + $0x218] ss:$12 sps:$4 sm:$0xff]   ;;  %v3219_v4 = vld [vmem:[%s3921_s0 + $0xc] ss:$16 sps:$4 sm:$0xff]   ;;  %v2780_v5 = vld [vmem:[%s3920_s1 + $0x168] ss:$12 sps:$4 sm:$0xff]  }
  0x18   :  { %742 = vmatprep.subr.bf16.mxu0 %v2723_v24  ;;  %2368 = vmatprep.subr.bf16.mxu1 %v2725_v25  ;;  %v2777_v2 = vld [vmem:[%s3920_s1 + $0x16c] ss:$12 sps:$4 sm:$0xff]   ;;  %v2781_v6 = vld [vmem:[%s3920_s1 + $0x230] ss:$12 sps:$4 sm:$0xff]   ;;  %v2801_v17 = vld [vmem:[%s3920_s1 + $0x1b4] ss:$12 sps:$4 sm:$0xff]  }
  0x19   :  { %v2787_v7 = vld [vmem:[%s3920_s1 + $0x184] ss:$12 sps:$4 sm:$0xff]   ;;  %v3237_v9 = vld [vmem:[%s3921_s0 + $0x8] ss:$16 sps:$4 sm:$0xff]   ;;  %v2785_v10 = vld [vmem:[%s3920_s1 + $0x180] ss:$12 sps:$4 sm:$0xff]  }
  0x1a   :  { %v2790_v8 = vld [vmem:[%s3922_s2 + $0x4] ss:$12 sps:$4 sm:$0xff]   ;;  %v2788_v11 = vld [vmem:[%s3922_s2] ss:$12 sps:$4 sm:$0xff]   ;;  %v2793_v12 = vld [vmem:[%s3920_s1 + $0x19c] ss:$12 sps:$4 sm:$0xff]  }
  0x1b   :  { %743 = vmatpush1.bf16.msra.mxu0 %v2726_v26  ;;  %2369 = vmatpush3.bf16.msra.mxu1 %v2727_v27  ;;  %v2796_v13 = vld [vmem:[%s3922_s2 + $0x1c] ss:$12 sps:$4 sm:$0xff]   ;;  %v2791_v15 = vld [vmem:[%s3920_s1 + $0x198] ss:$12 sps:$4 sm:$0xff]   ;;  %v2805_v18 = vld [vmem:[%s3922_s2 + $0x34] ss:$12 sps:$4 sm:$0xff]  }
  0x1c   :  { %744 = vmatprep.subr.bf16.mxu0 %v2728_v28  ;;  %2370 = vmatprep.subr.bf16.mxu1 %v2730_v29  ;;  %v3254_v14 = vld [vmem:[%s3921_s0 + $0x2c] ss:$16 sps:$4 sm:$0xff]   ;;  %v2794_v16 = vld [vmem:[%s3922_s2 + $0x18] ss:$12 sps:$4 sm:$0xff]   ;;  %v2806_v25 = vld [vmem:[%s3920_s1 + $0x1c8] ss:$12 sps:$4 sm:$0xff]  }
  0x1d   :  { %v2799_v19 = vld [vmem:[%s3920_s1 + $0x1b0] ss:$12 sps:$4 sm:$0xff]   ;;  %v3278_v20 = vld [vmem:[%s3921_s0 + $0x28] ss:$16 sps:$4 sm:$0xff]   ;;  %v2814_v29 = vld [vmem:[%s3920_s1 + $0x1e0] ss:$12 sps:$4 sm:$0xff]  }
  0x1e   :  { %v2803_v21 = vld [vmem:[%s3922_s2 + $0x30] ss:$12 sps:$4 sm:$0xff]   ;;  %v2808_v22 = vld [vmem:[%s3920_s1 + $0x1cc] ss:$12 sps:$4 sm:$0xff]   ;;  %v2809_v26 = vld [vmem:[%s3922_s2 + $0x48] ss:$12 sps:$4 sm:$0xff]  }
  0x1f   :  { %745 = vmatpush1.bf16.msra.mxu0 %v2731_v31  ;;  %2371 = vmatpush3.bf16.msra.mxu1 %v2732_v32  ;;  %v2811_v23 = vld [vmem:[%s3922_s2 + $0x4c] ss:$12 sps:$4 sm:$0xff]   ;;  %v2816_v27 = vld [vmem:[%s3920_s1 + $0x1e4] ss:$12 sps:$4 sm:$0xff]  }
  0x20   :  { %746 = vmatprep.subr.bf16.mxu0 %v2735_v33  ;;  %2390 = vmatprep.subr.bf16.mxu1 %v2738_v34  ;;  %v3292_v24 = vld [vmem:[%s3921_s0 + $0x4c] ss:$16 sps:$4 sm:$0xff]   ;;  %v2820_v28 = vld [vmem:[%s3922_s2 + $0x64] ss:$12 sps:$4 sm:$0xff]   ;;  %v3315_v31 = vld [vmem:[%s3921_s0 + $0x48] ss:$16 sps:$4 sm:$0xff]  }
  0x21   :  { %v2818_v32 = vld [vmem:[%s3922_s2 + $0x60] ss:$12 sps:$4 sm:$0xff]   ;;  %v2823_v33 = vld [vmem:[%s3920_s1 + $0x1fc] ss:$12 sps:$4 sm:$0xff]  }
  0x22   :  { %889 = vmatmul.mubr.bf16.vlgmr.msra.gmra.mrb[0].mxu1 %v3104_v35  ;;  %v2826_v34 = vld [vmem:[%s3922_s2 + $0x7c] ss:$12 sps:$4 sm:$0xff]  }
  0x23   :  { %747 = vmatpush1.bf16.msra.mxu0 %v2739_v36  ;;  %2391 = vmatpush3.bf16.msra.mxu1 %v2740_v37  ;;  %v2821_v36 = vld [vmem:[%s3920_s1 + $0x1f8] ss:$12 sps:$4 sm:$0xff]  }
  0x24   :  { %748 = vmatprep.subr.bf16.mxu0 %v2741_v38  ;;  %2392 = vmatprep.subr.bf16.mxu1 %v2743_v39  ;;  %v2824_v37 = vld [vmem:[%s3922_s2 + $0x78] ss:$12 sps:$4 sm:$0xff]   ;;  %v2829_v38 = vld [vmem:[%s3920_s1 + $0x214] ss:$12 sps:$4 sm:$0xff]  }
  0x25   :  { %896 = vmatprep.mubr.bf16.mxu1 %v3144_v47  ;;  %v2832_v39 = vld [vmem:[%s3922_s2 + $0x94] ss:$12 sps:$4 sm:$0xff]  }
  0x27   :  { %749 = vmatpush1.bf16.msra.mxu0 %v2744_v40  ;;  %2393 = vmatpush3.bf16.msra.mxu1 %v2745_v41  ;;  %v2827_v40 = vld [vmem:[%s3920_s1 + $0x210] ss:$12 sps:$4 sm:$0xff]  }
  0x28   :  { %750 = vmatprep.subr.bf16.mxu0 %v2746_v42  ;;  %2394 = vmatprep.subr.bf16.mxu1 %v2748_v43  ;;  %v2830_v41 = vld [vmem:[%s3922_s2 + $0x90] ss:$12 sps:$4 sm:$0xff]   ;;  %v2835_v42 = vld [vmem:[%s3920_s1 + $0x22c] ss:$12 sps:$4 sm:$0xff]  }
  0x29   :  { %v2838_v43 = vld [vmem:[%s3922_s2 + $0xac] ss:$12 sps:$4 sm:$0xff]  }
  0x2a   :  { %897 = vmatmul.mubr.bf16.gmra.mrb[4].mxu1 %v3152_v49 }
  0x2b   :  { %751 = vmatpush1.bf16.msra.mxu0 %v2749_v44  ;;  %2395 = vmatpush3.bf16.msra.mxu1 %v2750_v45  ;;  %v2833_v44 = vld [vmem:[%s3920_s1 + $0x228] ss:$12 sps:$4 sm:$0xff]  }
  0x2c   :  { %752 = vmatprep.subr.bf16.mxu0 %v2751_v46  ;;  %2396 = vmatprep.subr.bf16.mxu1 %v2753_v48  ;;  %v2836_v45 = vld [vmem:[%s3922_s2 + $0xa8] ss:$12 sps:$4 sm:$0xff]   ;;  %v2841_v46 = vld [vmem:[%s3920_s1 + $0x244] ss:$12 sps:$4 sm:$0xff]  }
  0x2d   :  { %904 = vmatprep.mubr.bf16.mxu1 %v3180_v57  ;;  %v2844_v48 = vld [vmem:[%s3922_s2 + $0xc4] ss:$12 sps:$4 sm:$0xff]  }
  0x2f   :  { %753 = vmatpush1.bf16.msra.mxu0 %v2754_v50  ;;  %2397 = vmatpush3.bf16.msra.mxu1 %v2757_v51  ;;  %v2839_v50 = vld [vmem:[%s3920_s1 + $0x240] ss:$12 sps:$4 sm:$0xff]  }
  0x30   :  { %754 = vmatprep.subr.bf16.mxu0 %v2759_v52  ;;  %2398 = vmatprep.subr.bf16.mxu1 %v2761_v53  ;;  %v2842_v51 = vld [vmem:[%s3922_s2 + $0xc0] ss:$12 sps:$4 sm:$0xff]   ;;  %v2847_v52 = vld [vmem:[%s3920_s1 + $0x25c] ss:$12 sps:$4 sm:$0xff]  }
  0x31   :  { %v2850_v53 = vld [vmem:[%s3922_s2 + $0xdc] ss:$12 sps:$4 sm:$0xff]  }
  0x32   :  { %905 = vmatmul.mubr.bf16.gmra.mrb[8].mxu1 %v3188_v59 }
  0x33   :  { %755 = vmatpush1.bf16.msra.mxu0 %v2762_v54  ;;  %2399 = vmatpush3.bf16.msra.mxu1 %v2763_v55  ;;  %v2845_v54 = vld [vmem:[%s3920_s1 + $0x258] ss:$12 sps:$4 sm:$0xff]  }
  0x34   :  { %756 = vmatprep.subr.bf16.mxu0 %v2764_v56  ;;  %2400 = vmatprep.subr.bf16.mxu1 %v2766_v58  ;;  %v2848_v55 = vld [vmem:[%s3922_s2 + $0xd8] ss:$12 sps:$4 sm:$0xff]   ;;  %v2853_v56 = vld [vmem:[%s3920_s1 + $0x274] ss:$12 sps:$4 sm:$0xff]  }
  0x35   :  { %945 = vmatprep.mubr.bf16.mxu1 %v3219_v4  ;;  %v2856_v58 = vld [vmem:[%s3922_s2 + $0xf4] ss:$12 sps:$4 sm:$0xff]  }
  0x37   :  { %757 = vmatpush1.bf16.msra.mxu0 %v2767_v60  ;;  %2401 = vmatpush3.bf16.msra.mxu1 %v2770_v61  ;;  %v2851_v60 = vld [vmem:[%s3920_s1 + $0x270] ss:$12 sps:$4 sm:$0xff]  }
  0x38   :  { %758 = vmatprep.subr.bf16.mxu0 %v2772_v62  ;;  %2402 = vmatprep.subr.bf16.mxu1 %v2774_v63  ;;  %v2854_v61 = vld [vmem:[%s3922_s2 + $0xf0] ss:$12 sps:$4 sm:$0xff]   ;;  %v2859_v62 = vld [vmem:[%s3920_s1 + $0x28c] ss:$12 sps:$4 sm:$0xff]  }
  0x39   :  { %v2862_v63 = vld [vmem:[%s3922_s2 + $0x10c] ss:$12 sps:$4 sm:$0xff]  }
  0x3b   :  { %759 = vmatpush1.bf16.msra.mxu0 %v2775_v0  ;;  %2403 = vmatpush3.bf16.msra.mxu1 %v2776_v1  ;;  %v2857_v0 = vld [vmem:[%s3920_s1 + $0x288] ss:$12 sps:$4 sm:$0xff]  }
  0x3c   :  { %760 = vmatprep.subr.bf16.mxu0 %v2777_v2  ;;  %2404 = vmatprep.subr.bf16.mxu1 %v2779_v3  ;;  %v2860_v1 = vld [vmem:[%s3922_s2 + $0x108] ss:$12 sps:$4 sm:$0xff]   ;;  %v2865_v2 = vld [vmem:[%s3920_s1 + $0x2a4] ss:$12 sps:$4 sm:$0xff]  }
  0x3d   :  { %v2868_v3 = vld [vmem:[%s3922_s2 + $0x124] ss:$12 sps:$4 sm:$0xff]  }
  0x3f   :  { %761 = vmatpush1.bf16.msra.mxu0 %v2780_v5  ;;  %2405 = vmatpush3.bf16.msra.mxu1 %v2781_v6  ;;  %v2863_v5 = vld [vmem:[%s3920_s1 + $0x2a0] ss:$12 sps:$4 sm:$0xff]  }
  0x40   :  { %793 = vmatprep.subr.bf16.mxu0 %v2787_v7  ;;  %1610 = vmatprep.subr.bf16.mxu1 %v2790_v8  ;;  %v2866_v6 = vld [vmem:[%s3922_s2 + $0x120] ss:$12 sps:$4 sm:$0xff]   ;;  %v2871_v7 = vld [vmem:[%s3920_s1 + $0x2bc] ss:$12 sps:$4 sm:$0xff]  }
  0x41   :  { %v2874_v8 = vld [vmem:[%s3922_s2 + $0x13c] ss:$12 sps:$4 sm:$0xff]  }
  0x42   :  { %763 = vmatmul.mubr.bf16.vlgmr.msra.gmra.mrb[0].mxu0 %v3104_v35  ;;  %946 = vmatmul.mubr.bf16.vlgmr.msra.gmra.mrb[12].mxu1 %v3237_v9 }
  0x43   :  { %794 = vmatpush1.bf16.msra.mxu0 %v2785_v10  ;;  %1611 = vmatpush1.bf16.msra.mxu1 %v2788_v11  ;;  %v2869_v10 = vld [vmem:[%s3920_s1 + $0x2b8] ss:$12 sps:$4 sm:$0xff]  }
  0x44   :  { %795 = vmatprep.subr.bf16.mxu0 %v2793_v12  ;;  %1612 = vmatprep.subr.bf16.mxu1 %v2796_v13  ;;  %v2872_v11 = vld [vmem:[%s3922_s2 + $0x138] ss:$12 sps:$4 sm:$0xff]   ;;  %v2877_v12 = vld [vmem:[%s3920_s1 + $0x2d4] ss:$12 sps:$4 sm:$0xff]  }
  0x45   :  { %953 = vmatprep.mubr.bf16.mxu1 %v3254_v14  ;;  %772 = vmatprep.mubr.bf16.mxu0 %v3144_v47  ;;  %v2880_v13 = vld [vmem:[%s3922_s2 + $0x154] ss:$12 sps:$4 sm:$0xff]  }
  0x47   :  { %796 = vmatpush1.bf16.msra.mxu0 %v2791_v15  ;;  %1613 = vmatpush1.bf16.msra.mxu1 %v2794_v16  ;;  %v2875_v15 = vld [vmem:[%s3920_s1 + $0x2d0] ss:$12 sps:$4 sm:$0xff]  }
  0x48   :  { %797 = vmatprep.subr.bf16.mxu0 %v2801_v17  ;;  %1614 = vmatprep.subr.bf16.mxu1 %v2805_v18  ;;  %v2878_v16 = vld [vmem:[%s3922_s2 + $0x150] ss:$12 sps:$4 sm:$0xff]   ;;  %v2883_v17 = vld [vmem:[%s3920_s1 + $0x2ec] ss:$12 sps:$4 sm:$0xff]  }
  0x49   :  { %v2886_v18 = vld [vmem:[%s3922_s2 + $0x16c] ss:$12 sps:$4 sm:$0xff]  }
  0x4a   :  { %773 = vmatmul.mubr.bf16.gmra.mrb[4].mxu0 %v3152_v49  ;;  %954 = vmatmul.mubr.bf16.gmra.mrb[16].mxu1 %v3278_v20 }
  0x4b   :  { %798 = vmatpush1.bf16.msra.mxu0 %v2799_v19  ;;  %1615 = vmatpush1.bf16.msra.mxu1 %v2803_v21  ;;  %v2881_v19 = vld [vmem:[%s3920_s1 + $0x2e8] ss:$12 sps:$4 sm:$0xff]  }
  0x4c   :  { %799 = vmatprep.subr.bf16.mxu0 %v2808_v22  ;;  %1616 = vmatprep.subr.bf16.mxu1 %v2811_v23  ;;  %v2884_v21 = vld [vmem:[%s3922_s2 + $0x168] ss:$12 sps:$4 sm:$0xff]   ;;  %v2889_v23 = vld [vmem:[%s3922_s2 + $0x184] ss:$12 sps:$4 sm:$0xff]  }
  0x4d   :  { %961 = vmatprep.mubr.bf16.mxu1 %v3292_v24  ;;  %782 = vmatprep.mubr.bf16.mxu0 %v3180_v57  ;;  %v2890_v22 = vld [vmem:[%s3922_s2 + $0xc8] ss:$12 sps:$4 sm:$0xff]  }
  0x4f   :  { %800 = vmatpush1.bf16.msra.mxu0 %v2806_v25  ;;  %1617 = vmatpush1.bf16.msra.mxu1 %v2809_v26  ;;  %v2887_v25 = vld [vmem:[%s3922_s2 + $0x180] ss:$12 sps:$4 sm:$0xff]   ;;  %v2891_v26 = vld [vmem:[%s3922_s2 + $0x8] ss:$12 sps:$4 sm:$0xff]  }
  0x50   :  { %801 = vmatprep.subr.bf16.mxu0 %v2816_v27  ;;  %1618 = vmatprep.subr.bf16.mxu1 %v2820_v28  ;;  %v2895_v27 = vld [vmem:[%s3922_s2 + $0xe0] ss:$12 sps:$4 sm:$0xff]   ;;  %v2894_v28 = vld [vmem:[%s3922_s2 + $0x19c] ss:$12 sps:$4 sm:$0xff]  }
  0x52   :  { %783 = vmatmul.mubr.bf16.gmra.mrb[8].mxu0 %v3188_v59  ;;  %962 = vmatmul.mubr.bf16.gmra.mrb[20].mxu1 %v3315_v31 }
  0x53   :  { %802 = vmatpush1.bf16.msra.mxu0 %v2814_v29  ;;  %1619 = vmatpush1.bf16.msra.mxu1 %v2818_v32  ;;  %v2892_v29 = vld [vmem:[%s3922_s2 + $0x198] ss:$12 sps:$4 sm:$0xff]   ;;  %v2896_v32 = vld [vmem:[%s3922_s2 + $0x20] ss:$12 sps:$4 sm:$0xff]  }
  0x54   :  { %803 = vmatprep.subr.bf16.mxu0 %v2823_v33  ;;  %1620 = vmatprep.subr.bf16.mxu1 %v2826_v34  ;;  %v2900_v33 = vld [vmem:[%s3922_s2 + $0xf8] ss:$12 sps:$4 sm:$0xff]   ;;  %v2899_v34 = vld [vmem:[%s3922_s2 + $0x1b4] ss:$12 sps:$4 sm:$0xff]  }
  0x55   :  { %825 = vmatprep.mubr.bf16.mxu0 %v3219_v4  ;;  %1642 = vmatprep.mubr.bf16.mxu1 %v3086_v30 }
  0x57   :  { %804 = vmatpush1.bf16.msra.mxu0 %v2821_v36  ;;  %1621 = vmatpush1.bf16.msra.mxu1 %v2824_v37  ;;  %v2901_v36 = vld [vmem:[%s3922_s2 + $0x38] ss:$12 sps:$4 sm:$0xff]   ;;  %v2905_v37 = vld [vmem:[%s3922_s2 + $0x110] ss:$12 sps:$4 sm:$0xff]  }
  0x58   :  { %805 = vmatprep.subr.bf16.mxu0 %v2829_v38  ;;  %1622 = vmatprep.subr.bf16.mxu1 %v2832_v39  ;;  %v2904_v38 = vld [vmem:[%s3922_s2 + $0x1cc] ss:$12 sps:$4 sm:$0xff]   ;;  %v2906_v39 = vld [vmem:[%s3922_s2 + $0x50] ss:$12 sps:$4 sm:$0xff]  }
  0x5b   :  { %806 = vmatpush1.bf16.msra.mxu0 %v2827_v40  ;;  %1623 = vmatpush1.bf16.msra.mxu1 %v2830_v41  ;;  %v2902_v40 = vld [vmem:[%s3922_s2 + $0x1c8] ss:$12 sps:$4 sm:$0xff]  }
  0x5c   :  { %807 = vmatprep.subr.bf16.mxu0 %v2835_v42  ;;  %1624 = vmatprep.subr.bf16.mxu1 %v2838_v43  ;;  %v2910_v41 = vld [vmem:[%s3922_s2 + $0x128] ss:$12 sps:$4 sm:$0xff]   ;;  %v2909_v42 = vld [vmem:[%s3922_s2 + $0x1e4] ss:$12 sps:$4 sm:$0xff]   ;;  %v2907_v43 = vld [vmem:[%s3922_s2 + $0x1e0] ss:$12 sps:$4 sm:$0xff]  }
  0x5f   :  { %808 = vmatpush1.bf16.msra.mxu0 %v2833_v44  ;;  %1625 = vmatpush1.bf16.msra.mxu1 %v2836_v45  ;;  %v2911_v44 = vld [vmem:[%s3922_s2 + $0x68] ss:$12 sps:$4 sm:$0xff]   ;;  %v2915_v45 = vld [vmem:[%s3922_s2 + $0x140] ss:$12 sps:$4 sm:$0xff]  }
  0x60   :  { %809 = vmatprep.subr.bf16.mxu0 %v2841_v46  ;;  %1626 = vmatprep.subr.bf16.mxu1 %v2844_v48  ;;  %v2914_v46 = vld [vmem:[%s3922_s2 + $0x1fc] ss:$12 sps:$4 sm:$0xff]   ;;  %v2912_v48 = vld [vmem:[%s3922_s2 + $0x1f8] ss:$12 sps:$4 sm:$0xff]  }
  0x63   :  { %810 = vmatpush1.bf16.msra.mxu0 %v2839_v50  ;;  %1627 = vmatpush1.bf16.msra.mxu1 %v2842_v51  ;;  %v2916_v50 = vld [vmem:[%s3922_s2 + $0x80] ss:$12 sps:$4 sm:$0xff]   ;;  %v2920_v51 = vld [vmem:[%s3922_s2 + $0x158] ss:$12 sps:$4 sm:$0xff]  }
  0x64   :  { %811 = vmatprep.subr.bf16.mxu0 %v2847_v52  ;;  %1628 = vmatprep.subr.bf16.mxu1 %v2850_v53  ;;  %v2919_v52 = vld [vmem:[%s3922_s2 + $0x214] ss:$12 sps:$4 sm:$0xff]   ;;  %v2917_v53 = vld [vmem:[%s3922_s2 + $0x210] ss:$12 sps:$4 sm:$0xff]  }
  0x67   :  { %812 = vmatpush1.bf16.msra.mxu0 %v2845_v54  ;;  %1629 = vmatpush1.bf16.msra.mxu1 %v2848_v55  ;;  %v2925_v54 = vld [vmem:[%s3922_s2 + $0x170] ss:$12 sps:$4 sm:$0xff]   ;;  %v2924_v55 = vld [vmem:[%s3922_s2 + $0x22c] ss:$12 sps:$4 sm:$0xff]  }
  0x68   :  { %813 = vmatprep.subr.bf16.mxu0 %v2853_v56  ;;  %1630 = vmatprep.subr.bf16.mxu1 %v2856_v58  ;;  %v2926_v56 = vld [vmem:[%s3922_s2 + $0xb0] ss:$12 sps:$4 sm:$0xff]   ;;  %v2922_v58 = vld [vmem:[%s3922_s2 + $0x228] ss:$12 sps:$4 sm:$0xff]  }
  0x6b   :  { %814 = vmatpush1.bf16.msra.mxu0 %v2851_v60  ;;  %1631 = vmatpush1.bf16.msra.mxu1 %v2854_v61  ;;  %v2930_v60 = vld [vmem:[%s3922_s2 + $0x248] ss:$12 sps:$4 sm:$0xff]   ;;  %v2929_v61 = vld [vmem:[%s3922_s2 + $0x244] ss:$12 sps:$4 sm:$0xff]  }
  0x6c   :  { %815 = vmatprep.subr.bf16.mxu0 %v2859_v62  ;;  %1632 = vmatprep.subr.bf16.mxu1 %v2862_v63  ;;  %v2931_v62 = vld [vmem:[%s3922_s2 + $0x188] ss:$12 sps:$4 sm:$0xff]   ;;  %v2927_v63 = vld [vmem:[%s3922_s2 + $0x240] ss:$12 sps:$4 sm:$0xff]  }
  0x6f   :  { %816 = vmatpush1.bf16.msra.mxu0 %v2857_v0  ;;  %1633 = vmatpush1.bf16.msra.mxu1 %v2860_v1  ;;  %v2935_v0 = vld [vmem:[%s3922_s2 + $0x260] ss:$12 sps:$4 sm:$0xff]   ;;  %v2934_v1 = vld [vmem:[%s3922_s2 + $0x25c] ss:$12 sps:$4 sm:$0xff]  }
  0x70   :  { %817 = vmatprep.subr.bf16.mxu0 %v2865_v2  ;;  %1634 = vmatprep.subr.bf16.mxu1 %v2868_v3  ;;  %v2967_v2 = vld [vmem:[%s3921_s0] ss:$16 sps:$4 sm:$0xff]  }
  0x71   :  { %v2936_v3 = vld [vmem:[%s3922_s2 + $0x1a0] ss:$12 sps:$4 sm:$0xff]  }
  0x73   :  { %818 = vmatpush1.bf16.msra.mxu0 %v2863_v5  ;;  %1635 = vmatpush1.bf16.msra.mxu1 %v2866_v6  ;;  %v2932_v5 = vld [vmem:[%s3922_s2 + $0x258] ss:$12 sps:$4 sm:$0xff]  }
  0x74   :  { %819 = vmatprep.subr.bf16.mxu0 %v2871_v7  ;;  %1636 = vmatprep.subr.bf16.mxu1 %v2874_v8  ;;  %v2940_v6 = vld [vmem:[%s3922_s2 + $0x278] ss:$12 sps:$4 sm:$0xff]   ;;  %v2939_v7 = vld [vmem:[%s3922_s2 + $0x274] ss:$12 sps:$4 sm:$0xff]   ;;  %v2937_v8 = vld [vmem:[%s3922_s2 + $0x270] ss:$12 sps:$4 sm:$0xff]  }
  0x77   :  { %820 = vmatpush1.bf16.msra.mxu0 %v2869_v10  ;;  %1637 = vmatpush1.bf16.msra.mxu1 %v2872_v11  ;;  %v2945_v10 = vld [vmem:[%s3922_s2 + $0x290] ss:$12 sps:$4 sm:$0xff]   ;;  %v2944_v11 = vld [vmem:[%s3922_s2 + $0x28c] ss:$12 sps:$4 sm:$0xff]  }
  0x78   :  { %821 = vmatprep.subr.bf16.mxu0 %v2877_v12  ;;  %1638 = vmatprep.subr.bf16.mxu1 %v2880_v13  ;;  %v2946_v12 = vld [vmem:[%s3922_s2 + $0x1d0] ss:$12 sps:$4 sm:$0xff]   ;;  %v2942_v13 = vld [vmem:[%s3922_s2 + $0x288] ss:$12 sps:$4 sm:$0xff]  }
  0x7b   :  { %822 = vmatpush1.bf16.msra.mxu0 %v2875_v15  ;;  %1639 = vmatpush1.bf16.msra.mxu1 %v2878_v16  ;;  %v2950_v15 = vld [vmem:[%s3922_s2 + $0x2a8] ss:$12 sps:$4 sm:$0xff]   ;;  %v2947_v16 = vld [vmem:[%s3922_s2 + $0x2a0] ss:$12 sps:$4 sm:$0xff]  }
  0x7c   :  { %823 = vmatprep.subr.bf16.mxu0 %v2883_v17  ;;  %1640 = vmatprep.subr.bf16.mxu1 %v2886_v18  ;;  %v2955_v17 = vld [vmem:[%s3922_s2 + $0x2c0] ss:$12 sps:$4 sm:$0xff]   ;;  %v2954_v18 = vld [vmem:[%s3922_s2 + $0x2bc] ss:$12 sps:$4 sm:$0xff]  }
  0x7f   :  { %824 = vmatpush1.bf16.msra.mxu0 %v2881_v19  ;;  %1641 = vmatpush1.bf16.msra.mxu1 %v2884_v21  ;;  %v2956_v19 = vld [vmem:[%s3922_s2 + $0x200] ss:$12 sps:$4 sm:$0xff]   ;;  %v2952_v21 = vld [vmem:[%s3922_s2 + $0x2b8] ss:$12 sps:$4 sm:$0xff]  }
  0x80   :  { %2424 = vmatprep.subr.bf16.mxu0 %v2890_v22  ;;  %1673 = vmatprep.subr.bf16.mxu1 %v2889_v23  ;;  %v2960_v22 = vld [vmem:[%s3922_s2 + $0x2d8] ss:$12 sps:$4 sm:$0xff]   ;;  %v2957_v23 = vld [vmem:[%s3922_s2 + $0x2d0] ss:$12 sps:$4 sm:$0xff]  }
  0x82   :  { %826 = vmatmul.mubr.bf16.vlgmr.msra.gmra.mrb[0].mxu0 %v3237_v9  ;;  %1643 = vmatmul.mubr.bf16.vlgmr.msra.gmra.mrb[24].mxu1 %v3104_v35  ;;  %v2897_v35 = vld [vmem:[%s3922_s2 + $0x1b0] ss:$12 sps:$4 sm:$0xff]  }
  0x83   :  { %2425 = vmatpush3.bf16.msra.mxu0 %v2891_v26  ;;  %1674 = vmatpush1.bf16.msra.mxu1 %v2887_v25  ;;  %v2965_v25 = vld [vmem:[%s3922_s2 + $0x2f0] ss:$12 sps:$4 sm:$0xff]   ;;  %v2964_v26 = vld [vmem:[%s3922_s2 + $0x2ec] ss:$12 sps:$4 sm:$0xff]  }
  0x84   :  { %2426 = vmatprep.subr.bf16.mxu0 %v2895_v27  ;;  %1675 = vmatprep.subr.bf16.mxu1 %v2894_v28  ;;  %v2966_v27 = vld [vmem:[%s3922_s2 + $0x230] ss:$12 sps:$4 sm:$0xff]   ;;  %v2962_v28 = vld [vmem:[%s3922_s2 + $0x2e8] ss:$12 sps:$4 sm:$0xff]  }
  0x85   :  { %835 = vmatprep.mubr.bf16.mxu0 %v3254_v14  ;;  %1652 = vmatprep.mubr.bf16.mxu1 %v3144_v47 }
  0x87   :  { %2427 = vmatpush3.bf16.msra.mxu0 %v2896_v32  ;;  %1676 = vmatpush1.bf16.msra.mxu1 %v2892_v29 }
  0x88   :  { %2428 = vmatprep.subr.bf16.mxu0 %v2900_v33  ;;  %1677 = vmatprep.subr.bf16.mxu1 %v2899_v34 }
  0x8a   :  { %836 = vmatmul.mubr.bf16.gmra.mrb[4].mxu0 %v3278_v20  ;;  %1653 = vmatmul.mubr.bf16.gmra.mrb[28].mxu1 %v3152_v49 }
  0x8b   :  { %2429 = vmatpush3.bf16.msra.mxu0 %v2901_v36  ;;  %845 = vmatprep.mubr.bf16.mxu0 %v3292_v24  ;;  %v1905_v36 = vld [vmem:[%s3923_s3 + $0x8] sm:$0xff] }
  0x8c   :  { %1678 = vmatpush1.bf16.msra.mxu1 %v2897_v35  ;;  %2430 = vmatprep.subr.bf16.mxu0 %v2905_v37  ;;  %v1922_v37 = vld [vmem:[%s3923_s3 + $0x90] sm:$0xff] }
  0x8d   :  { %1679 = vmatprep.subr.bf16.mxu1 %v2904_v38  ;;  %1662 = vmatprep.mubr.bf16.mxu1 %v3180_v57  ;;  %v1923_v38 = vld [vmem:[%s3923_s3 + $0x98] sm:$0xff] }
  0x8f   :  { %2431 = vmatpush3.bf16.msra.mxu0 %v2906_v39 }
  0x90   :  { %1680 = vmatpush1.bf16.msra.mxu1 %v2902_v40  ;;  %2432 = vmatprep.subr.bf16.mxu0 %v2910_v41  ;;  %v2609_v40 = vpack.c.bf16 %v1923_v38, %v1922_v37  ;;  %v1906_v41 = vld [vmem:[%s3923_s3 + $0x10] sm:$0xff]  ;;  %v1917_v37 = vld [vmem:[%s3923_s3 + $0x68] sm:$0xff] }
  0x91   :  { %1681 = vmatprep.subr.bf16.mxu1 %v2909_v42  ;;  %v1907_v42 = vld [vmem:[%s3923_s3 + $0x18] sm:$0xff]  ;;  %v1946_v38 = vld [vmem:[%s3923_s3 + $0x150] sm:$0xff] }
  0x92   :  { %846 = vmatmul.mubr.bf16.gmra.mrb[8].mxu0 %v3315_v31  ;;  %1663 = vmatmul.mubr.bf16.gmra.mrb[32].mxu1 %v3188_v59 }
  0x93   :  { %2433 = vmatpush3.bf16.msra.mxu0 %v2911_v44  ;;  %1768 = vmatprep.mubr.bf16.mxu0 %v3086_v30  ;;  %v2921_v30 = vld [vmem:[%s3922_s2 + $0x98] ss:$12 sps:$4 sm:$0xff]   ;;  %v1937_v44 = vld [vmem:[%s3923_s3 + $0x108] sm:$0xff] }
  0x94   :  { %1682 = vmatpush1.bf16.msra.mxu1 %v2907_v43  ;;  %2434 = vmatprep.subr.bf16.mxu0 %v2915_v45  ;;  %v1936_v43 = vld [vmem:[%s3923_s3 + $0x100] sm:$0xff] }
  0x95   :  { %1683 = vmatprep.subr.bf16.mxu1 %v2914_v46  ;;  %1705 = vmatprep.mubr.bf16.mxu1 %v3219_v4  ;;  %v2611_v46 = vpack.c.bf16 %v1907_v42, %v1906_v41 }
  0x97   :  { %2435 = vmatpush3.bf16.msra.mxu0 %v2916_v50 }
  0x98   :  { %1684 = vmatpush1.bf16.msra.mxu1 %v2912_v48  ;;  %2436 = vmatprep.subr.bf16.mxu0 %v2920_v51  ;;  %v2637_v48 = vpack.c.bf16 %v1937_v44, %v1936_v43  ;;  %v1924_v51 = vld [vmem:[%s3923_s3 + $0xa0] sm:$0xff]  ;;  %v1934_v43 = vld [vmem:[%s3923_s3 + $0xf0] sm:$0xff]  ;;  %v1935_v44 = vld [vmem:[%s3923_s3 + $0xf8] sm:$0xff] }
  0x99   :  { %1685 = vmatprep.subr.bf16.mxu1 %v2919_v52  ;;  %v1925_v52 = vld [vmem:[%s3923_s3 + $0xa8] sm:$0xff] }
  0x9b   :  { %2437 = vmatpush3.bf16.msra.mxu0 %v2921_v30 }
  0x9c   :  { %1686 = vmatpush1.bf16.msra.mxu1 %v2917_v53  ;;  %2438 = vmatprep.subr.bf16.mxu0 %v2925_v54  ;;  %v1908_v53 = vld [vmem:[%s3923_s3 + $0x20] sm:$0xff] }
  0x9d   :  { %1687 = vmatprep.subr.bf16.mxu1 %v2924_v55  ;;  %v2613_v55 = vpack.c.bf16 %v1925_v52, %v1924_v51  ;;  %v1948_v51 = vld [vmem:[%s3923_s3 + $0x160] sm:$0xff] }
  0x9f   :  { %2439 = vmatpush3.bf16.msra.mxu0 %v2926_v56  ;;  %v1909_v56 = vld [vmem:[%s3923_s3 + $0x28] sm:$0xff] }
  0xa0   :  { %1688 = vmatpush1.bf16.msra.mxu1 %v2922_v58  ;;  %2458 = vmatprep.subr.bf16.mxu0 %v2930_v60  ;;  %v1938_v58 = vld [vmem:[%s3923_s3 + $0x110] sm:$0xff]  ;;  %v1939_v60 = vld [vmem:[%s3923_s3 + $0x118] sm:$0xff] }
  0xa1   :  { %1689 = vmatprep.subr.bf16.mxu1 %v2929_v61 }
  0xa2   :  { %1769 = vmatmul.mubr.bf16.vlgmr.msra.gmra.mrb[12].mxu0 %v2967_v2  ;;  %v2615_v2 = vpack.c.bf16 %v1909_v56, %v1908_v53 }
  0xa3   :  { %2459 = vmatpush3.bf16.msra.mxu0 %v2931_v62  ;;  %1776 = vmatprep.mubr.bf16.mxu0 %v3144_v47  ;;  %v2941_v47 = vld [vmem:[%s3922_s2 + $0x1b8] ss:$12 sps:$4 sm:$0xff]   ;;  %v2641_v62 = vpack.c.bf16 %v1939_v60, %v1938_v58 }
  0xa4   :  { %1690 = vmatpush1.bf16.msra.mxu1 %v2927_v63  ;;  %2460 = vmatprep.subr.bf16.mxu0 %v2935_v0  ;;  %v1926_v63 = vld [vmem:[%s3923_s3 + $0xb0] sm:$0xff]  ;;  %v1927_v0 = vld [vmem:[%s3923_s3 + $0xb8] sm:$0xff] }
  0xa5   :  { %1691 = vmatprep.subr.bf16.mxu1 %v2934_v1 }
  0xa7   :  { %2461 = vmatpush3.bf16.msra.mxu0 %v2936_v3  ;;  %v1940_v3 = vld [vmem:[%s3923_s3 + $0x120] sm:$0xff] }
  0xa8   :  { %1692 = vmatpush1.bf16.msra.mxu1 %v2932_v5  ;;  %2462 = vmatprep.subr.bf16.mxu0 %v2940_v6  ;;  %v1941_v5 = vld [vmem:[%s3923_s3 + $0x128] sm:$0xff]  ;;  %v2617_v6 = vpack.c.bf16 %v1927_v0, %v1926_v63  ;;  %v1951_v63 = vld [vmem:[%s3923_s3 + $0x178] sm:$0xff] }
  0xa9   :  { %1693 = vmatprep.subr.bf16.mxu1 %v2939_v7  ;;  %v1910_v7 = vld [vmem:[%s3923_s3 + $0x30] sm:$0xff] }
  0xaa   :  { %1777 = vmatmul.mubr.bf16.gmra.mrb[16].mxu0 %v3152_v49  ;;  %v2949_v49 = vld [vmem:[%s3922_s2 + $0x2a4] ss:$12 sps:$4 sm:$0xff]  }
  0xab   :  { %2463 = vmatpush3.bf16.msra.mxu0 %v2941_v47  ;;  %1784 = vmatprep.mubr.bf16.mxu0 %v3180_v57  ;;  %v2951_v57 = vld [vmem:[%s3922_s2 + $0x1e8] ss:$12 sps:$4 sm:$0xff]   ;;  %v1911_v47 = vld [vmem:[%s3923_s3 + $0x38] sm:$0xff] }
  0xac   :  { %1694 = vmatpush1.bf16.msra.mxu1 %v2937_v8  ;;  %2464 = vmatprep.subr.bf16.mxu0 %v2945_v10  ;;  %v2645_v8 = vpack.c.bf16 %v1941_v5, %v1940_v3 }
  0xad   :  { %1695 = vmatprep.subr.bf16.mxu1 %v2944_v11  ;;  %v2619_v11 = vpack.c.bf16 %v1911_v47, %v1910_v7 }
  0xaf   :  { %2465 = vmatpush3.bf16.msra.mxu0 %v2946_v12 }
  0xb0   :  { %1696 = vmatpush1.bf16.msra.mxu1 %v2942_v13  ;;  %2466 = vmatprep.subr.bf16.mxu0 %v2950_v15  ;;  %v1928_v13 = vld [vmem:[%s3923_s3 + $0xc0] sm:$0xff]  ;;  %v1929_v15 = vld [vmem:[%s3923_s3 + $0xc8] sm:$0xff] }
  0xb1   :  { %1697 = vmatprep.subr.bf16.mxu1 %v2949_v49  ;;  %v1912_v49 = vld [vmem:[%s3923_s3 + $0x40] sm:$0xff] }
  0xb2   :  { %1785 = vmatmul.mubr.bf16.gmra.mrb[20].mxu0 %v3188_v59  ;;  %v2959_v59 = vld [vmem:[%s3922_s2 + $0x2d4] ss:$12 sps:$4 sm:$0xff]  }
  0xb3   :  { %2467 = vmatpush3.bf16.msra.mxu0 %v2951_v57  ;;  %1825 = vmatprep.mubr.bf16.mxu0 %v3219_v4  ;;  %v2961_v4 = vld [vmem:[%s3922_s2 + $0x218] ss:$12 sps:$4 sm:$0xff]  }
  0xb4   :  { %1698 = vmatpush1.bf16.msra.mxu1 %v2947_v16  ;;  %2468 = vmatprep.subr.bf16.mxu0 %v2955_v17  ;;  %v2621_v17 = vpack.c.bf16 %v1929_v15, %v1928_v13 }
  0xb5   :  { %1699 = vmatprep.subr.bf16.mxu1 %v2954_v18  ;;  %v1913_v18 = vld [vmem:[%s3923_s3 + $0x48] sm:$0xff] }
  0xb7   :  { %2469 = vmatpush3.bf16.msra.mxu0 %v2956_v19  ;;  %v1942_v19 = vld [vmem:[%s3923_s3 + $0x130] sm:$0xff] }
  0xb8   :  { %1700 = vmatpush1.bf16.msra.mxu1 %v2952_v21  ;;  %2470 = vmatprep.subr.bf16.mxu0 %v2960_v22  ;;  %v1943_v21 = vld [vmem:[%s3923_s3 + $0x138] sm:$0xff] }
  0xb9   :  { %1701 = vmatprep.subr.bf16.mxu1 %v2959_v59  ;;  %v2649_v59 = vpack.c.bf16 %v1943_v21, %v1942_v19 }
  0xbb   :  { %2471 = vmatpush3.bf16.msra.mxu0 %v2961_v4  ;;  %v1930_v4 = vld [vmem:[%s3923_s3 + $0xd0] sm:$0xff] }
  0xbc   :  { %1702 = vmatpush1.bf16.msra.mxu1 %v2957_v23  ;;  %2472 = vmatprep.subr.bf16.mxu0 %v2965_v25  ;;  %v1931_v23 = vld [vmem:[%s3923_s3 + $0xd8] sm:$0xff] }
  0xbd   :  { %1703 = vmatprep.subr.bf16.mxu1 %v2964_v26  ;;  %v2623_v26 = vpack.c.bf16 %v1913_v18, %v1912_v49 }
  0xbf   :  { %2473 = vmatpush3.bf16.msra.mxu0 %v2966_v27  ;;  %v1944_v27 = vld [vmem:[%s3923_s3 + $0x140] sm:$0xff] }
  0xc0   :  { %1704 = vmatpush1.bf16.msra.mxu1 %v2962_v28  ;;  %v1945_v28 = vld [vmem:[%s3923_s3 + $0x148] sm:$0xff] }
  0xc1   :  { %2638 = vmatprep.subr.bf16.mxu1 %v2637_v48 }
  0xc2   :  { %1826 = vmatmul.mubr.bf16.vlgmr.msra.gmra.mrb[24].mxu0 %v3237_v9 }
  0xc3   :  { %1706 = vmatmul.mubr.bf16.vlgmr.msra.gmra.mrb[24].mxu1 %v3237_v9  ;;  %1833 = vmatprep.mubr.bf16.mxu0 %v3254_v14 }
  0xc4   :  { %1715 = vmatprep.mubr.bf16.mxu1 %v3254_v14  ;;  %v1920_v14 = vld [vmem:[%s3923_s3 + $0x80] sm:$0xff]  ;;  %2640 = vmatpush3.bf16.msra.mxu1 %v2637_v48  ;;  %v1918_v48 = vld [vmem:[%s3923_s3 + $0x70] sm:$0xff] }
  0xc5   :  { %2642 = vmatprep.subr.bf16.mxu1 %v2641_v62 }
  0xc8   :  { %2644 = vmatpush3.bf16.msra.mxu1 %v2641_v62  ;;  %v1950_v62 = vld [vmem:[%s3923_s3 + $0x170] sm:$0xff] }
  0xc9   :  { %2646 = vmatprep.subr.bf16.mxu1 %v2645_v8 }
  0xca   :  { %1834 = vmatmul.mubr.bf16.gmra.mrb[28].mxu0 %v3278_v20 }
  0xcb   :  { %1716 = vmatmul.mubr.bf16.gmra.mrb[28].mxu1 %v3278_v20  ;;  %1841 = vmatprep.mubr.bf16.mxu0 %v3292_v24  ;;  %v1921_v20 = vld [vmem:[%s3923_s3 + $0x88] sm:$0xff] }
  0xcc   :  { %1725 = vmatprep.mubr.bf16.mxu1 %v3292_v24  ;;  %v1904_v24 = vld [vmem:[%s3923_s3] sm:$0xff]  ;;  %2648 = vmatpush3.bf16.msra.mxu1 %v2645_v8 }
  0xcd   :  { %v2607_v39 = vpack.c.bf16 %v1905_v36, %v1904_v24  ;;  %2650 = vmatprep.subr.bf16.mxu1 %v2649_v59  ;;  %v1916_v36 = vld [vmem:[%s3923_s3 + $0x60] sm:$0xff] }
  0xd0   :  { %2652 = vmatpush3.bf16.msra.mxu1 %v2649_v59 }
  0xd2   :  { %1842 = vmatmul.mubr.bf16.gmra.mrb[32].mxu0 %v3315_v31 }
  0xd3   :  { %1726 = vmatmul.mubr.bf16.gmra.mrb[32].mxu1 %v3315_v31  ;;  %v2605_v31 = vpack.c.bf16 %v1921_v20, %v1920_v14  ;;  %v1932_v14 = vld [vmem:[%s3923_s3 + $0xe0] sm:$0xff]  ;;  %v1933_v20 = vld [vmem:[%s3923_s3 + $0xe8] sm:$0xff] }
  0xd5   :  { %2606 = vmatprep.subr.bf16.mxu0 %v2605_v31  ;;  %v2629_v31 = vpack.c.bf16 %v1933_v20, %v1932_v14 }
  0xd6   :  { %2608 = vmatpush3.bf16.msra.mxu0 %v2607_v39  ;;  %v2631_v39 = vpack.c.bf16 %v1917_v37, %v1916_v36 }
  0xd7   :  { %2610 = vmatprep.subr.bf16.mxu0 %v2609_v40  ;;  %v1947_v40 = vld [vmem:[%s3923_s3 + $0x158] sm:$0xff] }
  0xd8   :  { %v2657_v41 = vpack.c.bf16 %v1947_v40, %v1946_v38 }
  0xda   :  { %2612 = vmatpush3.bf16.msra.mxu0 %v2611_v46  ;;  %v2633_v46 = vpack.c.bf16 %v1935_v44, %v1934_v43 }
  0xdb   :  { %2614 = vmatprep.subr.bf16.mxu0 %v2613_v55  ;;  %v1949_v55 = vld [vmem:[%s3923_s3 + $0x168] sm:$0xff] }
  0xdc   :  { %v2661_v58 = vpack.c.bf16 %v1949_v55, %v1948_v51 }
  0xde   :  { %2616 = vmatpush3.bf16.msra.mxu0 %v2615_v2  ;;  %v2665_v2 = vpack.c.bf16 %v1951_v63, %v1950_v62 }
  0xdf   :  { %2618 = vmatprep.subr.bf16.mxu0 %v2617_v6 }
  0xe2   :  { %2620 = vmatpush3.bf16.msra.mxu0 %v2619_v11 }
  0xe3   :  { %2622 = vmatprep.subr.bf16.mxu0 %v2621_v17 }
  0xe6   :  { %2624 = vmatpush3.bf16.msra.mxu0 %v2623_v26 }
  0xf5   :  { %v2372_v29 = vpop.f32.mrb[0].mxu1 }
  0xf6   :  { %v2373_v32 = vpop.f32.mrb[1].mxu1 }
  0xf7   :  { %v3679_v33 = vadd.f32 %v2373_v32, %v2372_v29  ;;  %v2375_v9 = vpop.f32.mrb[2].mxu1  ;;  %v2625_v29 = vpack.c.bf16 %v1931_v23, %v1930_v4  ;;  %v1914_v32 = vld [vmem:[%s3923_s3 + $0x50] sm:$0xff] }
  0xf8   :  { %v2376_v34 = vpop.f32.mrb[3].mxu1 }
  0xf9   :  { %v3681_v35 = vadd.f32 %v2376_v34, %v2375_v9  ;;  %v1915_v9 = vld [vmem:[%s3923_s3 + $0x58] sm:$0xff]  ;;  %v2653_v34 = vpack.c.bf16 %v1945_v28, %v1944_v27  ;;  %2626 = vmatprep.subr.bf16.mxu0 %v2625_v29 }
  0xfa   :  { %v2627_v24 = vpack.c.bf16 %v1915_v9, %v1914_v32 }
  0xfb   :  { %2654 = vmatprep.subr.bf16.mxu1 %v2653_v34 }
  0xfc   :  { %2656 = vmatpush3.bf16.msra.mxu1 %v2653_v34  ;;  %2628 = vmatpush3.bf16.msra.mxu0 %v2627_v24 }
  0xfd   :  { %v2378_v45 = vpop.f32.mrb[4].mxu1  ;;  %2630 = vmatprep.subr.bf16.mxu0 %v2629_v31  ;;  %2658 = vmatprep.subr.bf16.mxu1 %v2657_v41 }
  0xfe   :  { %v2379_v50 = vpop.f32.mrb[5].mxu1 }
  0xff   :  { %v3722_v30 = vadd.f32 %v2379_v50, %v2378_v45  ;;  %v2381_v54 = vpop.f32.mrb[6].mxu1  ;;  %v1919_v50 = vld [vmem:[%s3923_s3 + $0x78] sm:$0xff] }
 0x100   :  { %v2382_v61 = vpop.f32.mrb[7].mxu1  ;;  %2632 = vmatpush3.bf16.msra.mxu0 %v2631_v39  ;;  %2660 = vmatpush3.bf16.msra.mxu1 %v2657_v41 }
 0x101   :  { %v3739_v1 = vadd.f32 %v2382_v61, %v2381_v54  ;;  %v2635_v54 = vpack.c.bf16 %v1919_v50, %v1918_v48  ;;  %2634 = vmatprep.subr.bf16.mxu0 %v2633_v46  ;;  %2662 = vmatprep.subr.bf16.mxu1 %v2661_v58 }
 0x104   :  { %2636 = vmatpush3.bf16.msra.mxu0 %v2635_v54  ;;  %2664 = vmatpush3.bf16.msra.mxu1 %v2661_v58 }
 0x105   :  { %v2384_v10 = vpop.f32.mrb[8].mxu1  ;;  %2666 = vmatprep.subr.bf16.mxu1 %v2665_v2 }
 0x106   :  { %v2385_v12 = vpop.f32.mrb[9].mxu1 }
 0x107   :  { %v3762_v57 = vadd.f32 %v2385_v12, %v2384_v10  ;;  %v2387_v16 = vpop.f32.mrb[10].mxu1 }
 0x108   :  { %v2388_v22 = vpop.f32.mrb[11].mxu1  ;;  %2668 = vmatpush3.bf16.msra.mxu1 %v2665_v2 }
 0x109   :  { %v3779_v25 = vadd.f32 %v2388_v22, %v2387_v16 }
 0x115   :  { %v2406_v42 = vpop.f32.mrb[12].mxu1 }
 0x116   :  { %v2407_v45 = vpop.f32.mrb[13].mxu1 }
 0x117   :  { %v2408_v52 = vadd.f32 %v2407_v45, %v2406_v42  ;;  %v2409_v53 = vpop.f32.mrb[14].mxu1 }
 0x118   :  { %v2410_v56 = vpop.f32.mrb[15].mxu1 }
 0x119   :  { %v3830_v60 = vadd.f32 %v2408_v52, %v3679_v33  ;;  %v2411_v61 = vadd.f32 %v2410_v56, %v2409_v53 }
 0x11b   :  { %v3839_v0 = vadd.f32 %v2411_v61, %v3681_v35 }
 0x11d   :  { %v2412_v3 = vpop.f32.mrb[16].mxu1 }
 0x11e   :  { %v2413_v33 = vpop.f32.mrb[17].mxu1 }
 0x11f   :  { %v2414_v5 = vadd.f32 %v2413_v33, %v2412_v3  ;;  %v2415_v6 = vpop.f32.mrb[18].mxu1 }
 0x120   :  { %v2416_v7 = vpop.f32.mrb[19].mxu1 }
 0x121   :  { %v3842_v47 = vadd.f32 %v2414_v5, %v3722_v30  ;;  %v2417_v8 = vadd.f32 %v2416_v7, %v2415_v6 }
 0x123   :  { %v3845_v10 = vadd.f32 %v2417_v8, %v3739_v1  ;;  %v1852_v8 = vmul.f32 %v3830_v60, %v3830_v60 }
 0x125   :  { %v2418_v11 = vpop.f32.mrb[20].mxu1 }
 0x126   :  { %v2419_v12 = vpop.f32.mrb[21].mxu1 }
 0x127   :  { %v2420_v35 = vadd.f32 %v2419_v12, %v2418_v11  ;;  %v2421_v13 = vpop.f32.mrb[22].mxu1 }
 0x128   :  { %v2422_v15 = vpop.f32.mrb[23].mxu1 }
 0x129   :  { %v3848_v49 = vadd.f32 %v2420_v35, %v3762_v57  ;;  %v2423_v16 = vadd.f32 %v2422_v15, %v2421_v13  ;;  %v1855_v15 = vmul.f32 %v3839_v0, %v3839_v0 }
 0x12b   :  { %v3851_v17 = vadd.f32 %v2423_v16, %v3779_v25 }
 0x155   :  { %v827_v18 = vpop.f32.mrb[0].mxu0 }
 0x156   :  { %v829_v19 = vpop.f32.mrb[1].mxu0  ;;  %v1850_v48 = vmul.f32 %v827_v18, %v827_v18 }
 0x157   :  { %v831_v30 = vpop.f32.mrb[2].mxu0  ;;  %v1851_v54 = vmul.f32 %v829_v19, %v829_v19 }
 0x158   :  { %v833_v21 = vpop.f32.mrb[3].mxu0  ;;  %v1853_v55 = vmul.f32 %v831_v30, %v831_v30 }
 0x159   :  { %v1854_v5 = vmul.f32 %v833_v21, %v833_v21 }
 0x15d   :  { %v837_v22 = vpop.f32.mrb[4].mxu0 }
 0x15e   :  { %v3853_v59 = vpop.f32.mrb[5].mxu0 }
 0x15f   :  { %v3855_v1 = vpop.f32.mrb[6].mxu0 }
 0x160   :  { %v3857_v4 = vpop.f32.mrb[7].mxu0  ;;  %v1859_v0 = vmul.f32 %v3855_v1, %v3855_v1 }
 0x165   :  { %v3859_v23 = vpop.f32.mrb[8].mxu0 }
 0x166   :  { %v3861_v26 = vpop.f32.mrb[9].mxu0 }
 0x167   :  { %v3863_v57 = vpop.f32.mrb[10].mxu0 }
 0x168   :  { %v3865_v27 = vpop.f32.mrb[11].mxu0 }
 0x175   :  { %v2440_v25 = vpop.f32.mrb[12].mxu0 }
 0x176   :  { %v2441_v28 = vpop.f32.mrb[13].mxu0 }
 0x177   :  { %v2442_v29 = vadd.f32 %v2441_v28, %v2440_v25  ;;  %v2443_v32 = vpop.f32.mrb[14].mxu0  ;;  %v1856_v25 = vmul.f32 %v837_v22, %v837_v22 }
 0x178   :  { %v2444_v9 = vpop.f32.mrb[15].mxu0 }
 0x179   :  { %v2445_v34 = vadd.f32 %v2444_v9, %v2443_v32 }
 0x17d   :  { %v2446_v14 = vpop.f32.mrb[16].mxu0 }
 0x17e   :  { %v2447_v20 = vpop.f32.mrb[17].mxu0 }
 0x17f   :  { %v2448_v24 = vadd.f32 %v2447_v20, %v2446_v14  ;;  %v2449_v31 = vpop.f32.mrb[18].mxu0 }
 0x180   :  { %v2450_v36 = vpop.f32.mrb[19].mxu0 }
 0x181   :  { %v3867_v37 = vadd.f32 %v2450_v36, %v2449_v31 }
 0x185   :  { %v2452_v38 = vpop.f32.mrb[20].mxu0 }
 0x186   :  { %v2453_v39 = vpop.f32.mrb[21].mxu0 }
 0x187   :  { %v3869_v40 = vadd.f32 %v2453_v39, %v2452_v38  ;;  %v2455_v41 = vpop.f32.mrb[22].mxu0 }
 0x188   :  { %v2456_v42 = vpop.f32.mrb[23].mxu0 }
 0x189   :  { %v3871_v43 = vadd.f32 %v2456_v42, %v2455_v41  ;;  %v1860_v42 = vmul.f32 %v3857_v4, %v3857_v4 }
 0x195   :  { %v2474_v44 = vpop.f32.mrb[24].mxu0 }
 0x196   :  { %v1707_v45 = vpop.f32.mrb[24].mxu1  ;;  %v2475_v46 = vpop.f32.mrb[25].mxu0 }
 0x197   :  { %v1868_v50 = vmul.f32 %v1707_v45, %v1707_v45  ;;  %v1709_v51 = vpop.f32.mrb[25].mxu1  ;;  %v2476_v52 = vadd.f32 %v2475_v46, %v2474_v44  ;;  %v2477_v53 = vpop.f32.mrb[26].mxu0 }
 0x198   :  { %v1869_v56 = vmul.f32 %v1709_v51, %v1709_v51  ;;  %v1711_v58 = vpop.f32.mrb[26].mxu1  ;;  %v2478_v61 = vpop.f32.mrb[27].mxu0 }
 0x199   :  { %v1886_v62 = vadd.f32 %v1868_v50, %v1850_v48  ;;  %v1828_v63 = vadd.f32 %v2476_v52, %v2442_v29  ;;  %v1871_v2 = vmul.f32 %v1711_v58, %v1711_v58  ;;  %v1713_v3 = vpop.f32.mrb[27].mxu1  ;;  %v2479_v33 = vadd.f32 %v2478_v61, %v2477_v53 }
 0x19a   :  { %v1887_v6 = vadd.f32 %v1869_v56, %v1851_v54  ;;  %v1872_v7 = vmul.f32 %v1713_v3, %v1713_v3 }
 0x19b   :  { %v1870_v11 = vmul.f32 %v1828_v63, %v1828_v63  ;;  %v1889_v12 = vadd.f32 %v1871_v2, %v1853_v55  ;;  %v1831_v35 = vadd.f32 %v2479_v33, %v2445_v34  ;;  %v1857_v34 = vmul.f32 %v3853_v59, %v3853_v59 }
 0x19c   :  { %v1890_v13 = vadd.f32 %v1872_v7, %v1854_v5  ;;  %2016 = vmatprep.mubr.f32.mxu0 %v1887_v6  ;;  %v1858_v59 = vmul.f32 %v3842_v47, %v3842_v47  ;;  %v1862_v55 = vmul.f32 %v3859_v23, %v3859_v23 }
 0x19d   :  { %v1873_v16 = vmul.f32 %v1831_v35, %v1831_v35  ;;  %2017 = vmatmul.mubr.f32.vlgmr.msra.gmra.mrb[36].mxu0 %v1886_v62  ;;  %v2480_v18 = vpop.f32.mrb[28].mxu0  ;;  %v1888_v19 = vadd.f32 %v1870_v11, %v1852_v8  ;;  %v1863_v62 = vmul.f32 %v3861_v26, %v3861_v26  ;;  %v1866_v8 = vmul.f32 %v3865_v27, %v3865_v27 }
 0x19e   :  { %v1717_v30 = vpop.f32.mrb[28].mxu1  ;;  %2021 = vmatprep.mubr.f32.mxu0 %v1890_v13  ;;  %v2481_v21 = vpop.f32.mrb[29].mxu0  ;;  %v1864_v26 = vmul.f32 %v3848_v49, %v3848_v49 }
 0x19f   :  { %v1891_v28 = vadd.f32 %v1873_v16, %v1855_v15  ;;  %v1874_v29 = vmul.f32 %v1717_v30, %v1717_v30  ;;  %v1719_v32 = vpop.f32.mrb[29].mxu1  ;;  %v2482_v60 = vadd.f32 %v2481_v21, %v2480_v18  ;;  %v2483_v9 = vpop.f32.mrb[30].mxu0  ;;  %2596 = vmatprep.mubr.f32.mxu1 %v1888_v19 }
 0x1a0   :  { %v1875_v14 = vmul.f32 %v1719_v32, %v1719_v32  ;;  %v1721_v20 = vpop.f32.mrb[30].mxu1  ;;  %v2484_v31 = vpop.f32.mrb[31].mxu0 }
 0x1a1   :  { %v1892_v36 = vadd.f32 %v1874_v29, %v1856_v25  ;;  %v1836_v38 = vadd.f32 %v2482_v60, %v2448_v24  ;;  %v1877_v39 = vmul.f32 %v1721_v20, %v1721_v20  ;;  %v1723_v41 = vpop.f32.mrb[31].mxu1  ;;  %v2485_v22 = vadd.f32 %v2484_v31, %v2483_v9  ;;  %2022 = vmatmul.mubr.f32.gmra.mrb[38].mxu0 %v1889_v12 }
 0x1a2   :  { %v1893_v44 = vadd.f32 %v1875_v14, %v1857_v34  ;;  %v1878_v45 = vmul.f32 %v1723_v41, %v1723_v41  ;;  %2597 = vmatmul.mubr.f32.vlgmr.msra.gmra.mrb[36].mxu1 %v1891_v28  ;;  %v1861_v24 = vmul.f32 %v3845_v10, %v3845_v10  ;;  %v1865_v10 = vmul.f32 %v3863_v57, %v3863_v57 }
 0x1a3   :  { %v1876_v46 = vmul.f32 %v1836_v38, %v1836_v38  ;;  %v1895_v1 = vadd.f32 %v1877_v39, %v1859_v0  ;;  %v1839_v48 = vadd.f32 %v2485_v22, %v3867_v37 }
 0x1a4   :  { %v1896_v50 = vadd.f32 %v1878_v45, %v1860_v42  ;;  %2026 = vmatprep.mubr.f32.mxu0 %v1893_v44 }
 0x1a5   :  { %v1879_v51 = vmul.f32 %v1839_v48, %v1839_v48  ;;  %2027 = vmatmul.mubr.f32.gmra.mrb[40].mxu0 %v1892_v36  ;;  %v2486_v52 = vpop.f32.mrb[32].mxu0  ;;  %v1894_v53 = vadd.f32 %v1876_v46, %v1858_v59 }
 0x1a6   :  { %v1727_v4 = vpop.f32.mrb[32].mxu1  ;;  %2031 = vmatprep.mubr.f32.mxu0 %v1896_v50  ;;  %v2487_v54 = vpop.f32.mrb[33].mxu0 }
 0x1a7   :  { %v1880_v47 = vmul.f32 %v1727_v4, %v1727_v4  ;;  %v1729_v56 = vpop.f32.mrb[33].mxu1  ;;  %v2488_v58 = vadd.f32 %v2487_v54, %v2486_v52  ;;  %v2489_v61 = vpop.f32.mrb[34].mxu0  ;;  %2599 = vmatprep.mubr.f32.mxu1 %v1894_v53  ;;  %v1897_v37 = vadd.f32 %v1879_v51, %v1861_v24 }
 0x1a8   :  { %v1881_v63 = vmul.f32 %v1729_v56, %v1729_v56  ;;  %v1731_v2 = vpop.f32.mrb[34].mxu1  ;;  %v2490_v3 = vpop.f32.mrb[35].mxu0 }
 0x1a9   :  { %v1898_v33 = vadd.f32 %v1880_v47, %v1862_v55  ;;  %v1844_v5 = vadd.f32 %v2488_v58, %v3869_v40  ;;  %v1883_v6 = vmul.f32 %v1731_v2, %v1731_v2  ;;  %v1733_v23 = vpop.f32.mrb[35].mxu1  ;;  %v2491_v7 = vadd.f32 %v2490_v3, %v2489_v61  ;;  %2032 = vmatmul.mubr.f32.gmra.mrb[42].mxu0 %v1895_v1 }
 0x1aa   :  { %v1899_v11 = vadd.f32 %v1881_v63, %v1863_v62  ;;  %v1884_v12 = vmul.f32 %v1733_v23, %v1733_v23  ;;  %2600 = vmatmul.mubr.f32.gmra.mrb[38].mxu1 %v1897_v37  ;;  %v1867_v40 = vmul.f32 %v3851_v17, %v3851_v17 }
 0x1ab   :  { %v1882_v57 = vmul.f32 %v1844_v5, %v1844_v5  ;;  %v1901_v35 = vadd.f32 %v1883_v6, %v1865_v10  ;;  %v1847_v13 = vadd.f32 %v2491_v7, %v3871_v43 }
 0x1ac   :  { %v1902_v15 = vadd.f32 %v1884_v12, %v1866_v8  ;;  %2036 = vmatprep.mubr.f32.mxu0 %v1899_v11 }
 0x1ad   :  { %v1885_v16 = vmul.f32 %v1847_v13, %v1847_v13  ;;  %2037 = vmatmul.mubr.f32.gmra.mrb[44].mxu0 %v1898_v33  ;;  %v1900_v18 = vadd.f32 %v1882_v57, %v1864_v26 }
 0x1ae   :  { %2041 = vmatprep.mubr.f32.mxu0 %v1902_v15 }
 0x1af   :  { %2602 = vmatprep.mubr.f32.mxu1 %v1900_v18  ;;  %v1903_v27 = vadd.f32 %v1885_v16, %v1867_v40 }
 0x1b1   :  { %2042 = vmatmul.mubr.f32.gmra.mrb[46].mxu0 %v1901_v35  ;;  %2603 = vmatmul.mubr.f32.gmra.mrb[40].mxu1 %v1903_v27 }
 0x270   :  { %v2524_v19 = vpop.f32.mrb[36].mxu0 }
 0x271   :  { %v2525_v30 = vpop.f32.mrb[37].mxu0 }
 0x272   :  { %v2526_v49 = vadd.f32 %v2525_v30, %v2524_v19 }
 0x274   :  { %v2527_v21 = vpop.f32.mrb[38].mxu0 }
 0x275   :  { %v2528_v25 = vpop.f32.mrb[39].mxu0  ;;  %v2598_v28 = vpop.f32.mrb[36].mxu1 }
 0x276   :  { %v2529_v43 = vadd.f32 %v2528_v25, %v2527_v21  ;;  %v2113_v29 = vpop.f32.mrb[37].mxu1 }
 0x277   :  { %v2114_v32 = vadd.f32 %v2526_v49, %v2113_v29 }
 0x278   :  { %v2119_v60 = vadd.f32 %v2598_v28, %v2529_v43  ;;  %v2530_v9 = vpop.f32.mrb[40].mxu0 }
 0x279   :  { %2142 = vst [vmem:[%s3924_s4] sm:$0xff] %v2114_v32  ;;  %v2531_v17 = vpop.f32.mrb[41].mxu0 }
 0x27a   :  { %2143 = vst [vmem:[%s3924_s4 + $0x8] sm:$0xff] %v2119_v60  ;;  %v2532_v34 = vadd.f32 %v2531_v17, %v2530_v9 }
 0x27c   :  { %v2533_v0 = vpop.f32.mrb[42].mxu0 }
 0x27d   :  { %v2534_v14 = vpop.f32.mrb[43].mxu0  ;;  %v2601_v20 = vpop.f32.mrb[38].mxu1 }
 0x27e   :  { %v2535_v31 = vadd.f32 %v2534_v14, %v2533_v0  ;;  %v2123_v36 = vpop.f32.mrb[39].mxu1 }
 0x27f   :  { %v2124_v38 = vadd.f32 %v2532_v34, %v2123_v36 }
 0x280   :  { %v2129_v39 = vadd.f32 %v2601_v20, %v2535_v31  ;;  %v2536_v41 = vpop.f32.mrb[44].mxu0 }
 0x281   :  { %2144 = vst [vmem:[%s3924_s4 + $0x10] sm:$0xff] %v2124_v38  ;;  %v2537_v22 = vpop.f32.mrb[45].mxu0 }
 0x282   :  { %2145 = vst [vmem:[%s3924_s4 + $0x18] sm:$0xff] %v2129_v39  ;;  %v2538_v42 = vadd.f32 %v2537_v22, %v2536_v41 }
 0x284   :  { %v2539_v44 = vpop.f32.mrb[46].mxu0  ;;  %v2604_v45 = vpop.f32.mrb[40].mxu1 }
 0x285   :  { %v2540_v59 = vpop.f32.mrb[47].mxu0  ;;  %v2133_v46 = vpop.f32.mrb[41].mxu1 }
 0x286   :  { %v2541_v1 = vadd.f32 %v2540_v59, %v2539_v44  ;;  %v2134_v48 = vadd.f32 %v2538_v42, %v2133_v46 }
 0x288   :  { %v2139_v50 = vadd.f32 %v2604_v45, %v2541_v1  ;;  %2146 = vst [vmem:[%s3924_s4 + $0x20] sm:$0xff] %v2134_v48 }
 0x28a   :  { %2147 = vst [vmem:[%s3924_s4 + $0x28] sm:$0xff] %v2139_v50 }

// kernel: ecapa_forward.35
= control target key start
LH: loop header
LB: loop body
LE: loop exit
PB: predicated region body
PF: predicated region fallthrough
CT: control target
= control target key end

     0   :  { %s856_s12 = smov 0   ;;  %s961_s0 = inlined_call_operand.vmem [shape: bf16[2,28,128], index: 0, kind: input, shape index: {}]   ;;  %s962_s1 = inlined_call_operand.vmem [shape: bf16[3,128,128], index: 1, kind: input, shape index: {}]   ;;  %s963_s2 = inlined_call_operand.vmem [shape: f32[1,128], index: 2, kind: input, shape index: {}]   ;;  %s964_s3 = inlined_call_operand.vmem [shape: f32[2,24,128], index: 3, kind: output, shape index: {}]  }
   0x1 LB: > { %s625_s13 = sadd.s32 4294967295, %s834_s12   ;;  %p629_p0 = scmp.ge.s32.totalorder %s834_s12, 1  ;;  %s834_s12 = sphi %s856_s12, %s13_s12  }
   0x2   : > { %p137_p1 = scmp.lt.s32.totalorder %s834_s12, 3 }
   0x4   : > { %p138_p2 = pnand %p629_p0, %p137_p1 }
   0x5   : > { %v798_v0 = vld [vmem:[%s962_s1 + $0x40] sm:$0xff] (!%p138_p2)   ;;  %v800_v2 = vld [vmem:[%s962_s1 + $0x48] sm:$0xff] (!%p138_p2)   ;;  %p161_p3 = scmp.lt.s32.totalorder (!%p138_p2), %s625_s13, 1  ;;  %v802_v4 = vld [vmem:[%s962_s1 + $0x50] sm:$0xff] (!%p138_p2)   ;;  %vm220_vm0 = vcmask (!%p138_p2), 1046528   ;;  %vm449_vm1 = vcmask (!%p138_p2), 1045504  }
   0x6   : > { %141 = sbr.rel (%p138_p2) target bundleno = 292 (0x124), region = 32  ;;  %v799_v1 = vld [vmem:[%s962_s1] sm:$0xff] (!%p138_p2)   ;;  %729 = vmatprep.subr.bf16.mxu0 (!%p138_p2), %v798_v0  ;;  %v801_v3 = vld [vmem:[%s962_s1 + $0x8] sm:$0xff] (!%p138_p2)   ;;  %v803_v5 = vld [vmem:[%s962_s1 + $0x10] sm:$0xff] (!%p138_p2)  }
   0x7   : > { %749 = vmatprep.subr.bf16.mxu1 (!%p138_p2), %v799_v1  ;;  %730 = vmatpush3.bf16.msra.mxu0 (!%p138_p2), %v798_v0  ;;  %v804_v6 = vld [vmem:[%s962_s1 + $0x58] sm:$0xff] (!%p138_p2)   ;;  %v806_v8 = vld [vmem:[%s962_s1 + $0x60] sm:$0xff] (!%p138_p2)   ;;  %v808_v10 = vld [vmem:[%s962_s1 + $0x68] sm:$0xff] (!%p138_p2)  }
   0x8   : > { %750 = vmatpush3.bf16.msra.mxu1 (!%p138_p2), %v799_v1  ;;  %731 = vmatprep.subr.bf16.mxu0 (!%p138_p2), %v800_v2  ;;  %v805_v7 = vld [vmem:[%s962_s1 + $0x18] sm:$0xff] (!%p138_p2)   ;;  %v807_v9 = vld [vmem:[%s962_s1 + $0x20] sm:$0xff] (!%p138_p2)   ;;  %v809_v11 = vld [vmem:[%s962_s1 + $0x28] sm:$0xff] (!%p138_p2)  }
   0x9   : > { %751 = vmatprep.subr.bf16.mxu1 (!%p138_p2), %v801_v3  ;;  %v810_v21 = vld [vmem:[%s962_s1 + $0x70] sm:$0xff] (!%p138_p2)   ;;  %v812_v25 = vld [vmem:[%s962_s1 + $0x78] sm:$0xff] (!%p138_p2)   ;;  %v818_v31 = vld [vmem:[%s962_s1 + $0x80] sm:$0xff] (!%p138_p2)  }
   0xa   : > { %v811_v23 = vld [vmem:[%s962_s1 + $0x30] sm:$0xff] (!%p138_p2)   ;;  %v813_v26 = vld [vmem:[%s962_s1 + $0x38] sm:$0xff] (!%p138_p2)   ;;  %v819_v35 = vld [vmem:[%s962_s1 + $0x88] sm:$0xff] (!%p138_p2)  }
   0xb   : > { %732 = vmatpush3.bf16.msra.mxu0 (!%p138_p2), %v800_v2  ;;  %v820_v37 = vld [vmem:[%s962_s1 + $0x90] sm:$0xff] (!%p138_p2)   ;;  %v821_v38 = vld [vmem:[%s962_s1 + $0x98] sm:$0xff] (!%p138_p2)   ;;  %v822_v39 = vld [vmem:[%s962_s1 + $0xa0] sm:$0xff] (!%p138_p2)  }
   0xc   : > { %752 = vmatpush3.bf16.msra.mxu1 (!%p138_p2), %v801_v3  ;;  %733 = vmatprep.subr.bf16.mxu0 (!%p138_p2), %v802_v4  ;;  %v823_v40 = vld [vmem:[%s962_s1 + $0xa8] sm:$0xff] (!%p138_p2)   ;;  %v824_v41 = vld [vmem:[%s962_s1 + $0xb0] sm:$0xff] (!%p138_p2)   ;;  %v825_v42 = vld [vmem:[%s962_s1 + $0xb8] sm:$0xff] (!%p138_p2)  }
   0xd   : > { %s966_s13 = smov (!%p161_p3, %s625_s13), 1  ;;  %753 = vmatprep.subr.bf16.mxu1 %v803_v5  ;;  %v695_v55 = vld [vmem:[%s963_s2] ss:$0 sm:$0xff] }
   0xe   : > { %s698_s30 = sshll.u32 %s966_s13, 4  ;;  %s789_s16 = smul.u32 24, %s966_s13 }
   0xf   : > { %734 = vmatpush3.bf16.msra.mxu0 %v802_v4  ;;  %s900_s10 = scalar_lea.vmem %s961_s0, %s698_s30 }
  0x10   : > { %754 = vmatpush3.bf16.msra.mxu1 %v803_v5  ;;  %735 = vmatprep.subr.bf16.mxu0 %v804_v6  ;;  %v173_v12 = vld [vmem:[%s900_s10 + $0x4] sm:$0xf]  ;;  %v174_v13 = vld [vmem:[%s900_s10 + $0x8] sm:$0xf]  ;;  %v191_v14 = vld [vmem:[%s900_s10] sm:$0xe]  ;;  %s170_s21 = scalar_lea.vmem %s964_s3, %s789_s16 }
  0x11   : > { %755 = vmatprep.subr.bf16.mxu1 %v805_v7  ;;  %v192_v15 = vld [vmem:[%s900_s10 + $0xc] sm:$0x1]  ;;  %v649_v16 = vcombine.low %v191_v14, %v173_v12  ;;  %v172_v17 = vld [vmem:[%s900_s10] sm:$0xf]  ;;  %v660_v34 = vcombine.low %v174_v13, %v174_v13 }
  0x12   : > { %v650_v18 = vcombine.low %v174_v13, %v192_v15  ;;  %v659_v19 = vcombine.low %v172_v17, %v173_v12  ;;  %v424_v27 = vld [vmem:[%s900_s10] sm:$0xc]  ;;  %v425_v28 = vld [vmem:[%s900_s10 + $0xc] sm:$0x3] }
  0x13   : > { %736 = vmatpush3.bf16.msra.mxu0 %v804_v6  ;;  %v221_v20 = vrot.slane %v649_v16, 1  ;;  %v685_v29 = vcombine.low %v424_v27, %v173_v12  ;;  %v686_v30 = vcombine.low %v174_v13, %v425_v28 }
  0x14   : > { %756 = vmatpush3.bf16.msra.mxu1 %v805_v7  ;;  %737 = vmatprep.subr.bf16.mxu0 %v806_v8  ;;  %v222_v22 = vrot.slane %v650_v18, 1 }
  0x15   : > { %757 = vmatprep.subr.bf16.mxu1 %v807_v9  ;;  %765 = vmatprep.mubr.bf16.mxu1 %v659_v19  ;;  %v450_v32 = vrot.slane %v685_v29, 2  ;;  %v451_v33 = vrot.slane %v686_v30, 2 }
  0x16   : > { %v223_v24 = vsel %vm220_vm0, %v221_v20, %v222_v22 }
  0x17   : > { %738 = vmatpush3.bf16.msra.mxu0 %v806_v8  ;;  %745 = vmatprep.mubr.bf16.mxu0 %v223_v24  ;;  %v452_v36 = vsel %vm449_vm1, %v450_v32, %v451_v33 }
  0x18   : > { %758 = vmatpush3.bf16.msra.mxu1 %v807_v9  ;;  %739 = vmatprep.subr.bf16.mxu0 %v808_v10 }
  0x19   : > { %759 = vmatprep.subr.bf16.mxu1 %v809_v11 }
  0x1b   : > { %740 = vmatpush3.bf16.msra.mxu0 %v808_v10 }
  0x1c   : > { %760 = vmatpush3.bf16.msra.mxu1 %v809_v11  ;;  %741 = vmatprep.subr.bf16.mxu0 %v810_v21 }
  0x1d   : > { %761 = vmatprep.subr.bf16.mxu1 %v811_v23 }
  0x1f   : > { %742 = vmatpush3.bf16.msra.mxu0 %v810_v21 }
  0x20   : > { %762 = vmatpush3.bf16.msra.mxu1 %v811_v23  ;;  %743 = vmatprep.subr.bf16.mxu0 %v812_v25 }
  0x21   : > { %763 = vmatprep.subr.bf16.mxu1 %v813_v26 }
  0x23   : > { %744 = vmatpush3.bf16.msra.mxu0 %v812_v25 }
  0x24   : > { %764 = vmatpush3.bf16.msra.mxu1 %v813_v26  ;;  %769 = vmatprep.subr.bf16.mxu0 %v818_v31 }
  0x26   : > { %746 = vmatmul.mubr.bf16.vlgmr.msra.gmra.mrb[0].mxu0 %v222_v22 }
  0x27   : > { %766 = vmatmul.mubr.bf16.vlgmr.msra.gmra.mrb[0].mxu1 %v660_v34  ;;  %770 = vmatpush3.bf16.msra.mxu0 %v818_v31 }
  0x28   : > { %771 = vmatprep.subr.bf16.mxu0 %v819_v35  ;;  %785 = vmatprep.mubr.bf16.mxu0 %v452_v36 }
  0x2b   : > { %772 = vmatpush3.bf16.msra.mxu0 %v819_v35 }
  0x2c   : > { %773 = vmatprep.subr.bf16.mxu0 %v820_v37 }
  0x2f   : > { %774 = vmatpush3.bf16.msra.mxu0 %v820_v37 }
  0x30   : > { %775 = vmatprep.subr.bf16.mxu0 %v821_v38 }
  0x33   : > { %776 = vmatpush3.bf16.msra.mxu0 %v821_v38 }
  0x34   : > { %777 = vmatprep.subr.bf16.mxu0 %v822_v39 }
  0x37   : > { %778 = vmatpush3.bf16.msra.mxu0 %v822_v39 }
  0x38   : > { %779 = vmatprep.subr.bf16.mxu0 %v823_v40 }
  0x3b   : > { %780 = vmatpush3.bf16.msra.mxu0 %v823_v40 }
  0x3c   : > { %781 = vmatprep.subr.bf16.mxu0 %v824_v41 }
  0x3f   : > { %782 = vmatpush3.bf16.msra.mxu0 %v824_v41 }
  0x40   : > { %783 = vmatprep.subr.bf16.mxu0 %v825_v42 }
  0x43   : > { %784 = vmatpush3.bf16.msra.mxu0 %v825_v42 }
  0x46   : > { %786 = vmatmul.mubr.bf16.vlgmr.msra.gmra.mrb[4].mxu0 %v451_v33 }
  0xf9   : > { %v747_v43 = vpop.f32.mrb[0].mxu0 }
  0xfa   : > { %v767_v44 = vpop.f32.mrb[0].mxu1  ;;  %v308_v45 = vpop.f32.mrb[1].mxu0 }
  0xfb   : > { %v419_v46 = vadd.f32 %v767_v44, %v747_v43  ;;  %v410_v47 = vpop.f32.mrb[1].mxu1  ;;  %v748_v48 = vpop.f32.mrb[2].mxu0 }
  0xfc   : > { %v411_v49 = vadd.f32 %v410_v47, %v308_v45  ;;  %v768_v50 = vpop.f32.mrb[2].mxu1  ;;  %v311_v51 = vpop.f32.mrb[3].mxu0 }
  0xfd   : > { %v413_v52 = vpop.f32.mrb[3].mxu1 }
  0xfe   : > { %v414_v53 = vadd.f32 %v413_v52, %v311_v51 }
 0x119   : > { %v787_v54 = vpop.f32.mrb[4].mxu0 }
 0x11a   : > { %v553_v56 = vadd.f32 %v787_v54, %v419_v46  ;;  %v537_v57 = vpop.f32.mrb[5].mxu0 }
 0x11b   : > { %v551_v58 = vadd.f32 %v537_v57, %v411_v49  ;;  %v788_v59 = vpop.f32.mrb[6].mxu0 }
 0x11c   : > { %v563_v60 = vadd.f32 %v695_v55, %v553_v56  ;;  %v540_v61 = vpop.f32.mrb[7].mxu0 }
 0x11d   : > { %v561_v62 = vadd.f32 %v695_v55, %v551_v58  ;;  %v552_v63 = vadd.f32 %v540_v61, %v414_v53 }
 0x11e   : > { %v566_v0 = vmax.f32 %v563_v60, 0.0 }
 0x11f   : > { %v564_v1 = vmax.f32 %v561_v62, 0.0  ;;  %v562_v2 = vadd.f32 %v695_v55, %v552_v63 }
 0x120   : > { %569 = vst [vmem:[%s170_s21 + $0x10] sm:$0xff] %v566_v0 }
 0x121   : > { %567 = vst [vmem:[%s170_s21] sm:$0xff] %v564_v1  ;;  %v565_v3 = vmax.f32 %v562_v2, 0.0 }
 0x123   : > { %568 = vst [vmem:[%s170_s21 + $0x8] sm:$0xff] %v565_v3 }
 0x124 PF: > { %s13_s12 = sadd.s32 1, %s834_s12  }
 0x125   : > { %p10_p4 = scmp.ge.s32.totalorder %s13_s12, 4  }
 0x127   :  { %12 = sbr.rel (!%p10_p4) target bundleno = 1 (0x1), region = 64 }

// kernel: ecapa_forward.38
= control target key start
LH: loop header
LB: loop body
LE: loop exit
PB: predicated region body
PF: predicated region fallthrough
CT: control target
= control target key end

     0   :  { %8 = vsyncpa [#allocation3], 0  ;;  %s927_s12 = smov 0   ;;  %s1068_s0 = inlined_call_operand.vmem [shape: bf16[2,28,128], index: 0, kind: input, shape index: {}]   ;;  %s1069_s1 = inlined_call_operand.vmem [shape: bf16[3,128,128], index: 1, kind: input, shape index: {}]   ;;  %s1070_s2 = inlined_call_operand.hbm [shape: f32[1,128], index: 2, kind: input, shape index: {}]   ;;  %s1071_s3 = inlined_call_operand.vmem [shape: f32[2,24,128], index: 3, kind: output, shape index: {}]  }
   0x1 LB: > { %s933_s13 = sadd.s32 4294967295, %s904_s12   ;;  %p652_p0 = scmp.ge.s32.totalorder %s904_s12, 1  ;;  %s904_s12 = sphi %s927_s12, %s14_s12  }
   0x2   : > { %p113_p1 = scmp.lt.s32.totalorder %s904_s12, 3  ;;  %p1072_p3 = scmp.eq.s32.totalorder %s933_s13, 0 }
   0x3   : > { %s906_s15 = smov [#allocation2]   ;;  %s866_s20 = scalar_lea.hbm %s1070_s2, 16 }
   0x4   : > { %p937_p2 = pnand %p652_p0, %p113_p1  ;;  %s129_s16 = sshll.u32 %s906_s15, 4  ;;  %s130_s16 = int_to_ptr.vmem [resolvable:$true] %s129_s16 }
   0x5   : > { %p867_p6 = scmp.ne.s32.totalorder %s1070_s2, %s866_s20  ;;  %p873_p10 = scmp.lt.u32.totalorder %s866_s20, %s1070_s2 }
   0x6   : > { %s1074_s14 = scalar_select %p937_p2, 1, 0 }
   0x7   : > { %p821_p4 = pneg %p937_p2 }
   0x9   : > { %p946_p5 = pnand %p1072_p3, %p821_p4 }
   0xb   : > { %p868_p7 = pneg %p946_p5 }
   0xd   : > { %p869_p8 = pnand %p868_p7, %p867_p6 }
   0xf   : > { %p870_p9 = pneg %p869_p8 }
  0x11   : > { %p875_p11 = pnand %p873_p10, %p870_p9 }
  0x13   : > { %878 = shalt.err (!%p875_p11)
}
  0x14   : > { %s879_s25 = scalar_lea.vmem %s130_s16, 16  ;;  %s886_s26 = scalar_lea.vmem %s130_s16, 32 }
  0x15   : > { %p880_p12 = scmp.ne.s32.totalorder %s130_s16, %s879_s25  ;;  %p887_p1 = scmp.lt.s32.totalorder %s130_s16, %s130_s16 }
  0x16   : > { %p888_p4 = scmp.lt.s32.totalorder %s886_s26, %s879_s25 }
  0x17   : > { %p882_p13 = pnand %p880_p12, %p868_p7 }
  0x18   : > { %p889_p3 = por %p888_p4, %p887_p1 }
  0x19   : > { %p883_p0 = pneg %p882_p13 }
  0x1b   : > { %p890_p2 = pnand %p889_p3, %p883_p0 }
  0x1d   : > { %893 = shalt.err (!%p890_p2)
}
  0x1e   : > { %824 = dma.hbm_to_vmem [thread:$0]  (!%p946_p5), %s1070_s2, 16, %s130_s16, [#allocation3]  }
  0x1f   : > { %p1076_p6 = scmp.ne.s32.totalorder %s1074_s14, 0 }
  0x20   : > { %p1077_p8 = scmp.eq.s32.totalorder (!%p1076_p6), %s933_s13, 0 }
  0x21   : > { %150 = sbr.rel (%p1076_p6) target bundleno = 328 (0x148), region = 32 }
  0x28   : > { %899 = dma.done.wait (%p1077_p8), [#allocation3], 16   ;;  %p1078_p7 = pmov %p1077_p8 }
  0x29   : > { %v836_v0 = vld [vmem:[%s1069_s1 + $0x40] sm:$0xff]   ;;  %v838_v2 = vld [vmem:[%s1069_s1 + $0x48] sm:$0xff]   ;;  %p174_p2 = scmp.lt.s32.totalorder %s933_s13, 1  ;;  %v840_v4 = vld [vmem:[%s1069_s1 + $0x50] sm:$0xff]   ;;  %vm233_vm0 = vcmask 1046528   ;;  %vm462_vm1 = vcmask 1045504  }
  0x2a   : > { %901 = vsyncadd (%p1078_p7), [#allocation3], 4294967280  ;;  %v837_v1 = vld [vmem:[%s1069_s1] sm:$0xff]   ;;  %756 = vmatprep.subr.bf16.mxu0 %v836_v0  ;;  %v839_v3 = vld [vmem:[%s1069_s1 + $0x8] sm:$0xff]  }
  0x2b   : > { %776 = vmatprep.subr.bf16.mxu1 %v837_v1  ;;  %757 = vmatpush3.bf16.msra.mxu0 %v836_v0  ;;  %v841_v5 = vld [vmem:[%s1069_s1 + $0x10] sm:$0xff]   ;;  %s1080_s13 = smov (!%p174_p2, %s933_s13), 1  ;;  %v842_v6 = vld [vmem:[%s1069_s1 + $0x58] sm:$0xff]   ;;  %v844_v8 = vld [vmem:[%s1069_s1 + $0x60] sm:$0xff]  }
  0x2c   : > { %777 = vmatpush3.bf16.msra.mxu1 %v837_v1  ;;  %758 = vmatprep.subr.bf16.mxu0 %v838_v2  ;;  %v843_v7 = vld [vmem:[%s1069_s1 + $0x18] sm:$0xff]   ;;  %s725_s20 = sshll.u32 %s1080_s13, 4  ;;  %v845_v9 = vld [vmem:[%s1069_s1 + $0x20] sm:$0xff]   ;;  %v846_v10 = vld [vmem:[%s1069_s1 + $0x68] sm:$0xff]   ;;  %s816_s4 = smul.u32 24, %s1080_s13 }
  0x2d   : > { %778 = vmatprep.subr.bf16.mxu1 %v839_v3  ;;  %s1010_s27 = scalar_lea.vmem %s1068_s0, %s725_s20  ;;  %v847_v11 = vld [vmem:[%s1069_s1 + $0x28] sm:$0xff]   ;;  %v848_v21 = vld [vmem:[%s1069_s1 + $0x70] sm:$0xff]   ;;  %v850_v25 = vld [vmem:[%s1069_s1 + $0x78] sm:$0xff]  }
  0x2e   : > { %v186_v12 = vld [vmem:[%s1010_s27 + $0x4] sm:$0xf]  ;;  %v187_v13 = vld [vmem:[%s1010_s27 + $0x8] sm:$0xf]  ;;  %v204_v14 = vld [vmem:[%s1010_s27] sm:$0xe]  ;;  %s183_s7 = scalar_lea.vmem %s1071_s3, %s816_s4 }
  0x2f   : > { %759 = vmatpush3.bf16.msra.mxu0 %v838_v2  ;;  %v205_v15 = vld [vmem:[%s1010_s27 + $0xc] sm:$0x1]  ;;  %v676_v16 = vcombine.low %v204_v14, %v186_v12  ;;  %v185_v17 = vld [vmem:[%s1010_s27] sm:$0xf]  ;;  %v849_v23 = vld [vmem:[%s1069_s1 + $0x30] sm:$0xff]   ;;  %v687_v34 = vcombine.low %v187_v13, %v187_v13 }
  0x30   : > { %779 = vmatpush3.bf16.msra.mxu1 %v839_v3  ;;  %760 = vmatprep.subr.bf16.mxu0 %v840_v4  ;;  %v677_v18 = vcombine.low %v187_v13, %v205_v15  ;;  %v686_v19 = vcombine.low %v185_v17, %v186_v12  ;;  %v851_v26 = vld [vmem:[%s1069_s1 + $0x38] sm:$0xff]   ;;  %v437_v27 = vld [vmem:[%s1010_s27] sm:$0xc]  ;;  %v438_v28 = vld [vmem:[%s1010_s27 + $0xc] sm:$0x3] }
  0x31   : > { %780 = vmatprep.subr.bf16.mxu1 %v841_v5  ;;  %v234_v20 = vrot.slane %v676_v16, 1  ;;  %v712_v29 = vcombine.low %v437_v27, %v186_v12  ;;  %v713_v30 = vcombine.low %v187_v13, %v438_v28  ;;  %v856_v31 = vld [vmem:[%s1069_s1 + $0x80] sm:$0xff]   ;;  %v857_v35 = vld [vmem:[%s1069_s1 + $0x88] sm:$0xff]   ;;  %v858_v37 = vld [vmem:[%s1069_s1 + $0x90] sm:$0xff]  }
  0x32   : > { %v235_v22 = vrot.slane %v677_v18, 1  ;;  %792 = vmatprep.mubr.bf16.mxu1 %v686_v19  ;;  %v859_v38 = vld [vmem:[%s1069_s1 + $0x98] sm:$0xff]   ;;  %v860_v39 = vld [vmem:[%s1069_s1 + $0xa0] sm:$0xff]   ;;  %v861_v40 = vld [vmem:[%s1069_s1 + $0xa8] sm:$0xff]  }
  0x33   : > { %761 = vmatpush3.bf16.msra.mxu0 %v840_v4  ;;  %v463_v32 = vrot.slane %v712_v29, 2  ;;  %v464_v33 = vrot.slane %v713_v30, 2  ;;  %v862_v41 = vld [vmem:[%s1069_s1 + $0xb0] sm:$0xff]   ;;  %v863_v42 = vld [vmem:[%s1069_s1 + $0xb8] sm:$0xff]   ;;  %v722_v55 = vld [vmem:[#allocation2] ss:$0 sm:$0xff] }
  0x34   : > { %781 = vmatpush3.bf16.msra.mxu1 %v841_v5  ;;  %762 = vmatprep.subr.bf16.mxu0 %v842_v6  ;;  %v236_v24 = vsel %vm233_vm0, %v234_v20, %v235_v22 }
  0x35   : > { %782 = vmatprep.subr.bf16.mxu1 %v843_v7  ;;  %772 = vmatprep.mubr.bf16.mxu0 %v236_v24  ;;  %v465_v36 = vsel %vm462_vm1, %v463_v32, %v464_v33 }
  0x37   : > { %763 = vmatpush3.bf16.msra.mxu0 %v842_v6 }
  0x38   : > { %783 = vmatpush3.bf16.msra.mxu1 %v843_v7  ;;  %764 = vmatprep.subr.bf16.mxu0 %v844_v8 }
  0x39   : > { %784 = vmatprep.subr.bf16.mxu1 %v845_v9 }
  0x3b   : > { %765 = vmatpush3.bf16.msra.mxu0 %v844_v8 }
  0x3c   : > { %785 = vmatpush3.bf16.msra.mxu1 %v845_v9  ;;  %766 = vmatprep.subr.bf16.mxu0 %v846_v10 }
  0x3d   : > { %786 = vmatprep.subr.bf16.mxu1 %v847_v11 }
  0x3f   : > { %767 = vmatpush3.bf16.msra.mxu0 %v846_v10 }
  0x40   : > { %787 = vmatpush3.bf16.msra.mxu1 %v847_v11  ;;  %768 = vmatprep.subr.bf16.mxu0 %v848_v21 }
  0x41   : > { %788 = vmatprep.subr.bf16.mxu1 %v849_v23 }
  0x43   : > { %769 = vmatpush3.bf16.msra.mxu0 %v848_v21 }
  0x44   : > { %789 = vmatpush3.bf16.msra.mxu1 %v849_v23  ;;  %770 = vmatprep.subr.bf16.mxu0 %v850_v25 }
  0x45   : > { %790 = vmatprep.subr.bf16.mxu1 %v851_v26 }
  0x47   : > { %771 = vmatpush3.bf16.msra.mxu0 %v850_v25 }
  0x48   : > { %791 = vmatpush3.bf16.msra.mxu1 %v851_v26  ;;  %796 = vmatprep.subr.bf16.mxu0 %v856_v31 }
  0x4a   : > { %773 = vmatmul.mubr.bf16.vlgmr.msra.gmra.mrb[0].mxu0 %v235_v22 }
  0x4b   : > { %793 = vmatmul.mubr.bf16.vlgmr.msra.gmra.mrb[0].mxu1 %v687_v34  ;;  %797 = vmatpush3.bf16.msra.mxu0 %v856_v31 }
  0x4c   : > { %798 = vmatprep.subr.bf16.mxu0 %v857_v35  ;;  %812 = vmatprep.mubr.bf16.mxu0 %v465_v36 }
  0x4f   : > { %799 = vmatpush3.bf16.msra.mxu0 %v857_v35 }
  0x50   : > { %800 = vmatprep.subr.bf16.mxu0 %v858_v37 }
  0x53   : > { %801 = vmatpush3.bf16.msra.mxu0 %v858_v37 }
  0x54   : > { %802 = vmatprep.subr.bf16.mxu0 %v859_v38 }
  0x57   : > { %803 = vmatpush3.bf16.msra.mxu0 %v859_v38 }
  0x58   : > { %804 = vmatprep.subr.bf16.mxu0 %v860_v39 }
  0x5b   : > { %805 = vmatpush3.bf16.msra.mxu0 %v860_v39 }
  0x5c   : > { %806 = vmatprep.subr.bf16.mxu0 %v861_v40 }
  0x5f   : > { %807 = vmatpush3.bf16.msra.mxu0 %v861_v40 }
  0x60   : > { %808 = vmatprep.subr.bf16.mxu0 %v862_v41 }
  0x63   : > { %809 = vmatpush3.bf16.msra.mxu0 %v862_v41 }
  0x64   : > { %810 = vmatprep.subr.bf16.mxu0 %v863_v42 }
  0x67   : > { %811 = vmatpush3.bf16.msra.mxu0 %v863_v42 }
  0x6a   : > { %813 = vmatmul.mubr.bf16.vlgmr.msra.gmra.mrb[4].mxu0 %v464_v33 }
 0x11d   : > { %v774_v43 = vpop.f32.mrb[0].mxu0 }
 0x11e   : > { %v794_v44 = vpop.f32.mrb[0].mxu1  ;;  %v321_v45 = vpop.f32.mrb[1].mxu0 }
 0x11f   : > { %v432_v46 = vadd.f32 %v794_v44, %v774_v43  ;;  %v423_v47 = vpop.f32.mrb[1].mxu1  ;;  %v775_v48 = vpop.f32.mrb[2].mxu0 }
 0x120   : > { %v424_v49 = vadd.f32 %v423_v47, %v321_v45  ;;  %v795_v50 = vpop.f32.mrb[2].mxu1  ;;  %v324_v51 = vpop.f32.mrb[3].mxu0 }
 0x121   : > { %v426_v52 = vpop.f32.mrb[3].mxu1 }
 0x122   : > { %v427_v53 = vadd.f32 %v426_v52, %v324_v51 }
 0x13d   : > { %v814_v54 = vpop.f32.mrb[4].mxu0 }
 0x13e   : > { %v566_v56 = vadd.f32 %v814_v54, %v432_v46  ;;  %v550_v57 = vpop.f32.mrb[5].mxu0 }
 0x13f   : > { %v564_v58 = vadd.f32 %v550_v57, %v424_v49  ;;  %v815_v59 = vpop.f32.mrb[6].mxu0 }
 0x140   : > { %v576_v60 = vadd.f32 %v722_v55, %v566_v56  ;;  %v553_v61 = vpop.f32.mrb[7].mxu0 }
 0x141   : > { %v574_v62 = vadd.f32 %v722_v55, %v564_v58  ;;  %v565_v63 = vadd.f32 %v553_v61, %v427_v53 }
 0x142   : > { %v579_v0 = vmax.f32 %v576_v60, 0.0 }
 0x143   : > { %v577_v1 = vmax.f32 %v574_v62, 0.0  ;;  %v575_v2 = vadd.f32 %v722_v55, %v565_v63 }
 0x144   : > { %582 = vst [vmem:[%s183_s7 + $0x10] sm:$0xff] %v579_v0 }
 0x145   : > { %580 = vst [vmem:[%s183_s7] sm:$0xff] %v577_v1  ;;  %v578_v3 = vmax.f32 %v575_v2, 0.0 }
 0x147   : > { %581 = vst [vmem:[%s183_s7 + $0x8] sm:$0xff] %v578_v3 }
 0x148 PF: > { %s14_s12 = sadd.s32 1, %s904_s12  }
 0x149   : > { %p11_p3 = scmp.ge.s32.totalorder %s14_s12, 4  }
 0x14b   :  { %13 = sbr.rel (!%p11_p3) target bundleno = 1 (0x1), region = 69 }
 0x152   :  { %604 = vsyncpa [#allocation3], 1 }
 0x153   :  { %606 = vsyncpa [#allocation3 + $0x1], 1 }

// kernel: ecapa_forward.42
= control target key start
LH: loop header
LB: loop body
LE: loop exit
PB: predicated region body
PF: predicated region fallthrough
CT: control target
= control target key end

     0   :  { %v306_v0 = vmov 0.0   ;;  %vm307_vm0 = vmmov 0   ;;  %s385_s1 = inlined_call_operand.vmem [shape: bf16[128,128], index: 1, kind: input, shape index: {}]   ;;  %s386_s0 = inlined_call_operand.vmem [shape: bf16[48,128], index: 0, kind: input, shape index: {}]   ;;  %s387_s2 = inlined_call_operand.vmem [shape: f32[1,128], index: 2, kind: input, shape index: {}]   ;;  %s388_s3 = inlined_call_operand.vmem [shape: f32[48,128], index: 3, kind: output, shape index: {}]  }
   0x1   :  { %277 = vmatprep.subr.bf16.mxu1 %v306_v0  ;;  %v295_v1 = vld [vmem:[%s385_s1] sm:$0xff]   ;;  %249 = vmatprep.subr.bf16.mxu0 %v306_v0  ;;  %v296_v2 = vld [vmem:[%s385_s1 + $0x8] sm:$0xff]   ;;  %v297_v3 = vld [vmem:[%s385_s1 + $0x10] sm:$0xff]  }
   0x2   :  { %269 = vmatprep.mubr.msk.bf16.mxu1 %vm307_vm0, %v306_v0  ;;  %265 = vmatprep.mubr.msk.bf16.mxu0 %vm307_vm0, %v306_v0  ;;  %v298_v4 = vld [vmem:[%s385_s1 + $0x18] sm:$0xff]   ;;  %v299_v5 = vld [vmem:[%s385_s1 + $0x20] sm:$0xff]   ;;  %v300_v6 = vld [vmem:[%s385_s1 + $0x28] sm:$0xff]  }
   0x3   :  { %285 = vmatpush3.bf16.msra.mxu1 %v295_v1  ;;  %250 = vmatpush3.bf16.msra.mxu0 %v295_v1  ;;  %v301_v7 = vld [vmem:[%s385_s1 + $0x30] sm:$0xff]   ;;  %v302_v8 = vld [vmem:[%s385_s1 + $0x38] sm:$0xff]   ;;  %v303_v9 = vld [vmem:[%s386_s0 + $0x8] sm:$0xff]  }
   0x4   :  { %278 = vmatprep.subr.bf16.mxu1 %v306_v0  ;;  %251 = vmatprep.subr.bf16.mxu0 %v306_v0  ;;  %v304_v10 = vld [vmem:[%s386_s0] sm:$0xff]   ;;  %v305_v11 = vld [vmem:[%s386_s0 + $0x10] sm:$0xff]  }
   0x5   :  { %v237_v12 = vld [vmem:[%s387_s2] ss:$0 sm:$0xff] }
   0x7   :  { %286 = vmatpush3.bf16.msra.mxu1 %v296_v2  ;;  %252 = vmatpush3.bf16.msra.mxu0 %v296_v2 }
   0x8   :  { %279 = vmatprep.subr.bf16.mxu1 %v306_v0  ;;  %253 = vmatprep.subr.bf16.mxu0 %v306_v0 }
   0xb   :  { %287 = vmatpush3.bf16.msra.mxu1 %v297_v3  ;;  %254 = vmatpush3.bf16.msra.mxu0 %v297_v3 }
   0xc   :  { %280 = vmatprep.subr.bf16.mxu1 %v306_v0  ;;  %255 = vmatprep.subr.bf16.mxu0 %v306_v0 }
   0xf   :  { %288 = vmatpush3.bf16.msra.mxu1 %v298_v4  ;;  %256 = vmatpush3.bf16.msra.mxu0 %v298_v4 }
  0x10   :  { %281 = vmatprep.subr.bf16.mxu1 %v306_v0  ;;  %257 = vmatprep.subr.bf16.mxu0 %v306_v0 }
  0x13   :  { %289 = vmatpush3.bf16.msra.mxu1 %v299_v5  ;;  %258 = vmatpush3.bf16.msra.mxu0 %v299_v5 }
  0x14   :  { %282 = vmatprep.subr.bf16.mxu1 %v306_v0  ;;  %259 = vmatprep.subr.bf16.mxu0 %v306_v0 }
  0x17   :  { %290 = vmatpush3.bf16.msra.mxu1 %v300_v6  ;;  %260 = vmatpush3.bf16.msra.mxu0 %v300_v6 }
  0x18   :  { %283 = vmatprep.subr.bf16.mxu1 %v306_v0  ;;  %261 = vmatprep.subr.bf16.mxu0 %v306_v0 }
  0x1b   :  { %291 = vmatpush3.bf16.msra.mxu1 %v301_v7  ;;  %262 = vmatpush3.bf16.msra.mxu0 %v301_v7 }
  0x1c   :  { %284 = vmatprep.subr.bf16.mxu1 %v306_v0  ;;  %263 = vmatprep.subr.bf16.mxu0 %v306_v0 }
  0x1f   :  { %292 = vmatpush3.bf16.msra.mxu1 %v302_v8  ;;  %264 = vmatpush3.bf16.msra.mxu0 %v302_v8 }
  0x22   :  { %270 = vmatmul.mubr.bf16.vlgmr.msra.gmra.mrb[0].mxu1 %v303_v9  ;;  %266 = vmatmul.mubr.bf16.vlgmr.msra.gmra.mrb[0].mxu0 %v304_v10 }
  0x23   :  { %273 = vmatprep.mubr.msk.bf16.mxu1 %vm307_vm0, %v306_v0 }
  0x2a   :  { %274 = vmatmul.mubr.bf16.gmra.mrb[4].mxu1 %v305_v11 }
  0xf5   :  { %v161_v13 = vpop.f32.mrb[0].mxu1  ;;  %v153_v14 = vpop.f32.mrb[0].mxu0 }
  0xf6   :  { %v206_v15 = vadd.f32 %v237_v12, %v161_v13  ;;  %v271_v16 = vpop.f32.mrb[1].mxu1  ;;  %v204_v17 = vadd.f32 %v237_v12, %v153_v14  ;;  %v267_v18 = vpop.f32.mrb[1].mxu0 }
  0xf7   :  { %v164_v19 = vpop.f32.mrb[2].mxu1  ;;  %v156_v20 = vpop.f32.mrb[2].mxu0 }
  0xf8   :  { %v212_v21 = vmax.f32 %v206_v15, 0.0  ;;  %v207_v22 = vadd.f32 %v237_v12, %v164_v19  ;;  %v272_v23 = vpop.f32.mrb[3].mxu1  ;;  %v210_v24 = vmax.f32 %v204_v17, 0.0  ;;  %v205_v25 = vadd.f32 %v237_v12, %v156_v20  ;;  %v268_v26 = vpop.f32.mrb[3].mxu0 }
  0xfa   :  { %218 = vst [vmem:[%s388_s3 + $0x10] sm:$0xff] %v212_v21  ;;  %v213_v27 = vmax.f32 %v207_v22, 0.0  ;;  %216 = vst [vmem:[%s388_s3] sm:$0xff] %v210_v24  ;;  %v211_v28 = vmax.f32 %v205_v25, 0.0 }
  0xfc   :  { %219 = vst [vmem:[%s388_s3 + $0x18] sm:$0xff] %v213_v27  ;;  %217 = vst [vmem:[%s388_s3 + $0x8] sm:$0xff] %v211_v28 }
  0xfd   :  { %v169_v29 = vpop.f32.mrb[4].mxu1 }
  0xfe   :  { %v208_v30 = vadd.f32 %v237_v12, %v169_v29  ;;  %v275_v31 = vpop.f32.mrb[5].mxu1 }
  0xff   :  { %v172_v32 = vpop.f32.mrb[6].mxu1 }
 0x100   :  { %v214_v33 = vmax.f32 %v208_v30, 0.0  ;;  %v209_v34 = vadd.f32 %v237_v12, %v172_v32  ;;  %v276_v35 = vpop.f32.mrb[7].mxu1 }
 0x102   :  { %220 = vst [vmem:[%s388_s3 + $0x20] sm:$0xff] %v214_v33  ;;  %v215_v36 = vmax.f32 %v209_v34, 0.0 }
 0x104   :  { %221 = vst [vmem:[%s388_s3 + $0x28] sm:$0xff] %v215_v36 }

// kernel: ecapa_forward.53
= control target key start
LH: loop header
LB: loop body
LE: loop exit
PB: predicated region body
PF: predicated region fallthrough
CT: control target
= control target key end

     0   :  { %s855_s12 = smov 0   ;;  %s960_s0 = inlined_call_operand.vmem [shape: bf16[2,32,128], index: 0, kind: input, shape index: {}]   ;;  %s961_s1 = inlined_call_operand.vmem [shape: bf16[3,128,128], index: 1, kind: input, shape index: {}]   ;;  %s962_s2 = inlined_call_operand.vmem [shape: f32[1,128], index: 2, kind: input, shape index: {}]   ;;  %s963_s3 = inlined_call_operand.vmem [shape: f32[2,24,128], index: 3, kind: output, shape index: {}]  }
   0x1 LB: > { %s624_s13 = sadd.s32 4294967295, %s833_s12   ;;  %p628_p0 = scmp.ge.s32.totalorder %s833_s12, 1  ;;  %s833_s12 = sphi %s855_s12, %s13_s12  }
   0x2   : > { %p137_p1 = scmp.lt.s32.totalorder %s833_s12, 3 }
   0x4   : > { %p138_p2 = pnand %p628_p0, %p137_p1 }
   0x5   : > { %v797_v0 = vld [vmem:[%s961_s1 + $0x40] sm:$0xff] (!%p138_p2)   ;;  %v799_v2 = vld [vmem:[%s961_s1 + $0x48] sm:$0xff] (!%p138_p2)   ;;  %p161_p3 = scmp.lt.s32.totalorder (!%p138_p2), %s624_s13, 1  ;;  %v801_v4 = vld [vmem:[%s961_s1 + $0x50] sm:$0xff] (!%p138_p2)   ;;  %vm222_vm0 = vcmask (!%p138_p2), 1045504  }
   0x6   : > { %141 = sbr.rel (%p138_p2) target bundleno = 292 (0x124), region = 32  ;;  %v798_v1 = vld [vmem:[%s961_s1] sm:$0xff] (!%p138_p2)   ;;  %728 = vmatprep.subr.bf16.mxu0 (!%p138_p2), %v797_v0  ;;  %v800_v3 = vld [vmem:[%s961_s1 + $0x8] sm:$0xff] (!%p138_p2)   ;;  %v802_v5 = vld [vmem:[%s961_s1 + $0x10] sm:$0xff] (!%p138_p2)  }
   0x7   : > { %748 = vmatprep.subr.bf16.mxu1 (!%p138_p2), %v798_v1  ;;  %729 = vmatpush3.bf16.msra.mxu0 (!%p138_p2), %v797_v0  ;;  %v803_v6 = vld [vmem:[%s961_s1 + $0x58] sm:$0xff] (!%p138_p2)   ;;  %v805_v8 = vld [vmem:[%s961_s1 + $0x60] sm:$0xff] (!%p138_p2)   ;;  %v807_v10 = vld [vmem:[%s961_s1 + $0x68] sm:$0xff] (!%p138_p2)  }
   0x8   : > { %749 = vmatpush3.bf16.msra.mxu1 (!%p138_p2), %v798_v1  ;;  %730 = vmatprep.subr.bf16.mxu0 (!%p138_p2), %v799_v2  ;;  %v804_v7 = vld [vmem:[%s961_s1 + $0x18] sm:$0xff] (!%p138_p2)   ;;  %v806_v9 = vld [vmem:[%s961_s1 + $0x20] sm:$0xff] (!%p138_p2)   ;;  %v808_v11 = vld [vmem:[%s961_s1 + $0x28] sm:$0xff] (!%p138_p2)  }
   0x9   : > { %750 = vmatprep.subr.bf16.mxu1 (!%p138_p2), %v800_v3  ;;  %v809_v20 = vld [vmem:[%s961_s1 + $0x70] sm:$0xff] (!%p138_p2)   ;;  %v811_v24 = vld [vmem:[%s961_s1 + $0x78] sm:$0xff] (!%p138_p2)   ;;  %v817_v26 = vld [vmem:[%s961_s1 + $0x80] sm:$0xff] (!%p138_p2)  }
   0xa   : > { %v810_v22 = vld [vmem:[%s961_s1 + $0x30] sm:$0xff] (!%p138_p2)   ;;  %v812_v25 = vld [vmem:[%s961_s1 + $0x38] sm:$0xff] (!%p138_p2)   ;;  %v818_v28 = vld [vmem:[%s961_s1 + $0x88] sm:$0xff] (!%p138_p2)  }
   0xb   : > { %731 = vmatpush3.bf16.msra.mxu0 (!%p138_p2), %v799_v2  ;;  %v819_v30 = vld [vmem:[%s961_s1 + $0x90] sm:$0xff] (!%p138_p2)   ;;  %v820_v31 = vld [vmem:[%s961_s1 + $0x98] sm:$0xff] (!%p138_p2)   ;;  %v821_v32 = vld [vmem:[%s961_s1 + $0xa0] sm:$0xff] (!%p138_p2)  }
   0xc   : > { %751 = vmatpush3.bf16.msra.mxu1 (!%p138_p2), %v800_v3  ;;  %732 = vmatprep.subr.bf16.mxu0 (!%p138_p2), %v801_v4  ;;  %v822_v33 = vld [vmem:[%s961_s1 + $0xa8] sm:$0xff] (!%p138_p2)   ;;  %v823_v34 = vld [vmem:[%s961_s1 + $0xb0] sm:$0xff] (!%p138_p2)   ;;  %v824_v35 = vld [vmem:[%s961_s1 + $0xb8] sm:$0xff] (!%p138_p2)  }
   0xd   : > { %s965_s13 = smov (!%p161_p3, %s624_s13), 1  ;;  %752 = vmatprep.subr.bf16.mxu1 %v802_v5  ;;  %v694_v49 = vld [vmem:[%s962_s2] ss:$0 sm:$0xff] }
   0xe   : > { %s697_s30 = sshll.u32 %s965_s13, 4  ;;  %s788_s17 = smul.u32 24, %s965_s13 }
   0xf   : > { %733 = vmatpush3.bf16.msra.mxu0 %v801_v4  ;;  %s899_s10 = scalar_lea.vmem %s960_s0, %s697_s30 }
  0x10   : > { %753 = vmatpush3.bf16.msra.mxu1 %v802_v5  ;;  %734 = vmatprep.subr.bf16.mxu0 %v803_v6  ;;  %v191_v12 = vld [vmem:[%s899_s10] sm:$0xc]  ;;  %v192_v13 = vld [vmem:[%s899_s10 + $0x4] sm:$0xf]  ;;  %v193_v14 = vld [vmem:[%s899_s10 + $0x8] sm:$0xf]  ;;  %s170_s21 = scalar_lea.vmem %s963_s3, %s788_s17 }
  0x11   : > { %754 = vmatprep.subr.bf16.mxu1 %v804_v7  ;;  %v194_v15 = vld [vmem:[%s899_s10 + $0xc] sm:$0x3]  ;;  %v648_v16 = vcombine.low %v191_v12, %v192_v13  ;;  %v815_v18 = vld [vmem:[%s899_s10] sm:$0xff]   ;;  %v816_v27 = vld [vmem:[%s899_s10 + $0x8] ss:$0 sps:$4 sm:$0xff]   ;;  %v684_v29 = vcombine.low %v192_v13, %v193_v14 }
  0x12   : > { %v649_v17 = vcombine.low %v193_v14, %v194_v15  ;;  %764 = vmatprep.mubr.bf16.mxu1 %v815_v18  ;;  %v826_v36 = vld [vmem:[%s899_s10 + $0xc] ss:$0 sps:$4 sm:$0xff]  }
  0x13   : > { %735 = vmatpush3.bf16.msra.mxu0 %v803_v6  ;;  %v223_v19 = vrot.slane %v648_v16, 2 }
  0x14   : > { %755 = vmatpush3.bf16.msra.mxu1 %v804_v7  ;;  %736 = vmatprep.subr.bf16.mxu0 %v805_v8  ;;  %v224_v21 = vrot.slane %v649_v17, 2 }
  0x15   : > { %756 = vmatprep.subr.bf16.mxu1 %v806_v9 }
  0x16   : > { %v225_v23 = vsel %vm222_vm0, %v223_v19, %v224_v21 }
  0x17   : > { %737 = vmatpush3.bf16.msra.mxu0 %v805_v8  ;;  %744 = vmatprep.mubr.bf16.mxu0 %v225_v23 }
  0x18   : > { %757 = vmatpush3.bf16.msra.mxu1 %v806_v9  ;;  %738 = vmatprep.subr.bf16.mxu0 %v807_v10 }
  0x19   : > { %758 = vmatprep.subr.bf16.mxu1 %v808_v11 }
  0x1b   : > { %739 = vmatpush3.bf16.msra.mxu0 %v807_v10 }
  0x1c   : > { %759 = vmatpush3.bf16.msra.mxu1 %v808_v11  ;;  %740 = vmatprep.subr.bf16.mxu0 %v809_v20 }
  0x1d   : > { %760 = vmatprep.subr.bf16.mxu1 %v810_v22 }
  0x1f   : > { %741 = vmatpush3.bf16.msra.mxu0 %v809_v20 }
  0x20   : > { %761 = vmatpush3.bf16.msra.mxu1 %v810_v22  ;;  %742 = vmatprep.subr.bf16.mxu0 %v811_v24 }
  0x21   : > { %762 = vmatprep.subr.bf16.mxu1 %v812_v25 }
  0x23   : > { %743 = vmatpush3.bf16.msra.mxu0 %v811_v24 }
  0x24   : > { %763 = vmatpush3.bf16.msra.mxu1 %v812_v25  ;;  %768 = vmatprep.subr.bf16.mxu0 %v817_v26 }
  0x26   : > { %745 = vmatmul.mubr.bf16.vlgmr.msra.gmra.mrb[0].mxu0 %v224_v21 }
  0x27   : > { %765 = vmatmul.mubr.bf16.vlgmr.msra.gmra.mrb[0].mxu1 %v816_v27  ;;  %769 = vmatpush3.bf16.msra.mxu0 %v817_v26 }
  0x28   : > { %770 = vmatprep.subr.bf16.mxu0 %v818_v28  ;;  %784 = vmatprep.mubr.bf16.mxu0 %v684_v29 }
  0x2b   : > { %771 = vmatpush3.bf16.msra.mxu0 %v818_v28 }
  0x2c   : > { %772 = vmatprep.subr.bf16.mxu0 %v819_v30 }
  0x2f   : > { %773 = vmatpush3.bf16.msra.mxu0 %v819_v30 }
  0x30   : > { %774 = vmatprep.subr.bf16.mxu0 %v820_v31 }
  0x33   : > { %775 = vmatpush3.bf16.msra.mxu0 %v820_v31 }
  0x34   : > { %776 = vmatprep.subr.bf16.mxu0 %v821_v32 }
  0x37   : > { %777 = vmatpush3.bf16.msra.mxu0 %v821_v32 }
  0x38   : > { %778 = vmatprep.subr.bf16.mxu0 %v822_v33 }
  0x3b   : > { %779 = vmatpush3.bf16.msra.mxu0 %v822_v33 }
  0x3c   : > { %780 = vmatprep.subr.bf16.mxu0 %v823_v34 }
  0x3f   : > { %781 = vmatpush3.bf16.msra.mxu0 %v823_v34 }
  0x40   : > { %782 = vmatprep.subr.bf16.mxu0 %v824_v35 }
  0x43   : > { %783 = vmatpush3.bf16.msra.mxu0 %v824_v35 }
  0x46   : > { %785 = vmatmul.mubr.bf16.vlgmr.msra.gmra.mrb[4].mxu0 %v826_v36 }
  0xf9   : > { %v746_v37 = vpop.f32.mrb[0].mxu0 }
  0xfa   : > { %v766_v38 = vpop.f32.mrb[0].mxu1  ;;  %v310_v39 = vpop.f32.mrb[1].mxu0 }
  0xfb   : > { %v425_v40 = vadd.f32 %v766_v38, %v746_v37  ;;  %v416_v41 = vpop.f32.mrb[1].mxu1  ;;  %v747_v42 = vpop.f32.mrb[2].mxu0 }
  0xfc   : > { %v417_v43 = vadd.f32 %v416_v41, %v310_v39  ;;  %v767_v44 = vpop.f32.mrb[2].mxu1  ;;  %v313_v45 = vpop.f32.mrb[3].mxu0 }
  0xfd   : > { %v419_v46 = vpop.f32.mrb[3].mxu1 }
  0xfe   : > { %v420_v47 = vadd.f32 %v419_v46, %v313_v45 }
 0x119   : > { %v786_v48 = vpop.f32.mrb[4].mxu0 }
 0x11a   : > { %v552_v50 = vadd.f32 %v786_v48, %v425_v40  ;;  %v536_v51 = vpop.f32.mrb[5].mxu0 }
 0x11b   : > { %v550_v52 = vadd.f32 %v536_v51, %v417_v43  ;;  %v787_v53 = vpop.f32.mrb[6].mxu0 }
 0x11c   : > { %v562_v54 = vadd.f32 %v694_v49, %v552_v50  ;;  %v539_v55 = vpop.f32.mrb[7].mxu0 }
 0x11d   : > { %v560_v56 = vadd.f32 %v694_v49, %v550_v52  ;;  %v551_v57 = vadd.f32 %v539_v55, %v420_v47 }
 0x11e   : > { %v565_v58 = vmax.f32 %v562_v54, 0.0 }
 0x11f   : > { %v563_v59 = vmax.f32 %v560_v56, 0.0  ;;  %v561_v60 = vadd.f32 %v694_v49, %v551_v57 }
 0x120   : > { %568 = vst [vmem:[%s170_s21 + $0x10] sm:$0xff] %v565_v58 }
 0x121   : > { %566 = vst [vmem:[%s170_s21] sm:$0xff] %v563_v59  ;;  %v564_v61 = vmax.f32 %v561_v60, 0.0 }
 0x123   : > { %567 = vst [vmem:[%s170_s21 + $0x8] sm:$0xff] %v564_v61 }
 0x124 PF: > { %s13_s12 = sadd.s32 1, %s833_s12  }
 0x125   : > { %p10_p4 = scmp.ge.s32.totalorder %s13_s12, 4  }
 0x127   :  { %12 = sbr.rel (!%p10_p4) target bundleno = 1 (0x1), region = 64 }

// kernel: ecapa_forward.44
= control target key start
LH: loop header
LB: loop body
LE: loop exit
PB: predicated region body
PF: predicated region fallthrough
CT: control target
= control target key end

     0   :  { %s870_s12 = smov 0   ;;  %s975_s0 = inlined_call_operand.vmem [shape: bf16[2,30,128], index: 0, kind: input, shape index: {}]   ;;  %s976_s1 = inlined_call_operand.vmem [shape: bf16[3,128,128], index: 1, kind: input, shape index: {}]   ;;  %s977_s2 = inlined_call_operand.vmem [shape: f32[1,128], index: 2, kind: input, shape index: {}]   ;;  %s978_s3 = inlined_call_operand.vmem [shape: f32[2,24,128], index: 3, kind: output, shape index: {}]  }
   0x1 LB: > { %s639_s13 = sadd.s32 4294967295, %s848_s12   ;;  %p643_p0 = scmp.ge.s32.totalorder %s848_s12, 1  ;;  %s848_s12 = sphi %s870_s12, %s13_s12  }
   0x2   : > { %p137_p1 = scmp.lt.s32.totalorder %s848_s12, 3 }
   0x4   : > { %p138_p2 = pnand %p643_p0, %p137_p1 }
   0x5   : > { %v812_v0 = vld [vmem:[%s976_s1 + $0x40] sm:$0xff] (!%p138_p2)   ;;  %v814_v2 = vld [vmem:[%s976_s1 + $0x48] sm:$0xff] (!%p138_p2)   ;;  %p161_p3 = scmp.lt.s32.totalorder (!%p138_p2), %s639_s13, 1  ;;  %v816_v4 = vld [vmem:[%s976_s1 + $0x50] sm:$0xff] (!%p138_p2)   ;;  %vm220_vm0 = vsmask.f32 (!%p138_p2), 6400 }
   0x6   : > { %141 = sbr.rel (%p138_p2) target bundleno = 292 (0x124), region = 32  ;;  %v813_v1 = vld [vmem:[%s976_s1] sm:$0xff] (!%p138_p2)   ;;  %743 = vmatprep.subr.bf16.mxu0 (!%p138_p2), %v812_v0  ;;  %v815_v3 = vld [vmem:[%s976_s1 + $0x8] sm:$0xff] (!%p138_p2)   ;;  %v817_v5 = vld [vmem:[%s976_s1 + $0x10] sm:$0xff] (!%p138_p2)   ;;  %vm463_vm1 = vcmask (!%p138_p2), 1044480  }
   0x7   : > { %763 = vmatprep.subr.bf16.mxu1 (!%p138_p2), %v813_v1  ;;  %744 = vmatpush3.bf16.msra.mxu0 (!%p138_p2), %v812_v0  ;;  %v818_v6 = vld [vmem:[%s976_s1 + $0x58] sm:$0xff] (!%p138_p2)   ;;  %v820_v8 = vld [vmem:[%s976_s1 + $0x60] sm:$0xff] (!%p138_p2)   ;;  %v822_v10 = vld [vmem:[%s976_s1 + $0x68] sm:$0xff] (!%p138_p2)  }
   0x8   : > { %764 = vmatpush3.bf16.msra.mxu1 (!%p138_p2), %v813_v1  ;;  %745 = vmatprep.subr.bf16.mxu0 (!%p138_p2), %v814_v2  ;;  %v819_v7 = vld [vmem:[%s976_s1 + $0x18] sm:$0xff] (!%p138_p2)   ;;  %v821_v9 = vld [vmem:[%s976_s1 + $0x20] sm:$0xff] (!%p138_p2)   ;;  %v823_v14 = vld [vmem:[%s976_s1 + $0x28] sm:$0xff] (!%p138_p2)  }
   0x9   : > { %765 = vmatprep.subr.bf16.mxu1 (!%p138_p2), %v815_v3  ;;  %v824_v22 = vld [vmem:[%s976_s1 + $0x70] sm:$0xff] (!%p138_p2)   ;;  %v826_v31 = vld [vmem:[%s976_s1 + $0x78] sm:$0xff] (!%p138_p2)   ;;  %v832_v38 = vld [vmem:[%s976_s1 + $0x80] sm:$0xff] (!%p138_p2)  }
   0xa   : > { %v825_v23 = vld [vmem:[%s976_s1 + $0x30] sm:$0xff] (!%p138_p2)   ;;  %v827_v33 = vld [vmem:[%s976_s1 + $0x38] sm:$0xff] (!%p138_p2)   ;;  %v833_v43 = vld [vmem:[%s976_s1 + $0x88] sm:$0xff] (!%p138_p2)  }
   0xb   : > { %746 = vmatpush3.bf16.msra.mxu0 (!%p138_p2), %v814_v2  ;;  %v834_v45 = vld [vmem:[%s976_s1 + $0x90] sm:$0xff] (!%p138_p2)   ;;  %v835_v46 = vld [vmem:[%s976_s1 + $0x98] sm:$0xff] (!%p138_p2)   ;;  %v836_v47 = vld [vmem:[%s976_s1 + $0xa0] sm:$0xff] (!%p138_p2)  }
   0xc   : > { %766 = vmatpush3.bf16.msra.mxu1 (!%p138_p2), %v815_v3  ;;  %747 = vmatprep.subr.bf16.mxu0 (!%p138_p2), %v816_v4  ;;  %v837_v48 = vld [vmem:[%s976_s1 + $0xa8] sm:$0xff] (!%p138_p2)   ;;  %v838_v49 = vld [vmem:[%s976_s1 + $0xb0] sm:$0xff] (!%p138_p2)   ;;  %v839_v50 = vld [vmem:[%s976_s1 + $0xb8] sm:$0xff] (!%p138_p2)  }
   0xd   : > { %s980_s13 = smov (!%p161_p3, %s639_s13), 1  ;;  %767 = vmatprep.subr.bf16.mxu1 %v817_v5  ;;  %v709_v63 = vld [vmem:[%s977_s2] ss:$0 sm:$0xff] }
   0xe   : > { %s712_s30 = sshll.u32 %s980_s13, 4  ;;  %s803_s16 = smul.u32 24, %s980_s13 }
   0xf   : > { %748 = vmatpush3.bf16.msra.mxu0 %v816_v4  ;;  %s914_s10 = scalar_lea.vmem %s975_s0, %s712_s30 }
  0x10   : > { %768 = vmatpush3.bf16.msra.mxu1 %v817_v5  ;;  %749 = vmatprep.subr.bf16.mxu0 %v818_v6  ;;  %v173_v11 = vld [vmem:[%s914_s10 + $0x4] sm:$0xf]  ;;  %v174_v12 = vld [vmem:[%s914_s10 + $0x8] sm:$0xf]  ;;  %v191_v13 = vld [vmem:[%s914_s10] sm:$0xe]  ;;  %s170_s21 = scalar_lea.vmem %s978_s3, %s803_s16 }
  0x11   : > { %769 = vmatprep.subr.bf16.mxu1 %v819_v7  ;;  %v192_v15 = vld [vmem:[%s914_s10 + $0xc] sm:$0x3]  ;;  %v663_v16 = vcombine.low %v191_v13, %v173_v11  ;;  %v172_v17 = vld [vmem:[%s914_s10] sm:$0xf]  ;;  %v674_v42 = vcombine.low %v174_v12, %v174_v12 }
  0x12   : > { %v664_v18 = vcombine.low %v174_v12, %v192_v15  ;;  %v673_v19 = vcombine.low %v172_v17, %v173_v11  ;;  %v438_v35 = vld [vmem:[%s914_s10] sm:$0x8]  ;;  %v439_v36 = vld [vmem:[%s914_s10 + $0xc] sm:$0x7] }
  0x13   : > { %750 = vmatpush3.bf16.msra.mxu0 %v818_v6  ;;  %v222_v20 = vshrl.u32 %v663_v16, 16  ;;  %v225_v21 = vshll.u32 %v663_v16, 16  ;;  %v699_v37 = vcombine.low %v438_v35, %v173_v11  ;;  %v700_v39 = vcombine.low %v174_v12, %v439_v36 }
  0x14   : > { %770 = vmatpush3.bf16.msra.mxu1 %v819_v7  ;;  %751 = vmatprep.subr.bf16.mxu0 %v820_v8  ;;  %v230_v24 = vshrl.u32 %v664_v18, 16  ;;  %v233_v25 = vshll.u32 %v664_v18, 16 }
  0x15   : > { %771 = vmatprep.subr.bf16.mxu1 %v821_v9  ;;  %v224_v26 = vrot.slane %v222_v20, 1  ;;  %v227_v27 = vrot.slane %v225_v21, 2  ;;  %779 = vmatprep.mubr.bf16.mxu1 %v673_v19  ;;  %v464_v40 = vrot.slane %v699_v37, 3  ;;  %v465_v41 = vrot.slane %v700_v39, 3 }
  0x16   : > { %v232_v28 = vrot.slane %v230_v24, 1  ;;  %v235_v29 = vrot.slane %v233_v25, 2 }
  0x17   : > { %752 = vmatpush3.bf16.msra.mxu0 %v820_v8  ;;  %v228_v30 = vor.u32 %v227_v27, %v224_v26  ;;  %v466_v44 = vsel %vm463_vm1, %v464_v40, %v465_v41 }
  0x18   : > { %772 = vmatpush3.bf16.msra.mxu1 %v821_v9  ;;  %753 = vmatprep.subr.bf16.mxu0 %v822_v10  ;;  %v236_v32 = vor.u32 %v235_v29, %v232_v28 }
  0x19   : > { %773 = vmatprep.subr.bf16.mxu1 %v823_v14 }
  0x1a   : > { %v237_v34 = vsel %vm220_vm0, %v228_v30, %v236_v32 }
  0x1b   : > { %754 = vmatpush3.bf16.msra.mxu0 %v822_v10  ;;  %759 = vmatprep.mubr.bf16.mxu0 %v237_v34 }
  0x1c   : > { %774 = vmatpush3.bf16.msra.mxu1 %v823_v14  ;;  %755 = vmatprep.subr.bf16.mxu0 %v824_v22 }
  0x1d   : > { %775 = vmatprep.subr.bf16.mxu1 %v825_v23 }
  0x1f   : > { %756 = vmatpush3.bf16.msra.mxu0 %v824_v22 }
  0x20   : > { %776 = vmatpush3.bf16.msra.mxu1 %v825_v23  ;;  %757 = vmatprep.subr.bf16.mxu0 %v826_v31 }
  0x21   : > { %777 = vmatprep.subr.bf16.mxu1 %v827_v33 }
  0x23   : > { %758 = vmatpush3.bf16.msra.mxu0 %v826_v31 }
  0x24   : > { %778 = vmatpush3.bf16.msra.mxu1 %v827_v33  ;;  %783 = vmatprep.subr.bf16.mxu0 %v832_v38 }
  0x26   : > { %760 = vmatmul.mubr.bf16.vlgmr.msra.gmra.mrb[0].mxu0 %v236_v32 }
  0x27   : > { %780 = vmatmul.mubr.bf16.vlgmr.msra.gmra.mrb[0].mxu1 %v674_v42  ;;  %784 = vmatpush3.bf16.msra.mxu0 %v832_v38 }
  0x28   : > { %785 = vmatprep.subr.bf16.mxu0 %v833_v43  ;;  %799 = vmatprep.mubr.bf16.mxu0 %v466_v44 }
  0x2b   : > { %786 = vmatpush3.bf16.msra.mxu0 %v833_v43 }
  0x2c   : > { %787 = vmatprep.subr.bf16.mxu0 %v834_v45 }
  0x2f   : > { %788 = vmatpush3.bf16.msra.mxu0 %v834_v45 }
  0x30   : > { %789 = vmatprep.subr.bf16.mxu0 %v835_v46 }
  0x33   : > { %790 = vmatpush3.bf16.msra.mxu0 %v835_v46 }
  0x34   : > { %791 = vmatprep.subr.bf16.mxu0 %v836_v47 }
  0x37   : > { %792 = vmatpush3.bf16.msra.mxu0 %v836_v47 }
  0x38   : > { %793 = vmatprep.subr.bf16.mxu0 %v837_v48 }
  0x3b   : > { %794 = vmatpush3.bf16.msra.mxu0 %v837_v48 }
  0x3c   : > { %795 = vmatprep.subr.bf16.mxu0 %v838_v49 }
  0x3f   : > { %796 = vmatpush3.bf16.msra.mxu0 %v838_v49 }
  0x40   : > { %797 = vmatprep.subr.bf16.mxu0 %v839_v50 }
  0x43   : > { %798 = vmatpush3.bf16.msra.mxu0 %v839_v50 }
  0x46   : > { %800 = vmatmul.mubr.bf16.vlgmr.msra.gmra.mrb[4].mxu0 %v465_v41 }
  0xf9   : > { %v761_v51 = vpop.f32.mrb[0].mxu0 }
  0xfa   : > { %v781_v52 = vpop.f32.mrb[0].mxu1  ;;  %v322_v53 = vpop.f32.mrb[1].mxu0 }
  0xfb   : > { %v433_v54 = vadd.f32 %v781_v52, %v761_v51  ;;  %v424_v55 = vpop.f32.mrb[1].mxu1  ;;  %v762_v56 = vpop.f32.mrb[2].mxu0 }
  0xfc   : > { %v425_v57 = vadd.f32 %v424_v55, %v322_v53  ;;  %v782_v58 = vpop.f32.mrb[2].mxu1  ;;  %v325_v59 = vpop.f32.mrb[3].mxu0 }
  0xfd   : > { %v427_v60 = vpop.f32.mrb[3].mxu1 }
  0xfe   : > { %v428_v61 = vadd.f32 %v427_v60, %v325_v59 }
 0x119   : > { %v801_v62 = vpop.f32.mrb[4].mxu0 }
 0x11a   : > { %v567_v0 = vadd.f32 %v801_v62, %v433_v54  ;;  %v551_v1 = vpop.f32.mrb[5].mxu0 }
 0x11b   : > { %v565_v2 = vadd.f32 %v551_v1, %v425_v57  ;;  %v802_v3 = vpop.f32.mrb[6].mxu0 }
 0x11c   : > { %v577_v4 = vadd.f32 %v709_v63, %v567_v0  ;;  %v554_v5 = vpop.f32.mrb[7].mxu0 }
 0x11d   : > { %v575_v6 = vadd.f32 %v709_v63, %v565_v2  ;;  %v566_v7 = vadd.f32 %v554_v5, %v428_v61 }
 0x11e   : > { %v580_v8 = vmax.f32 %v577_v4, 0.0 }
 0x11f   : > { %v578_v9 = vmax.f32 %v575_v6, 0.0  ;;  %v576_v10 = vadd.f32 %v709_v63, %v566_v7 }
 0x120   : > { %583 = vst [vmem:[%s170_s21 + $0x10] sm:$0xff] %v580_v8 }
 0x121   : > { %581 = vst [vmem:[%s170_s21] sm:$0xff] %v578_v9  ;;  %v579_v11 = vmax.f32 %v576_v10, 0.0 }
 0x123   : > { %582 = vst [vmem:[%s170_s21 + $0x8] sm:$0xff] %v579_v11 }
 0x124 PF: > { %s13_s12 = sadd.s32 1, %s848_s12  }
 0x125   : > { %p10_p4 = scmp.ge.s32.totalorder %s13_s12, 4  }
 0x127   :  { %12 = sbr.rel (!%p10_p4) target bundleno = 1 (0x1), region = 64 }

// kernel: ecapa_forward.57
= control target key start
LH: loop header
LB: loop body
LE: loop exit
PB: predicated region body
PF: predicated region fallthrough
CT: control target
= control target key end

     0   :  { %8 = vsyncpa [#allocation3], 0  ;;  %s926_s12 = smov 0   ;;  %s1067_s0 = inlined_call_operand.vmem [shape: bf16[2,32,128], index: 0, kind: input, shape index: {}]   ;;  %s1068_s1 = inlined_call_operand.vmem [shape: bf16[3,128,128], index: 1, kind: input, shape index: {}]   ;;  %s1069_s2 = inlined_call_operand.hbm [shape: f32[1,128], index: 2, kind: input, shape index: {}]   ;;  %s1070_s3 = inlined_call_operand.vmem [shape: f32[2,24,128], index: 3, kind: output, shape index: {}]  }
   0x1 LB: > { %s932_s13 = sadd.s32 4294967295, %s903_s12   ;;  %p651_p0 = scmp.ge.s32.totalorder %s903_s12, 1  ;;  %s903_s12 = sphi %s926_s12, %s14_s12  }
   0x2   : > { %p113_p1 = scmp.lt.s32.totalorder %s903_s12, 3  ;;  %p1071_p3 = scmp.eq.s32.totalorder %s932_s13, 0 }
   0x3   : > { %s905_s15 = smov [#allocation2]   ;;  %s865_s20 = scalar_lea.hbm %s1069_s2, 16 }
   0x4   : > { %p936_p2 = pnand %p651_p0, %p113_p1  ;;  %s129_s16 = sshll.u32 %s905_s15, 4  ;;  %s130_s16 = int_to_ptr.vmem [resolvable:$true] %s129_s16 }
   0x5   : > { %p866_p6 = scmp.ne.s32.totalorder %s1069_s2, %s865_s20  ;;  %p872_p10 = scmp.lt.u32.totalorder %s865_s20, %s1069_s2 }
   0x6   : > { %s1073_s14 = scalar_select %p936_p2, 1, 0 }
   0x7   : > { %p820_p4 = pneg %p936_p2 }
   0x9   : > { %p945_p5 = pnand %p1071_p3, %p820_p4 }
   0xb   : > { %p867_p7 = pneg %p945_p5 }
   0xd   : > { %p868_p8 = pnand %p867_p7, %p866_p6 }
   0xf   : > { %p869_p9 = pneg %p868_p8 }
  0x11   : > { %p874_p11 = pnand %p872_p10, %p869_p9 }
  0x13   : > { %877 = shalt.err (!%p874_p11)
}
  0x14   : > { %s878_s25 = scalar_lea.vmem %s130_s16, 16  ;;  %s885_s26 = scalar_lea.vmem %s130_s16, 32 }
  0x15   : > { %p879_p12 = scmp.ne.s32.totalorder %s130_s16, %s878_s25  ;;  %p886_p1 = scmp.lt.s32.totalorder %s130_s16, %s130_s16 }
  0x16   : > { %p887_p4 = scmp.lt.s32.totalorder %s885_s26, %s878_s25 }
  0x17   : > { %p881_p13 = pnand %p879_p12, %p867_p7 }
  0x18   : > { %p888_p3 = por %p887_p4, %p886_p1 }
  0x19   : > { %p882_p0 = pneg %p881_p13 }
  0x1b   : > { %p889_p2 = pnand %p888_p3, %p882_p0 }
  0x1d   : > { %892 = shalt.err (!%p889_p2)
}
  0x1e   : > { %823 = dma.hbm_to_vmem [thread:$0]  (!%p945_p5), %s1069_s2, 16, %s130_s16, [#allocation3]  }
  0x1f   : > { %p1075_p6 = scmp.ne.s32.totalorder %s1073_s14, 0 }
  0x20   : > { %p1076_p8 = scmp.eq.s32.totalorder (!%p1075_p6), %s932_s13, 0 }
  0x21   : > { %150 = sbr.rel (%p1075_p6) target bundleno = 328 (0x148), region = 32 }
  0x28   : > { %898 = dma.done.wait (%p1076_p8), [#allocation3], 16   ;;  %p1077_p7 = pmov %p1076_p8 }
  0x29   : > { %v835_v0 = vld [vmem:[%s1068_s1 + $0x40] sm:$0xff]   ;;  %v837_v2 = vld [vmem:[%s1068_s1 + $0x48] sm:$0xff]   ;;  %p174_p2 = scmp.lt.s32.totalorder %s932_s13, 1  ;;  %v839_v4 = vld [vmem:[%s1068_s1 + $0x50] sm:$0xff]   ;;  %vm235_vm0 = vcmask 1045504  }
  0x2a   : > { %900 = vsyncadd (%p1077_p7), [#allocation3], 4294967280  ;;  %v836_v1 = vld [vmem:[%s1068_s1] sm:$0xff]   ;;  %755 = vmatprep.subr.bf16.mxu0 %v835_v0  ;;  %v838_v3 = vld [vmem:[%s1068_s1 + $0x8] sm:$0xff]  }
  0x2b   : > { %775 = vmatprep.subr.bf16.mxu1 %v836_v1  ;;  %756 = vmatpush3.bf16.msra.mxu0 %v835_v0  ;;  %v840_v5 = vld [vmem:[%s1068_s1 + $0x10] sm:$0xff]   ;;  %s1079_s13 = smov (!%p174_p2, %s932_s13), 1  ;;  %v841_v6 = vld [vmem:[%s1068_s1 + $0x58] sm:$0xff]   ;;  %v843_v8 = vld [vmem:[%s1068_s1 + $0x60] sm:$0xff]  }
  0x2c   : > { %776 = vmatpush3.bf16.msra.mxu1 %v836_v1  ;;  %757 = vmatprep.subr.bf16.mxu0 %v837_v2  ;;  %v842_v7 = vld [vmem:[%s1068_s1 + $0x18] sm:$0xff]   ;;  %s724_s20 = sshll.u32 %s1079_s13, 4  ;;  %v844_v9 = vld [vmem:[%s1068_s1 + $0x20] sm:$0xff]   ;;  %v845_v10 = vld [vmem:[%s1068_s1 + $0x68] sm:$0xff]   ;;  %s815_s5 = smul.u32 24, %s1079_s13 }
  0x2d   : > { %777 = vmatprep.subr.bf16.mxu1 %v838_v3  ;;  %s1009_s27 = scalar_lea.vmem %s1067_s0, %s724_s20  ;;  %v846_v11 = vld [vmem:[%s1068_s1 + $0x28] sm:$0xff]   ;;  %v847_v20 = vld [vmem:[%s1068_s1 + $0x70] sm:$0xff]   ;;  %v849_v24 = vld [vmem:[%s1068_s1 + $0x78] sm:$0xff]  }
  0x2e   : > { %v204_v12 = vld [vmem:[%s1009_s27] sm:$0xc]  ;;  %v205_v13 = vld [vmem:[%s1009_s27 + $0x4] sm:$0xf]  ;;  %v206_v14 = vld [vmem:[%s1009_s27 + $0x8] sm:$0xf]  ;;  %s183_s7 = scalar_lea.vmem %s1070_s3, %s815_s5 }
  0x2f   : > { %758 = vmatpush3.bf16.msra.mxu0 %v837_v2  ;;  %v207_v15 = vld [vmem:[%s1009_s27 + $0xc] sm:$0x3]  ;;  %v675_v16 = vcombine.low %v204_v12, %v205_v13  ;;  %v853_v18 = vld [vmem:[%s1009_s27] sm:$0xff]   ;;  %v848_v22 = vld [vmem:[%s1068_s1 + $0x30] sm:$0xff]   ;;  %v711_v29 = vcombine.low %v205_v13, %v206_v14 }
  0x30   : > { %778 = vmatpush3.bf16.msra.mxu1 %v838_v3  ;;  %759 = vmatprep.subr.bf16.mxu0 %v839_v4  ;;  %v676_v17 = vcombine.low %v206_v14, %v207_v15  ;;  %v850_v25 = vld [vmem:[%s1068_s1 + $0x38] sm:$0xff]   ;;  %v855_v26 = vld [vmem:[%s1068_s1 + $0x80] sm:$0xff]   ;;  %v854_v27 = vld [vmem:[%s1009_s27 + $0x8] ss:$0 sps:$4 sm:$0xff]  }
  0x31   : > { %779 = vmatprep.subr.bf16.mxu1 %v840_v5  ;;  %v236_v19 = vrot.slane %v675_v16, 2  ;;  %791 = vmatprep.mubr.bf16.mxu1 %v853_v18  ;;  %v856_v28 = vld [vmem:[%s1068_s1 + $0x88] sm:$0xff]   ;;  %v857_v30 = vld [vmem:[%s1068_s1 + $0x90] sm:$0xff]   ;;  %v858_v31 = vld [vmem:[%s1068_s1 + $0x98] sm:$0xff]  }
  0x32   : > { %v237_v21 = vrot.slane %v676_v17, 2  ;;  %v859_v32 = vld [vmem:[%s1068_s1 + $0xa0] sm:$0xff]   ;;  %v860_v33 = vld [vmem:[%s1068_s1 + $0xa8] sm:$0xff]   ;;  %v861_v34 = vld [vmem:[%s1068_s1 + $0xb0] sm:$0xff]  }
  0x33   : > { %760 = vmatpush3.bf16.msra.mxu0 %v839_v4  ;;  %v862_v35 = vld [vmem:[%s1068_s1 + $0xb8] sm:$0xff]   ;;  %v864_v36 = vld [vmem:[%s1009_s27 + $0xc] ss:$0 sps:$4 sm:$0xff]   ;;  %v721_v49 = vld [vmem:[#allocation2] ss:$0 sm:$0xff] }
  0x34   : > { %780 = vmatpush3.bf16.msra.mxu1 %v840_v5  ;;  %761 = vmatprep.subr.bf16.mxu0 %v841_v6  ;;  %v238_v23 = vsel %vm235_vm0, %v236_v19, %v237_v21 }
  0x35   : > { %781 = vmatprep.subr.bf16.mxu1 %v842_v7  ;;  %771 = vmatprep.mubr.bf16.mxu0 %v238_v23 }
  0x37   : > { %762 = vmatpush3.bf16.msra.mxu0 %v841_v6 }
  0x38   : > { %782 = vmatpush3.bf16.msra.mxu1 %v842_v7  ;;  %763 = vmatprep.subr.bf16.mxu0 %v843_v8 }
  0x39   : > { %783 = vmatprep.subr.bf16.mxu1 %v844_v9 }
  0x3b   : > { %764 = vmatpush3.bf16.msra.mxu0 %v843_v8 }
  0x3c   : > { %784 = vmatpush3.bf16.msra.mxu1 %v844_v9  ;;  %765 = vmatprep.subr.bf16.mxu0 %v845_v10 }
  0x3d   : > { %785 = vmatprep.subr.bf16.mxu1 %v846_v11 }
  0x3f   : > { %766 = vmatpush3.bf16.msra.mxu0 %v845_v10 }
  0x40   : > { %786 = vmatpush3.bf16.msra.mxu1 %v846_v11  ;;  %767 = vmatprep.subr.bf16.mxu0 %v847_v20 }
  0x41   : > { %787 = vmatprep.subr.bf16.mxu1 %v848_v22 }
  0x43   : > { %768 = vmatpush3.bf16.msra.mxu0 %v847_v20 }
  0x44   : > { %788 = vmatpush3.bf16.msra.mxu1 %v848_v22  ;;  %769 = vmatprep.subr.bf16.mxu0 %v849_v24 }
  0x45   : > { %789 = vmatprep.subr.bf16.mxu1 %v850_v25 }
  0x47   : > { %770 = vmatpush3.bf16.msra.mxu0 %v849_v24 }
  0x48   : > { %790 = vmatpush3.bf16.msra.mxu1 %v850_v25  ;;  %795 = vmatprep.subr.bf16.mxu0 %v855_v26 }
  0x4a   : > { %772 = vmatmul.mubr.bf16.vlgmr.msra.gmra.mrb[0].mxu0 %v237_v21 }
  0x4b   : > { %792 = vmatmul.mubr.bf16.vlgmr.msra.gmra.mrb[0].mxu1 %v854_v27  ;;  %796 = vmatpush3.bf16.msra.mxu0 %v855_v26 }
  0x4c   : > { %797 = vmatprep.subr.bf16.mxu0 %v856_v28  ;;  %811 = vmatprep.mubr.bf16.mxu0 %v711_v29 }
  0x4f   : > { %798 = vmatpush3.bf16.msra.mxu0 %v856_v28 }
  0x50   : > { %799 = vmatprep.subr.bf16.mxu0 %v857_v30 }
  0x53   : > { %800 = vmatpush3.bf16.msra.mxu0 %v857_v30 }
  0x54   : > { %801 = vmatprep.subr.bf16.mxu0 %v858_v31 }
  0x57   : > { %802 = vmatpush3.bf16.msra.mxu0 %v858_v31 }
  0x58   : > { %803 = vmatprep.subr.bf16.mxu0 %v859_v32 }
  0x5b   : > { %804 = vmatpush3.bf16.msra.mxu0 %v859_v32 }
  0x5c   : > { %805 = vmatprep.subr.bf16.mxu0 %v860_v33 }
  0x5f   : > { %806 = vmatpush3.bf16.msra.mxu0 %v860_v33 }
  0x60   : > { %807 = vmatprep.subr.bf16.mxu0 %v861_v34 }
  0x63   : > { %808 = vmatpush3.bf16.msra.mxu0 %v861_v34 }
  0x64   : > { %809 = vmatprep.subr.bf16.mxu0 %v862_v35 }
  0x67   : > { %810 = vmatpush3.bf16.msra.mxu0 %v862_v35 }
  0x6a   : > { %812 = vmatmul.mubr.bf16.vlgmr.msra.gmra.mrb[4].mxu0 %v864_v36 }
 0x11d   : > { %v773_v37 = vpop.f32.mrb[0].mxu0 }
 0x11e   : > { %v793_v38 = vpop.f32.mrb[0].mxu1  ;;  %v323_v39 = vpop.f32.mrb[1].mxu0 }
 0x11f   : > { %v438_v40 = vadd.f32 %v793_v38, %v773_v37  ;;  %v429_v41 = vpop.f32.mrb[1].mxu1  ;;  %v774_v42 = vpop.f32.mrb[2].mxu0 }
 0x120   : > { %v430_v43 = vadd.f32 %v429_v41, %v323_v39  ;;  %v794_v44 = vpop.f32.mrb[2].mxu1  ;;  %v326_v45 = vpop.f32.mrb[3].mxu0 }
 0x121   : > { %v432_v46 = vpop.f32.mrb[3].mxu1 }
 0x122   : > { %v433_v47 = vadd.f32 %v432_v46, %v326_v45 }
 0x13d   : > { %v813_v48 = vpop.f32.mrb[4].mxu0 }
 0x13e   : > { %v565_v50 = vadd.f32 %v813_v48, %v438_v40  ;;  %v549_v51 = vpop.f32.mrb[5].mxu0 }
 0x13f   : > { %v563_v52 = vadd.f32 %v549_v51, %v430_v43  ;;  %v814_v53 = vpop.f32.mrb[6].mxu0 }
 0x140   : > { %v575_v54 = vadd.f32 %v721_v49, %v565_v50  ;;  %v552_v55 = vpop.f32.mrb[7].mxu0 }
 0x141   : > { %v573_v56 = vadd.f32 %v721_v49, %v563_v52  ;;  %v564_v57 = vadd.f32 %v552_v55, %v433_v47 }
 0x142   : > { %v578_v58 = vmax.f32 %v575_v54, 0.0 }
 0x143   : > { %v576_v59 = vmax.f32 %v573_v56, 0.0  ;;  %v574_v60 = vadd.f32 %v721_v49, %v564_v57 }
 0x144   : > { %581 = vst [vmem:[%s183_s7 + $0x10] sm:$0xff] %v578_v58 }
 0x145   : > { %579 = vst [vmem:[%s183_s7] sm:$0xff] %v576_v59  ;;  %v577_v61 = vmax.f32 %v574_v60, 0.0 }
 0x147   : > { %580 = vst [vmem:[%s183_s7 + $0x8] sm:$0xff] %v577_v61 }
 0x148 PF: > { %s14_s12 = sadd.s32 1, %s903_s12  }
 0x149   : > { %p11_p3 = scmp.ge.s32.totalorder %s14_s12, 4  }
 0x14b   :  { %13 = sbr.rel (!%p11_p3) target bundleno = 1 (0x1), region = 69 }
 0x152   :  { %603 = vsyncpa [#allocation3], 1 }
 0x153   :  { %605 = vsyncpa [#allocation3 + $0x1], 1 }

// kernel: ecapa_forward.61
= control target key start
LH: loop header
LB: loop body
LE: loop exit
PB: predicated region body
PF: predicated region fallthrough
CT: control target
= control target key end

     0   :  { %s1641_s12 = smov 0   ;;  %s1643_s13 = smov 0   ;;  %s2045_s0 = inlined_call_operand.vmem [shape: bf16[48,256], index: 0, kind: input, shape index: {}]   ;;  %s2046_s1 = inlined_call_operand.vmem [shape: bf16[256,1536], index: 1, kind: input, shape index: {}]   ;;  %s2047_s2 = inlined_call_operand.vmem [shape: f32[1,1536], index: 2, kind: input, shape index: {}]   ;;  %s2048_s3 = inlined_call_operand.vmem [shape: f32[48,1536], index: 3, kind: output, shape index: {}]  }
   0x1   :  { %s1645_s14 = smov 0   ;;  %s1647_s15 = smov 0  }
   0x2   :  { %s1649_s16 = smov 0  }
   0x3 LB: > { %s28_s17 = sadd.s32 1, %s1615_s15  ;;  %s1348_s18 = sadd.s32 4294967295, %s1619_s16   ;;  %s1619_s16 = sphi %s1649_s16, %s13_s16   ;;  %s1615_s15 = sphi %s1647_s15, %s2053_s15   ;;  %s1611_s14 = sphi %s1645_s14, %s2052_s14   ;;  %s1607_s13 = sphi %s1643_s13, %s2051_s13   ;;  %s1603_s12 = sphi %s1641_s12, %s2050_s12  }
   0x4   : > { %p30_p0 = scmp.ge.s32.totalorder %s28_s17, 3  ;;  %p76_p1 = scmp.ne.s32.totalorder %s1607_s13, %s1603_s12 }
   0x5   : > { %p77_p2 = scmp.eq.s32.totalorder %s1619_s16, 0  ;;  %p134_p4 = scmp.eq.s32.totalorder %s1348_s18, 2 }
   0x6   : > { %s2055_s17 = smov (%p30_p0, %s28_s17), 0  ;;  %s69_s20 = sadd.s32 1, %s1607_s13 }
   0x7   : > { %p78_p3 = por %p77_p2, %p76_p1  ;;  %s65_s19 = ssub.s32 %s1615_s15, %s2055_s17 }
   0x8   : > { %p67_p5 = scmp.eq.s32.totalorder %s65_s19, 0  ;;  %p1676_p6 = por %p134_p4, %p76_p1 }
   0x9   : > { %p1352_p7 = scmp.ge.s32.totalorder %s1619_s16, 3 }
   0xa   : > { %s1681_s22 = scalar_select %p67_p5, %s1607_s13, %s69_s20  }
   0xb   : > { %171 = sbr.rel (%p1352_p7) target bundleno = 54 (0x36), region = 20 }
  0x12   : > { %174 = sbr.rel (!%p78_p3) target bundleno = 54 (0x36), region = 24  ;;  %s176_s23 = sand.u32 (%p78_p3), 1, %s1607_s13  }
  0x13   : > { %s1433_s24 = sshll.u32 (%p78_p3), %s1615_s15, 4  ;;  %s1353_s25 = sshll.u32 (%p78_p3), %s176_s23, 9 }
  0x14   : > { %s1689_s28 = scalar_lea.vmem (%p78_p3), %s2046_s1, %s1433_s24  ;;  %s1694_s29 = scalar_lea.vmem (%p78_p3), [#allocation3], %s1353_s25 }
  0x15   : > { %v197_v0 = vld [vmem:[%s1689_s28] sm:$0xff] (%p78_p3)  ;;  %v199_v1 = vld [vmem:[%s1689_s28 + $0x8] sm:$0xff] (%p78_p3)  ;;  %v201_v2 = vld [vmem:[%s1689_s28 + $0x30] sm:$0xff] (%p78_p3) }
  0x16   : > { %198 = vst [vmem:[%s1694_s29] sm:$0xff] (%p78_p3), %v197_v0  ;;  %200 = vst [vmem:[%s1694_s29 + $0x8] sm:$0xff] (%p78_p3), %v199_v1  ;;  %v203_v3 = vld [vmem:[%s1689_s28 + $0x38] sm:$0xff] (%p78_p3)  ;;  %v205_v4 = vld [vmem:[%s1689_s28 + $0x60] sm:$0xff] (%p78_p3) }
  0x17   : > { %202 = vst [vmem:[%s1694_s29 + $0x10] sm:$0xff] (%p78_p3), %v201_v2  ;;  %v207_v5 = vld [vmem:[%s1689_s28 + $0x68] sm:$0xff] (%p78_p3)  ;;  %204 = vst [vmem:[%s1694_s29 + $0x18] sm:$0xff] (%p78_p3), %v203_v3  ;;  %v209_v6 = vld [vmem:[%s1689_s28 + $0x90] sm:$0xff] (%p78_p3) }
  0x18   : > { %206 = vst [vmem:[%s1694_s29 + $0x20] sm:$0xff] (%p78_p3), %v205_v4  ;;  %208 = vst [vmem:[%s1694_s29 + $0x28] sm:$0xff] (%p78_p3), %v207_v5  ;;  %v211_v7 = vld [vmem:[%s1689_s28 + $0x98] sm:$0xff] (%p78_p3)  ;;  %v213_v8 = vld [vmem:[%s1689_s28 + $0xc0] sm:$0xff] (%p78_p3) }
  0x19   : > { %210 = vst [vmem:[%s1694_s29 + $0x30] sm:$0xff] %v209_v6  ;;  %212 = vst [vmem:[%s1694_s29 + $0x38] sm:$0xff] %v211_v7  ;;  %v215_v9 = vld [vmem:[%s1689_s28 + $0xc8] sm:$0xff]  ;;  %v217_v10 = vld [vmem:[%s1689_s28 + $0xf0] sm:$0xff] }
  0x1a   : > { %214 = vst [vmem:[%s1694_s29 + $0x40] sm:$0xff] %v213_v8  ;;  %v219_v11 = vld [vmem:[%s1689_s28 + $0xf8] sm:$0xff]  ;;  %216 = vst [vmem:[%s1694_s29 + $0x48] sm:$0xff] %v215_v9  ;;  %v221_v12 = vld [vmem:[%s1689_s28 + $0x120] sm:$0xff] }
  0x1b   : > { %218 = vst [vmem:[%s1694_s29 + $0x50] sm:$0xff] %v217_v10  ;;  %220 = vst [vmem:[%s1694_s29 + $0x58] sm:$0xff] %v219_v11  ;;  %v223_v13 = vld [vmem:[%s1689_s28 + $0x128] sm:$0xff]  ;;  %v225_v14 = vld [vmem:[%s1689_s28 + $0x150] sm:$0xff] }
  0x1c   : > { %222 = vst [vmem:[%s1694_s29 + $0x60] sm:$0xff] %v221_v12  ;;  %224 = vst [vmem:[%s1694_s29 + $0x68] sm:$0xff] %v223_v13  ;;  %v227_v15 = vld [vmem:[%s1689_s28 + $0x158] sm:$0xff]  ;;  %v229_v16 = vld [vmem:[%s1689_s28 + $0x180] sm:$0xff] }
  0x1d   : > { %226 = vst [vmem:[%s1694_s29 + $0x70] sm:$0xff] %v225_v14  ;;  %v231_v17 = vld [vmem:[%s1689_s28 + $0x188] sm:$0xff]  ;;  %228 = vst [vmem:[%s1694_s29 + $0x78] sm:$0xff] %v227_v15  ;;  %v233_v18 = vld [vmem:[%s1689_s28 + $0x1b0] sm:$0xff] }
  0x1e   : > { %230 = vst [vmem:[%s1694_s29 + $0x80] sm:$0xff] %v229_v16  ;;  %232 = vst [vmem:[%s1694_s29 + $0x88] sm:$0xff] %v231_v17  ;;  %v235_v19 = vld [vmem:[%s1689_s28 + $0x1b8] sm:$0xff]  ;;  %v237_v20 = vld [vmem:[%s1689_s28 + $0x1e0] sm:$0xff] }
  0x1f   : > { %234 = vst [vmem:[%s1694_s29 + $0x90] sm:$0xff] %v233_v18  ;;  %236 = vst [vmem:[%s1694_s29 + $0x98] sm:$0xff] %v235_v19  ;;  %v239_v21 = vld [vmem:[%s1689_s28 + $0x1e8] sm:$0xff]  ;;  %v241_v22 = vld [vmem:[%s1689_s28 + $0x210] sm:$0xff] }
  0x20   : > { %238 = vst [vmem:[%s1694_s29 + $0xa0] sm:$0xff] %v237_v20  ;;  %v243_v23 = vld [vmem:[%s1689_s28 + $0x218] sm:$0xff]  ;;  %240 = vst [vmem:[%s1694_s29 + $0xa8] sm:$0xff] %v239_v21  ;;  %v245_v24 = vld [vmem:[%s1689_s28 + $0x240] sm:$0xff] }
  0x21   : > { %242 = vst [vmem:[%s1694_s29 + $0xb0] sm:$0xff] %v241_v22  ;;  %244 = vst [vmem:[%s1694_s29 + $0xb8] sm:$0xff] %v243_v23  ;;  %v247_v25 = vld [vmem:[%s1689_s28 + $0x248] sm:$0xff]  ;;  %v249_v26 = vld [vmem:[%s1689_s28 + $0x270] sm:$0xff] }
  0x22   : > { %246 = vst [vmem:[%s1694_s29 + $0xc0] sm:$0xff] %v245_v24  ;;  %248 = vst [vmem:[%s1694_s29 + $0xc8] sm:$0xff] %v247_v25  ;;  %v251_v27 = vld [vmem:[%s1689_s28 + $0x278] sm:$0xff]  ;;  %v253_v28 = vld [vmem:[%s1689_s28 + $0x2a0] sm:$0xff] }
  0x23   : > { %250 = vst [vmem:[%s1694_s29 + $0xd0] sm:$0xff] %v249_v26  ;;  %v255_v29 = vld [vmem:[%s1689_s28 + $0x2a8] sm:$0xff]  ;;  %252 = vst [vmem:[%s1694_s29 + $0xd8] sm:$0xff] %v251_v27  ;;  %v257_v30 = vld [vmem:[%s1689_s28 + $0x2d0] sm:$0xff] }
  0x24   : > { %254 = vst [vmem:[%s1694_s29 + $0xe0] sm:$0xff] %v253_v28  ;;  %256 = vst [vmem:[%s1694_s29 + $0xe8] sm:$0xff] %v255_v29  ;;  %v259_v31 = vld [vmem:[%s1689_s28 + $0x2d8] sm:$0xff]  ;;  %v261_v32 = vld [vmem:[%s1689_s28 + $0x300] sm:$0xff] }
  0x25   : > { %258 = vst [vmem:[%s1694_s29 + $0xf0] sm:$0xff] %v257_v30  ;;  %260 = vst [vmem:[%s1694_s29 + $0xf8] sm:$0xff] %v259_v31  ;;  %v263_v33 = vld [vmem:[%s1689_s28 + $0x308] sm:$0xff]  ;;  %v265_v34 = vld [vmem:[%s1689_s28 + $0x330] sm:$0xff] }
  0x26   : > { %262 = vst [vmem:[%s1694_s29 + $0x100] sm:$0xff] %v261_v32  ;;  %v267_v35 = vld [vmem:[%s1689_s28 + $0x338] sm:$0xff]  ;;  %264 = vst [vmem:[%s1694_s29 + $0x108] sm:$0xff] %v263_v33  ;;  %v269_v36 = vld [vmem:[%s1689_s28 + $0x360] sm:$0xff] }
  0x27   : > { %266 = vst [vmem:[%s1694_s29 + $0x110] sm:$0xff] %v265_v34  ;;  %268 = vst [vmem:[%s1694_s29 + $0x118] sm:$0xff] %v267_v35  ;;  %v271_v37 = vld [vmem:[%s1689_s28 + $0x368] sm:$0xff]  ;;  %v273_v38 = vld [vmem:[%s1689_s28 + $0x390] sm:$0xff] }
  0x28   : > { %270 = vst [vmem:[%s1694_s29 + $0x120] sm:$0xff] %v269_v36  ;;  %272 = vst [vmem:[%s1694_s29 + $0x128] sm:$0xff] %v271_v37  ;;  %v275_v39 = vld [vmem:[%s1689_s28 + $0x398] sm:$0xff]  ;;  %v277_v40 = vld [vmem:[%s1689_s28 + $0x3c0] sm:$0xff] }
  0x29   : > { %274 = vst [vmem:[%s1694_s29 + $0x130] sm:$0xff] %v273_v38  ;;  %v279_v41 = vld [vmem:[%s1689_s28 + $0x3c8] sm:$0xff]  ;;  %276 = vst [vmem:[%s1694_s29 + $0x138] sm:$0xff] %v275_v39  ;;  %v281_v42 = vld [vmem:[%s1689_s28 + $0x3f0] sm:$0xff] }
  0x2a   : > { %278 = vst [vmem:[%s1694_s29 + $0x140] sm:$0xff] %v277_v40  ;;  %280 = vst [vmem:[%s1694_s29 + $0x148] sm:$0xff] %v279_v41  ;;  %v283_v43 = vld [vmem:[%s1689_s28 + $0x3f8] sm:$0xff]  ;;  %v285_v44 = vld [vmem:[%s1689_s28 + $0x420] sm:$0xff] }
  0x2b   : > { %282 = vst [vmem:[%s1694_s29 + $0x150] sm:$0xff] %v281_v42  ;;  %284 = vst [vmem:[%s1694_s29 + $0x158] sm:$0xff] %v283_v43  ;;  %v287_v45 = vld [vmem:[%s1689_s28 + $0x428] sm:$0xff]  ;;  %v289_v46 = vld [vmem:[%s1689_s28 + $0x450] sm:$0xff] }
  0x2c   : > { %286 = vst [vmem:[%s1694_s29 + $0x160] sm:$0xff] %v285_v44  ;;  %v291_v47 = vld [vmem:[%s1689_s28 + $0x458] sm:$0xff]  ;;  %288 = vst [vmem:[%s1694_s29 + $0x168] sm:$0xff] %v287_v45  ;;  %v293_v48 = vld [vmem:[%s1689_s28 + $0x480] sm:$0xff] }
  0x2d   : > { %290 = vst [vmem:[%s1694_s29 + $0x170] sm:$0xff] %v289_v46  ;;  %292 = vst [vmem:[%s1694_s29 + $0x178] sm:$0xff] %v291_v47  ;;  %v295_v49 = vld [vmem:[%s1689_s28 + $0x488] sm:$0xff]  ;;  %v297_v50 = vld [vmem:[%s1689_s28 + $0x4b0] sm:$0xff] }
  0x2e   : > { %294 = vst [vmem:[%s1694_s29 + $0x180] sm:$0xff] %v293_v48  ;;  %296 = vst [vmem:[%s1694_s29 + $0x188] sm:$0xff] %v295_v49  ;;  %v299_v51 = vld [vmem:[%s1689_s28 + $0x4b8] sm:$0xff]  ;;  %v301_v52 = vld [vmem:[%s1689_s28 + $0x4e0] sm:$0xff] }
  0x2f   : > { %298 = vst [vmem:[%s1694_s29 + $0x190] sm:$0xff] %v297_v50  ;;  %v303_v53 = vld [vmem:[%s1689_s28 + $0x4e8] sm:$0xff]  ;;  %300 = vst [vmem:[%s1694_s29 + $0x198] sm:$0xff] %v299_v51  ;;  %v305_v54 = vld [vmem:[%s1689_s28 + $0x510] sm:$0xff] }
  0x30   : > { %302 = vst [vmem:[%s1694_s29 + $0x1a0] sm:$0xff] %v301_v52  ;;  %304 = vst [vmem:[%s1694_s29 + $0x1a8] sm:$0xff] %v303_v53  ;;  %v307_v55 = vld [vmem:[%s1689_s28 + $0x518] sm:$0xff]  ;;  %v309_v56 = vld [vmem:[%s1689_s28 + $0x540] sm:$0xff] }
  0x31   : > { %306 = vst [vmem:[%s1694_s29 + $0x1b0] sm:$0xff] %v305_v54  ;;  %308 = vst [vmem:[%s1694_s29 + $0x1b8] sm:$0xff] %v307_v55  ;;  %v311_v57 = vld [vmem:[%s1689_s28 + $0x548] sm:$0xff]  ;;  %v313_v58 = vld [vmem:[%s1689_s28 + $0x570] sm:$0xff] }
  0x32   : > { %310 = vst [vmem:[%s1694_s29 + $0x1c0] sm:$0xff] %v309_v56  ;;  %v315_v59 = vld [vmem:[%s1689_s28 + $0x578] sm:$0xff]  ;;  %312 = vst [vmem:[%s1694_s29 + $0x1c8] sm:$0xff] %v311_v57  ;;  %v317_v60 = vld [vmem:[%s1689_s28 + $0x5a0] sm:$0xff] }
  0x33   : > { %314 = vst [vmem:[%s1694_s29 + $0x1d0] sm:$0xff] %v313_v58  ;;  %316 = vst [vmem:[%s1694_s29 + $0x1d8] sm:$0xff] %v315_v59  ;;  %v319_v61 = vld [vmem:[%s1689_s28 + $0x5a8] sm:$0xff]  ;;  %v321_v62 = vld [vmem:[%s1689_s28 + $0x5d0] sm:$0xff] }
  0x34   : > { %318 = vst [vmem:[%s1694_s29 + $0x1e0] sm:$0xff] %v317_v60  ;;  %320 = vst [vmem:[%s1694_s29 + $0x1e8] sm:$0xff] %v319_v61  ;;  %v323_v63 = vld [vmem:[%s1689_s28 + $0x5d8] sm:$0xff] }
  0x35   : > { %322 = vst [vmem:[%s1694_s29 + $0x1f0] sm:$0xff] %v321_v62  ;;  %324 = vst [vmem:[%s1694_s29 + $0x1f8] sm:$0xff] %v323_v63 }
  0x36 PF: > { %p1356_p8 = scmp.ge.s32.totalorder %s1619_s16, 1  ;;  %p337_p9 = scmp.lt.s32.totalorder %s1619_s16, 4 }
  0x38   : > { %p338_p10 = pnand %p1356_p8, %p337_p9 }
  0x39   : > { %s344_s30 = sand.u32 (!%p338_p10), 1, %s1603_s12   ;;  %v1574_v0 = vld [vmem:[%s2045_s0 + $0x4] ss:$8 sps:$4 sm:$0xff] (!%p338_p10)   ;;  %s1358_s26 = sshll.u32 (!%p338_p10), %s1611_s14, 2 }
  0x3a   : > { %341 = sbr.rel (%p338_p10) target bundleno = 370 (0x172), region = 51  ;;  %s1357_s4 = sshll.u32 (!%p338_p10), %s344_s30, 9  ;;  %905 = vmatprep.mubr.bf16.mxu0 (!%p338_p10), %v1574_v0  ;;  %968 = vmatprep.mubr.bf16.mxu1 (!%p338_p10), %v1574_v0 }
  0x3b   : > { %s1829_s7 = scalar_lea.vmem (!%p338_p10), [#allocation3], %s1357_s4  ;;  %p395_p11 = scmp.lt.s32.totalorder (!%p338_p10), %s1358_s26, 11 }
  0x3c   : > { %v1476_v1 = vld [vmem:[%s1829_s7 + $0x4] ss:$16 sps:$4 sm:$0xff] (!%p338_p10)   ;;  %v1478_v2 = vld [vmem:[%s1829_s7 + $0xc] ss:$16 sps:$4 sm:$0xff] (!%p338_p10)   ;;  %v1480_v3 = vld [vmem:[%s1829_s7] ss:$16 sps:$4 sm:$0xff] (!%p338_p10)  }
  0x3d   : > { %873 = vmatprep.subr.bf16.mxu0 (!%p338_p10), %v1476_v1  ;;  %v1481_v4 = vld [vmem:[%s1829_s7 + $0x8] ss:$16 sps:$4 sm:$0xff] (!%p338_p10)   ;;  %936 = vmatprep.subr.bf16.mxu1 (!%p338_p10), %v1478_v2  ;;  %v1482_v5 = vld [vmem:[%s1829_s7 + $0x24] ss:$16 sps:$4 sm:$0xff] (!%p338_p10)   ;;  %v1484_v6 = vld [vmem:[%s1829_s7 + $0x2c] ss:$16 sps:$4 sm:$0xff] (!%p338_p10)  }
  0x3e   : > { %874 = vmatpush1.bf16.msra.mxu0 (!%p338_p10), %v1480_v3  ;;  %937 = vmatpush1.bf16.msra.mxu1 (!%p338_p10), %v1481_v4  ;;  %v1486_v7 = vld [vmem:[%s1829_s7 + $0x20] ss:$16 sps:$4 sm:$0xff] (!%p338_p10)   ;;  %v1487_v8 = vld [vmem:[%s1829_s7 + $0x28] ss:$16 sps:$4 sm:$0xff] (!%p338_p10)   ;;  %v1488_v9 = vld [vmem:[%s1829_s7 + $0x44] ss:$16 sps:$4 sm:$0xff] (!%p338_p10)  }
  0x3f   : > { %875 = vmatprep.subr.bf16.mxu0 (!%p338_p10), %v1482_v5  ;;  %938 = vmatprep.subr.bf16.mxu1 (!%p338_p10), %v1484_v6  ;;  %v1490_v10 = vld [vmem:[%s1829_s7 + $0x4c] ss:$16 sps:$4 sm:$0xff] (!%p338_p10)   ;;  %v1492_v11 = vld [vmem:[%s1829_s7 + $0x40] ss:$16 sps:$4 sm:$0xff] (!%p338_p10)   ;;  %v1493_v12 = vld [vmem:[%s1829_s7 + $0x48] ss:$16 sps:$4 sm:$0xff] (!%p338_p10)   ;;  %v1076_v6 = vlaneseq (!%p338_p10) }
  0x40   : > { %v1494_v13 = vld [vmem:[%s1829_s7 + $0x64] ss:$16 sps:$4 sm:$0xff] (!%p338_p10)   ;;  %v1496_v14 = vld [vmem:[%s1829_s7 + $0x6c] ss:$16 sps:$4 sm:$0xff] (!%p338_p10)   ;;  %v1498_v15 = vld [vmem:[%s1829_s7 + $0x60] ss:$16 sps:$4 sm:$0xff] (!%p338_p10)  }
  0x41   : > { %v1499_v16 = vld [vmem:[%s1829_s7 + $0x68] ss:$16 sps:$4 sm:$0xff]   ;;  %v1500_v17 = vld [vmem:[%s1829_s7 + $0x84] ss:$16 sps:$4 sm:$0xff]   ;;  %v1502_v18 = vld [vmem:[%s1829_s7 + $0x8c] ss:$16 sps:$4 sm:$0xff]  }
  0x42   : > { %876 = vmatpush1.bf16.msra.mxu0 %v1486_v7  ;;  %939 = vmatpush1.bf16.msra.mxu1 %v1487_v8  ;;  %v1504_v19 = vld [vmem:[%s1829_s7 + $0x80] ss:$16 sps:$4 sm:$0xff]   ;;  %v1505_v20 = vld [vmem:[%s1829_s7 + $0x88] ss:$16 sps:$4 sm:$0xff]   ;;  %v1506_v21 = vld [vmem:[%s1829_s7 + $0xa4] ss:$16 sps:$4 sm:$0xff]  }
  0x43   : > { %877 = vmatprep.subr.bf16.mxu0 %v1488_v9  ;;  %940 = vmatprep.subr.bf16.mxu1 %v1490_v10  ;;  %v1508_v22 = vld [vmem:[%s1829_s7 + $0xac] ss:$16 sps:$4 sm:$0xff]   ;;  %v1510_v23 = vld [vmem:[%s1829_s7 + $0xa0] ss:$16 sps:$4 sm:$0xff]   ;;  %v1511_v24 = vld [vmem:[%s1829_s7 + $0xa8] ss:$16 sps:$4 sm:$0xff]  }
  0x44   : > { %v1512_v25 = vld [vmem:[%s1829_s7 + $0xc4] ss:$16 sps:$4 sm:$0xff]   ;;  %v1514_v26 = vld [vmem:[%s1829_s7 + $0xcc] ss:$16 sps:$4 sm:$0xff]   ;;  %v1516_v27 = vld [vmem:[%s1829_s7 + $0xc0] ss:$16 sps:$4 sm:$0xff]  }
  0x45   : > { %v1517_v28 = vld [vmem:[%s1829_s7 + $0xc8] ss:$16 sps:$4 sm:$0xff]   ;;  %v1518_v29 = vld [vmem:[%s1829_s7 + $0xe4] ss:$16 sps:$4 sm:$0xff]   ;;  %v1520_v30 = vld [vmem:[%s1829_s7 + $0xec] ss:$16 sps:$4 sm:$0xff]  }
  0x46   : > { %878 = vmatpush1.bf16.msra.mxu0 %v1492_v11  ;;  %941 = vmatpush1.bf16.msra.mxu1 %v1493_v12  ;;  %v1522_v31 = vld [vmem:[%s1829_s7 + $0xe0] ss:$16 sps:$4 sm:$0xff]   ;;  %v1523_v32 = vld [vmem:[%s1829_s7 + $0xe8] ss:$16 sps:$4 sm:$0xff]   ;;  %v1524_v33 = vld [vmem:[%s1829_s7 + $0x104] ss:$16 sps:$4 sm:$0xff]  }
  0x47   : > { %879 = vmatprep.subr.bf16.mxu0 %v1494_v13  ;;  %942 = vmatprep.subr.bf16.mxu1 %v1496_v14  ;;  %v1526_v34 = vld [vmem:[%s1829_s7 + $0x10c] ss:$16 sps:$4 sm:$0xff]   ;;  %v1528_v35 = vld [vmem:[%s1829_s7 + $0x100] ss:$16 sps:$4 sm:$0xff]   ;;  %v1529_v36 = vld [vmem:[%s1829_s7 + $0x108] ss:$16 sps:$4 sm:$0xff]  }
  0x48   : > { %v1530_v37 = vld [vmem:[%s1829_s7 + $0x124] ss:$16 sps:$4 sm:$0xff]   ;;  %v1532_v38 = vld [vmem:[%s1829_s7 + $0x12c] ss:$16 sps:$4 sm:$0xff]   ;;  %v1534_v39 = vld [vmem:[%s1829_s7 + $0x120] ss:$16 sps:$4 sm:$0xff]  }
  0x49   : > { %v1535_v40 = vld [vmem:[%s1829_s7 + $0x128] ss:$16 sps:$4 sm:$0xff]   ;;  %v1536_v41 = vld [vmem:[%s1829_s7 + $0x144] ss:$16 sps:$4 sm:$0xff]   ;;  %v1538_v42 = vld [vmem:[%s1829_s7 + $0x14c] ss:$16 sps:$4 sm:$0xff]  }
  0x4a   : > { %880 = vmatpush1.bf16.msra.mxu0 %v1498_v15  ;;  %943 = vmatpush1.bf16.msra.mxu1 %v1499_v16  ;;  %v1540_v43 = vld [vmem:[%s1829_s7 + $0x140] ss:$16 sps:$4 sm:$0xff]   ;;  %v1541_v44 = vld [vmem:[%s1829_s7 + $0x148] ss:$16 sps:$4 sm:$0xff]   ;;  %v1542_v45 = vld [vmem:[%s1829_s7 + $0x164] ss:$16 sps:$4 sm:$0xff]  }
  0x4b   : > { %881 = vmatprep.subr.bf16.mxu0 %v1500_v17  ;;  %944 = vmatprep.subr.bf16.mxu1 %v1502_v18  ;;  %v1544_v46 = vld [vmem:[%s1829_s7 + $0x16c] ss:$16 sps:$4 sm:$0xff]   ;;  %v1546_v47 = vld [vmem:[%s1829_s7 + $0x160] ss:$16 sps:$4 sm:$0xff]   ;;  %v1547_v48 = vld [vmem:[%s1829_s7 + $0x168] ss:$16 sps:$4 sm:$0xff]  }
  0x4c   : > { %v1548_v49 = vld [vmem:[%s1829_s7 + $0x184] ss:$16 sps:$4 sm:$0xff]   ;;  %v1550_v50 = vld [vmem:[%s1829_s7 + $0x18c] ss:$16 sps:$4 sm:$0xff]   ;;  %v1552_v51 = vld [vmem:[%s1829_s7 + $0x180] ss:$16 sps:$4 sm:$0xff]  }
  0x4d   : > { %v1553_v52 = vld [vmem:[%s1829_s7 + $0x188] ss:$16 sps:$4 sm:$0xff]   ;;  %v1554_v53 = vld [vmem:[%s1829_s7 + $0x1a4] ss:$16 sps:$4 sm:$0xff]   ;;  %v1556_v54 = vld [vmem:[%s1829_s7 + $0x1ac] ss:$16 sps:$4 sm:$0xff]  }
  0x4e   : > { %882 = vmatpush1.bf16.msra.mxu0 %v1504_v19  ;;  %945 = vmatpush1.bf16.msra.mxu1 %v1505_v20  ;;  %v1558_v55 = vld [vmem:[%s1829_s7 + $0x1a0] ss:$16 sps:$4 sm:$0xff]   ;;  %v1559_v56 = vld [vmem:[%s1829_s7 + $0x1a8] ss:$16 sps:$4 sm:$0xff]   ;;  %v1560_v57 = vld [vmem:[%s1829_s7 + $0x1c4] ss:$16 sps:$4 sm:$0xff]  }
  0x4f   : > { %883 = vmatprep.subr.bf16.mxu0 %v1506_v21  ;;  %946 = vmatprep.subr.bf16.mxu1 %v1508_v22  ;;  %v1562_v58 = vld [vmem:[%s1829_s7 + $0x1cc] ss:$16 sps:$4 sm:$0xff]   ;;  %v1564_v59 = vld [vmem:[%s1829_s7 + $0x1c0] ss:$16 sps:$4 sm:$0xff]   ;;  %v1565_v60 = vld [vmem:[%s1829_s7 + $0x1c8] ss:$16 sps:$4 sm:$0xff]  }
  0x50   : > { %v1566_v61 = vld [vmem:[%s1829_s7 + $0x1e4] ss:$16 sps:$4 sm:$0xff]   ;;  %v1568_v62 = vld [vmem:[%s1829_s7 + $0x1ec] ss:$16 sps:$4 sm:$0xff]   ;;  %v1570_v63 = vld [vmem:[%s1829_s7 + $0x1e0] ss:$16 sps:$4 sm:$0xff]  }
  0x51   : > { %v1571_v0 = vld [vmem:[%s1829_s7 + $0x1e8] ss:$16 sps:$4 sm:$0xff]   ;;  %v1575_v2 = vld [vmem:[%s2045_s0 + $0x14] ss:$8 sps:$4 sm:$0xff]   ;;  %v1578_v4 = vld [vmem:[%s2045_s0 + $0x24] ss:$8 sps:$4 sm:$0xff]  }
  0x52   : > { %884 = vmatpush1.bf16.msra.mxu0 %v1510_v23  ;;  %947 = vmatpush1.bf16.msra.mxu1 %v1511_v24  ;;  %v1572_v1 = vld [vmem:[%s2045_s0] ss:$8 sps:$4 sm:$0xff]   ;;  %v1577_v3 = vld [vmem:[%s2045_s0 + $0x10] ss:$8 sps:$4 sm:$0xff]   ;;  %s2057_s26 = smov (!%p395_p11, %s1358_s26), 11  ;;  %v1077_v7 = vshrl.u32 %v1076_v6, 7 }
  0x53   : > { %885 = vmatprep.subr.bf16.mxu0 %v1512_v25  ;;  %948 = vmatprep.subr.bf16.mxu1 %v1514_v26  ;;  %v1580_v5 = vld [vmem:[%s2045_s0 + $0x20] ss:$8 sps:$4 sm:$0xff]   ;;  %s397_s29 = scalar_lea.vmem %s2047_s2, %s2057_s26  ;;  %s1435_s4 = smul.u32 192, %s344_s30 }
  0x54   : > { %v1078_v8 = vsub.s32 0, %v1077_v7  ;;  %v1086_v9 = vsub.s32 2, %v1077_v7  ;;  %v1074_v10 = vld [vmem:[%s397_s29] sm:$0xf]  ;;  %v1082_v11 = vsub.s32 1, %v1077_v7  ;;  %v1090_v12 = vsub.s32 3, %v1077_v7 }
  0x55   : > { %s1932_s12 = scalar_lea.vmem [#allocation4], %s1435_s4  ;;  %s1434_s30 = sshll.u32 (%p1676_p6), %s1611_s14, 5 }
  0x56   : > { %886 = vmatpush1.bf16.msra.mxu0 %v1516_v27  ;;  %949 = vmatpush1.bf16.msra.mxu1 %v1517_v28  ;;  %v1914_v13 = vrot.slane %v1074_v10, %v1078_v8  ;;  %v1916_v14 = vrot.slane %v1074_v10, %v1086_v9  ;;  %v1920_v15 = vrot.slane %v1074_v10, %v1082_v11  ;;  %s1983_s7 = scalar_lea.vmem (%p1676_p6), %s2048_s3, %s1434_s30 }
  0x57   : > { %887 = vmatprep.subr.bf16.mxu0 %v1518_v29  ;;  %950 = vmatprep.subr.bf16.mxu1 %v1520_v30  ;;  %v1922_v16 = vrot.slane %v1074_v10, %v1090_v12 }
  0x5a   : > { %888 = vmatpush1.bf16.msra.mxu0 %v1522_v31  ;;  %951 = vmatpush1.bf16.msra.mxu1 %v1523_v32 }
  0x5b   : > { %889 = vmatprep.subr.bf16.mxu0 %v1524_v33  ;;  %952 = vmatprep.subr.bf16.mxu1 %v1526_v34 }
  0x5e   : > { %890 = vmatpush1.bf16.msra.mxu0 %v1528_v35  ;;  %953 = vmatpush1.bf16.msra.mxu1 %v1529_v36 }
  0x5f   : > { %891 = vmatprep.subr.bf16.mxu0 %v1530_v37  ;;  %954 = vmatprep.subr.bf16.mxu1 %v1532_v38 }
  0x62   : > { %892 = vmatpush1.bf16.msra.mxu0 %v1534_v39  ;;  %955 = vmatpush1.bf16.msra.mxu1 %v1535_v40 }
  0x63   : > { %893 = vmatprep.subr.bf16.mxu0 %v1536_v41  ;;  %956 = vmatprep.subr.bf16.mxu1 %v1538_v42 }
  0x66   : > { %894 = vmatpush1.bf16.msra.mxu0 %v1540_v43  ;;  %957 = vmatpush1.bf16.msra.mxu1 %v1541_v44 }
  0x67   : > { %895 = vmatprep.subr.bf16.mxu0 %v1542_v45  ;;  %958 = vmatprep.subr.bf16.mxu1 %v1544_v46 }
  0x6a   : > { %896 = vmatpush1.bf16.msra.mxu0 %v1546_v47  ;;  %959 = vmatpush1.bf16.msra.mxu1 %v1547_v48 }
  0x6b   : > { %897 = vmatprep.subr.bf16.mxu0 %v1548_v49  ;;  %960 = vmatprep.subr.bf16.mxu1 %v1550_v50 }
  0x6e   : > { %898 = vmatpush1.bf16.msra.mxu0 %v1552_v51  ;;  %961 = vmatpush1.bf16.msra.mxu1 %v1553_v52 }
  0x6f   : > { %899 = vmatprep.subr.bf16.mxu0 %v1554_v53  ;;  %962 = vmatprep.subr.bf16.mxu1 %v1556_v54 }
  0x72   : > { %900 = vmatpush1.bf16.msra.mxu0 %v1558_v55  ;;  %963 = vmatpush1.bf16.msra.mxu1 %v1559_v56 }
  0x73   : > { %901 = vmatprep.subr.bf16.mxu0 %v1560_v57  ;;  %964 = vmatprep.subr.bf16.mxu1 %v1562_v58 }
  0x76   : > { %902 = vmatpush1.bf16.msra.mxu0 %v1564_v59  ;;  %965 = vmatpush1.bf16.msra.mxu1 %v1565_v60 }
  0x77   : > { %903 = vmatprep.subr.bf16.mxu0 %v1566_v61  ;;  %966 = vmatprep.subr.bf16.mxu1 %v1568_v62 }
  0x7a   : > { %904 = vmatpush1.bf16.msra.mxu0 %v1570_v63  ;;  %967 = vmatpush1.bf16.msra.mxu1 %v1571_v0 }
  0x7d   : > { %906 = vmatmul.mubr.bf16.vlgmr.msra.gmra.mrb[0].mxu0 %v1572_v1  ;;  %969 = vmatmul.mubr.bf16.vlgmr.msra.gmra.mrb[0].mxu1 %v1572_v1 }
  0x7e   : > { %915 = vmatprep.mubr.bf16.mxu0 %v1575_v2  ;;  %978 = vmatprep.mubr.bf16.mxu1 %v1575_v2 }
  0x85   : > { %916 = vmatmul.mubr.bf16.gmra.mrb[4].mxu0 %v1577_v3  ;;  %979 = vmatmul.mubr.bf16.gmra.mrb[4].mxu1 %v1577_v3 }
  0x86   : > { %925 = vmatprep.mubr.bf16.mxu0 %v1578_v4  ;;  %988 = vmatprep.mubr.bf16.mxu1 %v1578_v4 }
  0x8d   : > { %926 = vmatmul.mubr.bf16.gmra.mrb[8].mxu0 %v1580_v5  ;;  %989 = vmatmul.mubr.bf16.gmra.mrb[8].mxu1 %v1580_v5 }
 0x150   : > { %v907_v17 = vpop.f32.mrb[0].mxu0  ;;  %v970_v18 = vpop.f32.mrb[0].mxu1 }
 0x151   : > { %v1096_v19 = vadd.f32 %v1914_v13, %v907_v17  ;;  %v1098_v20 = vadd.f32 %v1916_v14, %v970_v18  ;;  %v909_v21 = vpop.f32.mrb[1].mxu0  ;;  %v972_v22 = vpop.f32.mrb[1].mxu1 }
 0x152   : > { %v1097_v23 = vadd.f32 %v1920_v15, %v909_v21  ;;  %v1099_v24 = vadd.f32 %v1922_v16, %v972_v22  ;;  %v911_v25 = vpop.f32.mrb[2].mxu0  ;;  %v974_v26 = vpop.f32.mrb[2].mxu1 }
 0x153   : > { %v1120_v27 = vmax.f32 %v1096_v19, 0.0  ;;  %v1122_v28 = vmax.f32 %v1098_v20, 0.0  ;;  %v1100_v29 = vadd.f32 %v1914_v13, %v911_v25  ;;  %v1102_v30 = vadd.f32 %v1916_v14, %v974_v26  ;;  %v913_v31 = vpop.f32.mrb[3].mxu0  ;;  %v976_v32 = vpop.f32.mrb[3].mxu1 }
 0x154   : > { %v1121_v33 = vmax.f32 %v1097_v23, 0.0  ;;  %v1123_v34 = vmax.f32 %v1099_v24, 0.0  ;;  %v1101_v35 = vadd.f32 %v1920_v15, %v913_v31  ;;  %v1103_v36 = vadd.f32 %v1922_v16, %v976_v32 }
 0x155   : > { %1144 = vst [vmem:[%s1932_s12] sm:$0xff] %v1120_v27  ;;  %1146 = vst [vmem:[%s1932_s12 + $0x10] sm:$0xff] %v1122_v28  ;;  %v1124_v37 = vmax.f32 %v1100_v29, 0.0  ;;  %v1126_v38 = vmax.f32 %v1102_v30, 0.0 }
 0x156   : > { %1145 = vst [vmem:[%s1932_s12 + $0x8] sm:$0xff] %v1121_v33  ;;  %1147 = vst [vmem:[%s1932_s12 + $0x18] sm:$0xff] %v1123_v34  ;;  %v1125_v39 = vmax.f32 %v1101_v35, 0.0  ;;  %v1127_v40 = vmax.f32 %v1103_v36, 0.0 }
 0x157   : > { %1148 = vst [vmem:[%s1932_s12 + $0x20] sm:$0xff] %v1124_v37  ;;  %1150 = vst [vmem:[%s1932_s12 + $0x30] sm:$0xff] %v1126_v38 }
 0x158   : > { %1149 = vst [vmem:[%s1932_s12 + $0x28] sm:$0xff] %v1125_v39  ;;  %1151 = vst [vmem:[%s1932_s12 + $0x38] sm:$0xff] %v1127_v40  ;;  %v917_v41 = vpop.f32.mrb[4].mxu0  ;;  %v980_v42 = vpop.f32.mrb[4].mxu1 }
 0x159   : > { %v1104_v43 = vadd.f32 %v1914_v13, %v917_v41  ;;  %v1106_v44 = vadd.f32 %v1916_v14, %v980_v42  ;;  %v919_v45 = vpop.f32.mrb[5].mxu0  ;;  %v982_v46 = vpop.f32.mrb[5].mxu1 }
 0x15a   : > { %v1105_v47 = vadd.f32 %v1920_v15, %v919_v45  ;;  %v1107_v48 = vadd.f32 %v1922_v16, %v982_v46  ;;  %v921_v49 = vpop.f32.mrb[6].mxu0  ;;  %v984_v50 = vpop.f32.mrb[6].mxu1 }
 0x15b   : > { %v1128_v51 = vmax.f32 %v1104_v43, 0.0  ;;  %v1130_v52 = vmax.f32 %v1106_v44, 0.0  ;;  %v1108_v53 = vadd.f32 %v1914_v13, %v921_v49  ;;  %v1110_v54 = vadd.f32 %v1916_v14, %v984_v50  ;;  %v923_v55 = vpop.f32.mrb[7].mxu0  ;;  %v986_v56 = vpop.f32.mrb[7].mxu1 }
 0x15c   : > { %v1129_v57 = vmax.f32 %v1105_v47, 0.0  ;;  %v1131_v58 = vmax.f32 %v1107_v48, 0.0  ;;  %v1109_v59 = vadd.f32 %v1920_v15, %v923_v55  ;;  %v1111_v60 = vadd.f32 %v1922_v16, %v986_v56 }
 0x15d   : > { %1152 = vst [vmem:[%s1932_s12 + $0x40] sm:$0xff] %v1128_v51  ;;  %1154 = vst [vmem:[%s1932_s12 + $0x50] sm:$0xff] %v1130_v52  ;;  %v1132_v61 = vmax.f32 %v1108_v53, 0.0  ;;  %v1134_v62 = vmax.f32 %v1110_v54, 0.0  ;;  %v1199_v28 = vld [vmem:[%s1932_s12 + $0x18] sm:$0xff] (%p1676_p6) }
 0x15e   : > { %1153 = vst [vmem:[%s1932_s12 + $0x48] sm:$0xff] %v1129_v57  ;;  %1155 = vst [vmem:[%s1932_s12 + $0x58] sm:$0xff] %v1131_v58  ;;  %v1133_v63 = vmax.f32 %v1109_v59, 0.0  ;;  %v1135_v0 = vmax.f32 %v1111_v60, 0.0  ;;  %v1201_v29 = vld [vmem:[%s1932_s12 + $0x20] sm:$0xff] (%p1676_p6)  ;;  %v1205_v31 = vld [vmem:[%s1932_s12 + $0x30] sm:$0xff] (%p1676_p6) }
 0x15f   : > { %1156 = vst [vmem:[%s1932_s12 + $0x60] sm:$0xff] %v1132_v61  ;;  %1158 = vst [vmem:[%s1932_s12 + $0x70] sm:$0xff] %v1134_v62  ;;  %v1203_v30 = vld [vmem:[%s1932_s12 + $0x28] sm:$0xff] (%p1676_p6)  ;;  %v1207_v32 = vld [vmem:[%s1932_s12 + $0x38] sm:$0xff] (%p1676_p6) }
 0x160   : > { %1157 = vst [vmem:[%s1932_s12 + $0x68] sm:$0xff] %v1133_v63  ;;  %1159 = vst [vmem:[%s1932_s12 + $0x78] sm:$0xff] %v1135_v0  ;;  %v927_v1 = vpop.f32.mrb[8].mxu0  ;;  %v990_v2 = vpop.f32.mrb[8].mxu1 }
 0x161   : > { %v1112_v3 = vadd.f32 %v1914_v13, %v927_v1  ;;  %v1114_v4 = vadd.f32 %v1916_v14, %v990_v2  ;;  %v929_v5 = vpop.f32.mrb[9].mxu0  ;;  %v992_v6 = vpop.f32.mrb[9].mxu1  ;;  %1200 = vst [vmem:[%s1983_s7 + $0x18] sm:$0xff] (%p1676_p6), %v1199_v28  ;;  %1202 = vst [vmem:[%s1983_s7 + $0x60] sm:$0xff] (%p1676_p6), %v1201_v29 }
 0x162   : > { %v1113_v7 = vadd.f32 %v1920_v15, %v929_v5  ;;  %v1115_v8 = vadd.f32 %v1922_v16, %v992_v6  ;;  %v931_v9 = vpop.f32.mrb[10].mxu0  ;;  %v994_v10 = vpop.f32.mrb[10].mxu1  ;;  %1174 = sbr.rel (!%p1676_p6) target bundleno = 370 (0x172), region = 67  ;;  %1204 = vst [vmem:[%s1983_s7 + $0x68] sm:$0xff] (%p1676_p6), %v1203_v30  ;;  %1206 = vst [vmem:[%s1983_s7 + $0x70] sm:$0xff] (%p1676_p6), %v1205_v31 }
 0x163   : > { %v1136_v11 = vmax.f32 %v1112_v3, 0.0  ;;  %v1138_v12 = vmax.f32 %v1114_v4, 0.0  ;;  %v1116_v17 = vadd.f32 %v1914_v13, %v931_v9  ;;  %v1118_v18 = vadd.f32 %v1916_v14, %v994_v10  ;;  %v933_v19 = vpop.f32.mrb[11].mxu0  ;;  %v996_v20 = vpop.f32.mrb[11].mxu1  ;;  %v1193_v14 = vld [vmem:[%s1932_s12] sm:$0xff] (%p1676_p6)  ;;  %1208 = vst [vmem:[%s1983_s7 + $0x78] sm:$0xff] (%p1676_p6), %v1207_v32 }
 0x164   : > { %v1137_v21 = vmax.f32 %v1113_v7, 0.0  ;;  %v1139_v22 = vmax.f32 %v1115_v8, 0.0  ;;  %v1117_v23 = vadd.f32 %v1920_v15, %v933_v19  ;;  %v1119_v24 = vadd.f32 %v1922_v16, %v996_v20  ;;  %v1195_v15 = vld [vmem:[%s1932_s12 + $0x8] sm:$0xff] (%p1676_p6)  ;;  %v1197_v16 = vld [vmem:[%s1932_s12 + $0x10] sm:$0xff] (%p1676_p6)  ;;  %1194 = vst [vmem:[%s1983_s7] sm:$0xff] (%p1676_p6), %v1193_v14  ;;  %v1209_v33 = vld [vmem:[%s1932_s12 + $0x40] sm:$0xff] (%p1676_p6) }
 0x165   : > { %1160 = vst [vmem:[%s1932_s12 + $0x80] sm:$0xff] %v1136_v11  ;;  %1162 = vst [vmem:[%s1932_s12 + $0x90] sm:$0xff] %v1138_v12  ;;  %v1140_v25 = vmax.f32 %v1116_v17, 0.0  ;;  %v1142_v26 = vmax.f32 %v1118_v18, 0.0  ;;  %v1211_v34 = vld [vmem:[%s1932_s12 + $0x48] sm:$0xff] (%p1676_p6)  ;;  %v1213_v35 = vld [vmem:[%s1932_s12 + $0x50] sm:$0xff] (%p1676_p6) }
 0x166   : > { %1161 = vst [vmem:[%s1932_s12 + $0x88] sm:$0xff] %v1137_v21  ;;  %1163 = vst [vmem:[%s1932_s12 + $0x98] sm:$0xff] %v1139_v22  ;;  %v1141_v13 = vmax.f32 %v1117_v23, 0.0  ;;  %v1143_v27 = vmax.f32 %v1119_v24, 0.0  ;;  %v1215_v36 = vld [vmem:[%s1932_s12 + $0x58] sm:$0xff] (%p1676_p6)  ;;  %v1217_v37 = vld [vmem:[%s1932_s12 + $0x60] sm:$0xff] (%p1676_p6) }
 0x167   : > { %1164 = vst [vmem:[%s1932_s12 + $0xa0] sm:$0xff] %v1140_v25  ;;  %1166 = vst [vmem:[%s1932_s12 + $0xb0] sm:$0xff] %v1142_v26  ;;  %v1219_v38 = vld [vmem:[%s1932_s12 + $0x68] sm:$0xff] (%p1676_p6)  ;;  %v1221_v39 = vld [vmem:[%s1932_s12 + $0x70] sm:$0xff] (%p1676_p6) }
 0x168   : > { %1165 = vst [vmem:[%s1932_s12 + $0xa8] sm:$0xff] %v1141_v13  ;;  %1167 = vst [vmem:[%s1932_s12 + $0xb8] sm:$0xff] %v1143_v27  ;;  %v1223_v40 = vld [vmem:[%s1932_s12 + $0x78] sm:$0xff] (%p1676_p6) }
 0x169   : > { %1196 = vst [vmem:[%s1983_s7 + $0x8] sm:$0xff] %v1195_v15  ;;  %1198 = vst [vmem:[%s1983_s7 + $0x10] sm:$0xff] %v1197_v16 }
 0x16a   : > { %1210 = vst [vmem:[%s1983_s7 + $0xc0] sm:$0xff] %v1209_v33  ;;  %1212 = vst [vmem:[%s1983_s7 + $0xc8] sm:$0xff] %v1211_v34 }
 0x16b   : > { %1214 = vst [vmem:[%s1983_s7 + $0xd0] sm:$0xff] %v1213_v35  ;;  %1216 = vst [vmem:[%s1983_s7 + $0xd8] sm:$0xff] %v1215_v36 }
 0x16c   : > { %1218 = vst [vmem:[%s1983_s7 + $0x120] sm:$0xff] %v1217_v37  ;;  %1220 = vst [vmem:[%s1983_s7 + $0x128] sm:$0xff] %v1219_v38  ;;  %v1225_v41 = vld [vmem:[%s1932_s12 + $0x80] sm:$0xff]  ;;  %v1229_v43 = vld [vmem:[%s1932_s12 + $0x90] sm:$0xff] }
 0x16d   : > { %1222 = vst [vmem:[%s1983_s7 + $0x130] sm:$0xff] %v1221_v39  ;;  %v1227_v42 = vld [vmem:[%s1932_s12 + $0x88] sm:$0xff]  ;;  %1224 = vst [vmem:[%s1983_s7 + $0x138] sm:$0xff] %v1223_v40  ;;  %v1231_v44 = vld [vmem:[%s1932_s12 + $0x98] sm:$0xff] }
 0x16e   : > { %1226 = vst [vmem:[%s1983_s7 + $0x180] sm:$0xff] %v1225_v41  ;;  %1228 = vst [vmem:[%s1983_s7 + $0x188] sm:$0xff] %v1227_v42  ;;  %v1233_v45 = vld [vmem:[%s1932_s12 + $0xa0] sm:$0xff]  ;;  %v1237_v47 = vld [vmem:[%s1932_s12 + $0xb0] sm:$0xff] }
 0x16f   : > { %1230 = vst [vmem:[%s1983_s7 + $0x190] sm:$0xff] %v1229_v43  ;;  %1232 = vst [vmem:[%s1983_s7 + $0x198] sm:$0xff] %v1231_v44  ;;  %v1235_v46 = vld [vmem:[%s1932_s12 + $0xa8] sm:$0xff]  ;;  %v1239_v48 = vld [vmem:[%s1932_s12 + $0xb8] sm:$0xff] }
 0x170   : > { %1234 = vst [vmem:[%s1983_s7 + $0x1e0] sm:$0xff] %v1233_v45  ;;  %1236 = vst [vmem:[%s1983_s7 + $0x1e8] sm:$0xff] %v1235_v46 }
 0x171   : > { %1238 = vst [vmem:[%s1983_s7 + $0x1f0] sm:$0xff] %v1237_v47  ;;  %1240 = vst [vmem:[%s1983_s7 + $0x1f8] sm:$0xff] %v1239_v48 }
 0x172 PF: > { %s13_s16 = sadd.s32 1, %s1619_s16   ;;  %s2050_s12 = smov %s1607_s13 }
 0x173   : > { %p10_p12 = scmp.ge.s32.totalorder %s13_s16, 5   ;;  %s2051_s13 = smov %s1681_s22 }
 0x174   : > { %s2052_s14 = smov %s1615_s15  ;;  %s2053_s15 = smov %s2055_s17 }
 0x175   :  { %12 = sbr.rel (!%p10_p12) target bundleno = 3 (0x3), region = 127 }

// kernel: ecapa_forward.62
= control target key start
LH: loop header
LB: loop body
LE: loop exit
PB: predicated region body
PF: predicated region fallthrough
CT: control target
= control target key end

     0   :  { %s1446_s12 = smov 0   ;;  %s1448_s13 = smov 0   ;;  %s1632_s0 = inlined_call_operand.vmem [shape: bf16[48,1536], index: 0, kind: input, shape index: {}]   ;;  %s1633_s1 = inlined_call_operand.vmem [shape: bf16[1536,256], index: 1, kind: input, shape index: {}]   ;;  %s1634_s2 = inlined_call_operand.vmem [shape: f32[1,256], index: 2, kind: input, shape index: {}]   ;;  %s1635_s3 = inlined_call_operand.vmem [shape: f32[48,256], index: 3, kind: output, shape index: {}]  }
   0x1   :  { %s1450_s14 = smov 0   ;;  %s1452_s15 = smov 0  }
   0x2   :  { %s1454_s16 = smov 0  }
   0x3 LB: > { %s25_s17 = sadd.s32 1, %s1419_s15  ;;  %p48_p1 = scmp.ne.s32.totalorder %s1411_s13, %s1407_s12  ;;  %s1423_s16 = sphi %s1454_s16, %s13_s16   ;;  %s1419_s15 = sphi %s1452_s15, %s1639_s15   ;;  %s1415_s14 = sphi %s1450_s14, %s1638_s14   ;;  %s1411_s13 = sphi %s1448_s13, %s1637_s13   ;;  %s1407_s12 = sphi %s1446_s12, %s1636_s12  }
   0x4   : > { %p26_p0 = scmp.ge.s32.totalorder %s25_s17, 3  ;;  %p49_p2 = scmp.eq.s32.totalorder %s1423_s16, 0 }
   0x5   : > { %s41_s19 = sadd.s32 1, %s1411_s13  ;;  %p1125_p5 = scmp.ge.s32.totalorder %s1423_s16, 3 }
   0x6   : > { %s1641_s17 = smov (%p26_p0, %s25_s17), 0  ;;  %p50_p3 = por %p49_p2, %p48_p1 }
   0x7   : > { %s37_s18 = ssub.s32 %s1419_s15, %s1641_s17  ;;  %164 = sbr.rel (%p1125_p5) target bundleno = 25 (0x19), region = 20 }
   0x8   : > { %p39_p4 = scmp.eq.s32.totalorder %s37_s18, 0 }
   0xa   : > { %s1481_s20 = scalar_select %p39_p4, %s1411_s13, %s41_s19  }
   0xe   : > { %167 = sbr.rel (!%p50_p3) target bundleno = 25 (0x19), region = 24  ;;  %s169_s21 = sand.u32 (%p50_p3), 1, %s1411_s13  }
   0xf   : > { %s1214_s22 = sshll.u32 (%p50_p3), %s1419_s15, 4  ;;  %s1228_s23 = smul.u32 (%p50_p3), 96, %s169_s21 }
  0x10   : > { %s177_s26 = scalar_lea.vmem (%p50_p3), %s1632_s0, %s1214_s22 }
  0x11   : > { %v190_v0 = vld [vmem:[%s177_s26] sm:$0xff] (%p50_p3)  ;;  %v192_v1 = vld [vmem:[%s177_s26 + $0x8] sm:$0xff] (%p50_p3)  ;;  %v194_v2 = vld [vmem:[%s177_s26 + $0x30] sm:$0xff] (%p50_p3)  ;;  %s171_s27 = scalar_lea.vmem (%p50_p3), [#allocation3], %s1228_s23 }
  0x12   : > { %v196_v3 = vld [vmem:[%s177_s26 + $0x38] sm:$0xff] (%p50_p3)  ;;  %v198_v4 = vld [vmem:[%s177_s26 + $0x60] sm:$0xff] (%p50_p3)  ;;  %v200_v5 = vld [vmem:[%s177_s26 + $0x68] sm:$0xff] (%p50_p3)  ;;  %191 = vst [vmem:[%s171_s27] sm:$0xff] (%p50_p3), %v190_v0 }
  0x13   : > { %193 = vst [vmem:[%s171_s27 + $0x8] sm:$0xff] (%p50_p3), %v192_v1  ;;  %195 = vst [vmem:[%s171_s27 + $0x10] sm:$0xff] (%p50_p3), %v194_v2  ;;  %v202_v6 = vld [vmem:[%s177_s26 + $0x90] sm:$0xff] (%p50_p3)  ;;  %v204_v7 = vld [vmem:[%s177_s26 + $0x98] sm:$0xff] (%p50_p3) }
  0x14   : > { %197 = vst [vmem:[%s171_s27 + $0x18] sm:$0xff] (%p50_p3), %v196_v3  ;;  %199 = vst [vmem:[%s171_s27 + $0x20] sm:$0xff] (%p50_p3), %v198_v4  ;;  %v206_v8 = vld [vmem:[%s177_s26 + $0xc0] sm:$0xff] (%p50_p3)  ;;  %v208_v9 = vld [vmem:[%s177_s26 + $0xc8] sm:$0xff] (%p50_p3) }
  0x15   : > { %201 = vst [vmem:[%s171_s27 + $0x28] sm:$0xff] %v200_v5  ;;  %203 = vst [vmem:[%s171_s27 + $0x30] sm:$0xff] %v202_v6  ;;  %v210_v10 = vld [vmem:[%s177_s26 + $0xf0] sm:$0xff]  ;;  %v212_v11 = vld [vmem:[%s177_s26 + $0xf8] sm:$0xff] }
  0x16   : > { %205 = vst [vmem:[%s171_s27 + $0x38] sm:$0xff] %v204_v7  ;;  %207 = vst [vmem:[%s171_s27 + $0x40] sm:$0xff] %v206_v8 }
  0x17   : > { %209 = vst [vmem:[%s171_s27 + $0x48] sm:$0xff] %v208_v9  ;;  %211 = vst [vmem:[%s171_s27 + $0x50] sm:$0xff] %v210_v10 }
  0x18   : > { %213 = vst [vmem:[%s171_s27 + $0x58] sm:$0xff] %v212_v11 }
  0x19 PF: > { %p1128_p6 = scmp.ge.s32.totalorder %s1423_s16, 1  ;;  %p233_p7 = scmp.lt.s32.totalorder %s1423_s16, 4 }
  0x1b   : > { %p234_p8 = pnand %p1128_p6, %p233_p7 }
  0x1c   : > { %s240_s28 = sand.u32 (!%p234_p8), 1, %s1407_s12   ;;  %s1129_s29 = sshll.u32 (!%p234_p8), %s1415_s14, 6 }
  0x1d   : > { %237 = sbr.rel (%p234_p8) target bundleno = 356 (0x164), region = 51  ;;  %p286_p9 = scmp.lt.s32.totalorder (!%p234_p8), %s1129_s29, 191 }
  0x1e   : > { %s1229_s30 = smul.u32 (!%p234_p8), 96, %s240_s28  ;;  %p1132_p10 = scmp.ne.s32.totalorder (!%p234_p8), %s1415_s14, 0 }
  0x20   : > { %s1498_s8 = scalar_lea.vmem (!%p234_p8), [#allocation3], %s1229_s30 }
  0x24   : > { %s1643_s29 = smov (!%p286_p9, %s1129_s29), 191  ;;  %316 = sbr.rel (%p1132_p10) target bundleno = 44 (0x2c), region = 59 }
  0x25   : > { %s1215_s4 = sshll.u32 %s1643_s29, 3  ;;  %v1425_v12 = vmov (!%p1132_p10), 0.0  }
  0x26   : > { %s1496_s7 = scalar_lea.vmem %s1633_s1, %s1215_s4  ;;  %317 = vst [vmem:[#allocation2] sm:$0xff] (!%p1132_p10), %v1425_v12  ;;  %318 = vst [vmem:[#allocation2 + $0x8] sm:$0xff] (!%p1132_p10), %v1425_v12 }
  0x27   : > { %319 = vst [vmem:[#allocation2 + $0x10] sm:$0xff] (!%p1132_p10), %v1425_v12  ;;  %320 = vst [vmem:[#allocation2 + $0x18] sm:$0xff] (!%p1132_p10), %v1425_v12 }
  0x28   : > { %321 = vst [vmem:[#allocation2 + $0x20] sm:$0xff] (!%p1132_p10), %v1425_v12  ;;  %322 = vst [vmem:[#allocation2 + $0x28] sm:$0xff] (!%p1132_p10), %v1425_v12 }
  0x29   : > { %323 = vst [vmem:[#allocation2 + $0x30] sm:$0xff] (!%p1132_p10), %v1425_v12  ;;  %324 = vst [vmem:[#allocation2 + $0x38] sm:$0xff] (!%p1132_p10), %v1425_v12 }
  0x2a   : > { %325 = vst [vmem:[#allocation2 + $0x40] sm:$0xff] (!%p1132_p10), %v1425_v12  ;;  %326 = vst [vmem:[#allocation2 + $0x48] sm:$0xff] (!%p1132_p10), %v1425_v12 }
  0x2b   : > { %327 = vst [vmem:[#allocation2 + $0x50] sm:$0xff] %v1425_v12  ;;  %328 = vst [vmem:[#allocation2 + $0x58] sm:$0xff] %v1425_v12 }
  0x2c PF: > { %v1271_v13 = vld [vmem:[%s1496_s7 + $0x4] ss:$8 sps:$4 sm:$0xff]   ;;  %v1275_v15 = vld [vmem:[%s1496_s7] ss:$8 sps:$4 sm:$0xff]   ;;  %v1277_v17 = vld [vmem:[%s1496_s7 + $0x14] ss:$8 sps:$4 sm:$0xff]  }
  0x2d   : > { %v1273_v14 = vld [vmem:[%s1496_s7 + $0x104] ss:$8 sps:$4 sm:$0xff]   ;;  %797 = vmatprep.subr.bf16.mxu1 %v1271_v13  ;;  %v1276_v16 = vld [vmem:[%s1496_s7 + $0x100] ss:$8 sps:$4 sm:$0xff]   ;;  %v1279_v18 = vld [vmem:[%s1496_s7 + $0x114] ss:$8 sps:$4 sm:$0xff]  }
  0x2e   : > { %860 = vmatprep.subr.bf16.mxu0 %v1273_v14  ;;  %798 = vmatpush1.bf16.msra.mxu1 %v1275_v15  ;;  %v1281_v19 = vld [vmem:[%s1496_s7 + $0x10] ss:$8 sps:$4 sm:$0xff]   ;;  %v1283_v21 = vld [vmem:[%s1496_s7 + $0x24] ss:$8 sps:$4 sm:$0xff]   ;;  %v1287_v23 = vld [vmem:[%s1496_s7 + $0x20] ss:$8 sps:$4 sm:$0xff]  }
  0x2f   : > { %861 = vmatpush1.bf16.msra.mxu0 %v1276_v16  ;;  %799 = vmatprep.subr.bf16.mxu1 %v1277_v17  ;;  %v1282_v20 = vld [vmem:[%s1496_s7 + $0x110] ss:$8 sps:$4 sm:$0xff]   ;;  %v1285_v22 = vld [vmem:[%s1496_s7 + $0x124] ss:$8 sps:$4 sm:$0xff]   ;;  %v1288_v24 = vld [vmem:[%s1496_s7 + $0x120] ss:$8 sps:$4 sm:$0xff]  }
  0x30   : > { %862 = vmatprep.subr.bf16.mxu0 %v1279_v18  ;;  %v1289_v25 = vld [vmem:[%s1496_s7 + $0x34] ss:$8 sps:$4 sm:$0xff]   ;;  %v1293_v27 = vld [vmem:[%s1496_s7 + $0x30] ss:$8 sps:$4 sm:$0xff]   ;;  %v1295_v29 = vld [vmem:[%s1496_s7 + $0x44] ss:$8 sps:$4 sm:$0xff]  }
  0x31   : > { %v1291_v26 = vld [vmem:[%s1496_s7 + $0x134] ss:$8 sps:$4 sm:$0xff]   ;;  %v1294_v28 = vld [vmem:[%s1496_s7 + $0x130] ss:$8 sps:$4 sm:$0xff]   ;;  %v1297_v30 = vld [vmem:[%s1496_s7 + $0x144] ss:$8 sps:$4 sm:$0xff]  }
  0x32   : > { %800 = vmatpush1.bf16.msra.mxu1 %v1281_v19  ;;  %v1299_v31 = vld [vmem:[%s1496_s7 + $0x40] ss:$8 sps:$4 sm:$0xff]   ;;  %v1301_v33 = vld [vmem:[%s1496_s7 + $0x54] ss:$8 sps:$4 sm:$0xff]   ;;  %v1305_v35 = vld [vmem:[%s1496_s7 + $0x50] ss:$8 sps:$4 sm:$0xff]  }
  0x33   : > { %863 = vmatpush1.bf16.msra.mxu0 %v1282_v20  ;;  %801 = vmatprep.subr.bf16.mxu1 %v1283_v21  ;;  %v1300_v32 = vld [vmem:[%s1496_s7 + $0x140] ss:$8 sps:$4 sm:$0xff]   ;;  %v1303_v34 = vld [vmem:[%s1496_s7 + $0x154] ss:$8 sps:$4 sm:$0xff]   ;;  %v1306_v36 = vld [vmem:[%s1496_s7 + $0x150] ss:$8 sps:$4 sm:$0xff]  }
  0x34   : > { %864 = vmatprep.subr.bf16.mxu0 %v1285_v22  ;;  %v1307_v37 = vld [vmem:[%s1496_s7 + $0x64] ss:$8 sps:$4 sm:$0xff]   ;;  %v1311_v39 = vld [vmem:[%s1496_s7 + $0x60] ss:$8 sps:$4 sm:$0xff]   ;;  %v1313_v41 = vld [vmem:[%s1496_s7 + $0x74] ss:$8 sps:$4 sm:$0xff]  }
  0x35   : > { %v1309_v38 = vld [vmem:[%s1496_s7 + $0x164] ss:$8 sps:$4 sm:$0xff]   ;;  %v1312_v40 = vld [vmem:[%s1496_s7 + $0x160] ss:$8 sps:$4 sm:$0xff]   ;;  %v1315_v42 = vld [vmem:[%s1496_s7 + $0x174] ss:$8 sps:$4 sm:$0xff]  }
  0x36   : > { %802 = vmatpush1.bf16.msra.mxu1 %v1287_v23  ;;  %v1317_v43 = vld [vmem:[%s1496_s7 + $0x70] ss:$8 sps:$4 sm:$0xff]   ;;  %v1319_v45 = vld [vmem:[%s1496_s7 + $0x84] ss:$8 sps:$4 sm:$0xff]   ;;  %v1323_v47 = vld [vmem:[%s1496_s7 + $0x80] ss:$8 sps:$4 sm:$0xff]  }
  0x37   : > { %865 = vmatpush1.bf16.msra.mxu0 %v1288_v24  ;;  %803 = vmatprep.subr.bf16.mxu1 %v1289_v25  ;;  %v1318_v44 = vld [vmem:[%s1496_s7 + $0x170] ss:$8 sps:$4 sm:$0xff]   ;;  %v1321_v46 = vld [vmem:[%s1496_s7 + $0x184] ss:$8 sps:$4 sm:$0xff]   ;;  %v1324_v48 = vld [vmem:[%s1496_s7 + $0x180] ss:$8 sps:$4 sm:$0xff]  }
  0x38   : > { %866 = vmatprep.subr.bf16.mxu0 %v1291_v26  ;;  %v1325_v49 = vld [vmem:[%s1496_s7 + $0x94] ss:$8 sps:$4 sm:$0xff]   ;;  %v1329_v51 = vld [vmem:[%s1496_s7 + $0x90] ss:$8 sps:$4 sm:$0xff]   ;;  %v1331_v53 = vld [vmem:[%s1496_s7 + $0xa4] ss:$8 sps:$4 sm:$0xff]  }
  0x39   : > { %v1327_v50 = vld [vmem:[%s1496_s7 + $0x194] ss:$8 sps:$4 sm:$0xff]   ;;  %v1330_v52 = vld [vmem:[%s1496_s7 + $0x190] ss:$8 sps:$4 sm:$0xff]   ;;  %v1333_v54 = vld [vmem:[%s1496_s7 + $0x1a4] ss:$8 sps:$4 sm:$0xff]  }
  0x3a   : > { %804 = vmatpush1.bf16.msra.mxu1 %v1293_v27  ;;  %v1335_v55 = vld [vmem:[%s1496_s7 + $0xa0] ss:$8 sps:$4 sm:$0xff]   ;;  %v1337_v57 = vld [vmem:[%s1496_s7 + $0xb4] ss:$8 sps:$4 sm:$0xff]   ;;  %v1341_v59 = vld [vmem:[%s1496_s7 + $0xb0] ss:$8 sps:$4 sm:$0xff]  }
  0x3b   : > { %867 = vmatpush1.bf16.msra.mxu0 %v1294_v28  ;;  %805 = vmatprep.subr.bf16.mxu1 %v1295_v29  ;;  %v1336_v56 = vld [vmem:[%s1496_s7 + $0x1a0] ss:$8 sps:$4 sm:$0xff]   ;;  %v1339_v58 = vld [vmem:[%s1496_s7 + $0x1b4] ss:$8 sps:$4 sm:$0xff]   ;;  %v1342_v60 = vld [vmem:[%s1496_s7 + $0x1b0] ss:$8 sps:$4 sm:$0xff]  }
  0x3c   : > { %868 = vmatprep.subr.bf16.mxu0 %v1297_v30  ;;  %v1343_v61 = vld [vmem:[%s1496_s7 + $0xc4] ss:$8 sps:$4 sm:$0xff]   ;;  %v1347_v1 = vld [vmem:[%s1496_s7 + $0xc0] ss:$8 sps:$4 sm:$0xff]   ;;  %v1349_v3 = vld [vmem:[%s1496_s7 + $0xd4] ss:$8 sps:$4 sm:$0xff]  }
  0x3d   : > { %v1369_v62 = vld [vmem:[%s1498_s8 + $0x4] ss:$16 sps:$4 sm:$0xff]   ;;  %v1372_v0 = vld [vmem:[%s1498_s8 + $0xc] ss:$16 sps:$4 sm:$0xff]   ;;  %v1348_v2 = vld [vmem:[%s1496_s7 + $0x1c0] ss:$8 sps:$4 sm:$0xff]  }
  0x3e   : > { %806 = vmatpush1.bf16.msra.mxu1 %v1299_v31  ;;  %v1345_v63 = vld [vmem:[%s1496_s7 + $0x1c4] ss:$8 sps:$4 sm:$0xff]   ;;  %829 = vmatprep.mubr.bf16.mxu1 %v1369_v62  ;;  %v1351_v4 = vld [vmem:[%s1496_s7 + $0x1d4] ss:$8 sps:$4 sm:$0xff]   ;;  %v1353_v5 = vld [vmem:[%s1496_s7 + $0xd0] ss:$8 sps:$4 sm:$0xff]  }
  0x3f   : > { %869 = vmatpush1.bf16.msra.mxu0 %v1300_v32  ;;  %807 = vmatprep.subr.bf16.mxu1 %v1301_v33  ;;  %v1354_v6 = vld [vmem:[%s1496_s7 + $0x1d0] ss:$8 sps:$4 sm:$0xff]   ;;  %v1355_v7 = vld [vmem:[%s1496_s7 + $0xe4] ss:$8 sps:$4 sm:$0xff]   ;;  %v1359_v9 = vld [vmem:[%s1496_s7 + $0xe0] ss:$8 sps:$4 sm:$0xff]  }
  0x40   : > { %870 = vmatprep.subr.bf16.mxu0 %v1303_v34  ;;  %892 = vmatprep.mubr.bf16.mxu0 %v1372_v0  ;;  %v1357_v8 = vld [vmem:[%s1496_s7 + $0x1e4] ss:$8 sps:$4 sm:$0xff]   ;;  %v1360_v10 = vld [vmem:[%s1496_s7 + $0x1e0] ss:$8 sps:$4 sm:$0xff]   ;;  %v1361_v11 = vld [vmem:[%s1496_s7 + $0xf4] ss:$8 sps:$4 sm:$0xff]  }
  0x41   : > { %v1363_v12 = vld [vmem:[%s1496_s7 + $0x1f4] ss:$8 sps:$4 sm:$0xff]   ;;  %v1365_v13 = vld [vmem:[%s1496_s7 + $0xf0] ss:$8 sps:$4 sm:$0xff]   ;;  %v329_v26 = vld [vmem:[#allocation2] sm:$0xff]  ;;  %p1209_p11 = scmp.ne.s32.totalorder %s1415_s14, 2 }
  0x42   : > { %808 = vmatpush1.bf16.msra.mxu1 %v1305_v35  ;;  %v1366_v14 = vld [vmem:[%s1496_s7 + $0x1f0] ss:$8 sps:$4 sm:$0xff]   ;;  %v1373_v17 = vld [vmem:[%s1498_s8 + $0x24] ss:$16 sps:$4 sm:$0xff]   ;;  %v1375_v18 = vld [vmem:[%s1498_s8 + $0x2c] ss:$16 sps:$4 sm:$0xff]  }
  0x43   : > { %871 = vmatpush1.bf16.msra.mxu0 %v1306_v36  ;;  %809 = vmatprep.subr.bf16.mxu1 %v1307_v37  ;;  %v1367_v15 = vld [vmem:[%s1498_s8] ss:$16 sps:$4 sm:$0xff]   ;;  %v1370_v16 = vld [vmem:[%s1498_s8 + $0x8] ss:$16 sps:$4 sm:$0xff]   ;;  %v1379_v21 = vld [vmem:[%s1498_s8 + $0x44] ss:$16 sps:$4 sm:$0xff]  }
  0x44   : > { %872 = vmatprep.subr.bf16.mxu0 %v1309_v38  ;;  %v1377_v19 = vld [vmem:[%s1498_s8 + $0x20] ss:$16 sps:$4 sm:$0xff]   ;;  %v1378_v20 = vld [vmem:[%s1498_s8 + $0x28] ss:$16 sps:$4 sm:$0xff]   ;;  %v1381_v22 = vld [vmem:[%s1498_s8 + $0x4c] ss:$16 sps:$4 sm:$0xff]  }
  0x45   : > { %v1383_v23 = vld [vmem:[%s1498_s8 + $0x40] ss:$16 sps:$4 sm:$0xff]   ;;  %v1384_v24 = vld [vmem:[%s1498_s8 + $0x48] ss:$16 sps:$4 sm:$0xff]  }
  0x46   : > { %810 = vmatpush1.bf16.msra.mxu1 %v1311_v39  ;;  %v330_v30 = vld [vmem:[#allocation2 + $0x8] sm:$0xff]  ;;  %v331_v34 = vld [vmem:[#allocation2 + $0x10] sm:$0xff]  ;;  %v332_v39 = vld [vmem:[#allocation2 + $0x18] sm:$0xff] }
  0x47   : > { %873 = vmatpush1.bf16.msra.mxu0 %v1312_v40  ;;  %811 = vmatprep.subr.bf16.mxu1 %v1313_v41 }
  0x48   : > { %874 = vmatprep.subr.bf16.mxu0 %v1315_v42 }
  0x4a   : > { %812 = vmatpush1.bf16.msra.mxu1 %v1317_v43 }
  0x4b   : > { %875 = vmatpush1.bf16.msra.mxu0 %v1318_v44  ;;  %813 = vmatprep.subr.bf16.mxu1 %v1319_v45 }
  0x4c   : > { %876 = vmatprep.subr.bf16.mxu0 %v1321_v46  ;;  %v333_v46 = vld [vmem:[#allocation2 + $0x20] sm:$0xff] }
  0x4e   : > { %814 = vmatpush1.bf16.msra.mxu1 %v1323_v47 }
  0x4f   : > { %877 = vmatpush1.bf16.msra.mxu0 %v1324_v48  ;;  %815 = vmatprep.subr.bf16.mxu1 %v1325_v49 }
  0x50   : > { %878 = vmatprep.subr.bf16.mxu0 %v1327_v50  ;;  %v334_v50 = vld [vmem:[#allocation2 + $0x28] sm:$0xff] }
  0x52   : > { %816 = vmatpush1.bf16.msra.mxu1 %v1329_v51 }
  0x53   : > { %879 = vmatpush1.bf16.msra.mxu0 %v1330_v52  ;;  %817 = vmatprep.subr.bf16.mxu1 %v1331_v53 }
  0x54   : > { %880 = vmatprep.subr.bf16.mxu0 %v1333_v54  ;;  %v335_v54 = vld [vmem:[#allocation2 + $0x30] sm:$0xff] }
  0x56   : > { %818 = vmatpush1.bf16.msra.mxu1 %v1335_v55 }
  0x57   : > { %881 = vmatpush1.bf16.msra.mxu0 %v1336_v56  ;;  %819 = vmatprep.subr.bf16.mxu1 %v1337_v57 }
  0x58   : > { %882 = vmatprep.subr.bf16.mxu0 %v1339_v58 }
  0x5a   : > { %820 = vmatpush1.bf16.msra.mxu1 %v1341_v59  ;;  %v336_v59 = vld [vmem:[#allocation2 + $0x38] sm:$0xff] }
  0x5b   : > { %883 = vmatpush1.bf16.msra.mxu0 %v1342_v60  ;;  %821 = vmatprep.subr.bf16.mxu1 %v1343_v61 }
  0x5c   : > { %884 = vmatprep.subr.bf16.mxu0 %v1345_v63 }
  0x5e   : > { %822 = vmatpush1.bf16.msra.mxu1 %v1347_v1 }
  0x5f   : > { %885 = vmatpush1.bf16.msra.mxu0 %v1348_v2  ;;  %823 = vmatprep.subr.bf16.mxu1 %v1349_v3  ;;  %v337_v2 = vld [vmem:[#allocation2 + $0x40] sm:$0xff] }
  0x60   : > { %886 = vmatprep.subr.bf16.mxu0 %v1351_v4 }
  0x62   : > { %824 = vmatpush1.bf16.msra.mxu1 %v1353_v5 }
  0x63   : > { %887 = vmatpush1.bf16.msra.mxu0 %v1354_v6  ;;  %825 = vmatprep.subr.bf16.mxu1 %v1355_v7  ;;  %v338_v6 = vld [vmem:[#allocation2 + $0x48] sm:$0xff] }
  0x64   : > { %888 = vmatprep.subr.bf16.mxu0 %v1357_v8 }
  0x66   : > { %826 = vmatpush1.bf16.msra.mxu1 %v1359_v9 }
  0x67   : > { %889 = vmatpush1.bf16.msra.mxu0 %v1360_v10  ;;  %827 = vmatprep.subr.bf16.mxu1 %v1361_v11  ;;  %v339_v10 = vld [vmem:[#allocation2 + $0x50] sm:$0xff] }
  0x68   : > { %890 = vmatprep.subr.bf16.mxu0 %v1363_v12 }
  0x6a   : > { %828 = vmatpush1.bf16.msra.mxu1 %v1365_v13 }
  0x6b   : > { %891 = vmatpush1.bf16.msra.mxu0 %v1366_v14 }
  0x6d   : > { %830 = vmatmul.mubr.bf16.vlgmr.msra.gmra.mrb[0].mxu1 %v1367_v15  ;;  %v340_v15 = vld [vmem:[#allocation2 + $0x58] sm:$0xff] }
  0x6e   : > { %893 = vmatmul.mubr.bf16.vlgmr.msra.gmra.mrb[0].mxu0 %v1370_v16  ;;  %839 = vmatprep.mubr.bf16.mxu1 %v1373_v17 }
  0x6f   : > { %902 = vmatprep.mubr.bf16.mxu0 %v1375_v18 }
  0x75   : > { %840 = vmatmul.mubr.bf16.gmra.mrb[4].mxu1 %v1377_v19 }
  0x76   : > { %903 = vmatmul.mubr.bf16.gmra.mrb[4].mxu0 %v1378_v20  ;;  %849 = vmatprep.mubr.bf16.mxu1 %v1379_v21  ;;  %v965_v21 = vlaneseq (!%p1209_p11) }
  0x77   : > { %912 = vmatprep.mubr.bf16.mxu0 %v1381_v22 }
  0x78   : > { %v966_v22 = vshrl.u32 (!%p1209_p11), %v965_v21, 7 }
  0x7d   : > { %850 = vmatmul.mubr.bf16.gmra.mrb[8].mxu1 %v1383_v23  ;;  %v963_v23 = vld [vmem:[%s1634_s2] sm:$0x3] (!%p1209_p11) }
  0x7e   : > { %913 = vmatmul.mubr.bf16.gmra.mrb[8].mxu0 %v1384_v24 }
 0x140   : > { %v831_v25 = vpop.f32.mrb[0].mxu1 }
 0x141   : > { %v894_v27 = vpop.f32.mrb[0].mxu0  ;;  %v833_v29 = vpop.f32.mrb[1].mxu1 }
 0x142   : > { %v895_v28 = vadd.f32 %v894_v27, %v831_v25  ;;  %v896_v31 = vpop.f32.mrb[1].mxu0  ;;  %v835_v33 = vpop.f32.mrb[2].mxu1  ;;  %v967_v25 = vsub.s32 (!%p1209_p11), 0, %v966_v22  ;;  %v971_v27 = vsub.s32 (!%p1209_p11), 1, %v966_v22 }
 0x143   : > { %v897_v32 = vadd.f32 %v896_v31, %v833_v29  ;;  %v898_v35 = vpop.f32.mrb[2].mxu0  ;;  %v837_v38 = vpop.f32.mrb[3].mxu1 }
 0x144   : > { %v923_v36 = vadd.f32 %v895_v28, %v329_v26  ;;  %v899_v37 = vadd.f32 %v898_v35, %v835_v33  ;;  %v900_v40 = vpop.f32.mrb[3].mxu0  ;;  %v972_v33 = vrot.slane (!%p1209_p11), %v963_v23, %v971_v27 }
 0x145   : > { %v924_v41 = vadd.f32 %v897_v32, %v330_v30  ;;  %v901_v42 = vadd.f32 %v900_v40, %v837_v38  ;;  %v968_v32 = vrot.slane (!%p1209_p11), %v963_v23, %v967_v25 }
 0x146   : > { %935 = vst [vmem:[#allocation2] sm:$0xff] %v923_v36  ;;  %v925_v43 = vadd.f32 %v899_v37, %v331_v34 }
 0x147   : > { %936 = vst [vmem:[#allocation2 + $0x8] sm:$0xff] %v924_v41  ;;  %v926_v44 = vadd.f32 %v901_v42, %v332_v39 }
 0x148   : > { %937 = vst [vmem:[#allocation2 + $0x10] sm:$0xff] %v925_v43  ;;  %v841_v45 = vpop.f32.mrb[4].mxu1 }
 0x149   : > { %938 = vst [vmem:[#allocation2 + $0x18] sm:$0xff] %v926_v44  ;;  %v904_v47 = vpop.f32.mrb[4].mxu0  ;;  %v843_v49 = vpop.f32.mrb[5].mxu1 }
 0x14a   : > { %v905_v48 = vadd.f32 %v904_v47, %v841_v45  ;;  %v906_v51 = vpop.f32.mrb[5].mxu0  ;;  %v845_v53 = vpop.f32.mrb[6].mxu1 }
 0x14b   : > { %v907_v52 = vadd.f32 %v906_v51, %v843_v49  ;;  %v908_v55 = vpop.f32.mrb[6].mxu0  ;;  %v847_v58 = vpop.f32.mrb[7].mxu1 }
 0x14c   : > { %v927_v56 = vadd.f32 %v905_v48, %v333_v46  ;;  %v909_v57 = vadd.f32 %v908_v55, %v845_v53  ;;  %v910_v60 = vpop.f32.mrb[7].mxu0 }
 0x14d   : > { %v928_v61 = vadd.f32 %v907_v52, %v334_v50  ;;  %v911_v62 = vadd.f32 %v910_v60, %v847_v58  ;;  %v951_v24 = vld [vmem:[#allocation2] sm:$0xff] (!%p1209_p11) }
 0x14e   : > { %939 = vst [vmem:[#allocation2 + $0x20] sm:$0xff] %v927_v56  ;;  %v929_v63 = vadd.f32 %v909_v57, %v335_v54  ;;  %v952_v26 = vld [vmem:[#allocation2 + $0x8] sm:$0xff] (!%p1209_p11)  ;;  %v975_v40 = vadd.f32 (!%p1209_p11), %v968_v32, %v951_v24 }
 0x14f   : > { %940 = vst [vmem:[#allocation2 + $0x28] sm:$0xff] %v928_v61  ;;  %v930_v0 = vadd.f32 %v911_v62, %v336_v59  ;;  %v953_v28 = vld [vmem:[#allocation2 + $0x10] sm:$0xff] (!%p1209_p11)  ;;  %v976_v41 = vadd.f32 (!%p1209_p11), %v972_v33, %v952_v26 }
 0x150   : > { %941 = vst [vmem:[#allocation2 + $0x30] sm:$0xff] %v929_v63  ;;  %v851_v1 = vpop.f32.mrb[8].mxu1  ;;  %v954_v29 = vld [vmem:[#allocation2 + $0x18] sm:$0xff] (!%p1209_p11)  ;;  %v977_v42 = vadd.f32 (!%p1209_p11), %v968_v32, %v953_v28  ;;  %987 = vst [vmem:[%s1635_s3] sm:$0xff] (!%p1209_p11), %v975_v40 }
 0x151   : > { %942 = vst [vmem:[#allocation2 + $0x38] sm:$0xff] %v930_v0  ;;  %v914_v3 = vpop.f32.mrb[8].mxu0  ;;  %v853_v5 = vpop.f32.mrb[9].mxu1  ;;  %v978_v43 = vadd.f32 (!%p1209_p11), %v972_v33, %v954_v29  ;;  %988 = vst [vmem:[%s1635_s3 + $0x8] sm:$0xff] (!%p1209_p11), %v976_v41 }
 0x152   : > { %v915_v4 = vadd.f32 %v914_v3, %v851_v1  ;;  %v916_v7 = vpop.f32.mrb[9].mxu0  ;;  %v855_v9 = vpop.f32.mrb[10].mxu1  ;;  %989 = vst [vmem:[%s1635_s3 + $0x10] sm:$0xff] (!%p1209_p11), %v977_v42 }
 0x153   : > { %v917_v8 = vadd.f32 %v916_v7, %v853_v5  ;;  %v918_v11 = vpop.f32.mrb[10].mxu0  ;;  %v857_v14 = vpop.f32.mrb[11].mxu1  ;;  %950 = sbr.rel (%p1209_p11) target bundleno = 356 (0x164), region = 63  ;;  %990 = vst [vmem:[%s1635_s3 + $0x18] sm:$0xff] (!%p1209_p11), %v978_v43 }
 0x154   : > { %v931_v12 = vadd.f32 %v915_v4, %v337_v2  ;;  %v919_v13 = vadd.f32 %v918_v11, %v855_v9  ;;  %v920_v16 = vpop.f32.mrb[11].mxu0 }
 0x155   : > { %v932_v17 = vadd.f32 %v917_v8, %v338_v6  ;;  %v921_v18 = vadd.f32 %v920_v16, %v857_v14  ;;  %v955_v30 = vld [vmem:[#allocation2 + $0x20] sm:$0xff] (!%p1209_p11) }
 0x156   : > { %943 = vst [vmem:[#allocation2 + $0x40] sm:$0xff] %v931_v12  ;;  %v933_v19 = vadd.f32 %v919_v13, %v339_v10  ;;  %v956_v31 = vld [vmem:[#allocation2 + $0x28] sm:$0xff] (!%p1209_p11)  ;;  %v979_v44 = vadd.f32 (!%p1209_p11), %v968_v32, %v955_v30 }
 0x157   : > { %944 = vst [vmem:[#allocation2 + $0x48] sm:$0xff] %v932_v17  ;;  %v934_v20 = vadd.f32 %v921_v18, %v340_v15  ;;  %v957_v34 = vld [vmem:[#allocation2 + $0x30] sm:$0xff] (!%p1209_p11)  ;;  %v980_v45 = vadd.f32 (!%p1209_p11), %v972_v33, %v956_v31 }
 0x158   : > { %945 = vst [vmem:[#allocation2 + $0x50] sm:$0xff] %v933_v19  ;;  %v958_v35 = vld [vmem:[#allocation2 + $0x38] sm:$0xff] (!%p1209_p11)  ;;  %v981_v46 = vadd.f32 (!%p1209_p11), %v968_v32, %v957_v34  ;;  %991 = vst [vmem:[%s1635_s3 + $0x20] sm:$0xff] (!%p1209_p11), %v979_v44 }
 0x159   : > { %946 = vst [vmem:[#allocation2 + $0x58] sm:$0xff] %v934_v20  ;;  %v982_v47 = vadd.f32 (!%p1209_p11), %v972_v33, %v958_v35  ;;  %992 = vst [vmem:[%s1635_s3 + $0x28] sm:$0xff] (!%p1209_p11), %v980_v45 }
 0x15a   : > { %993 = vst [vmem:[%s1635_s3 + $0x30] sm:$0xff] %v981_v46 }
 0x15b   : > { %994 = vst [vmem:[%s1635_s3 + $0x38] sm:$0xff] %v982_v47 }
 0x15d   : > { %v959_v36 = vld [vmem:[#allocation2 + $0x40] sm:$0xff] }
 0x15e   : > { %v960_v37 = vld [vmem:[#allocation2 + $0x48] sm:$0xff]  ;;  %v983_v48 = vadd.f32 %v968_v32, %v959_v36 }
 0x15f   : > { %v961_v38 = vld [vmem:[#allocation2 + $0x50] sm:$0xff]  ;;  %v984_v49 = vadd.f32 %v972_v33, %v960_v37 }
 0x160   : > { %v962_v39 = vld [vmem:[#allocation2 + $0x58] sm:$0xff]  ;;  %v985_v50 = vadd.f32 %v968_v32, %v961_v38  ;;  %995 = vst [vmem:[%s1635_s3 + $0x40] sm:$0xff] %v983_v48 }
 0x161   : > { %v986_v51 = vadd.f32 %v972_v33, %v962_v39  ;;  %996 = vst [vmem:[%s1635_s3 + $0x48] sm:$0xff] %v984_v49 }
 0x162   : > { %997 = vst [vmem:[%s1635_s3 + $0x50] sm:$0xff] %v985_v50 }
 0x163   : > { %998 = vst [vmem:[%s1635_s3 + $0x58] sm:$0xff] %v986_v51 }
 0x164 PF: > { %s13_s16 = sadd.s32 1, %s1423_s16   ;;  %s1636_s12 = smov %s1411_s13 }
 0x165   : > { %p10_p12 = scmp.ge.s32.totalorder %s13_s16, 5   ;;  %s1637_s13 = smov %s1481_s20 }
 0x166   : > { %s1638_s14 = smov %s1419_s15  ;;  %s1639_s15 = smov %s1641_s17 }
 0x167   :  { %12 = sbr.rel (!%p10_p12) target bundleno = 3 (0x3), region = 104 }

// kernel: ecapa_forward.63
= control target key start
LH: loop header
LB: loop body
LE: loop exit
PB: predicated region body
PF: predicated region fallthrough
CT: control target
= control target key end

     0   :  { %s3873_s21 = smov 0   ;;  %s3875_s22 = smov 0   ;;  %s5310_s0 = inlined_call_operand.vmem [shape: bf16[2,24,256], index: 0, kind: input, shape index: {}]   ;;  %s5311_s1 = inlined_call_operand.vmem [shape: f32[2,24,1536], index: 1, kind: input, shape index: {}]   ;;  %s5312_s2 = inlined_call_operand.vmem [shape: bf16[256,1536], index: 2, kind: input, shape index: {}]   ;;  %s5313_s3 = inlined_call_operand.vmem [shape: f32[1,1536], index: 3, kind: input, shape index: {}]   ;;  %s5314_s4 = inlined_call_operand.vmem [shape: f32[1,24,1], index: 4, kind: input, shape index: {}]   ;;  %s5315_s5 = inlined_call_operand.vmem [shape: f32[2,1,1536], index: 5, kind: output, shape index: {0}]   ;;  %s5316_s6 = inlined_call_operand.vmem [shape: f32[2,1,1536], index: 6, kind: output, shape index: {1}]  }
   0x1   :  { %s3877_s23 = smov 0  }
   0x2 LB: > { %s29_s24 = sadd.s32 1, %s3828_s22  ;;  %p3199_p0 = scmp.ge.s32.totalorder %s3832_s23, 1  ;;  %s3832_s23 = sphi %s3877_s23, %s17_s23   ;;  %s3828_s22 = sphi %s3875_s22, %s5432_s22   ;;  %s3824_s21 = sphi %s3873_s21, %s5431_s21  }
   0x3   : > { %p31_p1 = scmp.ge.s32.totalorder %s29_s24, 2  ;;  %p264_p2 = scmp.lt.s32.totalorder %s3832_s23, 3 }
   0x5   : > { %s5434_s24 = smov (%p31_p1, %s29_s24), 0  ;;  %p265_p3 = pnand %p3199_p0, %p264_p2 }
   0x7   : > { %268 = sbr.rel (%p265_p3) target bundleno = 624 (0x270), region = 40 }
   0xe   : > { %v3433_v0 = vld [vmem:[%s5312_s2 + $0x4] ss:$48 sps:$4 sm:$0xff]   ;;  %v3435_v1 = vld [vmem:[%s5312_s2 + $0xc] ss:$48 sps:$4 sm:$0xff]   ;;  %v3437_v2 = vld [vmem:[%s5312_s2] ss:$48 sps:$4 sm:$0xff]  }
   0xf   : > { %1641 = vmatprep.subr.bf16.mxu0 %v3433_v0  ;;  %v3438_v3 = vld [vmem:[%s5312_s2 + $0x8] ss:$48 sps:$4 sm:$0xff]   ;;  %1692 = vmatprep.subr.bf16.mxu1 %v3435_v1  ;;  %v3439_v4 = vld [vmem:[%s5312_s2 + $0x64] ss:$48 sps:$4 sm:$0xff]   ;;  %v3441_v5 = vld [vmem:[%s5312_s2 + $0x6c] ss:$48 sps:$4 sm:$0xff]  }
  0x10   : > { %1642 = vmatpush1.bf16.msra.mxu0 %v3437_v2  ;;  %1693 = vmatpush1.bf16.msra.mxu1 %v3438_v3  ;;  %v3443_v6 = vld [vmem:[%s5312_s2 + $0x60] ss:$48 sps:$4 sm:$0xff]   ;;  %v3444_v7 = vld [vmem:[%s5312_s2 + $0x68] ss:$48 sps:$4 sm:$0xff]   ;;  %v3445_v8 = vld [vmem:[%s5312_s2 + $0xc4] ss:$48 sps:$4 sm:$0xff]  }
  0x11   : > { %1643 = vmatprep.subr.bf16.mxu0 %v3439_v4  ;;  %1694 = vmatprep.subr.bf16.mxu1 %v3441_v5  ;;  %v3447_v9 = vld [vmem:[%s5312_s2 + $0xcc] ss:$48 sps:$4 sm:$0xff]   ;;  %v3449_v10 = vld [vmem:[%s5312_s2 + $0xc0] ss:$48 sps:$4 sm:$0xff]   ;;  %v3450_v11 = vld [vmem:[%s5312_s2 + $0xc8] ss:$48 sps:$4 sm:$0xff]  }
  0x12   : > { %v3451_v12 = vld [vmem:[%s5312_s2 + $0x124] ss:$48 sps:$4 sm:$0xff]   ;;  %v3453_v13 = vld [vmem:[%s5312_s2 + $0x12c] ss:$48 sps:$4 sm:$0xff]   ;;  %v3455_v14 = vld [vmem:[%s5312_s2 + $0x120] ss:$48 sps:$4 sm:$0xff]  }
  0x13   : > { %v3456_v15 = vld [vmem:[%s5312_s2 + $0x128] ss:$48 sps:$4 sm:$0xff]   ;;  %v3457_v16 = vld [vmem:[%s5312_s2 + $0x184] ss:$48 sps:$4 sm:$0xff]   ;;  %v3459_v17 = vld [vmem:[%s5312_s2 + $0x18c] ss:$48 sps:$4 sm:$0xff]  }
  0x14   : > { %1644 = vmatpush1.bf16.msra.mxu0 %v3443_v6  ;;  %1695 = vmatpush1.bf16.msra.mxu1 %v3444_v7  ;;  %v3461_v18 = vld [vmem:[%s5312_s2 + $0x180] ss:$48 sps:$4 sm:$0xff]   ;;  %v3462_v19 = vld [vmem:[%s5312_s2 + $0x188] ss:$48 sps:$4 sm:$0xff]   ;;  %v3463_v20 = vld [vmem:[%s5312_s2 + $0x1e4] ss:$48 sps:$4 sm:$0xff]  }
  0x15   : > { %1645 = vmatprep.subr.bf16.mxu0 %v3445_v8  ;;  %1696 = vmatprep.subr.bf16.mxu1 %v3447_v9  ;;  %v3465_v21 = vld [vmem:[%s5312_s2 + $0x1ec] ss:$48 sps:$4 sm:$0xff]   ;;  %v3467_v22 = vld [vmem:[%s5312_s2 + $0x1e0] ss:$48 sps:$4 sm:$0xff]   ;;  %v3468_v23 = vld [vmem:[%s5312_s2 + $0x1e8] ss:$48 sps:$4 sm:$0xff]  }
  0x16   : > { %v3469_v24 = vld [vmem:[%s5312_s2 + $0x244] ss:$48 sps:$4 sm:$0xff]   ;;  %v3471_v25 = vld [vmem:[%s5312_s2 + $0x24c] ss:$48 sps:$4 sm:$0xff]   ;;  %v3834_v26 = vmov 0   ;;  %p318_p4 = scmp.lt.s32.totalorder %s3824_s21, 1 }
  0x17   : > { %3431 = vset.pattern.permute.xlu0 %v3834_v26  ;;  %3432 = vset.pattern.permute.xlu1 %v3834_v26  ;;  %v3473_v27 = vld [vmem:[%s5312_s2 + $0x240] ss:$48 sps:$4 sm:$0xff]   ;;  %v3474_v28 = vld [vmem:[%s5312_s2 + $0x248] ss:$48 sps:$4 sm:$0xff]   ;;  %v3475_v29 = vld [vmem:[%s5312_s2 + $0x2a4] ss:$48 sps:$4 sm:$0xff]  }
  0x18   : > { %1646 = vmatpush1.bf16.msra.mxu0 %v3449_v10  ;;  %1697 = vmatpush1.bf16.msra.mxu1 %v3450_v11  ;;  %v3477_v30 = vld [vmem:[%s5312_s2 + $0x2ac] ss:$48 sps:$4 sm:$0xff]   ;;  %v3479_v31 = vld [vmem:[%s5312_s2 + $0x2a0] ss:$48 sps:$4 sm:$0xff]   ;;  %v3480_v32 = vld [vmem:[%s5312_s2 + $0x2a8] ss:$48 sps:$4 sm:$0xff]  }
  0x19   : > { %1647 = vmatprep.subr.bf16.mxu0 %v3451_v12  ;;  %1698 = vmatprep.subr.bf16.mxu1 %v3453_v13  ;;  %v3481_v33 = vld [vmem:[%s5312_s2 + $0x304] ss:$48 sps:$4 sm:$0xff]   ;;  %v3483_v34 = vld [vmem:[%s5312_s2 + $0x30c] ss:$48 sps:$4 sm:$0xff]   ;;  %v3485_v35 = vld [vmem:[%s5312_s2 + $0x300] ss:$48 sps:$4 sm:$0xff]  }
  0x1a   : > { %v3486_v36 = vld [vmem:[%s5312_s2 + $0x308] ss:$48 sps:$4 sm:$0xff]   ;;  %v3487_v37 = vld [vmem:[%s5312_s2 + $0x364] ss:$48 sps:$4 sm:$0xff]   ;;  %s5436_s21 = smov (!%p318_p4, %s3824_s21), 1 }
  0x1b   : > { %v3489_v38 = vld [vmem:[%s5312_s2 + $0x36c] ss:$48 sps:$4 sm:$0xff]   ;;  %v3491_v39 = vld [vmem:[%s5312_s2 + $0x360] ss:$48 sps:$4 sm:$0xff]   ;;  %v3492_v40 = vld [vmem:[%s5312_s2 + $0x368] ss:$48 sps:$4 sm:$0xff]  }
  0x1c   : > { %1648 = vmatpush1.bf16.msra.mxu0 %v3455_v14  ;;  %1699 = vmatpush1.bf16.msra.mxu1 %v3456_v15  ;;  %v3493_v41 = vld [vmem:[%s5312_s2 + $0x3c4] ss:$48 sps:$4 sm:$0xff]   ;;  %s3400_s27 = smul.u32 24, %s5436_s21  ;;  %v3495_v42 = vld [vmem:[%s5312_s2 + $0x3cc] ss:$48 sps:$4 sm:$0xff]  }
  0x1d   : > { %1649 = vmatprep.subr.bf16.mxu0 %v3457_v16  ;;  %1700 = vmatprep.subr.bf16.mxu1 %v3459_v17  ;;  %v3497_v43 = vld [vmem:[%s5312_s2 + $0x3c0] ss:$48 sps:$4 sm:$0xff]   ;;  %v3498_v44 = vld [vmem:[%s5312_s2 + $0x3c8] ss:$48 sps:$4 sm:$0xff]   ;;  %v3499_v45 = vld [vmem:[%s5312_s2 + $0x424] ss:$48 sps:$4 sm:$0xff]  }
  0x1e   : > { %s4036_s14 = scalar_lea.vmem %s5310_s0, %s3400_s27  ;;  %v3501_v46 = vld [vmem:[%s5312_s2 + $0x42c] ss:$48 sps:$4 sm:$0xff]   ;;  %v3503_v47 = vld [vmem:[%s5312_s2 + $0x420] ss:$48 sps:$4 sm:$0xff]   ;;  %v3504_v48 = vld [vmem:[%s5312_s2 + $0x428] ss:$48 sps:$4 sm:$0xff]  }
  0x1f   : > { %v4048_v49 = vld [vmem:[%s4036_s14 + $0x4] ss:$8 sps:$4 sm:$0xff]   ;;  %v3509_v52 = vld [vmem:[%s5312_s2 + $0x480] ss:$48 sps:$4 sm:$0xff]   ;;  %v3510_v53 = vld [vmem:[%s5312_s2 + $0x488] ss:$48 sps:$4 sm:$0xff]  }
  0x20   : > { %1650 = vmatpush1.bf16.msra.mxu0 %v3461_v18  ;;  %1701 = vmatpush1.bf16.msra.mxu1 %v3462_v19  ;;  %v3505_v50 = vld [vmem:[%s5312_s2 + $0x484] ss:$48 sps:$4 sm:$0xff]   ;;  %v3507_v51 = vld [vmem:[%s5312_s2 + $0x48c] ss:$48 sps:$4 sm:$0xff]   ;;  %v3515_v56 = vld [vmem:[%s5312_s2 + $0x4e0] ss:$48 sps:$4 sm:$0xff]  }
  0x21   : > { %1651 = vmatprep.subr.bf16.mxu0 %v3463_v20  ;;  %1702 = vmatprep.subr.bf16.mxu1 %v3465_v21  ;;  %v3511_v54 = vld [vmem:[%s5312_s2 + $0x4e4] ss:$48 sps:$4 sm:$0xff]   ;;  %v3513_v55 = vld [vmem:[%s5312_s2 + $0x4ec] ss:$48 sps:$4 sm:$0xff]   ;;  %v3516_v57 = vld [vmem:[%s5312_s2 + $0x4e8] ss:$48 sps:$4 sm:$0xff]  }
  0x22   : > { %1673 = vmatprep.mubr.bf16.mxu0 %v4048_v49  ;;  %1724 = vmatprep.mubr.bf16.mxu1 %v4048_v49  ;;  %v3517_v58 = vld [vmem:[%s5312_s2 + $0x544] ss:$48 sps:$4 sm:$0xff]   ;;  %v3519_v59 = vld [vmem:[%s5312_s2 + $0x54c] ss:$48 sps:$4 sm:$0xff]   ;;  %v3521_v60 = vld [vmem:[%s5312_s2 + $0x540] ss:$48 sps:$4 sm:$0xff]  }
  0x23   : > { %v3522_v61 = vld [vmem:[%s5312_s2 + $0x548] ss:$48 sps:$4 sm:$0xff]   ;;  %v3523_v62 = vld [vmem:[%s5312_s2 + $0x5a4] ss:$48 sps:$4 sm:$0xff]   ;;  %v3525_v63 = vld [vmem:[%s5312_s2 + $0x5ac] ss:$48 sps:$4 sm:$0xff]  }
  0x24   : > { %1652 = vmatpush1.bf16.msra.mxu0 %v3467_v22  ;;  %1703 = vmatpush1.bf16.msra.mxu1 %v3468_v23  ;;  %v3527_v0 = vld [vmem:[%s5312_s2 + $0x5a0] ss:$48 sps:$4 sm:$0xff]   ;;  %v3528_v1 = vld [vmem:[%s5312_s2 + $0x5a8] ss:$48 sps:$4 sm:$0xff]   ;;  %v3534_v2 = vld [vmem:[%s5312_s2 + $0x14] ss:$48 sps:$4 sm:$0xff]  }
  0x25   : > { %1653 = vmatprep.subr.bf16.mxu0 %v3469_v24  ;;  %1704 = vmatprep.subr.bf16.mxu1 %v3471_v25  ;;  %v3537_v3 = vld [vmem:[%s5312_s2 + $0x1c] ss:$48 sps:$4 sm:$0xff]   ;;  %v4107_v4 = vld [vmem:[%s4036_s14] ss:$8 sps:$4 sm:$0xff]   ;;  %v371_v6 = vld [vmem:[%s4036_s14 + $0x10] sm:$0xff]  ;;  %s3401_s19 = smul.u32 288, %s5436_s21 }
  0x26   : > { %v3532_v5 = vld [vmem:[%s5312_s2 + $0x10] ss:$48 sps:$4 sm:$0xff]   ;;  %v3535_v7 = vld [vmem:[%s5312_s2 + $0x18] ss:$48 sps:$4 sm:$0xff]   ;;  %v3540_v8 = vld [vmem:[%s5312_s2 + $0x74] ss:$48 sps:$4 sm:$0xff]   ;;  %v4122_v10 = vcombine.high %v371_v6, %v371_v6  ;;  %v4140_v15 = vcombine.low %v371_v6, %v371_v6 }
  0x27   : > { %v3543_v9 = vld [vmem:[%s5312_s2 + $0x7c] ss:$48 sps:$4 sm:$0xff]   ;;  %v3538_v11 = vld [vmem:[%s5312_s2 + $0x70] ss:$48 sps:$4 sm:$0xff]   ;;  %v3541_v12 = vld [vmem:[%s5312_s2 + $0x78] ss:$48 sps:$4 sm:$0xff]   ;;  %s4780_s26 = scalar_lea.vmem %s5311_s1, %s3401_s19 }
  0x28   : > { %1654 = vmatpush1.bf16.msra.mxu0 %v3473_v27  ;;  %1705 = vmatpush1.bf16.msra.mxu1 %v3474_v28  ;;  %v3548_v13 = vld [vmem:[%s5312_s2 + $0xd4] ss:$48 sps:$4 sm:$0xff]   ;;  %v3551_v14 = vld [vmem:[%s5312_s2 + $0xdc] ss:$48 sps:$4 sm:$0xff]   ;;  %v3546_v16 = vld [vmem:[%s5312_s2 + $0xd0] ss:$48 sps:$4 sm:$0xff]  }
  0x29   : > { %1655 = vmatprep.subr.bf16.mxu0 %v3475_v29  ;;  %1706 = vmatprep.subr.bf16.mxu1 %v3477_v30  ;;  %v3549_v17 = vld [vmem:[%s5312_s2 + $0xd8] ss:$48 sps:$4 sm:$0xff]   ;;  %v3554_v18 = vld [vmem:[%s5312_s2 + $0x134] ss:$48 sps:$4 sm:$0xff]   ;;  %v3557_v19 = vld [vmem:[%s5312_s2 + $0x13c] ss:$48 sps:$4 sm:$0xff]  }
  0x2a   : > { %v3552_v20 = vld [vmem:[%s5312_s2 + $0x130] ss:$48 sps:$4 sm:$0xff]   ;;  %v3555_v21 = vld [vmem:[%s5312_s2 + $0x138] ss:$48 sps:$4 sm:$0xff]   ;;  %v3560_v22 = vld [vmem:[%s5312_s2 + $0x194] ss:$48 sps:$4 sm:$0xff]  }
  0x2b   : > { %v3563_v23 = vld [vmem:[%s5312_s2 + $0x19c] ss:$48 sps:$4 sm:$0xff]   ;;  %v3558_v24 = vld [vmem:[%s5312_s2 + $0x190] ss:$48 sps:$4 sm:$0xff]   ;;  %v3561_v25 = vld [vmem:[%s5312_s2 + $0x198] ss:$48 sps:$4 sm:$0xff]  }
  0x2c   : > { %1656 = vmatpush1.bf16.msra.mxu0 %v3479_v31  ;;  %1707 = vmatpush1.bf16.msra.mxu1 %v3480_v32  ;;  %v3566_v26 = vld [vmem:[%s5312_s2 + $0x1f4] ss:$48 sps:$4 sm:$0xff]   ;;  %v3569_v27 = vld [vmem:[%s5312_s2 + $0x1fc] ss:$48 sps:$4 sm:$0xff]   ;;  %v3564_v28 = vld [vmem:[%s5312_s2 + $0x1f0] ss:$48 sps:$4 sm:$0xff]  }
  0x2d   : > { %1657 = vmatprep.subr.bf16.mxu0 %v3481_v33  ;;  %1708 = vmatprep.subr.bf16.mxu1 %v3483_v34  ;;  %v3567_v29 = vld [vmem:[%s5312_s2 + $0x1f8] ss:$48 sps:$4 sm:$0xff]   ;;  %v3572_v30 = vld [vmem:[%s5312_s2 + $0x254] ss:$48 sps:$4 sm:$0xff]   ;;  %v3575_v31 = vld [vmem:[%s5312_s2 + $0x25c] ss:$48 sps:$4 sm:$0xff]  }
  0x2e   : > { %v3570_v32 = vld [vmem:[%s5312_s2 + $0x250] ss:$48 sps:$4 sm:$0xff]   ;;  %v3573_v33 = vld [vmem:[%s5312_s2 + $0x258] ss:$48 sps:$4 sm:$0xff]   ;;  %v3578_v34 = vld [vmem:[%s5312_s2 + $0x2b4] ss:$48 sps:$4 sm:$0xff]  }
  0x2f   : > { %v3621_v6 = vld [vmem:[%s5312_s2 + $0x558] ss:$48 sps:$4 sm:$0xff]   ;;  %s3402_s29 = smul.u32 12, %s5436_s21 }
  0x30   : > { %1658 = vmatpush1.bf16.msra.mxu0 %v3485_v35  ;;  %1709 = vmatpush1.bf16.msra.mxu1 %v3486_v36  ;;  %v3581_v35 = vld [vmem:[%s5312_s2 + $0x2bc] ss:$48 sps:$4 sm:$0xff]   ;;  %v3576_v36 = vld [vmem:[%s5312_s2 + $0x2b0] ss:$48 sps:$4 sm:$0xff]  }
  0x31   : > { %1659 = vmatprep.subr.bf16.mxu0 %v3487_v37  ;;  %1710 = vmatprep.subr.bf16.mxu1 %v3489_v38  ;;  %v3579_v37 = vld [vmem:[%s5312_s2 + $0x2b8] ss:$48 sps:$4 sm:$0xff]   ;;  %v3584_v38 = vld [vmem:[%s5312_s2 + $0x314] ss:$48 sps:$4 sm:$0xff]   ;;  %s5172_s7 = scalar_lea.vmem %s5315_s5, %s3402_s29  ;;  %s5216_s10 = scalar_lea.vmem %s5316_s6, %s3402_s29 }
  0x34   : > { %1660 = vmatpush1.bf16.msra.mxu0 %v3491_v39  ;;  %1711 = vmatpush1.bf16.msra.mxu1 %v3492_v40  ;;  %v3587_v39 = vld [vmem:[%s5312_s2 + $0x31c] ss:$48 sps:$4 sm:$0xff]   ;;  %v3582_v40 = vld [vmem:[%s5312_s2 + $0x310] ss:$48 sps:$4 sm:$0xff]  }
  0x35   : > { %1661 = vmatprep.subr.bf16.mxu0 %v3493_v41  ;;  %1712 = vmatprep.subr.bf16.mxu1 %v3495_v42  ;;  %v3585_v41 = vld [vmem:[%s5312_s2 + $0x318] ss:$48 sps:$4 sm:$0xff]   ;;  %v3590_v42 = vld [vmem:[%s5312_s2 + $0x374] ss:$48 sps:$4 sm:$0xff]  }
  0x38   : > { %1662 = vmatpush1.bf16.msra.mxu0 %v3497_v43  ;;  %1713 = vmatpush1.bf16.msra.mxu1 %v3498_v44  ;;  %v3593_v43 = vld [vmem:[%s5312_s2 + $0x37c] ss:$48 sps:$4 sm:$0xff]   ;;  %v3588_v44 = vld [vmem:[%s5312_s2 + $0x370] ss:$48 sps:$4 sm:$0xff]  }
  0x39   : > { %1663 = vmatprep.subr.bf16.mxu0 %v3499_v45  ;;  %1714 = vmatprep.subr.bf16.mxu1 %v3501_v46  ;;  %v3591_v45 = vld [vmem:[%s5312_s2 + $0x378] ss:$48 sps:$4 sm:$0xff]   ;;  %v1947_v46 = vld [vmem:[%s5314_s4] sm:$0xff] }
  0x3a   : > { %1952 = vperm.xlu0 %3431, %v1947_v46   ;;  %v3678_v46 = vld [vmem:[%s5312_s2 + $0x320] ss:$48 sps:$4 sm:$0xff]  }
  0x3c   : > { %1664 = vmatpush1.bf16.msra.mxu0 %v3503_v47  ;;  %1715 = vmatpush1.bf16.msra.mxu1 %v3504_v48  ;;  %v3596_v47 = vld [vmem:[%s5312_s2 + $0x3d4] ss:$48 sps:$4 sm:$0xff]   ;;  %v3599_v48 = vld [vmem:[%s5312_s2 + $0x3dc] ss:$48 sps:$4 sm:$0xff]  }
  0x3d   : > { %1665 = vmatprep.subr.bf16.mxu0 %v3505_v50  ;;  %1716 = vmatprep.subr.bf16.mxu1 %v3507_v51  ;;  %v3594_v50 = vld [vmem:[%s5312_s2 + $0x3d0] ss:$48 sps:$4 sm:$0xff]   ;;  %v1948_v51 = vld [vmem:[%s5314_s4 + $0x8] sm:$0xff] }
  0x3e   : > { %1957 = vperm.xlu0 %3431, %v1948_v51   ;;  %v3684_v51 = vld [vmem:[%s5312_s2 + $0x380] ss:$48 sps:$4 sm:$0xff]  }
  0x40   : > { %1666 = vmatpush1.bf16.msra.mxu0 %v3509_v52  ;;  %1717 = vmatpush1.bf16.msra.mxu1 %v3510_v53  ;;  %v3597_v52 = vld [vmem:[%s5312_s2 + $0x3d8] ss:$48 sps:$4 sm:$0xff]   ;;  %v3602_v53 = vld [vmem:[%s5312_s2 + $0x434] ss:$48 sps:$4 sm:$0xff]  }
  0x41   : > { %1667 = vmatprep.subr.bf16.mxu0 %v3511_v54  ;;  %1718 = vmatprep.subr.bf16.mxu1 %v3513_v55  ;;  %v3605_v54 = vld [vmem:[%s5312_s2 + $0x43c] ss:$48 sps:$4 sm:$0xff]   ;;  %v3600_v55 = vld [vmem:[%s5312_s2 + $0x430] ss:$48 sps:$4 sm:$0xff]  }
  0x44   : > { %1668 = vmatpush1.bf16.msra.mxu0 %v3515_v56  ;;  %1719 = vmatpush1.bf16.msra.mxu1 %v3516_v57  ;;  %v3603_v56 = vld [vmem:[%s5312_s2 + $0x438] ss:$48 sps:$4 sm:$0xff]   ;;  %v3608_v57 = vld [vmem:[%s5312_s2 + $0x494] ss:$48 sps:$4 sm:$0xff]  }
  0x45   : > { %1669 = vmatprep.subr.bf16.mxu0 %v3517_v58  ;;  %1720 = vmatprep.subr.bf16.mxu1 %v3519_v59  ;;  %v3611_v58 = vld [vmem:[%s5312_s2 + $0x49c] ss:$48 sps:$4 sm:$0xff]   ;;  %v1949_v59 = vld [vmem:[%s5314_s4 + $0x10] sm:$0xff] }
  0x46   : > { %1962 = vperm.xlu1 %3432, %v1949_v59   ;;  %v3696_v59 = vld [vmem:[%s5312_s2 + $0x440] ss:$48 sps:$4 sm:$0xff]  }
  0x48   : > { %1670 = vmatpush1.bf16.msra.mxu0 %v3521_v60  ;;  %1721 = vmatpush1.bf16.msra.mxu1 %v3522_v61  ;;  %v3606_v60 = vld [vmem:[%s5312_s2 + $0x490] ss:$48 sps:$4 sm:$0xff]   ;;  %v3609_v61 = vld [vmem:[%s5312_s2 + $0x498] ss:$48 sps:$4 sm:$0xff]  }
  0x49   : > { %1671 = vmatprep.subr.bf16.mxu0 %v3523_v62  ;;  %1722 = vmatprep.subr.bf16.mxu1 %v3525_v63  ;;  %v3614_v62 = vld [vmem:[%s5312_s2 + $0x4f4] ss:$48 sps:$4 sm:$0xff]   ;;  %v3617_v63 = vld [vmem:[%s5312_s2 + $0x4fc] ss:$48 sps:$4 sm:$0xff]  }
  0x4c   : > { %1672 = vmatpush1.bf16.msra.mxu0 %v3527_v0  ;;  %1723 = vmatpush1.bf16.msra.mxu1 %v3528_v1  ;;  %v3612_v0 = vld [vmem:[%s5312_s2 + $0x4f0] ss:$48 sps:$4 sm:$0xff]   ;;  %v3615_v1 = vld [vmem:[%s5312_s2 + $0x4f8] ss:$48 sps:$4 sm:$0xff]  }
  0x4d   : > { %1743 = vmatprep.subr.bf16.mxu0 %v3534_v2  ;;  %1794 = vmatprep.subr.bf16.mxu1 %v3537_v3  ;;  %v3620_v2 = vld [vmem:[%s5312_s2 + $0x554] ss:$48 sps:$4 sm:$0xff]   ;;  %v3623_v3 = vld [vmem:[%s5312_s2 + $0x55c] ss:$48 sps:$4 sm:$0xff]  }
  0x4f   : > { %1674 = vmatmul.mubr.bf16.vlgmr.msra.gmra.mrb[0].mxu0 %v4107_v4  ;;  %1725 = vmatmul.mubr.bf16.vlgmr.msra.gmra.mrb[0].mxu1 %v4107_v4 }
  0x50   : > { %1744 = vmatpush1.bf16.msra.mxu0 %v3532_v5  ;;  %1795 = vmatpush1.bf16.msra.mxu1 %v3535_v7  ;;  %v3618_v5 = vld [vmem:[%s5312_s2 + $0x550] ss:$48 sps:$4 sm:$0xff]   ;;  %v3626_v7 = vld [vmem:[%s5312_s2 + $0x5b4] ss:$48 sps:$4 sm:$0xff]  }
  0x51   : > { %1745 = vmatprep.subr.bf16.mxu0 %v3540_v8  ;;  %1796 = vmatprep.subr.bf16.mxu1 %v3543_v9  ;;  %v3629_v8 = vld [vmem:[%s5312_s2 + $0x5bc] ss:$48 sps:$4 sm:$0xff]   ;;  %v3624_v9 = vld [vmem:[%s5312_s2 + $0x5b0] ss:$48 sps:$4 sm:$0xff]  }
  0x52   : > { %1683 = vmatprep.mubr.bf16.mxu0 %v4122_v10  ;;  %1734 = vmatprep.mubr.bf16.mxu1 %v4122_v10 }
  0x54   : > { %1746 = vmatpush1.bf16.msra.mxu0 %v3538_v11  ;;  %1797 = vmatpush1.bf16.msra.mxu1 %v3541_v12  ;;  %v3627_v11 = vld [vmem:[%s5312_s2 + $0x5b8] ss:$48 sps:$4 sm:$0xff]   ;;  %v3632_v12 = vld [vmem:[%s5312_s2 + $0x24] ss:$48 sps:$4 sm:$0xff]  }
  0x55   : > { %1747 = vmatprep.subr.bf16.mxu0 %v3548_v13  ;;  %1798 = vmatprep.subr.bf16.mxu1 %v3551_v14  ;;  %v3635_v13 = vld [vmem:[%s5312_s2 + $0x2c] ss:$48 sps:$4 sm:$0xff]   ;;  %v3630_v14 = vld [vmem:[%s5312_s2 + $0x20] ss:$48 sps:$4 sm:$0xff]  }
  0x57   : > { %1684 = vmatmul.mubr.bf16.gmra.mrb[4].mxu0 %v4140_v15  ;;  %1735 = vmatmul.mubr.bf16.gmra.mrb[4].mxu1 %v4140_v15 }
  0x58   : > { %1748 = vmatpush1.bf16.msra.mxu0 %v3546_v16  ;;  %1799 = vmatpush1.bf16.msra.mxu1 %v3549_v17  ;;  %v3633_v16 = vld [vmem:[%s5312_s2 + $0x28] ss:$48 sps:$4 sm:$0xff]   ;;  %v3638_v17 = vld [vmem:[%s5312_s2 + $0x84] ss:$48 sps:$4 sm:$0xff]  }
  0x59   : > { %1749 = vmatprep.subr.bf16.mxu0 %v3554_v18  ;;  %1800 = vmatprep.subr.bf16.mxu1 %v3557_v19  ;;  %v3641_v18 = vld [vmem:[%s5312_s2 + $0x8c] ss:$48 sps:$4 sm:$0xff]   ;;  %v3636_v19 = vld [vmem:[%s5312_s2 + $0x80] ss:$48 sps:$4 sm:$0xff]  }
  0x5a   : > { %1775 = vmatprep.mubr.bf16.mxu0 %v4048_v49  ;;  %1826 = vmatprep.mubr.bf16.mxu1 %v4048_v49 }
  0x5c   : > { %1750 = vmatpush1.bf16.msra.mxu0 %v3552_v20  ;;  %1801 = vmatpush1.bf16.msra.mxu1 %v3555_v21  ;;  %v3639_v20 = vld [vmem:[%s5312_s2 + $0x88] ss:$48 sps:$4 sm:$0xff]   ;;  %v3644_v21 = vld [vmem:[%s5312_s2 + $0xe4] ss:$48 sps:$4 sm:$0xff]  }
  0x5d   : > { %1751 = vmatprep.subr.bf16.mxu0 %v3560_v22  ;;  %1802 = vmatprep.subr.bf16.mxu1 %v3563_v23  ;;  %v3647_v22 = vld [vmem:[%s5312_s2 + $0xec] ss:$48 sps:$4 sm:$0xff]   ;;  %v3642_v23 = vld [vmem:[%s5312_s2 + $0xe0] ss:$48 sps:$4 sm:$0xff]  }
  0x60   : > { %1752 = vmatpush1.bf16.msra.mxu0 %v3558_v24  ;;  %1803 = vmatpush1.bf16.msra.mxu1 %v3561_v25  ;;  %v3645_v24 = vld [vmem:[%s5312_s2 + $0xe8] ss:$48 sps:$4 sm:$0xff]   ;;  %v3650_v25 = vld [vmem:[%s5312_s2 + $0x144] ss:$48 sps:$4 sm:$0xff]  }
  0x61   : > { %1753 = vmatprep.subr.bf16.mxu0 %v3566_v26  ;;  %1804 = vmatprep.subr.bf16.mxu1 %v3569_v27  ;;  %v3653_v26 = vld [vmem:[%s5312_s2 + $0x14c] ss:$48 sps:$4 sm:$0xff]   ;;  %v3648_v27 = vld [vmem:[%s5312_s2 + $0x140] ss:$48 sps:$4 sm:$0xff]  }
  0x64   : > { %1754 = vmatpush1.bf16.msra.mxu0 %v3564_v28  ;;  %1805 = vmatpush1.bf16.msra.mxu1 %v3567_v29  ;;  %v3651_v28 = vld [vmem:[%s5312_s2 + $0x148] ss:$48 sps:$4 sm:$0xff]   ;;  %v3656_v29 = vld [vmem:[%s5312_s2 + $0x1a4] ss:$48 sps:$4 sm:$0xff]  }
  0x65   : > { %1755 = vmatprep.subr.bf16.mxu0 %v3572_v30  ;;  %1806 = vmatprep.subr.bf16.mxu1 %v3575_v31  ;;  %v3659_v30 = vld [vmem:[%s5312_s2 + $0x1ac] ss:$48 sps:$4 sm:$0xff]   ;;  %v3654_v31 = vld [vmem:[%s5312_s2 + $0x1a0] ss:$48 sps:$4 sm:$0xff]  }
  0x68   : > { %1756 = vmatpush1.bf16.msra.mxu0 %v3570_v32  ;;  %1807 = vmatpush1.bf16.msra.mxu1 %v3573_v33  ;;  %v3657_v32 = vld [vmem:[%s5312_s2 + $0x1a8] ss:$48 sps:$4 sm:$0xff]   ;;  %v3662_v33 = vld [vmem:[%s5312_s2 + $0x204] ss:$48 sps:$4 sm:$0xff]  }
  0x69   : > { %1757 = vmatprep.subr.bf16.mxu0 %v3578_v34  ;;  %1808 = vmatprep.subr.bf16.mxu1 %v3581_v35  ;;  %v3660_v34 = vld [vmem:[%s5312_s2 + $0x200] ss:$48 sps:$4 sm:$0xff]   ;;  %v3663_v35 = vld [vmem:[%s5312_s2 + $0x208] ss:$48 sps:$4 sm:$0xff]  }
  0x6c   : > { %1758 = vmatpush1.bf16.msra.mxu0 %v3576_v36  ;;  %1809 = vmatpush1.bf16.msra.mxu1 %v3579_v37  ;;  %v3668_v36 = vld [vmem:[%s5312_s2 + $0x264] ss:$48 sps:$4 sm:$0xff]   ;;  %v3671_v37 = vld [vmem:[%s5312_s2 + $0x26c] ss:$48 sps:$4 sm:$0xff]  }
  0x6d   : > { %1759 = vmatprep.subr.bf16.mxu0 %v3584_v38  ;;  %1810 = vmatprep.subr.bf16.mxu1 %v3587_v39  ;;  %v3666_v38 = vld [vmem:[%s5312_s2 + $0x260] ss:$48 sps:$4 sm:$0xff]   ;;  %v3669_v39 = vld [vmem:[%s5312_s2 + $0x268] ss:$48 sps:$4 sm:$0xff]  }
  0x70   : > { %1760 = vmatpush1.bf16.msra.mxu0 %v3582_v40  ;;  %1811 = vmatpush1.bf16.msra.mxu1 %v3585_v41  ;;  %v3674_v40 = vld [vmem:[%s5312_s2 + $0x2c4] ss:$48 sps:$4 sm:$0xff]   ;;  %v3677_v41 = vld [vmem:[%s5312_s2 + $0x2cc] ss:$48 sps:$4 sm:$0xff]  }
  0x71   : > { %1761 = vmatprep.subr.bf16.mxu0 %v3590_v42  ;;  %1812 = vmatprep.subr.bf16.mxu1 %v3593_v43  ;;  %v3672_v42 = vld [vmem:[%s5312_s2 + $0x2c0] ss:$48 sps:$4 sm:$0xff]   ;;  %v3675_v43 = vld [vmem:[%s5312_s2 + $0x2c8] ss:$48 sps:$4 sm:$0xff]  }
  0x74   : > { %1762 = vmatpush1.bf16.msra.mxu0 %v3588_v44  ;;  %1813 = vmatpush1.bf16.msra.mxu1 %v3591_v45  ;;  %v3680_v44 = vld [vmem:[%s5312_s2 + $0x324] ss:$48 sps:$4 sm:$0xff]   ;;  %v3683_v45 = vld [vmem:[%s5312_s2 + $0x32c] ss:$48 sps:$4 sm:$0xff]  }
  0x75   : > { %1763 = vmatprep.subr.bf16.mxu0 %v3596_v47  ;;  %1814 = vmatprep.subr.bf16.mxu1 %v3599_v48  ;;  %v3681_v47 = vld [vmem:[%s5312_s2 + $0x328] ss:$48 sps:$4 sm:$0xff]   ;;  %v3686_v48 = vld [vmem:[%s5312_s2 + $0x384] ss:$48 sps:$4 sm:$0xff]  }
  0x78   : > { %1764 = vmatpush1.bf16.msra.mxu0 %v3594_v50  ;;  %1815 = vmatpush1.bf16.msra.mxu1 %v3597_v52  ;;  %v3689_v50 = vld [vmem:[%s5312_s2 + $0x38c] ss:$48 sps:$4 sm:$0xff]   ;;  %v3687_v52 = vld [vmem:[%s5312_s2 + $0x388] ss:$48 sps:$4 sm:$0xff]  }
  0x79   : > { %1765 = vmatprep.subr.bf16.mxu0 %v3602_v53  ;;  %1816 = vmatprep.subr.bf16.mxu1 %v3605_v54  ;;  %v3692_v53 = vld [vmem:[%s5312_s2 + $0x3e4] ss:$48 sps:$4 sm:$0xff]   ;;  %v3695_v54 = vld [vmem:[%s5312_s2 + $0x3ec] ss:$48 sps:$4 sm:$0xff]  }
  0x7c   : > { %1766 = vmatpush1.bf16.msra.mxu0 %v3600_v55  ;;  %1817 = vmatpush1.bf16.msra.mxu1 %v3603_v56  ;;  %v3690_v55 = vld [vmem:[%s5312_s2 + $0x3e0] ss:$48 sps:$4 sm:$0xff]   ;;  %v3693_v56 = vld [vmem:[%s5312_s2 + $0x3e8] ss:$48 sps:$4 sm:$0xff]  }
  0x7d   : > { %1767 = vmatprep.subr.bf16.mxu0 %v3608_v57  ;;  %1818 = vmatprep.subr.bf16.mxu1 %v3611_v58  ;;  %v3698_v57 = vld [vmem:[%s5312_s2 + $0x444] ss:$48 sps:$4 sm:$0xff]   ;;  %v3701_v58 = vld [vmem:[%s5312_s2 + $0x44c] ss:$48 sps:$4 sm:$0xff]  }
  0x80   : > { %1768 = vmatpush1.bf16.msra.mxu0 %v3606_v60  ;;  %1819 = vmatpush1.bf16.msra.mxu1 %v3609_v61  ;;  %v3699_v60 = vld [vmem:[%s5312_s2 + $0x448] ss:$48 sps:$4 sm:$0xff]   ;;  %v3704_v61 = vld [vmem:[%s5312_s2 + $0x4a4] ss:$48 sps:$4 sm:$0xff]  }
  0x81   : > { %1769 = vmatprep.subr.bf16.mxu0 %v3614_v62  ;;  %1820 = vmatprep.subr.bf16.mxu1 %v3617_v63  ;;  %v3707_v62 = vld [vmem:[%s5312_s2 + $0x4ac] ss:$48 sps:$4 sm:$0xff]   ;;  %v3702_v63 = vld [vmem:[%s5312_s2 + $0x4a0] ss:$48 sps:$4 sm:$0xff]  }
  0x84   : > { %1770 = vmatpush1.bf16.msra.mxu0 %v3612_v0  ;;  %1821 = vmatpush1.bf16.msra.mxu1 %v3615_v1  ;;  %v3705_v0 = vld [vmem:[%s5312_s2 + $0x4a8] ss:$48 sps:$4 sm:$0xff]   ;;  %v3710_v1 = vld [vmem:[%s5312_s2 + $0x504] ss:$48 sps:$4 sm:$0xff]  }
  0x85   : > { %1771 = vmatprep.subr.bf16.mxu0 %v3620_v2  ;;  %1822 = vmatprep.subr.bf16.mxu1 %v3623_v3  ;;  %v3713_v2 = vld [vmem:[%s5312_s2 + $0x50c] ss:$48 sps:$4 sm:$0xff]   ;;  %v3708_v3 = vld [vmem:[%s5312_s2 + $0x500] ss:$48 sps:$4 sm:$0xff]  }
  0x88   : > { %1772 = vmatpush1.bf16.msra.mxu0 %v3618_v5  ;;  %1823 = vmatpush1.bf16.msra.mxu1 %v3621_v6  ;;  %v3711_v5 = vld [vmem:[%s5312_s2 + $0x508] ss:$48 sps:$4 sm:$0xff]   ;;  %v3716_v6 = vld [vmem:[%s5312_s2 + $0x564] ss:$48 sps:$4 sm:$0xff]  }
  0x89   : > { %1773 = vmatprep.subr.bf16.mxu0 %v3626_v7  ;;  %1824 = vmatprep.subr.bf16.mxu1 %v3629_v8  ;;  %v3719_v7 = vld [vmem:[%s5312_s2 + $0x56c] ss:$48 sps:$4 sm:$0xff]   ;;  %v3714_v8 = vld [vmem:[%s5312_s2 + $0x560] ss:$48 sps:$4 sm:$0xff]  }
  0x8c   : > { %1774 = vmatpush1.bf16.msra.mxu0 %v3624_v9  ;;  %1825 = vmatpush1.bf16.msra.mxu1 %v3627_v11  ;;  %v3717_v9 = vld [vmem:[%s5312_s2 + $0x568] ss:$48 sps:$4 sm:$0xff]   ;;  %v3722_v11 = vld [vmem:[%s5312_s2 + $0x5c4] ss:$48 sps:$4 sm:$0xff]  }
  0x8d   : > { %1845 = vmatprep.subr.bf16.mxu0 %v3632_v12  ;;  %1896 = vmatprep.subr.bf16.mxu1 %v3635_v13  ;;  %v3725_v12 = vld [vmem:[%s5312_s2 + $0x5cc] ss:$48 sps:$4 sm:$0xff]   ;;  %v3720_v13 = vld [vmem:[%s5312_s2 + $0x5c0] ss:$48 sps:$4 sm:$0xff]  }
  0x8f   : > { %1776 = vmatmul.mubr.bf16.vlgmr.msra.gmra.mrb[8].mxu0 %v4107_v4  ;;  %1827 = vmatmul.mubr.bf16.vlgmr.msra.gmra.mrb[8].mxu1 %v4107_v4 }
  0x90   : > { %1846 = vmatpush1.bf16.msra.mxu0 %v3630_v14  ;;  %1897 = vmatpush1.bf16.msra.mxu1 %v3633_v16  ;;  %v3723_v14 = vld [vmem:[%s5312_s2 + $0x5c8] ss:$48 sps:$4 sm:$0xff]   ;;  %v358_v16 = vlaneseq }
  0x91   : > { %1847 = vmatprep.subr.bf16.mxu0 %v3638_v17  ;;  %1898 = vmatprep.subr.bf16.mxu1 %v3641_v18 }
  0x92   : > { %1785 = vmatprep.mubr.bf16.mxu0 %v4122_v10  ;;  %1836 = vmatprep.mubr.bf16.mxu1 %v4122_v10  ;;  %v4524_v17 = vshrl.u32 %v358_v16, 7  ;;  %vm4683_vm0 = vcmp.lt.s32.totalorder %v358_v16, 512 }
  0x94   : > { %1848 = vmatpush1.bf16.msra.mxu0 %v3636_v19  ;;  %1899 = vmatpush1.bf16.msra.mxu1 %v3639_v20  ;;  %v4529_v19 = vsub.s32 0, %v4524_v17  ;;  %v4532_v20 = vsub.s32 2, %v4524_v17 }
  0x95   : > { %1849 = vmatprep.subr.bf16.mxu0 %v3644_v21  ;;  %1900 = vmatprep.subr.bf16.mxu1 %v3647_v22 }
  0x96   : > { %5345 = vst [vmem:[#allocation7_spill] sm:$0xff] %v4529_v19  ;;  %5346 = vst [vmem:[#allocation8_spill] sm:$0xff] %v4532_v20 }
  0x97   : > { %1786 = vmatmul.mubr.bf16.gmra.mrb[12].mxu0 %v4140_v15  ;;  %1837 = vmatmul.mubr.bf16.gmra.mrb[12].mxu1 %v4140_v15 }
  0x98   : > { %1850 = vmatpush1.bf16.msra.mxu0 %v3642_v23  ;;  %1901 = vmatpush1.bf16.msra.mxu1 %v3645_v24 }
  0x99   : > { %1851 = vmatprep.subr.bf16.mxu0 %v3650_v25  ;;  %1902 = vmatprep.subr.bf16.mxu1 %v3653_v26 }
  0x9a   : > { %1877 = vmatprep.mubr.bf16.mxu0 %v4048_v49  ;;  %1928 = vmatprep.mubr.bf16.mxu1 %v4048_v49  ;;  %v3665_v49 = vld [vmem:[%s5312_s2 + $0x20c] ss:$48 sps:$4 sm:$0xff]  }
  0x9c   : > { %1852 = vmatpush1.bf16.msra.mxu0 %v3648_v27  ;;  %1903 = vmatpush1.bf16.msra.mxu1 %v3651_v28 }
  0x9d   : > { %1853 = vmatprep.subr.bf16.mxu0 %v3656_v29  ;;  %1904 = vmatprep.subr.bf16.mxu1 %v3659_v30 }
  0xa0   : > { %1854 = vmatpush1.bf16.msra.mxu0 %v3654_v31  ;;  %1905 = vmatpush1.bf16.msra.mxu1 %v3657_v32 }
  0xa1   : > { %1855 = vmatprep.subr.bf16.mxu0 %v3662_v33  ;;  %1906 = vmatprep.subr.bf16.mxu1 %v3665_v49 }
  0xa4   : > { %1856 = vmatpush1.bf16.msra.mxu0 %v3660_v34  ;;  %1907 = vmatpush1.bf16.msra.mxu1 %v3663_v35 }
  0xa5   : > { %1857 = vmatprep.subr.bf16.mxu0 %v3668_v36  ;;  %1908 = vmatprep.subr.bf16.mxu1 %v3671_v37 }
  0xa8   : > { %1858 = vmatpush1.bf16.msra.mxu0 %v3666_v38  ;;  %1909 = vmatpush1.bf16.msra.mxu1 %v3669_v39 }
  0xa9   : > { %1859 = vmatprep.subr.bf16.mxu0 %v3674_v40  ;;  %1910 = vmatprep.subr.bf16.mxu1 %v3677_v41 }
  0xac   : > { %1860 = vmatpush1.bf16.msra.mxu0 %v3672_v42  ;;  %1911 = vmatpush1.bf16.msra.mxu1 %v3675_v43 }
  0xad   : > { %1861 = vmatprep.subr.bf16.mxu0 %v3680_v44  ;;  %1912 = vmatprep.subr.bf16.mxu1 %v3683_v45 }
  0xb0   : > { %1862 = vmatpush1.bf16.msra.mxu0 %v3678_v46  ;;  %1913 = vmatpush1.bf16.msra.mxu1 %v3681_v47 }
  0xb1   : > { %1863 = vmatprep.subr.bf16.mxu0 %v3686_v48  ;;  %1914 = vmatprep.subr.bf16.mxu1 %v3689_v50 }
  0xb4   : > { %1864 = vmatpush1.bf16.msra.mxu0 %v3684_v51  ;;  %1915 = vmatpush1.bf16.msra.mxu1 %v3687_v52 }
  0xb5   : > { %1865 = vmatprep.subr.bf16.mxu0 %v3692_v53  ;;  %1916 = vmatprep.subr.bf16.mxu1 %v3695_v54 }
  0xb8   : > { %1866 = vmatpush1.bf16.msra.mxu0 %v3690_v55  ;;  %1917 = vmatpush1.bf16.msra.mxu1 %v3693_v56 }
  0xb9   : > { %1867 = vmatprep.subr.bf16.mxu0 %v3698_v57  ;;  %1918 = vmatprep.subr.bf16.mxu1 %v3701_v58  ;;  %v4526_v18 = vpop.permute.xlu0 %1952 }
  0xba   : > { %5344 = vst [vmem:[#allocation6_spill] sm:$0xff] %v4526_v18 }
  0xbc   : > { %1868 = vmatpush1.bf16.msra.mxu0 %v3696_v59  ;;  %1919 = vmatpush1.bf16.msra.mxu1 %v3699_v60 }
  0xbd   : > { %1869 = vmatprep.subr.bf16.mxu0 %v3704_v61  ;;  %1920 = vmatprep.subr.bf16.mxu1 %v3707_v62  ;;  %v4553_v25 = vpop.permute.xlu0 %1957 }
  0xbe   : > { %5349 = vst [vmem:[#allocation11_spill] sm:$0xff] %v4553_v25 }
  0xc0   : > { %1870 = vmatpush1.bf16.msra.mxu0 %v3702_v63  ;;  %1921 = vmatpush1.bf16.msra.mxu1 %v3705_v0 }
  0xc1   : > { %1871 = vmatprep.subr.bf16.mxu0 %v3710_v1  ;;  %1922 = vmatprep.subr.bf16.mxu1 %v3713_v2 }
  0xc4   : > { %1872 = vmatpush1.bf16.msra.mxu0 %v3708_v3  ;;  %1923 = vmatpush1.bf16.msra.mxu1 %v3711_v5 }
  0xc5   : > { %1873 = vmatprep.subr.bf16.mxu0 %v3716_v6  ;;  %1924 = vmatprep.subr.bf16.mxu1 %v3719_v7  ;;  %v4583_v52 = vpop.permute.xlu1 %1962 }
  0xc6   : > { %5350 = vst [vmem:[#allocation12_spill] sm:$0xff] %v4583_v52 }
  0xc8   : > { %1874 = vmatpush1.bf16.msra.mxu0 %v3714_v8  ;;  %1925 = vmatpush1.bf16.msra.mxu1 %v3717_v9 }
  0xc9   : > { %1875 = vmatprep.subr.bf16.mxu0 %v3722_v11  ;;  %1926 = vmatprep.subr.bf16.mxu1 %v3725_v12 }
  0xcc   : > { %1876 = vmatpush1.bf16.msra.mxu0 %v3720_v13  ;;  %1927 = vmatpush1.bf16.msra.mxu1 %v3723_v14 }
  0xcf   : > { %1878 = vmatmul.mubr.bf16.vlgmr.msra.gmra.mrb[16].mxu0 %v4107_v4  ;;  %1929 = vmatmul.mubr.bf16.vlgmr.msra.gmra.mrb[16].mxu1 %v4107_v4  ;;  %v4537_v4 = vld [vmem:[%s5313_s3] sm:$0xff] }
  0xd0   : > { %1887 = vmatprep.mubr.bf16.mxu0 %v4122_v10  ;;  %1938 = vmatprep.mubr.bf16.mxu1 %v4122_v10  ;;  %v4540_v10 = vsub.s32 1, %v4524_v17  ;;  %v607_v21 = vrot.slane %v4537_v4, %v4529_v19  ;;  %v615_v22 = vrot.slane %v4537_v4, %v4532_v20 }
  0xd2   : > { %5347 = vst [vmem:[#allocation9_spill] sm:$0xff] %v4540_v10  ;;  %v611_v23 = vrot.slane %v4537_v4, %v4540_v10 }
  0xd7   : > { %1888 = vmatmul.mubr.bf16.gmra.mrb[20].mxu0 %v4140_v15  ;;  %1939 = vmatmul.mubr.bf16.gmra.mrb[20].mxu1 %v4140_v15  ;;  %v4543_v15 = vsub.s32 3, %v4524_v17 }
  0xd9   : > { %5348 = vst [vmem:[#allocation10_spill] sm:$0xff] %v4543_v15  ;;  %v619_v24 = vrot.slane %v4537_v4, %v4543_v15 }
 0x122   : > { %v1675_v26 = vpop.f32.mrb[0].mxu0  ;;  %v1726_v27 = vpop.f32.mrb[0].mxu1 }
 0x123   : > { %v1676_v28 = vadd.f32 %v1675_v26, %v607_v21  ;;  %v1727_v29 = vadd.f32 %v1726_v27, %v615_v22  ;;  %v1677_v30 = vpop.f32.mrb[1].mxu0  ;;  %v1728_v31 = vpop.f32.mrb[1].mxu1  ;;  %v3835_v26 = vmov 1966171168  }
 0x124   : > { %v1678_v32 = vadd.f32 %v1677_v30, %v611_v23  ;;  %v1729_v33 = vadd.f32 %v1728_v31, %v619_v24  ;;  %v1679_v49 = vpop.f32.mrb[2].mxu0  ;;  %v1730_v34 = vpop.f32.mrb[2].mxu1  ;;  %v2116_v27 = vunpack.c.l.s4 %v3835_v26 }
 0x125   : > { %v4556_v35 = vadd.f32 %v4526_v18, %v1676_v28  ;;  %v4559_v36 = vadd.f32 %v4526_v18, %v1727_v29  ;;  %v1680_v37 = vadd.f32 %v1679_v49, %v607_v21  ;;  %v1731_v38 = vadd.f32 %v1730_v34, %v615_v22  ;;  %v1681_v39 = vpop.f32.mrb[3].mxu0  ;;  %v1732_v40 = vpop.f32.mrb[3].mxu1 }
 0x126   : > { %v1682_v41 = vadd.f32 %v1681_v39, %v611_v23  ;;  %v1733_v42 = vadd.f32 %v1732_v40, %v619_v24  ;;  %v4568_v45 = vadd.f32 %v4526_v18, %v1678_v32  ;;  %v4571_v46 = vadd.f32 %v4526_v18, %v1729_v33 }
 0x127   : > { %v4562_v43 = vadd.f32 %v4553_v25, %v1680_v37  ;;  %v4565_v44 = vadd.f32 %v4553_v25, %v1731_v38  ;;  %v2117_v37 = vunpack.c.0.s8 %v2116_v27 }
 0x128   : > { %v4574_v47 = vadd.f32 %v4553_v25, %v1682_v41  ;;  %v4577_v48 = vadd.f32 %v4553_v25, %v1733_v42 }
 0x129   : > { %v2003_v50 = vmax.f32 %v4556_v35, %v4562_v43  ;;  %v2019_v51 = vmax.f32 %v4559_v36, %v4565_v44 }
 0x12a   : > { %v2011_v53 = vmax.f32 %v4568_v45, %v4574_v47  ;;  %v2027_v54 = vmax.f32 %v4571_v46, %v4577_v48  ;;  %v1685_v55 = vpop.f32.mrb[4].mxu0  ;;  %v1736_v56 = vpop.f32.mrb[4].mxu1 }
 0x12b   : > { %v1686_v57 = vadd.f32 %v1685_v55, %v607_v21  ;;  %v1737_v58 = vadd.f32 %v1736_v56, %v615_v22  ;;  %v1687_v59 = vpop.f32.mrb[5].mxu0  ;;  %v1738_v60 = vpop.f32.mrb[5].mxu1 }
 0x12c   : > { %v1688_v61 = vadd.f32 %v1687_v59, %v611_v23  ;;  %v1739_v62 = vadd.f32 %v1738_v60, %v619_v24  ;;  %v1689_v63 = vpop.f32.mrb[6].mxu0  ;;  %v1740_v0 = vpop.f32.mrb[6].mxu1 }
 0x12d   : > { %v4590_v1 = vadd.f32 %v4583_v52, %v1686_v57  ;;  %v4593_v2 = vadd.f32 %v4583_v52, %v1737_v58  ;;  %v1690_v3 = vpop.f32.mrb[7].mxu0  ;;  %v1741_v5 = vpop.f32.mrb[7].mxu1  ;;  %v5318_v63 = vsub.s32 6, %v4524_v17  ;;  %v5319_v0 = vsub.s32 5, %v4524_v17 }
 0x12e   : > { %v4596_v6 = vadd.f32 %v4583_v52, %v1688_v61  ;;  %v4599_v7 = vadd.f32 %v4583_v52, %v1739_v62  ;;  %v5320_v62 = vsub.s32 4, %v4524_v17  ;;  %v5317_v3 = vsub.s32 7, %v4524_v17 }
 0x12f   : > { %v2004_v8 = vmax.f32 %v2003_v50, %v4590_v1  ;;  %v2020_v9 = vmax.f32 %v2019_v51, %v4593_v2 }
 0x130   : > { %v2012_v11 = vmax.f32 %v2011_v53, %v4596_v6  ;;  %v2028_v12 = vmax.f32 %v2027_v54, %v4599_v7  ;;  %v4606_v54 = vsub.s32 %v2117_v37, %v4524_v17  ;;  %v623_v5 = vrot.slane %v4537_v4, %v5320_v62 }
 0x131   : > { %v2005_v13 = vrot.slane %v2004_v8, 4  ;;  %v2021_v14 = vrot.slane %v2020_v9, 4 }
 0x132   : > { %v2013_v21 = vrot.slane %v2012_v11, 4  ;;  %v2029_v22 = vrot.slane %v2028_v12, 4 }
 0x133   : > { %v2006_v23 = vmax.f32 %v2004_v8, %v2005_v13  ;;  %v2022_v24 = vmax.f32 %v2020_v9, %v2021_v14  ;;  %v631_v8 = vrot.slane %v4537_v4, %v5318_v63  ;;  %v627_v9 = vrot.slane %v4537_v4, %v5319_v0 }
 0x134   : > { %v2014_v28 = vmax.f32 %v2012_v11, %v2013_v21  ;;  %v2030_v29 = vmax.f32 %v2028_v12, %v2029_v22  ;;  %v635_v11 = vrot.slane %v4537_v4, %v5317_v3 }
 0x135   : > { %v2007_v30 = vrot.slane %v2006_v23, 2  ;;  %v2023_v31 = vrot.slane %v2022_v24, 2 }
 0x136   : > { %v2015_v32 = vrot.slane %v2014_v28, 2  ;;  %v2031_v33 = vrot.slane %v2030_v29, 2 }
 0x137   : > { %v2008_v49 = vmax.f32 %v2006_v23, %v2007_v30  ;;  %v2024_v34 = vmax.f32 %v2022_v24, %v2023_v31 }
 0x138   : > { %v2016_v38 = vmax.f32 %v2014_v28, %v2015_v32  ;;  %v2032_v39 = vmax.f32 %v2030_v29, %v2031_v33 }
 0x139   : > { %v2009_v40 = vrot.slane %v2008_v49, 1  ;;  %v2025_v41 = vrot.slane %v2024_v34, 1 }
 0x13a   : > { %v2017_v42 = vrot.slane %v2016_v38, 1  ;;  %v2033_v50 = vrot.slane %v2032_v39, 1 }
 0x13b   : > { %v2010_v51 = vmax.f32 %v2008_v49, %v2009_v40  ;;  %v2026_v53 = vmax.f32 %v2024_v34, %v2025_v41 }
 0x13c   : > { %v2018_v55 = vmax.f32 %v2016_v38, %v2017_v42  ;;  %v2034_v56 = vmax.f32 %v2032_v39, %v2033_v50 }
 0x13e   : > { %v2111_v57 = vcombine.low %v2010_v51, %v2018_v55  ;;  %v2112_v58 = vcombine.low %v2026_v53, %v2034_v56 }
 0x140   : > { %v4609_v59 = vrot.slane %v2111_v57, %v4606_v54  ;;  %v4612_v60 = vrot.slane %v2112_v58, %v4606_v54 }
 0x142   : > { %v5354_v16 = vcombine.low %v4609_v59, %v4612_v60  ;;  %v5355_v59 = vsub.s32 4, %v4524_v17 }
 0x162   : > { %v1777_v12 = vpop.f32.mrb[8].mxu0  ;;  %v1828_v13 = vpop.f32.mrb[8].mxu1 }
 0x163   : > { %v1778_v14 = vadd.f32 %v1777_v12, %v623_v5  ;;  %v1829_v21 = vadd.f32 %v1828_v13, %v631_v8  ;;  %v1779_v22 = vpop.f32.mrb[9].mxu0  ;;  %v1830_v23 = vpop.f32.mrb[9].mxu1 }
 0x164   : > { %v1780_v24 = vadd.f32 %v1779_v22, %v627_v9  ;;  %v1831_v26 = vadd.f32 %v1830_v23, %v635_v11  ;;  %v1781_v27 = vpop.f32.mrb[10].mxu0  ;;  %v1832_v28 = vpop.f32.mrb[10].mxu1 }
 0x165   : > { %v4633_v29 = vadd.f32 %v4526_v18, %v1778_v14  ;;  %v4636_v30 = vadd.f32 %v4526_v18, %v1829_v21  ;;  %v1782_v31 = vadd.f32 %v1781_v27, %v623_v5  ;;  %v1833_v32 = vadd.f32 %v1832_v28, %v631_v8  ;;  %v1783_v33 = vpop.f32.mrb[11].mxu0  ;;  %v1834_v4 = vpop.f32.mrb[11].mxu1 }
 0x166   : > { %v1784_v49 = vadd.f32 %v1783_v33, %v627_v9  ;;  %v1835_v34 = vadd.f32 %v1834_v4, %v635_v11  ;;  %v4645_v39 = vadd.f32 %v4526_v18, %v1780_v24  ;;  %v4648_v40 = vadd.f32 %v4526_v18, %v1831_v26 }
 0x167   : > { %v4639_v37 = vadd.f32 %v4553_v25, %v1782_v31  ;;  %v4642_v38 = vadd.f32 %v4553_v25, %v1833_v32 }
 0x168   : > { %v4651_v41 = vadd.f32 %v4553_v25, %v1784_v49  ;;  %v4654_v42 = vadd.f32 %v4553_v25, %v1835_v34 }
 0x169   : > { %v2035_v50 = vmax.f32 %v4633_v29, %v4639_v37  ;;  %v2051_v51 = vmax.f32 %v4636_v30, %v4642_v38 }
 0x16a   : > { %v2043_v53 = vmax.f32 %v4645_v39, %v4651_v41  ;;  %v2059_v55 = vmax.f32 %v4648_v40, %v4654_v42  ;;  %v1787_v56 = vpop.f32.mrb[12].mxu0  ;;  %v1838_v57 = vpop.f32.mrb[12].mxu1 }
 0x16b   : > { %v1788_v58 = vadd.f32 %v1787_v56, %v623_v5  ;;  %v1839_v12 = vadd.f32 %v1838_v57, %v631_v8  ;;  %v1789_v13 = vpop.f32.mrb[13].mxu0  ;;  %v1840_v14 = vpop.f32.mrb[13].mxu1 }
 0x16c   : > { %v1790_v21 = vadd.f32 %v1789_v13, %v627_v9  ;;  %v1841_v22 = vadd.f32 %v1840_v14, %v635_v11  ;;  %v1791_v23 = vpop.f32.mrb[14].mxu0  ;;  %v1842_v24 = vpop.f32.mrb[14].mxu1 }
 0x16d   : > { %v4665_v26 = vadd.f32 %v4583_v52, %v1788_v58  ;;  %v4668_v27 = vadd.f32 %v4583_v52, %v1839_v12  ;;  %v1792_v28 = vpop.f32.mrb[15].mxu0  ;;  %v1843_v31 = vpop.f32.mrb[15].mxu1 }
 0x16e   : > { %v4671_v32 = vadd.f32 %v4583_v52, %v1790_v21  ;;  %v4674_v5 = vadd.f32 %v4583_v52, %v1841_v22  ;;  %v4926_v52 = vld [vmem:[%s4780_s26 + $0x98] sm:$0xff] }
 0x16f   : > { %v2036_v8 = vmax.f32 %v2035_v50, %v4665_v26  ;;  %v2052_v9 = vmax.f32 %v2051_v51, %v4668_v27 }
 0x170   : > { %v2044_v11 = vmax.f32 %v2043_v53, %v4671_v32  ;;  %v2060_v33 = vmax.f32 %v2059_v55, %v4674_v5 }
 0x171   : > { %v2037_v4 = vrot.slane %v2036_v8, 4  ;;  %v2053_v49 = vrot.slane %v2052_v9, 4 }
 0x172   : > { %v2045_v34 = vrot.slane %v2044_v11, 4  ;;  %v2061_v56 = vrot.slane %v2060_v33, 4 }
 0x173   : > { %v2038_v57 = vmax.f32 %v2036_v8, %v2037_v4  ;;  %v2054_v58 = vmax.f32 %v2052_v9, %v2053_v49  ;;  %v5351_v4 = vmov 0 }
 0x174   : > { %v2046_v12 = vmax.f32 %v2044_v11, %v2045_v34  ;;  %v2062_v13 = vmax.f32 %v2060_v33, %v2061_v56  ;;  %v5352_v4 = vsel %vm4683_vm0, 4294967295, %v5351_v4  ;;  %v3836_v34 = vmov -1e+30  }
 0x175   : > { %v2039_v14 = vrot.slane %v2038_v57, 2  ;;  %v2055_v21 = vrot.slane %v2054_v58, 2  ;;  %5353 = vst [vmem:[#allocation13_spill] sm:$0xff] %v5352_v4  ;;  %362 = vst.msk [vmem:[#allocation2 + $0x8] sm:$0xf] %vm4683_vm0, %v3836_v34  ;;  %v3837_v56 = vmov 0.0  }
 0x176   : > { %v2047_v22 = vrot.slane %v2046_v12, 2  ;;  %v2063_v23 = vrot.slane %v2062_v13, 2  ;;  %364 = vst.msk [vmem:[#allocation3 + $0x8] sm:$0xf] %vm4683_vm0, %v3837_v56  ;;  %366 = vst.msk [vmem:[#allocation4 + $0x8] sm:$0xf] %vm4683_vm0, %v3837_v56 }
 0x177   : > { %v2040_v24 = vmax.f32 %v2038_v57, %v2039_v14  ;;  %v2056_v50 = vmax.f32 %v2054_v58, %v2055_v21  ;;  %368 = vst.msk [vmem:[#allocation5 + $0x8] sm:$0xf] %vm4683_vm0, %v3837_v56  ;;  %v5356_v14 = vsub.s32 5, %v4524_v17  ;;  %v4910_v4 = vld [vmem:[%s4780_s26 + $0x88] sm:$0xff] }
 0x178   : > { %v2048_v28 = vmax.f32 %v2046_v12, %v2047_v22  ;;  %v2064_v51 = vmax.f32 %v2062_v13, %v2063_v23  ;;  %v5357_v22 = vsub.s32 6, %v4524_v17 }
 0x179   : > { %v2041_v31 = vrot.slane %v2040_v24, 1  ;;  %v2057_v53 = vrot.slane %v2056_v50, 1 }
 0x17a   : > { %v2049_v3 = vrot.slane %v2048_v28, 1  ;;  %v2065_v55 = vrot.slane %v2064_v51, 1 }
 0x17b   : > { %v2042_v63 = vmax.f32 %v2040_v24, %v2041_v31  ;;  %v2058_v0 = vmax.f32 %v2056_v50, %v2057_v53  ;;  %v5358_v50 = vsub.s32 7, %v4524_v17 }
 0x17c   : > { %v2050_v62 = vmax.f32 %v2048_v28, %v2049_v3  ;;  %v2066_v61 = vmax.f32 %v2064_v51, %v2065_v55 }
 0x17e   : > { %v2113_v8 = vcombine.low %v2042_v63, %v2050_v62  ;;  %v2114_v9 = vcombine.low %v2058_v0, %v2066_v61  ;;  %v2151_v61 = vrot.slane %v5354_v16, %v4606_v54 }
 0x180   : > { %v2135_v11 = vrot.slane %v2113_v8, %v4606_v54  ;;  %v2142_v33 = vrot.slane %v2114_v9, %v4606_v54 }
 0x182   : > { %v2144_v49 = vcombine.low %v2135_v11, %v2142_v33 }
 0x184   : > { %v2158_v62 = vrot.slane %v2144_v49, %v4606_v54 }
 0x186   : > { %v2159_v63 = vcombine.low %v2151_v61, %v2158_v62 }
 0x188   : > { %v2186_v0 = vmax.f32 %v2159_v63, -1e+30  ;;  %v372_v63 = vld [vmem:[%s4780_s26] sm:$0xff] }
 0x18a   : > { %v2188_v3 = vsub.f32 -1e+30, %v2186_v0  ;;  %v4701_v57 = vrot.slane %v2186_v0, %v4529_v19  ;;  %v4704_v58 = vrot.slane %v2186_v0, %v4540_v10  ;;  %v4707_v12 = vrot.slane %v2186_v0, %v4532_v20 }
 0x18b   : > { %v4710_v13 = vrot.slane %v2186_v0, %v4543_v15  ;;  %v4714_v60 = vrot.slane %v2186_v0, %v5355_v59  ;;  %v4718_v21 = vrot.slane %v2186_v0, %v5356_v14  ;;  %v4722_v23 = vrot.slane %v2186_v0, %v5357_v22 }
 0x18c   : > { %v2190_v24 = vmul.f32 1.442695, %v2188_v3  ;;  %v4726_v28 = vrot.slane %v2186_v0, %v5358_v50  ;;  %v2256_v51 = vsub.f32 %v4556_v35, %v4701_v57  ;;  %v2257_v31 = vsub.f32 %v4568_v45, %v4704_v58 }
 0x18d   : > { %v2258_v53 = vsub.f32 %v4559_v36, %v4707_v12  ;;  %v2259_v55 = vsub.f32 %v4571_v46, %v4710_v13  ;;  %v2260_v8 = vsub.f32 %v4633_v29, %v4714_v60  ;;  %v2261_v17 = vsub.f32 %v4645_v39, %v4718_v21 }
 0x18e   : > { %3726 = vpow2.f32 %v2190_v24  ;;  %v2262_v9 = vsub.f32 %v4636_v30, %v4722_v23  ;;  %v2263_v35 = vsub.f32 %v4648_v40, %v4726_v28  ;;  %v2268_v45 = vsub.f32 %v4562_v43, %v4701_v57  ;;  %v375_v24 = vld [vmem:[%s4780_s26 + $0x18] sm:$0xff] }
 0x18f   : > { %v2269_v36 = vsub.f32 %v4574_v47, %v4704_v58  ;;  %v2270_v46 = vsub.f32 %v4565_v44, %v4707_v12  ;;  %v2271_v29 = vsub.f32 %v4577_v48, %v4710_v13  ;;  %v2272_v39 = vsub.f32 %v4639_v37, %v4714_v60 }
 0x190   : > { %v2273_v30 = vsub.f32 %v4651_v41, %v4718_v21  ;;  %v2274_v40 = vsub.f32 %v4642_v38, %v4722_v23  ;;  %v2275_v43 = vsub.f32 %v4654_v42, %v4726_v28  ;;  %v2280_v47 = vsub.f32 %v4590_v1, %v4701_v57  ;;  %v373_v57 = vld [vmem:[%s4780_s26 + $0x8] sm:$0xff] }
 0x191   : > { %v2281_v44 = vsub.f32 %v4596_v6, %v4704_v58  ;;  %v2282_v48 = vsub.f32 %v4593_v2, %v4707_v12  ;;  %v2283_v37 = vsub.f32 %v4599_v7, %v4710_v13  ;;  %v2284_v41 = vsub.f32 %v4665_v26, %v4714_v60  ;;  %v374_v60 = vld [vmem:[%s4780_s26 + $0x10] sm:$0xff] }
 0x192   : > { %v2285_v38 = vsub.f32 %v4671_v32, %v4718_v21  ;;  %v2286_v42 = vsub.f32 %v4668_v27, %v4722_v23  ;;  %v2287_v1 = vsub.f32 %v4674_v5, %v4726_v28  ;;  %v2292_v11 = vmul.f32 1.442695, %v2256_v51  ;;  %v601_v5 = vld [vmem:[%s5313_s3 + $0x8] sm:$0xf] }
 0x193   : > { %v2294_v6 = vmul.f32 1.442695, %v2257_v31  ;;  %v2296_v33 = vmul.f32 1.442695, %v2258_v53  ;;  %v2298_v49 = vmul.f32 1.442695, %v2259_v55  ;;  %v4789_v3 = vrot.slane %v601_v5, %v4529_v19 }
 0x194   : > { %3728 = vpow2.f32 %v2292_v11  ;;  %v2300_v2 = vmul.f32 1.442695, %v2260_v8  ;;  %v2302_v7 = vmul.f32 1.442695, %v2261_v17  ;;  %v2304_v26 = vmul.f32 1.442695, %v2262_v9 }
 0x195   : > { %3730 = vpow2.f32 %v2294_v6  ;;  %v2306_v34 = vmul.f32 1.442695, %v2263_v35  ;;  %v2316_v56 = vmul.f32 1.442695, %v2268_v45  ;;  %v2318_v27 = vmul.f32 1.442695, %v2269_v36 }
 0x196   : > { %3732 = vpow2.f32 %v2296_v33  ;;  %v2320_v16 = vmul.f32 1.442695, %v2270_v46  ;;  %v2322_v62 = vmul.f32 1.442695, %v2271_v29  ;;  %v2324_v0 = vmul.f32 1.442695, %v2272_v39 }
 0x197   : > { %3734 = vpow2.f32 %v2298_v49  ;;  %5359 = vst [vmem:[#allocation14_spill] sm:$0xff] %v4789_v3  ;;  %v2326_v58 = vmul.f32 1.442695, %v2273_v30  ;;  %v4793_v12 = vrot.slane %v601_v5, %v4532_v20  ;;  %v4796_v13 = vrot.slane %v601_v5, %v4540_v10  ;;  %v376_v53 = vld [vmem:[%s4780_s26 + $0x20] sm:$0xff]  ;;  %v377_v35 = vld [vmem:[%s4780_s26 + $0x28] sm:$0xff]  ;;  %v378_v45 = vld [vmem:[%s4780_s26 + $0x30] sm:$0xff] }
 0x198   : > { %v3727_v32 = vpop.eup %3726  ;;  %3736 = vpow2.f32 %v2300_v2  ;;  %v2328_v14 = vmul.f32 1.442695, %v2274_v40  ;;  %v2330_v21 = vmul.f32 1.442695, %v2275_v43  ;;  %v4802_v22 = vrot.slane %v601_v5, %v4543_v15  ;;  %v4847_v33 = vld [vmem:[%s4780_s26 + $0x60] sm:$0xff] }
 0x199   : > { %3738 = vpow2.f32 %v2302_v7  ;;  %v4785_v61 = vmul.f32 0.0, %v3727_v32  ;;  %5360 = vst [vmem:[#allocation15_spill] sm:$0xff] %v4793_v12  ;;  %5361 = vst [vmem:[#allocation16_spill] sm:$0xff] %v4796_v13  ;;  %v2340_v50 = vmul.f32 1.442695, %v2280_v47 }
 0x19a   : > { %3740 = vpow2.f32 %v2304_v26  ;;  %5362 = vst [vmem:[#allocation17_spill] sm:$0xff] %v4802_v22  ;;  %v2342_v28 = vmul.f32 1.442695, %v2281_v44  ;;  %v2344_v55 = vmul.f32 1.442695, %v2282_v48  ;;  %v5024_v22 = vld [vmem:[%s4780_s26 + $0xf8] sm:$0xff] }
 0x19b   : > { %3742 = vpow2.f32 %v2306_v34  ;;  %v2346_v8 = vmul.f32 1.442695, %v2283_v37  ;;  %v2348_v36 = vmul.f32 1.442695, %v2284_v41  ;;  %v2350_v46 = vmul.f32 1.442695, %v2285_v38 }
 0x19c   : > { %3744 = vpow2.f32 %v2316_v56  ;;  %v2352_v30 = vmul.f32 1.442695, %v2286_v42  ;;  %v2354_v40 = vmul.f32 1.442695, %v2287_v1  ;;  %v4831_v37 = vld [vmem:[%s4780_s26 + $0x38] sm:$0xff]  ;;  %v4865_v56 = vld [vmem:[%s4780_s26 + $0x68] sm:$0xff] }
 0x19d   : > { %3746 = vpow2.f32 %v2318_v27  ;;  %5390 = vst [vmem:[#allocation45_spill] sm:$0xff] %v5024_v22 }
 0x19e   : > { %v4798_v59 = vpop.eup %3728  ;;  %3748 = vpow2.f32 %v2320_v16 }
 0x19f   : > { %v4804_v23 = vpop.eup %3730  ;;  %3750 = vpow2.f32 %v2322_v62  ;;  %v4808_v51 = vmul.f32 %v4798_v59, %v372_v63 }
 0x1a0   : > { %v4810_v31 = vpop.eup %3732  ;;  %3752 = vpow2.f32 %v2324_v0  ;;  %v4814_v17 = vmul.f32 %v4804_v23, %v373_v57 }
 0x1a1   : > { %v4816_v9 = vpop.eup %3734  ;;  %3754 = vpow2.f32 %v2326_v58  ;;  %v4821_v29 = vmul.f32 %v4810_v31, %v374_v60  ;;  %v4837_v38 = vmul.f32 %v4808_v51, %v372_v63 }
 0x1a2   : > { %v4823_v39 = vpop.eup %3736  ;;  %3756 = vpow2.f32 %v2328_v14  ;;  %v4826_v43 = vmul.f32 %v4816_v9, %v375_v24  ;;  %v1879_v47 = vpop.f32.mrb[16].mxu0  ;;  %v4853_v2 = vmul.f32 %v4814_v17, %v373_v57  ;;  %v4881_v57 = vld [vmem:[%s4780_s26 + $0x70] sm:$0xff] }
 0x1a3   : > { %v1930_v44 = vpop.f32.mrb[16].mxu1  ;;  %v4828_v48 = vpop.eup %3738  ;;  %3758 = vpow2.f32 %v2330_v21  ;;  %v4834_v41 = vmul.f32 %v4823_v39, %v376_v53  ;;  %5363 = vst [vmem:[#allocation18_spill] sm:$0xff] %v4837_v38  ;;  %v1880_v42 = vadd.f32 %v1879_v47, %v4789_v3  ;;  %v4856_v7 = vmul.f32 %v4821_v29, %v374_v60 }
 0x1a4   : > { %v4840_v1 = vpop.f32.mrb[17].mxu0  ;;  %v4842_v11 = vpop.f32.mrb[17].mxu1  ;;  %3760 = vpow2.f32 %v2340_v50  ;;  %v4850_v49 = vmul.f32 %v4828_v48, %v377_v35  ;;  %5366 = vst [vmem:[#allocation21_spill] sm:$0xff] %v4853_v2  ;;  %v4871_v5 = vmul.f32 %v4826_v43, %v375_v24  ;;  %v4874_v16 = vadd.f32 %v1930_v44, %v4793_v12  ;;  %v4894_v24 = vld [vmem:[%s4780_s26 + $0x78] sm:$0xff]  ;;  %v4902_v44 = vld [vmem:[%s4780_s26 + $0x80] sm:$0xff] }
 0x1a5   : > { %5364 = vst [vmem:[#allocation19_spill] sm:$0xff] %v4840_v1  ;;  %5365 = vst [vmem:[#allocation20_spill] sm:$0xff] %v4842_v11  ;;  %v4844_v6 = vpop.eup %3740  ;;  %v4858_v26 = vpop.f32.mrb[18].mxu0  ;;  %3762 = vpow2.f32 %v2342_v28  ;;  %v4888_v60 = vmul.f32 %v4834_v41, %v376_v53  ;;  %v4891_v14 = vadd.f32 %v4526_v18, %v1880_v42 }
 0x1a6   : > { %5367 = vst [vmem:[#allocation22_spill] sm:$0xff] %v4856_v7  ;;  %5368 = vst [vmem:[#allocation23_spill] sm:$0xff] %v4858_v26  ;;  %v4860_v34 = vpop.f32.mrb[18].mxu1  ;;  %v4862_v32 = vpop.eup %3742  ;;  %v4868_v27 = vmul.f32 %v4844_v6, %v378_v45  ;;  %3764 = vpow2.f32 %v2344_v55  ;;  %v4899_v55 = vmul.f32 %v4850_v49, %v377_v35 }
 0x1a7   : > { %5369 = vst [vmem:[#allocation24_spill] sm:$0xff] %v4860_v34  ;;  %5370 = vst [vmem:[#allocation25_spill] sm:$0xff] %v4871_v5  ;;  %v4876_v62 = vpop.f32.mrb[19].mxu0  ;;  %v4878_v63 = vpop.f32.mrb[19].mxu1  ;;  %v4885_v58 = vmul.f32 %v4862_v32, %v4831_v37  ;;  %3766 = vpow2.f32 %v2346_v8 }
 0x1a8   : > { %5371 = vst [vmem:[#allocation26_spill] sm:$0xff] %v4874_v16  ;;  %5372 = vst [vmem:[#allocation27_spill] sm:$0xff] %v4876_v62  ;;  %v3745_v0 = vpop.eup %3744  ;;  %3768 = vpow2.f32 %v2348_v36  ;;  %v4907_v15 = vmul.f32 %v4868_v27, %v378_v45  ;;  %v4916_v36 = vld [vmem:[%s4780_s26 + $0x90] sm:$0xff] }
 0x1a9   : > { %5373 = vst [vmem:[#allocation28_spill] sm:$0xff] %v4878_v63  ;;  %5374 = vst [vmem:[#allocation29_spill] sm:$0xff] %v4888_v60  ;;  %v3747_v21 = vpop.eup %3746  ;;  %v2376_v50 = vmul.f32 %v3745_v0, %v4847_v33  ;;  %v2404_v28 = vadd.f32 %v3745_v0, %v4798_v59  ;;  %3770 = vpow2.f32 %v2350_v46 }
 0x1aa   : > { %5375 = vst [vmem:[#allocation30_spill] sm:$0xff] %v4891_v14  ;;  %5376 = vst [vmem:[#allocation31_spill] sm:$0xff] %v4899_v55  ;;  %v3749_v47 = vpop.eup %3748  ;;  %v2377_v53 = vmul.f32 %v3747_v21, %v4865_v56  ;;  %v2412_v42 = vadd.f32 %v3747_v21, %v4804_v23  ;;  %3772 = vpow2.f32 %v2352_v30  ;;  %v4921_v10 = vpop.f32.mrb[20].mxu0 }
 0x1ab   : > { %5377 = vst [vmem:[#allocation32_spill] sm:$0xff] %v4907_v15  ;;  %v3751_v8 = vpop.eup %3750  ;;  %v2378_v59 = vmul.f32 %v3749_v47, %v4881_v57  ;;  %v2420_v35 = vadd.f32 %v3749_v47, %v4810_v31  ;;  %v2599_v0 = vadd.f32 %v2376_v50, %v4808_v51  ;;  %5378 = vst [vmem:[#allocation33_spill] sm:$0xff] %v4921_v10  ;;  %v4923_v46 = vpop.f32.mrb[20].mxu1  ;;  %3774 = vpow2.f32 %v2354_v40 }
 0x1ac   : > { %v3753_v20 = vpop.eup %3752  ;;  %v2379_v23 = vmul.f32 %v3751_v8, %v4894_v24  ;;  %v2428_v45 = vadd.f32 %v3751_v8, %v4816_v9  ;;  %v2607_v21 = vadd.f32 %v2377_v53, %v4814_v17  ;;  %5379 = vst [vmem:[#allocation34_spill] sm:$0xff] %v4923_v46  ;;  %v4935_v9 = vpop.f32.mrb[21].mxu0  ;;  %v4940_v8 = vld [vmem:[%s4780_s26 + $0xc0] sm:$0xff] }
 0x1ad   : > { %v3755_v19 = vpop.eup %3754  ;;  %v4929_v51 = vmul.f32 %v3753_v20, %v4902_v44  ;;  %v2436_v31 = vadd.f32 %v3753_v20, %v4823_v39  ;;  %v4933_v30 = vadd.f32 %v2378_v59, %v4821_v29  ;;  %5380 = vst [vmem:[#allocation35_spill] sm:$0xff] %v4935_v9  ;;  %v4937_v17 = vpop.f32.mrb[21].mxu1  ;;  %v4951_v20 = vmul.f32 %v4885_v58, %v4831_v37  ;;  %v4954_v9 = vld [vmem:[%s4780_s26 + $0xc8] sm:$0xff] }
 0x1ae   : > { %5381 = vst [vmem:[#allocation36_spill] sm:$0xff] %v4937_v17  ;;  %v3757_v47 = vpop.eup %3756  ;;  %v4943_v46 = vmul.f32 %v3755_v19, %v4910_v4  ;;  %v2444_v40 = vadd.f32 %v3755_v19, %v4828_v48  ;;  %v4947_v10 = vadd.f32 %v2379_v23, %v4826_v43  ;;  %v1893_v29 = vpop.f32.mrb[22].mxu0  ;;  %v4965_v43 = vmul.f32 %v2376_v50, %v4847_v33  ;;  %v4982_v50 = vld [vmem:[%s4780_s26 + $0xd8] sm:$0xff] }
 0x1af   : > { %5382 = vst [vmem:[#allocation37_spill] sm:$0xff] %v4951_v20  ;;  %v1944_v39 = vpop.f32.mrb[22].mxu1  ;;  %v3759_v17 = vpop.eup %3758  ;;  %v4957_v14 = vmul.f32 %v3757_v47, %v4916_v36  ;;  %v2452_v63 = vadd.f32 %v3757_v47, %v4844_v6  ;;  %v4962_v19 = vadd.f32 %v4929_v51, %v4834_v41  ;;  %v4979_v41 = vmul.f32 %v2377_v53, %v4865_v56 }
 0x1b0   : > { %5383 = vst [vmem:[#allocation38_spill] sm:$0xff] %v4965_v43  ;;  %v1894_v48 = vpop.f32.mrb[23].mxu0  ;;  %v1945_v37 = vpop.f32.mrb[23].mxu1  ;;  %v4968_v39 = vld [vmem:[%s4780_s26 + $0xd0] sm:$0xff]  ;;  %v4971_v62 = vmul.f32 %v3759_v17, %v4926_v52  ;;  %v2460_v25 = vadd.f32 %v3759_v17, %v4862_v32  ;;  %v4976_v6 = vadd.f32 %v4943_v46, %v4850_v49  ;;  %v4992_v32 = vmul.f32 %v2378_v59, %v4881_v57  ;;  %v4995_v17 = vld [vmem:[%s4780_s26 + $0xe0] sm:$0xff] }
 0x1b1   : > { %v3761_v29 = vpop.eup %3760  ;;  %5384 = vst [vmem:[#allocation39_spill] sm:$0xff] %v4979_v41  ;;  %v4989_v37 = vadd.f32 %v4957_v14, %v4868_v27  ;;  %5386 = vst [vmem:[#allocation41_spill] sm:$0xff] %v4995_v17 }
 0x1b2   : > { %v3763_v33 = vpop.eup %3762  ;;  %v4985_v47 = vmul.f32 %v3761_v29, %v4940_v8  ;;  %v2405_v48 = vadd.f32 %v3761_v29, %v2404_v28  ;;  %5385 = vst [vmem:[#allocation40_spill] sm:$0xff] %v4992_v32  ;;  %v5002_v34 = vadd.f32 %v4971_v62, %v4885_v58  ;;  %v5005_v28 = vmul.f32 %v2379_v23, %v4894_v24  ;;  %v5008_v29 = vld [vmem:[%s4780_s26 + $0xe8] sm:$0xff] }
 0x1b3   : > { %v3765_v49 = vpop.eup %3764  ;;  %v4998_v56 = vmul.f32 %v3763_v33, %v4954_v9  ;;  %v2413_v53 = vadd.f32 %v3763_v33, %v2412_v42  ;;  %5388 = vst [vmem:[#allocation43_spill] sm:$0xff] %v5008_v29  ;;  %v5015_v42 = vld [vmem:[%s4780_s26 + $0xf0] sm:$0xff] }
 0x1b4   : > { %5387 = vst [vmem:[#allocation42_spill] sm:$0xff] %v5005_v28  ;;  %v3767_v27 = vpop.eup %3766  ;;  %v5011_v57 = vmul.f32 %v3765_v49, %v4968_v39  ;;  %v2406_v59 = vrot.slane %v2405_v48, 4  ;;  %v2421_v12 = vadd.f32 %v3765_v49, %v2420_v35  ;;  %v2600_v26 = vadd.f32 %v2599_v0, %v4985_v47  ;;  %5389 = vst [vmem:[#allocation44_spill] sm:$0xff] %v5015_v42 }
 0x1b5   : > { %v3769_v3 = vpop.eup %3768  ;;  %v5018_v33 = vmul.f32 %v3767_v27, %v4982_v50  ;;  %v2414_v58 = vrot.slane %v2413_v53, 4  ;;  %v2429_v11 = vadd.f32 %v3767_v27, %v2428_v45  ;;  %v5021_v24 = vadd.f32 %v2607_v21, %v4998_v56 }
 0x1b6   : > { %v3771_v23 = vpop.eup %3770  ;;  %v5027_v1 = vmul.f32 %v3769_v3, %v4995_v17  ;;  %v2407_v35 = vadd.f32 %v2406_v59, %v2405_v48  ;;  %v2422_v49 = vrot.slane %v2421_v12, 4  ;;  %v2437_v0 = vadd.f32 %v3769_v3, %v2436_v31 }
 0x1b7   : > { %v3773_v13 = vpop.eup %3772  ;;  %v5030_v18 = vmul.f32 %v3771_v23, %v5008_v29  ;;  %v2415_v16 = vadd.f32 %v2414_v58, %v2413_v53  ;;  %v2430_v20 = vrot.slane %v2429_v11, 4  ;;  %v2445_v15 = vadd.f32 %v3771_v23, %v2444_v40 }
 0x1b8   : > { %v3775_v45 = vpop.eup %3774  ;;  %v5033_v21 = vmul.f32 %v3773_v13, %v5015_v42  ;;  %v2408_v27 = vrot.slane %v2407_v35, 2  ;;  %v2423_v55 = vadd.f32 %v2422_v49, %v2421_v12  ;;  %v2438_v60 = vrot.slane %v2437_v0, 4 }
 0x1b9   : > { %v5036_v28 = vmul.f32 %v3775_v45, %v5024_v22  ;;  %v2416_v48 = vrot.slane %v2415_v16, 2  ;;  %v2431_v59 = vadd.f32 %v2430_v20, %v2429_v11  ;;  %v2446_v3 = vrot.slane %v2445_v15, 4 }
 0x1ba   : > { %v2409_v31 = vadd.f32 %v2408_v27, %v2407_v35  ;;  %v2424_v5 = vrot.slane %v2423_v55, 2  ;;  %v2439_v32 = vadd.f32 %v2438_v60, %v2437_v0  ;;  %v2453_v7 = vadd.f32 %v3773_v13, %v2452_v63 }
 0x1bb   : > { %v2417_v53 = vadd.f32 %v2416_v48, %v2415_v16  ;;  %v2432_v58 = vrot.slane %v2431_v59, 2  ;;  %v2447_v40 = vadd.f32 %v2446_v3, %v2445_v15  ;;  %v2461_v23 = vadd.f32 %v3775_v45, %v2460_v25 }
 0x1bc   : > { %v2410_v41 = vrot.slane %v2409_v31, 1  ;;  %v2425_v2 = vadd.f32 %v2424_v5, %v2423_v55  ;;  %v2440_v43 = vrot.slane %v2439_v32, 2  ;;  %v2454_v38 = vrot.slane %v2453_v7, 4 }
 0x1bd   : > { %v2418_v12 = vrot.slane %v2417_v53, 1  ;;  %v2433_v49 = vadd.f32 %v2432_v58, %v2431_v59  ;;  %v2448_v42 = vrot.slane %v2447_v40, 2  ;;  %v2462_v22 = vrot.slane %v2461_v23, 4 }
 0x1be   : > { %v2411_v29 = vadd.f32 %v2410_v41, %v2409_v31  ;;  %v2426_v17 = vrot.slane %v2425_v2, 1  ;;  %v2441_v11 = vadd.f32 %v2440_v43, %v2439_v32  ;;  %v2455_v20 = vadd.f32 %v2454_v38, %v2453_v7 }
 0x1bf   : > { %v2419_v35 = vadd.f32 %v2418_v12, %v2417_v53  ;;  %v2434_v27 = vrot.slane %v2433_v49, 1  ;;  %v2449_v60 = vadd.f32 %v2448_v42, %v2447_v40  ;;  %v2463_v13 = vadd.f32 %v2462_v22, %v2461_v23 }
 0x1c0   : > { %v2427_v16 = vadd.f32 %v2426_v17, %v2425_v2  ;;  %v2442_v63 = vrot.slane %v2441_v11, 1  ;;  %v2456_v15 = vrot.slane %v2455_v20, 2  ;;  %v2601_v25 = vrot.slane %v2600_v26, 4 }
 0x1c1   : > { %v2435_v0 = vadd.f32 %v2434_v27, %v2433_v49  ;;  %v2450_v5 = vrot.slane %v2449_v60, 1  ;;  %v2464_v55 = vrot.slane %v2463_v13, 2  ;;  %v2512_v45 = vcombine.low %v2411_v29, %v2419_v35 }
 0x1c2   : > { %v2443_v48 = vadd.f32 %v2442_v63, %v2441_v11  ;;  %v2457_v59 = vadd.f32 %v2456_v15, %v2455_v20  ;;  %v2602_v3 = vadd.f32 %v2601_v25, %v2600_v26  ;;  %v2609_v41 = vrot.slane %v5021_v24, 4 }
 0x1c3   : > { %v2451_v31 = vadd.f32 %v2450_v5, %v2449_v60  ;;  %v2465_v43 = vadd.f32 %v2464_v55, %v2463_v13  ;;  %v2513_v38 = vcombine.low %v2427_v16, %v2435_v0  ;;  %v2522_v7 = vrot.slane %v2512_v45, %v4606_v54 }
 0x1c4   : > { %v2458_v32 = vrot.slane %v2457_v59, 1  ;;  %v2603_v22 = vrot.slane %v2602_v3, 2  ;;  %v2610_v2 = vadd.f32 %v2609_v41, %v5021_v24  ;;  %v2616_v17 = vadd.f32 %v4933_v30, %v5011_v57 }
 0x1c5   : > { %v2466_v42 = vrot.slane %v2465_v43, 1  ;;  %v2514_v53 = vcombine.low %v2443_v48, %v2451_v31  ;;  %v2529_v29 = vrot.slane %v2513_v38, %v4606_v54  ;;  %v2624_v26 = vadd.f32 %v4947_v10, %v5018_v33 }
 0x1c6   : > { %v2459_v58 = vadd.f32 %v2458_v32, %v2457_v59  ;;  %v2604_v40 = vadd.f32 %v2603_v22, %v2602_v3  ;;  %v2611_v23 = vrot.slane %v2610_v2, 2  ;;  %v2617_v12 = vrot.slane %v2616_v17, 4 }
 0x1c7   : > { %v2467_v49 = vadd.f32 %v2466_v42, %v2465_v43  ;;  %v2536_v11 = vrot.slane %v2514_v53, %v4606_v54  ;;  %v2544_v20 = vcombine.low %v2522_v7, %v2529_v29  ;;  %v2625_v35 = vrot.slane %v2624_v26, 4 }
 0x1c8   : > { %v2605_v24 = vrot.slane %v2604_v40, 1  ;;  %v2612_v27 = vadd.f32 %v2611_v23, %v2610_v2  ;;  %v2618_v60 = vadd.f32 %v2617_v12, %v2616_v17  ;;  %v2632_v30 = vadd.f32 %v4962_v19, %v5027_v1 }
 0x1c9   : > { %v2515_v13 = vcombine.low %v2459_v58, %v2467_v49  ;;  %v2552_v16 = vrot.slane %v2544_v20, %v4606_v54  ;;  %v2626_v63 = vadd.f32 %v2625_v35, %v2624_v26  ;;  %v2640_v10 = vadd.f32 %v4976_v6, %v5030_v18 }
 0x1ca   : > { %v2606_v15 = vadd.f32 %v2605_v24, %v2604_v40  ;;  %v2613_v25 = vrot.slane %v2612_v27, 1  ;;  %v2619_v0 = vrot.slane %v2618_v60, 2  ;;  %v2633_v5 = vrot.slane %v2632_v30, 4 }
 0x1cb   : > { %v2543_v55 = vrot.slane %v2515_v13, %v4606_v54  ;;  %v2627_v45 = vrot.slane %v2626_v63, 2  ;;  %v2641_v48 = vrot.slane %v2640_v10, 4  ;;  %v2648_v59 = vadd.f32 %v4989_v37, %v5033_v21 }
 0x1cc   : > { %v2614_v3 = vadd.f32 %v2613_v25, %v2612_v27  ;;  %v2620_v19 = vadd.f32 %v2619_v0, %v2618_v60  ;;  %v2634_v41 = vadd.f32 %v2633_v5, %v2632_v30  ;;  %v2656_v31 = vadd.f32 %v5002_v34, %v5036_v28 }
 0x1cd   : > { %v2545_v43 = vcombine.low %v2536_v11, %v2543_v55  ;;  %v2628_v38 = vadd.f32 %v2627_v45, %v2626_v63  ;;  %v2642_v6 = vadd.f32 %v2641_v48, %v2640_v10  ;;  %v2649_v7 = vrot.slane %v2648_v59, 4  ;;  %v5391_v45 = vld [vmem:[#allocation41_spill] sm:$0xff] }
 0x1ce   : > { %v2621_v32 = vrot.slane %v2620_v19, 1  ;;  %v2635_v22 = vrot.slane %v2634_v41, 2  ;;  %v2657_v2 = vrot.slane %v2656_v31, 4  ;;  %v2707_v17 = vcombine.low %v2606_v15, %v2614_v3  ;;  %v5392_v3 = vld [vmem:[#allocation43_spill] sm:$0xff] }
 0x1cf   : > { %v2559_v42 = vrot.slane %v2545_v43, %v4606_v54  ;;  %v2629_v53 = vrot.slane %v2628_v38, 1  ;;  %v2643_v29 = vrot.slane %v2642_v6, 2  ;;  %v2650_v26 = vadd.f32 %v2649_v7, %v2648_v59  ;;  %v5398_v43 = vld [vmem:[#allocation22_spill] sm:$0xff] }
 0x1d0   : > { %v2622_v37 = vadd.f32 %v2621_v32, %v2620_v19  ;;  %v2636_v58 = vadd.f32 %v2635_v22, %v2634_v41  ;;  %v2658_v40 = vadd.f32 %v2657_v2, %v2656_v31  ;;  %v2806_v23 = vmul.f32 %v4929_v51, %v4902_v44  ;;  %v5400_v32 = vld [vmem:[#allocation25_spill] sm:$0xff] }
 0x1d1   : > { %v2560_v34 = vcombine.low %v2552_v16, %v2559_v42  ;;  %v2630_v12 = vadd.f32 %v2629_v53, %v2628_v38  ;;  %v2644_v49 = vadd.f32 %v2643_v29, %v2642_v6  ;;  %v2651_v11 = vrot.slane %v2650_v26, 2  ;;  %v5399_v38 = vld [vmem:[#allocation40_spill] sm:$0xff]  ;;  %v5402_v2 = vld [vmem:[#allocation29_spill] sm:$0xff]  ;;  %v5403_v53 = vld [vmem:[#allocation31_spill] sm:$0xff] }
 0x1d2   : > { %v2637_v20 = vrot.slane %v2636_v58, 1  ;;  %v2659_v35 = vrot.slane %v2658_v40, 2  ;;  %v2717_v24 = vrot.slane %v2707_v17, %v4606_v54  ;;  %v2807_v27 = vmul.f32 %v4943_v46, %v4910_v4 }
 0x1d3   : > { %v5064_v60 = vadd.f32 %v2560_v34, %v4785_v61  ;;  %v2645_v30 = vrot.slane %v2644_v49, 1  ;;  %v2652_v13 = vadd.f32 %v2651_v11, %v2650_v26  ;;  %v2708_v63 = vcombine.low %v2622_v37, %v2630_v12  ;;  %v5404_v26 = vld [vmem:[#allocation32_spill] sm:$0xff] }
 0x1d4   : > { %v2638_v10 = vadd.f32 %v2637_v20, %v2636_v58  ;;  %v2660_v15 = vadd.f32 %v2659_v35, %v2658_v40  ;;  %v2808_v44 = vmul.f32 %v4957_v14, %v4916_v36  ;;  %v5070_v51 = vmul.f32 %v4971_v62, %v4926_v52 }
 0x1d5   : > { %v2646_v16 = vadd.f32 %v2645_v30, %v2644_v49  ;;  %v2653_v25 = vrot.slane %v2652_v13, 1  ;;  %v2724_v0 = vrot.slane %v2708_v63, %v4606_v54  ;;  %v2814_v4 = vmul.f32 %v4985_v47, %v4940_v8  ;;  %v5393_v47 = vld [vmem:[#allocation44_spill] sm:$0xff] }
 0x1d6   : > { %v2661_v46 = vrot.slane %v2660_v15, 1  ;;  %v2815_v5 = vmul.f32 %v4998_v56, %v4954_v9  ;;  %v2816_v55 = vmul.f32 %v5011_v57, %v4968_v39  ;;  %v2817_v14 = vmul.f32 %v5018_v33, %v4982_v50  ;;  %v5394_v9 = vld [vmem:[#allocation18_spill] sm:$0xff]  ;;  %v5396_v57 = vld [vmem:[#allocation21_spill] sm:$0xff]  ;;  %v5397_v33 = vld [vmem:[#allocation39_spill] sm:$0xff] }
 0x1d7   : > { %v2654_v36 = vadd.f32 %v2653_v25, %v2652_v13  ;;  %v2709_v52 = vcombine.low %v2638_v10, %v2646_v16  ;;  %v2739_v62 = vcombine.low %v2717_v24, %v2724_v0  ;;  %v2818_v48 = vmul.f32 %v5027_v1, %v5391_v45  ;;  %v5395_v56 = vld [vmem:[#allocation38_spill] sm:$0xff] }
 0x1d8   : > { %v2662_v59 = vadd.f32 %v2661_v46, %v2660_v15  ;;  %v2819_v8 = vmul.f32 %v5030_v18, %v5392_v3  ;;  %v2820_v19 = vmul.f32 %v5033_v21, %v5393_v47  ;;  %v2826_v41 = vadd.f32 %v5395_v56, %v5394_v9  ;;  %v5401_v18 = vld [vmem:[#allocation42_spill] sm:$0xff]  ;;  %v5405_v56 = vld [vmem:[#allocation45_spill] sm:$0xff] }
 0x1d9   : > { %v2731_v39 = vrot.slane %v2709_v52, %v4606_v54  ;;  %v2747_v50 = vrot.slane %v2739_v62, %v4606_v54  ;;  %v2834_v31 = vadd.f32 %v5397_v33, %v5396_v57  ;;  %v2842_v1 = vadd.f32 %v5399_v38, %v5398_v43  ;;  %v5406_v38 = vld [vmem:[#allocation37_spill] sm:$0xff] }
 0x1da   : > { %v2710_v6 = vcombine.low %v2654_v36, %v2662_v59  ;;  %v2827_v7 = vadd.f32 %v2826_v41, %v2814_v4  ;;  %v2850_v22 = vadd.f32 %v5401_v18, %v5400_v32  ;;  %v2858_v21 = vadd.f32 %v2806_v23, %v5402_v2 }
 0x1db   : > { %v2835_v17 = vadd.f32 %v2834_v31, %v2815_v5  ;;  %v2843_v42 = vadd.f32 %v2842_v1, %v2816_v55  ;;  %v2866_v29 = vadd.f32 %v2807_v27, %v5403_v53  ;;  %v2874_v37 = vadd.f32 %v2808_v44, %v5404_v26  ;;  %v5408_v53 = vld [vmem:[#allocation6_spill] sm:$0xff]  ;;  %v5409_v26 = vld [vmem:[#allocation16_spill] sm:$0xff] }
 0x1dc   : > { %v2738_v58 = vrot.slane %v2710_v6, %v4606_v54  ;;  %v2828_v40 = vrot.slane %v2827_v7, 4  ;;  %v2851_v34 = vadd.f32 %v2850_v22, %v2817_v14  ;;  %v2859_v12 = vadd.f32 %v2858_v21, %v2818_v48 }
 0x1dd   : > { %v2836_v49 = vrot.slane %v2835_v17, 4  ;;  %v2844_v11 = vrot.slane %v2843_v42, 4  ;;  %v2867_v20 = vadd.f32 %v2866_v29, %v2819_v8  ;;  %v2875_v35 = vadd.f32 %v2874_v37, %v2820_v19  ;;  %v5410_v37 = vld [vmem:[#allocation19_spill] sm:$0xff] }
 0x1de   : > { %v2740_v24 = vcombine.low %v2731_v39, %v2738_v58  ;;  %v2829_v30 = vadd.f32 %v2828_v40, %v2827_v7  ;;  %v2852_v13 = vrot.slane %v2851_v34, 4  ;;  %v2860_v63 = vrot.slane %v2859_v12, 4 }
 0x1df   : > { %v2837_v23 = vadd.f32 %v2836_v49, %v2835_v17  ;;  %v2845_v10 = vadd.f32 %v2844_v11, %v2843_v42  ;;  %v2868_v15 = vrot.slane %v2867_v20, 4  ;;  %v2876_v16 = vrot.slane %v2875_v35, 4  ;;  %v5407_v42 = vld [vmem:[#allocation26_spill] sm:$0xff] }
 0x1e0   : > { %v2754_v27 = vrot.slane %v2740_v24, %v4606_v54  ;;  %v2830_v44 = vrot.slane %v2829_v30, 2  ;;  %v2853_v25 = vadd.f32 %v2852_v13, %v2851_v34  ;;  %v2861_v0 = vadd.f32 %v2860_v63, %v2859_v12  ;;  %v5411_v34 = vld [vmem:[#allocation17_spill] sm:$0xff]  ;;  %v5412_v12 = vld [vmem:[#allocation20_spill] sm:$0xff]  ;;  %v5413_v11 = vld [vmem:[#allocation14_spill] sm:$0xff] }
 0x1e1   : > { %v2838_v4 = vrot.slane %v2837_v23, 2  ;;  %v2846_v46 = vrot.slane %v2845_v10, 2  ;;  %v2869_v5 = vadd.f32 %v2868_v15, %v2867_v20  ;;  %v2877_v55 = vadd.f32 %v2876_v16, %v2875_v35  ;;  %v5414_v20 = vld [vmem:[#allocation23_spill] sm:$0xff]  ;;  %v5416_v63 = vld [vmem:[#allocation24_spill] sm:$0xff] }
 0x1e2   : > { %v2755_v14 = vcombine.low %v2747_v50, %v2754_v27  ;;  %v2831_v36 = vadd.f32 %v2830_v44, %v2829_v30  ;;  %v2854_v52 = vrot.slane %v2853_v25, 2  ;;  %v2862_v62 = vrot.slane %v2861_v0, 2  ;;  %v5415_v13 = vld [vmem:[#allocation15_spill] sm:$0xff] }
 0x1e3   : > { %v2839_v45 = vadd.f32 %v2838_v4, %v2837_v23  ;;  %v2847_v48 = vadd.f32 %v2846_v46, %v2845_v10  ;;  %v2870_v59 = vrot.slane %v2869_v5, 2  ;;  %v2878_v3 = vrot.slane %v2877_v55, 2  ;;  %v5417_v27 = vld [vmem:[#allocation11_spill] sm:$0xff] }
 0x1e4   : > { %v2782_v8 = vadd.f32 %v2755_v14, %v4785_v61  ;;  %v2832_v47 = vrot.slane %v2831_v36, 1  ;;  %v2855_v19 = vadd.f32 %v2854_v52, %v2853_v25  ;;  %v2863_v9 = vadd.f32 %v2862_v62, %v2861_v0  ;;  %v5418_v4 = vld [vmem:[#allocation27_spill] sm:$0xff]  ;;  %v5420_v52 = vld [vmem:[#allocation30_spill] sm:$0xff] }
 0x1e5   : > { %v2821_v41 = vmul.f32 %v5036_v28, %v5405_v56  ;;  %v2840_v39 = vrot.slane %v2839_v45, 1  ;;  %v2848_v57 = vrot.slane %v2847_v48, 1  ;;  %v2871_v33 = vadd.f32 %v2870_v59, %v2869_v5  ;;  %v5419_v5 = vld [vmem:[#allocation28_spill] sm:$0xff] }
 0x1e6   : > { %v2833_v31 = vadd.f32 %v2832_v47, %v2831_v36  ;;  %v2856_v50 = vrot.slane %v2855_v19, 1  ;;  %v2864_v43 = vrot.slane %v2863_v9, 1  ;;  %v2882_v1 = vadd.f32 %v5070_v51, %v5406_v38  ;;  %v5425_v38 = vld [vmem:[#allocation36_spill] sm:$0xff] }
 0x1e7   : > { %v2841_v6 = vadd.f32 %v2840_v39, %v2839_v45  ;;  %v2849_v7 = vadd.f32 %v2848_v57, %v2847_v48  ;;  %v2872_v32 = vrot.slane %v2871_v33, 1  ;;  %v2879_v18 = vadd.f32 %v2878_v3, %v2877_v55  ;;  %v5421_v45 = vld [vmem:[#allocation33_spill] sm:$0xff]  ;;  %v5424_v57 = vld [vmem:[#allocation35_spill] sm:$0xff] }
 0x1e8   : > { %v2857_v22 = vadd.f32 %v2856_v50, %v2855_v19  ;;  %v2865_v2 = vadd.f32 %v2864_v43, %v2863_v9  ;;  %v2883_v21 = vadd.f32 %v2882_v1, %v2821_v41  ;;  %3776 = vrcp.f32 %v5064_v60  ;;  %v5422_v19 = vld [vmem:[#allocation34_spill] sm:$0xff]  ;;  %v5423_v41 = vld [vmem:[#allocation12_spill] sm:$0xff] }
 0x1e9   : > { %v2873_v17 = vadd.f32 %v2872_v32, %v2871_v33  ;;  %v2934_v28 = vcombine.low %v2833_v31, %v2841_v6  ;;  %v5110_v29 = vadd.f32 %v5408_v53, %v5407_v42  ;;  %v1882_v58 = vadd.f32 %v5410_v37, %v5409_v26 }
 0x1ea   : > { %v2884_v40 = vrot.slane %v2883_v21, 4  ;;  %v2935_v51 = vcombine.low %v2849_v7, %v2857_v22  ;;  %v1933_v49 = vadd.f32 %v5412_v12, %v5411_v34  ;;  %v1884_v35 = vadd.f32 %v5414_v20, %v5413_v11 }
 0x1eb   : > { %v2880_v24 = vrot.slane %v2879_v18, 1  ;;  %v2936_v60 = vcombine.low %v2865_v2, %v2873_v17  ;;  %v2944_v30 = vrot.slane %v2934_v28, %v4606_v54  ;;  %v1935_v23 = vadd.f32 %v5416_v63, %v5415_v13 }
 0x1ec   : > { %v2885_v10 = vadd.f32 %v2884_v40, %v2883_v21  ;;  %v2951_v15 = vrot.slane %v2935_v51, %v4606_v54  ;;  %v5123_v16 = vadd.f32 %v5408_v53, %v1882_v58  ;;  %v5126_v44 = vadd.f32 %v5417_v27, %v1884_v35 }
 0x1ed   : > { %v5129_v25 = vadd.f32 %v5408_v53, %v1933_v49  ;;  %v5132_v0 = vadd.f32 %v5417_v27, %v1935_v23  ;;  %v1886_v46 = vadd.f32 %v5418_v4, %v5409_v26  ;;  %v1937_v55 = vadd.f32 %v5419_v5, %v5411_v34 }
 0x1ee   : > { %v2886_v14 = vrot.slane %v2885_v10, 2  ;;  %v2966_v36 = vcombine.low %v2944_v30, %v2951_v15  ;;  %v2067_v62 = vmax.f32 %v5420_v52, %v5126_v44  ;;  %v1890_v48 = vadd.f32 %v5421_v45, %v5413_v11 }
 0x1ef   : > { %v2083_v59 = vmax.f32 %v5110_v29, %v5132_v0  ;;  %v5146_v3 = vadd.f32 %v5417_v27, %v1886_v46  ;;  %v5149_v47 = vadd.f32 %v5417_v27, %v1937_v55  ;;  %v1941_v9 = vadd.f32 %v5422_v19, %v5415_v13 }
 0x1f0   : > { %v2887_v56 = vadd.f32 %v2886_v14, %v2885_v10  ;;  %v5154_v39 = vadd.f32 %v5423_v41, %v1890_v48  ;;  %v1892_v33 = vadd.f32 %v5424_v57, %v5409_v26  ;;  %v1943_v1 = vadd.f32 %v5425_v38, %v5411_v34 }
 0x1f1   : > { %v2075_v31 = vmax.f32 %v5123_v16, %v5146_v3  ;;  %v2091_v50 = vmax.f32 %v5129_v25, %v5149_v47  ;;  %v5163_v43 = vadd.f32 %v5423_v41, %v1941_v9  ;;  %v2881_v7 = vadd.f32 %v2880_v24, %v2879_v18 }
 0x1f2   : > { %v3777_v6 = vpop.eup %3776  ;;  %v2888_v32 = vrot.slane %v2887_v56, 1  ;;  %v2068_v22 = vmax.f32 %v2067_v62, %v5154_v39  ;;  %v5176_v2 = vadd.f32 %v5423_v41, %v1892_v33  ;;  %v5180_v28 = vadd.f32 %v5423_v41, %v1943_v1 }
 0x1f3   : > { %v3026_v21 = vmul.f32 %v3777_v6, %v2782_v8  ;;  %v2084_v17 = vmax.f32 %v2083_v59, %v5163_v43  ;;  %v2958_v40 = vrot.slane %v2936_v60, %v4606_v54  ;;  %v2974_v13 = vrot.slane %v2966_v36, %v4606_v54 }
 0x1f4   : > { %v2889_v42 = vadd.f32 %v2888_v32, %v2887_v56  ;;  %v2069_v53 = vrot.slane %v2068_v22, 4  ;;  %v2076_v26 = vmax.f32 %v2075_v31, %v5176_v2  ;;  %v2092_v18 = vmax.f32 %v2091_v50, %v5180_v28 }
 0x1f5   : > { %3032 = vst [vmem:[%s5172_s7] sm:$0xff] %v3026_v21  ;;  %v2085_v37 = vrot.slane %v2084_v17, 4  ;;  %v3034_v19 = vmul.f32 %v3026_v21, %v3026_v21  ;;  %v5427_v21 = vld [vmem:[#allocation9_spill] sm:$0xff] }
 0x1f6   : > { %v2937_v58 = vcombine.low %v2881_v7, %v2889_v42  ;;  %v2070_v51 = vmax.f32 %v2068_v22, %v2069_v53  ;;  %v2077_v34 = vrot.slane %v2076_v26, 4  ;;  %v2093_v8 = vrot.slane %v2092_v18, 4  ;;  %v2002_v7 = vld [vmem:[#allocation2 + $0x8] sm:$0xf]  ;;  %v5428_v53 = vld [vmem:[#allocation8_spill] sm:$0xff] }
 0x1f7   : > { %v2086_v12 = vmax.f32 %v2084_v17, %v2085_v37  ;;  %v5426_v17 = vld [vmem:[#allocation7_spill] sm:$0xff]  ;;  %v5430_v37 = vld [vmem:[#allocation10_spill] sm:$0xff] }
 0x1f8   : > { %v2965_v49 = vrot.slane %v2937_v58, %v4606_v54  ;;  %v2071_v11 = vrot.slane %v2070_v51, 2  ;;  %v2078_v20 = vmax.f32 %v2076_v26, %v2077_v34  ;;  %v2094_v24 = vmax.f32 %v2092_v18, %v2093_v8 }
 0x1f9   : > { %v2087_v35 = vrot.slane %v2086_v12, 2 }
 0x1fa   : > { %v2967_v30 = vcombine.low %v2958_v40, %v2965_v49  ;;  %v2072_v63 = vmax.f32 %v2070_v51, %v2071_v11  ;;  %v2079_v23 = vrot.slane %v2078_v20, 2  ;;  %v2095_v15 = vrot.slane %v2094_v24, 2 }
 0x1fb   : > { %v2088_v10 = vmax.f32 %v2086_v12, %v2087_v35 }
 0x1fc   : > { %v2981_v27 = vrot.slane %v2967_v30, %v4606_v54  ;;  %v2073_v60 = vrot.slane %v2072_v63, 1  ;;  %v2080_v4 = vmax.f32 %v2078_v20, %v2079_v23  ;;  %v2096_v5 = vmax.f32 %v2094_v24, %v2095_v15 }
 0x1fd   : > { %v2089_v46 = vrot.slane %v2088_v10, 1 }
 0x1fe   : > { %v2982_v55 = vcombine.low %v2974_v13, %v2981_v27  ;;  %v2074_v14 = vmax.f32 %v2072_v63, %v2073_v60  ;;  %v2081_v62 = vrot.slane %v2080_v4, 1  ;;  %v2097_v48 = vrot.slane %v2096_v5, 1  ;;  %v380_v60 = vld [vmem:[%s4780_s26 + $0x40] sm:$0xff] }
 0x1ff   : > { %v2090_v45 = vmax.f32 %v2088_v10, %v2089_v46 }
 0x200   : > { %v3009_v59 = vadd.f32 %v2982_v55, %v4785_v61  ;;  %v2082_v9 = vmax.f32 %v2080_v4, %v2081_v62  ;;  %v2098_v36 = vmax.f32 %v2096_v5, %v2097_v48  ;;  %v381_v4 = vld [vmem:[%s4780_s26 + $0x48] sm:$0xff]  ;;  %v382_v5 = vld [vmem:[%s4780_s26 + $0x50] sm:$0xff]  ;;  %v383_v62 = vld [vmem:[%s4780_s26 + $0x58] sm:$0xff] }
 0x202   : > { %v3030_v56 = vmul.f32 %v3777_v6, %v3009_v59  ;;  %v2160_v41 = vcombine.low %v2074_v14, %v2082_v9  ;;  %v2161_v57 = vcombine.low %v2090_v45, %v2098_v36  ;;  %v392_v59 = vld [vmem:[%s4780_s26 + $0xa0] sm:$0xff]  ;;  %v393_v36 = vld [vmem:[%s4780_s26 + $0xa8] sm:$0xff] }
 0x204   : > { %v3036_v33 = vsub.f32 %v3030_v56, %v3034_v19  ;;  %v2168_v31 = vrot.slane %v2160_v41, %v4606_v54  ;;  %v2175_v50 = vrot.slane %v2161_v57, %v4606_v54  ;;  %v394_v57 = vld [vmem:[%s4780_s26 + $0xb0] sm:$0xff] }
 0x206   : > { %v3038_v38 = vmax.f32 %v3036_v33, 0.0001  ;;  %v2176_v1 = vcombine.low %v2168_v31, %v2175_v50  ;;  %v395_v50 = vld [vmem:[%s4780_s26 + $0xb8] sm:$0xff] }
 0x208   : > { %3778 = vrsqrt.f32 %v3038_v38  ;;  %v2183_v32 = vrot.slane %v2176_v1, %v4606_v54  ;;  %vm3042_vm1 = vcmp.eq.f32.partialorder %v3038_v38, inf  ;;  %vm3044_vm2 = vcmp.eq.f32.partialorder %v3038_v38, 0.0 }
 0x20a   : > { %v2187_v22 = vmax.f32 %v2002_v7, %v2183_v32 }
 0x20c   : > { %v2231_v61 = vrot.slane %v2187_v22, %v5426_v17  ;;  %v2235_v42 = vrot.slane %v2187_v22, %v5427_v21  ;;  %v2239_v6 = vrot.slane %v2187_v22, %v5428_v53  ;;  %3014 = vst.msk [vmem:[#allocation2 + $0x8] sm:$0xf] %vm4683_vm0, %v2187_v22  ;;  %v2243_v18 = vrot.slane %v2187_v22, %v5430_v37  ;;  %v5232_v17 = vld [vmem:[%s4780_s26 + $0x100] sm:$0xff]  ;;  %v5239_v37 = vld [vmem:[%s4780_s26 + $0x108] sm:$0xff] }
 0x20d   : > { %v2189_v10 = vsub.f32 %v2002_v7, %v2187_v22 }
 0x20e   : > { %v2264_v58 = vsub.f32 %v5420_v52, %v2231_v61  ;;  %v2265_v40 = vsub.f32 %v5123_v16, %v2235_v42  ;;  %v2266_v51 = vsub.f32 %v5110_v29, %v2239_v6  ;;  %v2267_v34 = vsub.f32 %v5129_v25, %v2243_v18 }
 0x20f   : > { %v2276_v12 = vsub.f32 %v5126_v44, %v2231_v61  ;;  %v2277_v8 = vsub.f32 %v5146_v3, %v2235_v42  ;;  %v2278_v49 = vsub.f32 %v5132_v0, %v2239_v6  ;;  %v2279_v11 = vsub.f32 %v5149_v47, %v2243_v18 }
 0x210   : > { %v2288_v20 = vsub.f32 %v5154_v39, %v2231_v61  ;;  %v2289_v35 = vsub.f32 %v5176_v2, %v2235_v42  ;;  %v2290_v16 = vsub.f32 %v5163_v43, %v2239_v6  ;;  %v2291_v29 = vsub.f32 %v5180_v28, %v2243_v18 }
 0x211   : > { %v2308_v24 = vmul.f32 1.442695, %v2264_v58  ;;  %v2310_v30 = vmul.f32 1.442695, %v2265_v40  ;;  %v2312_v13 = vmul.f32 1.442695, %v2266_v51 }
 0x212   : > { %v3779_v52 = vpop.eup %3778  ;;  %v2314_v44 = vmul.f32 1.442695, %v2267_v34  ;;  %v3045_v0 = vand.u32 2147483648, %v3038_v38  ;;  %v2332_v3 = vmul.f32 1.442695, %v2276_v12  ;;  %v5244_v12 = vld [vmem:[%s4780_s26 + $0x110] sm:$0xff] }
 0x213   : > { %v3041_v25 = vmul.f32 %v3779_v52, %v3038_v38  ;;  %3780 = vpow2.f32 %v2308_v24  ;;  %v2334_v39 = vmul.f32 1.442695, %v2277_v8  ;;  %v2336_v2 = vmul.f32 1.442695, %v2278_v49  ;;  %v5249_v52 = vld [vmem:[%s4780_s26 + $0x118] sm:$0xff] }
 0x214   : > { %3782 = vpow2.f32 %v2310_v30  ;;  %v2338_v28 = vmul.f32 1.442695, %v2279_v11  ;;  %v2356_v63 = vmul.f32 1.442695, %v2288_v20  ;;  %v2358_v23 = vmul.f32 1.442695, %v2289_v35 }
 0x215   : > { %v3043_v47 = vsel %vm3042_vm1, %v3038_v38, %v3041_v25  ;;  %3784 = vpow2.f32 %v2312_v13  ;;  %v2360_v15 = vmul.f32 1.442695, %v2290_v16  ;;  %v2362_v27 = vmul.f32 1.442695, %v2291_v29 }
 0x216   : > { %v3046_v43 = vsel %vm3044_vm2, %v3045_v0, %v3043_v47  ;;  %3786 = vpow2.f32 %v2314_v44  ;;  %v2192_v55 = vmul.f32 1.442695, %v2189_v10 }
 0x217   : > { %3054 = vst [vmem:[%s5216_s10] sm:$0xff] %v3046_v43  ;;  %3788 = vpow2.f32 %v2332_v3 }
 0x218   : > { %3790 = vpow2.f32 %v2334_v39 }
 0x219   : > { %3792 = vpow2.f32 %v2336_v2 }
 0x21a   : > { %3794 = vpow2.f32 %v2338_v28 }
 0x21b   : > { %3796 = vpow2.f32 %v2356_v63 }
 0x21c   : > { %3798 = vpow2.f32 %v2358_v23 }
 0x21d   : > { %v3781_v46 = vpop.eup %3780  ;;  %3800 = vpow2.f32 %v2360_v15 }
 0x21e   : > { %v3783_v14 = vpop.eup %3782  ;;  %3802 = vpow2.f32 %v2362_v27  ;;  %v2372_v45 = vmul.f32 %v3781_v46, %v380_v60 }
 0x21f   : > { %v3785_v48 = vpop.eup %3784  ;;  %v2373_v19 = vmul.f32 %v3783_v14, %v381_v4  ;;  %3804 = vpow2.f32 %v2192_v55 }
 0x220   : > { %v3787_v9 = vpop.eup %3786  ;;  %v2374_v56 = vmul.f32 %v3785_v48, %v382_v5  ;;  %v5227_v7 = vmul.f32 %v2372_v45, %v380_v60 }
 0x221   : > { %v3789_v41 = vpop.eup %3788  ;;  %v2375_v33 = vmul.f32 %v3787_v9, %v383_v62  ;;  %v5229_v32 = vmul.f32 %v2373_v19, %v381_v4 }
 0x222   : > { %v3791_v31 = vpop.eup %3790  ;;  %v2384_v38 = vmul.f32 %v3789_v41, %v392_v59  ;;  %v2468_v1 = vadd.f32 %v3789_v41, %v3781_v46  ;;  %v5234_v42 = vmul.f32 %v2374_v56, %v382_v5 }
 0x223   : > { %v3793_v22 = vpop.eup %3792  ;;  %v2385_v61 = vmul.f32 %v3791_v31, %v393_v36  ;;  %v2476_v21 = vadd.f32 %v3791_v31, %v3783_v14  ;;  %v5236_v53 = vmul.f32 %v2375_v33, %v383_v62 }
 0x224   : > { %v3795_v6 = vpop.eup %3794  ;;  %v2386_v18 = vmul.f32 %v3793_v22, %v394_v57  ;;  %v2484_v58 = vadd.f32 %v3793_v22, %v3785_v48  ;;  %v2663_v40 = vadd.f32 %v2384_v38, %v2372_v45  ;;  %v5241_v51 = vmul.f32 %v2384_v38, %v392_v59 }
 0x225   : > { %v3797_v34 = vpop.eup %3796  ;;  %v2387_v8 = vmul.f32 %v3795_v6, %v395_v50  ;;  %v2492_v49 = vadd.f32 %v3795_v6, %v3787_v9  ;;  %v2671_v11 = vadd.f32 %v2385_v61, %v2373_v19  ;;  %v5246_v20 = vmul.f32 %v2385_v61, %v393_v36 }
 0x226   : > { %v3799_v35 = vpop.eup %3798  ;;  %v2396_v16 = vmul.f32 %v3797_v34, %v5232_v17  ;;  %v2469_v29 = vadd.f32 %v3797_v34, %v2468_v1  ;;  %v2679_v24 = vadd.f32 %v2386_v18, %v2374_v56  ;;  %v5252_v30 = vmul.f32 %v2386_v18, %v394_v57 }
 0x227   : > { %v3801_v25 = vpop.eup %3800  ;;  %v5255_v13 = vmul.f32 %v3799_v35, %v5239_v37  ;;  %v2477_v44 = vadd.f32 %v3799_v35, %v2476_v21  ;;  %v2687_v0 = vadd.f32 %v2387_v8, %v2375_v33  ;;  %v5257_v3 = vmul.f32 %v2387_v8, %v395_v50 }
 0x228   : > { %v3803_v47 = vpop.eup %3802  ;;  %v2398_v39 = vmul.f32 %v3801_v25, %v5244_v12  ;;  %v2470_v43 = vrot.slane %v2469_v29, 4  ;;  %v2485_v2 = vadd.f32 %v3801_v25, %v2484_v58  ;;  %v2664_v28 = vadd.f32 %v2663_v40, %v2396_v16 }
 0x229   : > { %v2399_v63 = vmul.f32 %v3803_v47, %v5249_v52  ;;  %v2478_v23 = vrot.slane %v2477_v44, 4  ;;  %v2493_v10 = vadd.f32 %v3803_v47, %v2492_v49  ;;  %v2672_v15 = vadd.f32 %v2671_v11, %v5255_v13  ;;  %v5262_v5 = vpop.eup %3804 }
 0x22a   : > { %v2471_v27 = vadd.f32 %v2470_v43, %v2469_v29  ;;  %v2486_v60 = vrot.slane %v2485_v2, 4  ;;  %v2665_v4 = vrot.slane %v2664_v28, 4  ;;  %v2680_v46 = vadd.f32 %v2679_v24, %v2398_v39 }
 0x22b   : > { %v2479_v55 = vadd.f32 %v2478_v23, %v2477_v44  ;;  %v2494_v14 = vrot.slane %v2493_v10, 4  ;;  %v2673_v62 = vrot.slane %v2672_v15, 4  ;;  %v2688_v45 = vadd.f32 %v2687_v0, %v2399_v63 }
 0x22c   : > { %v2472_v48 = vrot.slane %v2471_v27, 2  ;;  %v2487_v59 = vadd.f32 %v2486_v60, %v2485_v2  ;;  %v2666_v19 = vadd.f32 %v2665_v4, %v2664_v28  ;;  %v2681_v9 = vrot.slane %v2680_v46, 4 }
 0x22d   : > { %v2480_v36 = vrot.slane %v2479_v55, 2  ;;  %v2495_v56 = vadd.f32 %v2494_v14, %v2493_v10  ;;  %v2674_v41 = vadd.f32 %v2673_v62, %v2672_v15  ;;  %v2689_v57 = vrot.slane %v2688_v45, 4 }
 0x22e   : > { %v2473_v33 = vadd.f32 %v2472_v48, %v2471_v27  ;;  %v2488_v31 = vrot.slane %v2487_v59, 2  ;;  %v2667_v50 = vrot.slane %v2666_v19, 2  ;;  %v2682_v38 = vadd.f32 %v2681_v9, %v2680_v46 }
 0x22f   : > { %v2481_v1 = vadd.f32 %v2480_v36, %v2479_v55  ;;  %v2496_v22 = vrot.slane %v2495_v56, 2  ;;  %v2675_v61 = vrot.slane %v2674_v41, 2  ;;  %v2690_v21 = vadd.f32 %v2689_v57, %v2688_v45 }
 0x230   : > { %v2474_v6 = vrot.slane %v2473_v33, 1  ;;  %v2489_v18 = vadd.f32 %v2488_v31, %v2487_v59  ;;  %v2668_v58 = vadd.f32 %v2667_v50, %v2666_v19  ;;  %v2683_v40 = vrot.slane %v2682_v38, 2 }
 0x231   : > { %v2482_v34 = vrot.slane %v2481_v1, 1  ;;  %v2497_v8 = vadd.f32 %v2496_v22, %v2495_v56  ;;  %v2676_v49 = vadd.f32 %v2675_v61, %v2674_v41  ;;  %v2691_v11 = vrot.slane %v2690_v21, 2 }
 0x232   : > { %v2475_v35 = vadd.f32 %v2474_v6, %v2473_v33  ;;  %v2490_v29 = vrot.slane %v2489_v18, 1  ;;  %v2669_v24 = vrot.slane %v2668_v58, 1  ;;  %v2684_v25 = vadd.f32 %v2683_v40, %v2682_v38 }
 0x233   : > { %v2483_v44 = vadd.f32 %v2482_v34, %v2481_v1  ;;  %v2498_v0 = vrot.slane %v2497_v8, 1  ;;  %v2677_v47 = vrot.slane %v2676_v49, 1  ;;  %v2692_v43 = vadd.f32 %v2691_v11, %v2690_v21 }
 0x234   : > { %v2491_v2 = vadd.f32 %v2490_v29, %v2489_v18  ;;  %v2670_v28 = vadd.f32 %v2669_v24, %v2668_v58  ;;  %v2685_v23 = vrot.slane %v2684_v25, 1  ;;  %v2822_v10 = vmul.f32 %v2396_v16, %v5232_v17 }
 0x235   : > { %v2499_v15 = vadd.f32 %v2498_v0, %v2497_v8  ;;  %v2561_v27 = vcombine.low %v2475_v35, %v2483_v44  ;;  %v2678_v60 = vadd.f32 %v2677_v47, %v2676_v49  ;;  %v2693_v4 = vrot.slane %v2692_v43, 1 }
 0x236   : > { %v2686_v46 = vadd.f32 %v2685_v23, %v2684_v25  ;;  %v2823_v55 = vmul.f32 %v5255_v13, %v5239_v37  ;;  %v2824_v14 = vmul.f32 %v2398_v39, %v5244_v12  ;;  %v2825_v62 = vmul.f32 %v2399_v63, %v5249_v52  ;;  %v2401_v39 = vld [vmem:[#allocation3 + $0x8] sm:$0xf] }
 0x237   : > { %v2562_v45 = vcombine.low %v2491_v2, %v2499_v15  ;;  %v2569_v48 = vrot.slane %v2561_v27, %v4606_v54  ;;  %v2694_v59 = vadd.f32 %v2693_v4, %v2692_v43  ;;  %v2756_v19 = vcombine.low %v2670_v28, %v2678_v60  ;;  %v2787_v60 = vld [vmem:[#allocation5 + $0x8] sm:$0xf] }
 0x238   : > { %v2890_v17 = vadd.f32 %v5241_v51, %v5227_v7  ;;  %v2898_v16 = vadd.f32 %v5246_v20, %v5229_v32  ;;  %v2906_v9 = vadd.f32 %v5252_v30, %v5234_v42  ;;  %v2914_v37 = vadd.f32 %v5257_v3, %v5236_v53  ;;  %v2596_v32 = vld [vmem:[#allocation4 + $0x8] sm:$0xf] }
 0x239   : > { %v2576_v12 = vrot.slane %v2562_v45, %v4606_v54  ;;  %v2757_v52 = vcombine.low %v2686_v46, %v2694_v59  ;;  %v2764_v13 = vrot.slane %v2756_v19, %v4606_v54  ;;  %v2403_v53 = vmul.f32 %v5262_v5, %v2401_v39 }
 0x23a   : > { %v2891_v63 = vadd.f32 %v2890_v17, %v2822_v10  ;;  %v2899_v36 = vadd.f32 %v2898_v16, %v2823_v55  ;;  %v2907_v56 = vadd.f32 %v2906_v9, %v2824_v14  ;;  %v2915_v41 = vadd.f32 %v2914_v37, %v2825_v62 }
 0x23b   : > { %v2577_v7 = vcombine.low %v2569_v48, %v2576_v12  ;;  %v2771_v51 = vrot.slane %v2757_v52, %v4606_v54  ;;  %v2598_v61 = vmul.f32 %v5262_v5, %v2596_v32  ;;  %v2789_v46 = vmul.f32 %v5262_v5, %v2787_v60 }
 0x23c   : > { %v2892_v20 = vrot.slane %v2891_v63, 4  ;;  %v2900_v57 = vrot.slane %v2899_v36, 4  ;;  %v2908_v42 = vrot.slane %v2907_v56, 4  ;;  %v2916_v30 = vrot.slane %v2915_v41, 4 }
 0x23d   : > { %v2584_v3 = vrot.slane %v2577_v7, %v4606_v54  ;;  %v2772_v33 = vcombine.low %v2764_v13, %v2771_v51 }
 0x23e   : > { %v2893_v31 = vadd.f32 %v2892_v20, %v2891_v63  ;;  %v2901_v50 = vadd.f32 %v2900_v57, %v2899_v36  ;;  %v2909_v38 = vadd.f32 %v2908_v42, %v2907_v56  ;;  %v2917_v1 = vadd.f32 %v2916_v30, %v2915_v41 }
 0x23f   : > { %v2588_v22 = vadd.f32 %v2584_v3, %v2403_v53  ;;  %v2779_v21 = vrot.slane %v2772_v33, %v4606_v54 }
 0x240   : > { %v2894_v6 = vrot.slane %v2893_v31, 2  ;;  %v2902_v18 = vrot.slane %v2901_v50, 2  ;;  %v2910_v58 = vrot.slane %v2909_v38, 2  ;;  %v2918_v40 = vrot.slane %v2917_v1, 2 }
 0x241   : > { %2594 = vst.msk [vmem:[#allocation3 + $0x8] sm:$0xf] %vm4683_vm0, %v2588_v22  ;;  %v2783_v34 = vadd.f32 %v2779_v21, %v2598_v61 }
 0x242   : > { %v2895_v8 = vadd.f32 %v2894_v6, %v2893_v31  ;;  %v2903_v49 = vadd.f32 %v2902_v18, %v2901_v50  ;;  %v2911_v11 = vadd.f32 %v2910_v58, %v2909_v38  ;;  %v2919_v35 = vadd.f32 %v2918_v40, %v2917_v1 }
 0x243   : > { %2785 = vst.msk [vmem:[#allocation4 + $0x8] sm:$0xf] %vm4683_vm0, %v2783_v34 }
 0x244   : > { %v2896_v29 = vrot.slane %v2895_v8, 1  ;;  %v2904_v24 = vrot.slane %v2903_v49, 1  ;;  %v2912_v25 = vrot.slane %v2911_v11, 1  ;;  %v2920_v44 = vrot.slane %v2919_v35, 1 }
 0x246   : > { %v2897_v0 = vadd.f32 %v2896_v29, %v2895_v8  ;;  %v2905_v47 = vadd.f32 %v2904_v24, %v2903_v49  ;;  %v2913_v43 = vadd.f32 %v2912_v25, %v2911_v11  ;;  %v2921_v2 = vadd.f32 %v2920_v44, %v2919_v35 }
 0x248   : > { %v2983_v28 = vcombine.low %v2897_v0, %v2905_v47  ;;  %v2984_v23 = vcombine.low %v2913_v43, %v2921_v2  ;;  %v3019_v10 = vld [vmem:[#allocation3 + $0x8] sm:$0xf] }
 0x249   : > { %3806 = vrcp.f32 %v3019_v10 }
 0x24a   : > { %v2991_v15 = vrot.slane %v2983_v28, %v4606_v54  ;;  %v2998_v27 = vrot.slane %v2984_v23, %v4606_v54  ;;  %v3025_v45 = vld [vmem:[#allocation4 + $0x8] sm:$0xf] }
 0x24c   : > { %v2999_v4 = vcombine.low %v2991_v15, %v2998_v27 }
 0x24e   : > { %v3006_v55 = vrot.slane %v2999_v4, %v4606_v54 }
 0x250   : > { %v3010_v14 = vadd.f32 %v3006_v55, %v2789_v46 }
 0x252   : > { %3012 = vst.msk [vmem:[#allocation5 + $0x8] sm:$0xf] %vm4683_vm0, %v3010_v14 }
 0x253   : > { %v3807_v62 = vpop.eup %3806 }
 0x254   : > { %v3027_v48 = vmul.f32 %v3807_v62, %v3025_v45 }
 0x256   : > { %3033 = vst.msk [vmem:[%s5172_s7 + $0x8] sm:$0xf] %vm4683_vm0, %v3027_v48  ;;  %v3035_v59 = vmul.f32 %v3027_v48, %v3027_v48 }
 0x259   : > { %v3029_v19 = vld [vmem:[#allocation5 + $0x8] sm:$0xf] }
 0x25a   : > { %v3031_v17 = vmul.f32 %v3807_v62, %v3029_v19 }
 0x25c   : > { %v3037_v16 = vsub.f32 %v3031_v17, %v3035_v59 }
 0x25e   : > { %v3039_v9 = vmax.f32 %v3037_v16, 0.0001 }
 0x260   : > { %3808 = vrsqrt.f32 %v3039_v9  ;;  %vm3049_vm3 = vcmp.eq.f32.partialorder %v3039_v9, inf  ;;  %v3052_v54 = vand.u32 2147483648, %v3039_v9  ;;  %vm3051_vm4 = vcmp.eq.f32.partialorder %v3039_v9, 0.0 }
 0x26a   : > { %v3809_v5 = vpop.eup %3808 }
 0x26b   : > { %v3048_v37 = vmul.f32 %v3809_v5, %v3039_v9 }
 0x26d   : > { %v3050_v12 = vsel %vm3049_vm3, %v3039_v9, %v3048_v37 }
 0x26e   : > { %v3053_v52 = vsel %vm3051_vm4, %v3052_v54, %v3050_v12 }
 0x26f   : > { %3055 = vst.msk [vmem:[%s5216_s10 + $0x8] sm:$0xf] %vm4683_vm0, %v3053_v52 }
 0x270 PF: > { %s17_s23 = sadd.s32 1, %s3832_s23   ;;  %s5431_s21 = smov %s3828_s22 }
 0x271   : > { %p14_p5 = scmp.ge.s32.totalorder %s17_s23, 4   ;;  %s5432_s22 = smov %s5434_s24 }
 0x273   :  { %16 = sbr.rel (!%p14_p5) target bundleno = 2 (0x2), region = 96 }

</bundles_post_ra>
